<compile_context>
chip_gen: v5e
topology: v5e:2x2
jax: 0.10.0
libtpu: 0.0.40
codegen_flags: <defaults>
</compile_context>

<pallas_src>
import functools

import jax
import jax.numpy as jnp
from jax.experimental import pallas as pl
from jax.experimental.pallas import tpu as pltpu

EPS_WS = 1e-5   # weight-standardization eps (float32 path of WeightStandardizedConv2d)
EPS_IN = 1e-5   # nn.InstanceNorm2d default eps (affine=False, no running stats)


def _res_block_kernel(*refs, has_proj):
    """One sample per grid step.

    Refs (in order):
      x_ref    : (H, W, Cin)          un-padded input sample (NHWC, N squeezed)
      w1_ref   : (9*Cin,  Cout)       standardized 3x3 weights, tap-major im2col layout
      b1_ref   : (1, Cout)
      w2_ref   : (9*Cout, Cout)
      b2_ref   : (1, Cout)
      [wres_ref: (Cin, Cout), bres_ref: (1, Cout)]   only when has_proj
      o_ref    : (H, W, Cout)
      xpad_ref : (H+2, W+2, Cin)      VMEM scratch (padded input)
      hpad_ref : (H+2, W+2, Cout)     VMEM scratch (padded block1 activation)
    """
    if has_proj:
        (x_ref, w1_ref, b1_ref, w2_ref, b2_ref, wres_ref, bres_ref,
         o_ref, xpad_ref, hpad_ref) = refs
    else:
        (x_ref, w1_ref, b1_ref, w2_ref, b2_ref,
         o_ref, xpad_ref, hpad_ref) = refs

    H, W, Cout = o_ref.shape
    Cin = x_ref.shape[-1]
    inv_n = 1.0 / float(H * W)

    # --- zero only the 1-px border of the padded scratches (cheap, and safe
    #     under "parallel" megacore sharding since it is done every step).
    def zero_border(ref, c):
        ref[0:1, :, :] = jnp.zeros((1, W + 2, c), jnp.float32)
        ref[H + 1:H + 2, :, :] = jnp.zeros((1, W + 2, c), jnp.float32)
        ref[1:H + 1, 0:1, :] = jnp.zeros((H, 1, c), jnp.float32)
        ref[1:H + 1, W + 1:W + 2, :] = jnp.zeros((H, 1, c), jnp.float32)

    zero_border(xpad_ref, Cin)
    zero_border(hpad_ref, Cout)

    # --- place current sample into the interior of the padded scratch.
    x = x_ref[...]                                            # (H, W, Cin)
    xpad_ref[1:H + 1, 1:W + 1, :] = x

    def conv3x3_inorm_silu(pad_ref, w_ref, b_ref, cin):
        # im2col: (H*W, 9*cin) patch matrix -> single MXU matmul, K = 9*cin.
        cols = []
        for ky in range(3):
            for kx in range(3):
                cols.append(pad_ref[ky:ky + H, kx:kx + W, :].reshape(H * W, cin))
        patches = jnp.concatenate(cols, axis=-1)              # (H*W, 9*cin)
        y = jnp.dot(patches, w_ref[...],
                    preferred_element_type=jnp.float32) + b_ref[0]
        # InstanceNorm2d (affine=False): per-(sample, channel) stats over H*W,
        # single-pass sum / sum-of-squares.
        mean = jnp.sum(y, axis=0, keepdims=True) * inv_n
        ex2 = jnp.sum(y * y, axis=0, keepdims=True) * inv_n
        var = jnp.maximum(ex2 - mean * mean, 0.0)             # biased variance
        yn = (y - mean) * jax.lax.rsqrt(var + EPS_IN)
        # SiLU
        return yn * jax.nn.sigmoid(yn)

    # ---- block1 ----
    h1 = conv3x3_inorm_silu(xpad_ref, w1_ref, b1_ref, Cin)     # (H*W, Cout)
    hpad_ref[1:H + 1, 1:W + 1, :] = h1.reshape(H, W, Cout)

    # ---- block2 ----
    h2 = conv3x3_inorm_silu(hpad_ref, w2_ref, b2_ref, Cout)    # (H*W, Cout)

    # ---- residual path ----
    if has_proj:
        res = jnp.dot(x.reshape(H * W, Cin), wres_ref[...],
                      preferred_element_type=jnp.float32) + bres_ref[0]
    else:
        # nn.Identity(): direct add, no matmul, no extra weights.
        res = x.reshape(H * W, Cin)

    o_ref[...] = (h2 + res).reshape(H, W, Cout)


def weight_standardize(w, eps=EPS_WS):
    # w: (Cout, Cin, kh, kw) PyTorch layout; per-output-channel mean/var (biased).
    mean = jnp.mean(w, axis=(1, 2, 3), keepdims=True)
    var = jnp.mean((w - mean) ** 2, axis=(1, 2, 3), keepdims=True)
    return (w - mean) * jax.lax.rsqrt(var + eps)


def residual_block_pallas(x_nchw, params, in_ch, out_ch):
    N, C, H, W = x_nchw.shape
    assert C == in_ch
    x = jnp.transpose(x_nchw, (0, 2, 3, 1)).astype(jnp.float32)      # NHWC (no pad)

    def prep_w3(w):  # (Cout, Cin, 3, 3) -> standardized im2col layout (9*Cin, Cout)
        cout, cin = w.shape[0], w.shape[1]
        w = weight_standardize(w)
        return jnp.transpose(w, (2, 3, 1, 0)).reshape(9 * cin, cout)

    w1 = prep_w3(params["w1"])
    b1 = params["b1"].reshape(1, out_ch)
    w2 = prep_w3(params["w2"])
    b2 = params["b2"].reshape(1, out_ch)

    has_proj = in_ch != out_ch
    inputs = [x, w1, b1, w2, b2]
    in_specs = [
        pl.BlockSpec((None, H, W, in_ch), lambda n: (n, 0, 0, 0)),
        pl.BlockSpec((9 * in_ch, out_ch), lambda n: (0, 0)),
        pl.BlockSpec((1, out_ch), lambda n: (0, 0)),
        pl.BlockSpec((9 * out_ch, out_ch), lambda n: (0, 0)),
        pl.BlockSpec((1, out_ch), lambda n: (0, 0)),
    ]
    if has_proj:
        wres = jnp.transpose(params["wres"][:, :, 0, 0], (1, 0))     # (Cin, Cout)
        bres = params["bres"].reshape(1, out_ch)
        inputs += [wres, bres]
        in_specs += [
            pl.BlockSpec((in_ch, out_ch), lambda n: (0, 0)),
            pl.BlockSpec((1, out_ch), lambda n: (0, 0)),
        ]

    kernel = functools.partial(_res_block_kernel, has_proj=has_proj)

    out_nhwc = pl.pallas_call(
        kernel,
        out_shape=jax.ShapeDtypeStruct((N, H, W, out_ch), jnp.float32),
        grid_spec=pltpu.PrefetchScalarGridSpec(
            num_scalar_prefetch=0,
            grid=(N,),
            in_specs=in_specs,
            out_specs=pl.BlockSpec((None, H, W, out_ch), lambda n: (n, 0, 0, 0)),
            scratch_shapes=[
                pltpu.VMEM((H + 2, W + 2, in_ch), jnp.float32),
                pltpu.VMEM((H + 2, W + 2, out_ch), jnp.float32),
            ],
        ),
        compiler_params=pltpu.CompilerParams(
            dimension_semantics=("parallel",),           # samples are independent
            vmem_limit_bytes=64 * 1024 * 1024,           # above v5e's 16 MiB default
        ),
    )(*inputs)

    return jnp.transpose(out_nhwc, (0, 3, 1, 2))                     # back to NCHW


# ----------------------- pure-JAX reference (for sanity) -----------------------
def residual_block_ref(x, params, in_ch, out_ch):
    dn = ("NCHW", "OIHW", "NCHW")

    def ws_conv3(x, w, b):
        w = weight_standardize(w)
        y = jax.lax.conv_general_dilated(x, w, (1, 1), ((1, 1), (1, 1)),
                                         dimension_numbers=dn)
        return y + b[None, :, None, None]

    def inorm(y):
        m = jnp.mean(y, axis=(2, 3), keepdims=True)
        v = jnp.mean((y - m) ** 2, axis=(2, 3), keepdims=True)
        return (y - m) * jax.lax.rsqrt(v + EPS_IN)

    def silu(y):
        return y * jax.nn.sigmoid(y)

    h = silu(inorm(ws_conv3(x, params["w1"], params["b1"])))
    h = silu(inorm(ws_conv3(h, params["w2"], params["b2"])))
    if in_ch == out_ch:
        res = x
    else:
        res = jax.lax.conv_general_dilated(x, params["wres"], (1, 1), ((0, 0), (0, 0)),
                                           dimension_numbers=dn)
        res = res + params["bres"][None, :, None, None]
    return h + res


def make_params(key, in_ch, out_ch):
    ks = jax.random.split(key, 6)

    def conv_init(k, shape):  # PyTorch-ish uniform(-1/sqrt(fan_in), 1/sqrt(fan_in))
        fan_in = shape[1] * shape[2] * shape[3]
        bound = 1.0 / (fan_in ** 0.5)
        return jax.random.uniform(k, shape, jnp.float32, -bound, bound)

    def bias_init(k, n, fan_in):
        bound = 1.0 / (fan_in ** 0.5)
        return jax.random.uniform(k, (n,), jnp.float32, -bound, bound)

    params = {
        "w1": conv_init(ks[0], (out_ch, in_ch, 3, 3)),
        "b1": bias_init(ks[1], out_ch, in_ch * 9),
        "w2": conv_init(ks[2], (out_ch, out_ch, 3, 3)),
        "b2": bias_init(ks[3], out_ch, out_ch * 9),
    }
    if in_ch != out_ch:
        params["wres"] = conv_init(ks[4], (out_ch, in_ch, 1, 1))
        params["bres"] = bias_init(ks[5], out_ch, in_ch)
    return params


if __name__ == "__main__":
    key = jax.random.PRNGKey(0)

    # Config 1: in_ch != out_ch  (1x1 conv residual projection path)
    N, in_ch, out_ch, H, W = 2, 4, 8, 16, 16
    kx_, kp = jax.random.split(key)
    x = jax.random.normal(kx_, (N, in_ch, H, W), jnp.float32)
    params = make_params(kp, in_ch, out_ch)

    out = jax.block_until_ready(residual_block_pallas(x, params, in_ch, out_ch))
    ref = jax.block_until_ready(residual_block_ref(x, params, in_ch, out_ch))
    assert out.shape == (N, out_ch, H, W)
    assert bool(jnp.all(jnp.isfinite(out)))
    assert bool(jnp.allclose(out, ref, atol=3e-2, rtol=3e-2)), \
        f"max abs diff {float(jnp.max(jnp.abs(out - ref)))}"

    # Config 2: in_ch == out_ch  (nn.Identity residual path, no matmul)
    in_ch2 = out_ch2 = 8
    kx2, kp2 = jax.random.split(kp)
    x2 = jax.random.normal(kx2, (N, in_ch2, H, W), jnp.float32)
    params2 = make_params(kp2, in_ch2, out_ch2)

    out2 = jax.block_until_ready(residual_block_pallas(x2, params2, in_ch2, out_ch2))
    ref2 = jax.block_until_ready(residual_block_ref(x2, params2, in_ch2, out_ch2))
    assert out2.shape == (N, out_ch2, H, W)
    assert bool(jnp.all(jnp.isfinite(out2)))
    assert bool(jnp.allclose(out2, ref2, atol=3e-2, rtol=3e-2)), \
        f"max abs diff {float(jnp.max(jnp.abs(out2 - ref2)))}"

    print("KERNEL_OK")
</pallas_src>

<mosaic_0001>
module attributes {stable_mosaic.version = 11 : i64} {
  func.func @_res_block_kernel(%arg0: i32, %arg1: memref<1x16x16x4xf32, #tpu.memory_space<vmem>>, %arg2: memref<36x8xf32, #tpu.memory_space<vmem>>, %arg3: memref<1x8xf32, #tpu.memory_space<vmem>>, %arg4: memref<72x8xf32, #tpu.memory_space<vmem>>, %arg5: memref<1x8xf32, #tpu.memory_space<vmem>>, %arg6: memref<4x8xf32, #tpu.memory_space<vmem>>, %arg7: memref<1x8xf32, #tpu.memory_space<vmem>>, %arg8: memref<1x16x16x8xf32, #tpu.memory_space<vmem>>, %arg9: memref<18x18x4xf32, #tpu.memory_space<vmem>>, %arg10: memref<18x18x8xf32, #tpu.memory_space<vmem>>) attributes {dimension_semantics = [#tpu.dimension_semantics<parallel>], iteration_bounds = array<i64: 2>, scalar_prefetch = 0 : i64, scratch_operands = 2 : i64, tpu.core_type = #tpu.core_type<tc>, window_params = [{transform_indices = @transform_0, window_bounds = array<i64: 1, 16, 16, 4>}, {pipeline_mode = #tpu.pipeline_mode<synchronous>, transform_indices = @transform_1, window_bounds = array<i64: 36, 8>}, {pipeline_mode = #tpu.pipeline_mode<synchronous>, transform_indices = @transform_2, window_bounds = array<i64: 1, 8>}, {pipeline_mode = #tpu.pipeline_mode<synchronous>, transform_indices = @transform_3, window_bounds = array<i64: 72, 8>}, {pipeline_mode = #tpu.pipeline_mode<synchronous>, transform_indices = @transform_4, window_bounds = array<i64: 1, 8>}, {pipeline_mode = #tpu.pipeline_mode<synchronous>, transform_indices = @transform_5, window_bounds = array<i64: 4, 8>}, {pipeline_mode = #tpu.pipeline_mode<synchronous>, transform_indices = @transform_6, window_bounds = array<i64: 1, 8>}, {transform_indices = @transform_7, window_bounds = array<i64: 1, 16, 16, 8>}]} {
    %cst = arith.constant 0.000000e+00 : f32
    %0 = vector.broadcast %cst : f32 to vector<1x18x4xf32>
    %c0 = arith.constant 0 : index
    %c0_0 = arith.constant 0 : index
    %c0_1 = arith.constant 0 : index
    %1 = vector.load %arg9[%c0, %c0_0, %c0_1] : memref<18x18x4xf32, #tpu.memory_space<vmem>>, vector<1x18x4xf32>
    tpu.vector_store %arg9[%c0, %c0_0, %c0_1], %0 {strides = array<i32>} : memref<18x18x4xf32, #tpu.memory_space<vmem>>, vector<1x18x4xf32>,
    %cst_2 = arith.constant 0.000000e+00 : f32
    %2 = vector.broadcast %cst_2 : f32 to vector<1x18x4xf32>
    %c17 = arith.constant 17 : index
    %c0_3 = arith.constant 0 : index
    %c0_4 = arith.constant 0 : index
    %3 = vector.load %arg9[%c17, %c0_3, %c0_4] : memref<18x18x4xf32, #tpu.memory_space<vmem>>, vector<1x18x4xf32>
    tpu.vector_store %arg9[%c17, %c0_3, %c0_4], %2 {strides = array<i32>} : memref<18x18x4xf32, #tpu.memory_space<vmem>>, vector<1x18x4xf32>,
    %cst_5 = arith.constant 0.000000e+00 : f32
    %4 = vector.broadcast %cst_5 : f32 to vector<16x1x4xf32>
    %c1 = arith.constant 1 : index
    %c0_6 = arith.constant 0 : index
    %c0_7 = arith.constant 0 : index
    %5 = vector.load %arg9[%c1, %c0_6, %c0_7] : memref<18x18x4xf32, #tpu.memory_space<vmem>>, vector<16x1x4xf32>
    tpu.vector_store %arg9[%c1, %c0_6, %c0_7], %4 {strides = array<i32>} : memref<18x18x4xf32, #tpu.memory_space<vmem>>, vector<16x1x4xf32>,
    %cst_8 = arith.constant 0.000000e+00 : f32
    %6 = vector.broadcast %cst_8 : f32 to vector<16x1x4xf32>
    %c1_9 = arith.constant 1 : index
    %c17_10 = arith.constant 17 : index
    %c0_11 = arith.constant 0 : index
    %7 = vector.load %arg9[%c1_9, %c17_10, %c0_11] : memref<18x18x4xf32, #tpu.memory_space<vmem>>, vector<16x1x4xf32>
    tpu.vector_store %arg9[%c1_9, %c17_10, %c0_11], %6 {strides = array<i32>} : memref<18x18x4xf32, #tpu.memory_space<vmem>>, vector<16x1x4xf32>,
    %cst_12 = arith.constant 0.000000e+00 : f32
    %8 = vector.broadcast %cst_12 : f32 to vector<1x18x8xf32>
    %c0_13 = arith.constant 0 : index
    %c0_14 = arith.constant 0 : index
    %c0_15 = arith.constant 0 : index
    %9 = vector.load %arg10[%c0_13, %c0_14, %c0_15] : memref<18x18x8xf32, #tpu.memory_space<vmem>>, vector<1x18x8xf32>
    tpu.vector_store %arg10[%c0_13, %c0_14, %c0_15], %8 {strides = array<i32>} : memref<18x18x8xf32, #tpu.memory_space<vmem>>, vector<1x18x8xf32>,
    %cst_16 = arith.constant 0.000000e+00 : f32
    %10 = vector.broadcast %cst_16 : f32 to vector<1x18x8xf32>
    %c17_17 = arith.constant 17 : index
    %c0_18 = arith.constant 0 : index
    %c0_19 = arith.constant 0 : index
    %11 = vector.load %arg10[%c17_17, %c0_18, %c0_19] : memref<18x18x8xf32, #tpu.memory_space<vmem>>, vector<1x18x8xf32>
    tpu.vector_store %arg10[%c17_17, %c0_18, %c0_19], %10 {strides = array<i32>} : memref<18x18x8xf32, #tpu.memory_space<vmem>>, vector<1x18x8xf32>,
    %cst_20 = arith.constant 0.000000e+00 : f32
    %12 = vector.broadcast %cst_20 : f32 to vector<16x1x8xf32>
    %c1_21 = arith.constant 1 : index
    %c0_22 = arith.constant 0 : index
    %c0_23 = arith.constant 0 : index
    %13 = vector.load %arg10[%c1_21, %c0_22, %c0_23] : memref<18x18x8xf32, #tpu.memory_space<vmem>>, vector<16x1x8xf32>
    tpu.vector_store %arg10[%c1_21, %c0_22, %c0_23], %12 {strides = array<i32>} : memref<18x18x8xf32, #tpu.memory_space<vmem>>, vector<16x1x8xf32>,
    %cst_24 = arith.constant 0.000000e+00 : f32
    %14 = vector.broadcast %cst_24 : f32 to vector<16x1x8xf32>
    %c1_25 = arith.constant 1 : index
    %c17_26 = arith.constant 17 : index
    %c0_27 = arith.constant 0 : index
    %15 = vector.load %arg10[%c1_25, %c17_26, %c0_27] : memref<18x18x8xf32, #tpu.memory_space<vmem>>, vector<16x1x8xf32>
    tpu.vector_store %arg10[%c1_25, %c17_26, %c0_27], %14 {strides = array<i32>} : memref<18x18x8xf32, #tpu.memory_space<vmem>>, vector<16x1x8xf32>,
    %c0_28 = arith.constant 0 : index
    %c0_29 = arith.constant 0 : index
    %c0_30 = arith.constant 0 : index
    %c0_31 = arith.constant 0 : index
    %16 = vector.load %arg1[%c0_28, %c0_29, %c0_30, %c0_31] : memref<1x16x16x4xf32, #tpu.memory_space<vmem>>, vector<1x16x16x4xf32>
    %17 = vector.shape_cast %16 : vector<1x16x16x4xf32> to vector<16x16x4xf32>
    %c1_32 = arith.constant 1 : index
    %c1_33 = arith.constant 1 : index
    %c0_34 = arith.constant 0 : index
    %18 = vector.load %arg9[%c1_32, %c1_33, %c0_34] : memref<18x18x4xf32, #tpu.memory_space<vmem>>, vector<16x16x4xf32>
    tpu.vector_store %arg9[%c1_32, %c1_33, %c0_34], %17 {strides = array<i32>} : memref<18x18x4xf32, #tpu.memory_space<vmem>>, vector<16x16x4xf32>,
    %c0_35 = arith.constant 0 : index
    %c0_36 = arith.constant 0 : index
    %c0_37 = arith.constant 0 : index
    %19 = vector.load %arg9[%c0_35, %c0_36, %c0_37] : memref<18x18x4xf32, #tpu.memory_space<vmem>>, vector<16x16x4xf32>
    %20 = vector.shape_cast %19 : vector<16x16x4xf32> to vector<256x4xf32>
    %c0_38 = arith.constant 0 : index
    %c1_39 = arith.constant 1 : index
    %c0_40 = arith.constant 0 : index
    %21 = vector.load %arg9[%c0_38, %c1_39, %c0_40] : memref<18x18x4xf32, #tpu.memory_space<vmem>>, vector<16x16x4xf32>
    %22 = vector.shape_cast %21 : vector<16x16x4xf32> to vector<256x4xf32>
    %c0_41 = arith.constant 0 : index
    %c2 = arith.constant 2 : index
    %c0_42 = arith.constant 0 : index
    %23 = vector.load %arg9[%c0_41, %c2, %c0_42] : memref<18x18x4xf32, #tpu.memory_space<vmem>>, vector<16x16x4xf32>
    %24 = vector.shape_cast %23 : vector<16x16x4xf32> to vector<256x4xf32>
    %c1_43 = arith.constant 1 : index
    %c0_44 = arith.constant 0 : index
    %c0_45 = arith.constant 0 : index
    %25 = vector.load %arg9[%c1_43, %c0_44, %c0_45] : memref<18x18x4xf32, #tpu.memory_space<vmem>>, vector<16x16x4xf32>
    %26 = vector.shape_cast %25 : vector<16x16x4xf32> to vector<256x4xf32>
    %c1_46 = arith.constant 1 : index
    %c1_47 = arith.constant 1 : index
    %c0_48 = arith.constant 0 : index
    %27 = vector.load %arg9[%c1_46, %c1_47, %c0_48] : memref<18x18x4xf32, #tpu.memory_space<vmem>>, vector<16x16x4xf32>
    %28 = vector.shape_cast %27 : vector<16x16x4xf32> to vector<256x4xf32>
    %c1_49 = arith.constant 1 : index
    %c2_50 = arith.constant 2 : index
    %c0_51 = arith.constant 0 : index
    %29 = vector.load %arg9[%c1_49, %c2_50, %c0_51] : memref<18x18x4xf32, #tpu.memory_space<vmem>>, vector<16x16x4xf32>
    %30 = vector.shape_cast %29 : vector<16x16x4xf32> to vector<256x4xf32>
    %c2_52 = arith.constant 2 : index
    %c0_53 = arith.constant 0 : index
    %c0_54 = arith.constant 0 : index
    %31 = vector.load %arg9[%c2_52, %c0_53, %c0_54] : memref<18x18x4xf32, #tpu.memory_space<vmem>>, vector<16x16x4xf32>
    %32 = vector.shape_cast %31 : vector<16x16x4xf32> to vector<256x4xf32>
    %c2_55 = arith.constant 2 : index
    %c1_56 = arith.constant 1 : index
    %c0_57 = arith.constant 0 : index
    %33 = vector.load %arg9[%c2_55, %c1_56, %c0_57] : memref<18x18x4xf32, #tpu.memory_space<vmem>>, vector<16x16x4xf32>
    %34 = vector.shape_cast %33 : vector<16x16x4xf32> to vector<256x4xf32>
    %c2_58 = arith.constant 2 : index
    %c2_59 = arith.constant 2 : index
    %c0_60 = arith.constant 0 : index
    %35 = vector.load %arg9[%c2_58, %c2_59, %c0_60] : memref<18x18x4xf32, #tpu.memory_space<vmem>>, vector<16x16x4xf32>
    %36 = vector.shape_cast %35 : vector<16x16x4xf32> to vector<256x4xf32>
    %37 = tpu.concatenate %20, %22, %24, %26, %28, %30, %32, %34, %36 in 1 : vector<256x4xf32>, vector<256x4xf32>, vector<256x4xf32>, vector<256x4xf32>, vector<256x4xf32>, vector<256x4xf32>, vector<256x4xf32>, vector<256x4xf32>, vector<256x4xf32> -> vector<256x36xf32>
    %c0_61 = arith.constant 0 : index
    %c0_62 = arith.constant 0 : index
    %38 = vector.load %arg2[%c0_61, %c0_62] : memref<36x8xf32, #tpu.memory_space<vmem>>, vector<36x8xf32>
    %cst_63 = arith.constant dense<0.000000e+00> : vector<256x8xf32>
    %39 = tpu.matmul %37, %38, %cst_63 {dimension_numbers = #tpu.dot_dimension_numbers<[1], [0], [0], [1], [0, 0, 1, 1], [], []>} : vector<256x36xf32>, vector<36x8xf32>, vector<256x8xf32> -> vector<256x8xf32>
    %c0_64 = arith.constant 0 : index
    %c0_65 = arith.constant 0 : index
    %40 = vector.load %arg3[%c0_64, %c0_65] : memref<1x8xf32, #tpu.memory_space<vmem>>, vector<1x8xf32>
    %41 = vector.shape_cast %40 : vector<1x8xf32> to vector<8xf32>
    %42 = vector.shape_cast %41 : vector<8xf32> to vector<1x8xf32>
    %43 = vector.broadcast %42 : vector<1x8xf32> to vector<256x8xf32>
    %44 = arith.addf %39, %43 : vector<256x8xf32>
    %cst_66 = arith.constant dense<0.000000e+00> : vector<8xf32>
    %45 = vector.multi_reduction <add>, %44, %cst_66 [0] : vector<256x8xf32> to vector<8xf32>
    %46 = vector.shape_cast %45 : vector<8xf32> to vector<1x8xf32>
    %cst_67 = arith.constant 3.906250e-03 : f32
    %47 = vector.broadcast %cst_67 : f32 to vector<1x8xf32>
    %48 = arith.mulf %46, %47 : vector<1x8xf32>
    %49 = arith.mulf %44, %44 : vector<256x8xf32>
    %cst_68 = arith.constant dense<0.000000e+00> : vector<8xf32>
    %50 = vector.multi_reduction <add>, %49, %cst_68 [0] : vector<256x8xf32> to vector<8xf32>
    %51 = vector.shape_cast %50 : vector<8xf32> to vector<1x8xf32>
    %cst_69 = arith.constant 3.906250e-03 : f32
    %52 = vector.broadcast %cst_69 : f32 to vector<1x8xf32>
    %53 = arith.mulf %51, %52 : vector<1x8xf32>
    %54 = arith.mulf %48, %48 : vector<1x8xf32>
    %55 = arith.subf %53, %54 : vector<1x8xf32>
    %cst_70 = arith.constant 0.000000e+00 : f32
    %56 = vector.broadcast %cst_70 : f32 to vector<1x8xf32>
    %57 = arith.maximumf %55, %56 : vector<1x8xf32>
    %58 = vector.broadcast %48 : vector<1x8xf32> to vector<256x8xf32>
    %59 = arith.subf %44, %58 : vector<256x8xf32>
    %cst_71 = arith.constant 9.99999974E-6 : f32
    %60 = vector.broadcast %cst_71 : f32 to vector<1x8xf32>
    %61 = arith.addf %57, %60 : vector<1x8xf32>
    %62 = math.rsqrt %61 : vector<1x8xf32>
    %63 = vector.broadcast %62 : vector<1x8xf32> to vector<256x8xf32>
    %64 = arith.mulf %59, %63 : vector<256x8xf32>
    %65 = arith.negf %64 : vector<256x8xf32>
    %66 = math.exp %65 : vector<256x8xf32>
    %cst_72 = arith.constant 1.000000e+00 : f32
    %67 = vector.broadcast %cst_72 : f32 to vector<256x8xf32>
    %68 = arith.addf %67, %66 : vector<256x8xf32>
    %69 = arith.divf %67, %68 : vector<256x8xf32>
    %70 = arith.mulf %64, %69 : vector<256x8xf32>
    %71 = vector.shape_cast %70 : vector<256x8xf32> to vector<16x16x8xf32>
    %c1_73 = arith.constant 1 : index
    %c1_74 = arith.constant 1 : index
    %c0_75 = arith.constant 0 : index
    %72 = vector.load %arg10[%c1_73, %c1_74, %c0_75] : memref<18x18x8xf32, #tpu.memory_space<vmem>>, vector<16x16x8xf32>
    tpu.vector_store %arg10[%c1_73, %c1_74, %c0_75], %71 {strides = array<i32>} : memref<18x18x8xf32, #tpu.memory_space<vmem>>, vector<16x16x8xf32>,
    %c0_76 = arith.constant 0 : index
    %c0_77 = arith.constant 0 : index
    %c0_78 = arith.constant 0 : index
    %73 = vector.load %arg10[%c0_76, %c0_77, %c0_78] : memref<18x18x8xf32, #tpu.memory_space<vmem>>, vector<16x16x8xf32>
    %74 = vector.shape_cast %73 : vector<16x16x8xf32> to vector<256x8xf32>
    %c0_79 = arith.constant 0 : index
    %c1_80 = arith.constant 1 : index
    %c0_81 = arith.constant 0 : index
    %75 = vector.load %arg10[%c0_79, %c1_80, %c0_81] : memref<18x18x8xf32, #tpu.memory_space<vmem>>, vector<16x16x8xf32>
    %76 = vector.shape_cast %75 : vector<16x16x8xf32> to vector<256x8xf32>
    %c0_82 = arith.constant 0 : index
    %c2_83 = arith.constant 2 : index
    %c0_84 = arith.constant 0 : index
    %77 = vector.load %arg10[%c0_82, %c2_83, %c0_84] : memref<18x18x8xf32, #tpu.memory_space<vmem>>, vector<16x16x8xf32>
    %78 = vector.shape_cast %77 : vector<16x16x8xf32> to vector<256x8xf32>
    %c1_85 = arith.constant 1 : index
    %c0_86 = arith.constant 0 : index
    %c0_87 = arith.constant 0 : index
    %79 = vector.load %arg10[%c1_85, %c0_86, %c0_87] : memref<18x18x8xf32, #tpu.memory_space<vmem>>, vector<16x16x8xf32>
    %80 = vector.shape_cast %79 : vector<16x16x8xf32> to vector<256x8xf32>
    %c1_88 = arith.constant 1 : index
    %c1_89 = arith.constant 1 : index
    %c0_90 = arith.constant 0 : index
    %81 = vector.load %arg10[%c1_88, %c1_89, %c0_90] : memref<18x18x8xf32, #tpu.memory_space<vmem>>, vector<16x16x8xf32>
    %82 = vector.shape_cast %81 : vector<16x16x8xf32> to vector<256x8xf32>
    %c1_91 = arith.constant 1 : index
    %c2_92 = arith.constant 2 : index
    %c0_93 = arith.constant 0 : index
    %83 = vector.load %arg10[%c1_91, %c2_92, %c0_93] : memref<18x18x8xf32, #tpu.memory_space<vmem>>, vector<16x16x8xf32>
    %84 = vector.shape_cast %83 : vector<16x16x8xf32> to vector<256x8xf32>
    %c2_94 = arith.constant 2 : index
    %c0_95 = arith.constant 0 : index
    %c0_96 = arith.constant 0 : index
    %85 = vector.load %arg10[%c2_94, %c0_95, %c0_96] : memref<18x18x8xf32, #tpu.memory_space<vmem>>, vector<16x16x8xf32>
    %86 = vector.shape_cast %85 : vector<16x16x8xf32> to vector<256x8xf32>
    %c2_97 = arith.constant 2 : index
    %c1_98 = arith.constant 1 : index
    %c0_99 = arith.constant 0 : index
    %87 = vector.load %arg10[%c2_97, %c1_98, %c0_99] : memref<18x18x8xf32, #tpu.memory_space<vmem>>, vector<16x16x8xf32>
    %88 = vector.shape_cast %87 : vector<16x16x8xf32> to vector<256x8xf32>
    %c2_100 = arith.constant 2 : index
    %c2_101 = arith.constant 2 : index
    %c0_102 = arith.constant 0 : index
    %89 = vector.load %arg10[%c2_100, %c2_101, %c0_102] : memref<18x18x8xf32, #tpu.memory_space<vmem>>, vector<16x16x8xf32>
    %90 = vector.shape_cast %89 : vector<16x16x8xf32> to vector<256x8xf32>
    %91 = tpu.concatenate %74, %76, %78, %80, %82, %84, %86, %88, %90 in 1 : vector<256x8xf32>, vector<256x8xf32>, vector<256x8xf32>, vector<256x8xf32>, vector<256x8xf32>, vector<256x8xf32>, vector<256x8xf32>, vector<256x8xf32>, vector<256x8xf32> -> vector<256x72xf32>
    %c0_103 = arith.constant 0 : index
    %c0_104 = arith.constant 0 : index
    %92 = vector.load %arg4[%c0_103, %c0_104] : memref<72x8xf32, #tpu.memory_space<vmem>>, vector<72x8xf32>
    %cst_105 = arith.constant dense<0.000000e+00> : vector<256x8xf32>
    %93 = tpu.matmul %91, %92, %cst_105 {dimension_numbers = #tpu.dot_dimension_numbers<[1], [0], [0], [1], [0, 0, 1, 1], [], []>} : vector<256x72xf32>, vector<72x8xf32>, vector<256x8xf32> -> vector<256x8xf32>
    %c0_106 = arith.constant 0 : index
    %c0_107 = arith.constant 0 : index
    %94 = vector.load %arg5[%c0_106, %c0_107] : memref<1x8xf32, #tpu.memory_space<vmem>>, vector<1x8xf32>
    %95 = vector.shape_cast %94 : vector<1x8xf32> to vector<8xf32>
    %96 = vector.shape_cast %95 : vector<8xf32> to vector<1x8xf32>
    %97 = vector.broadcast %96 : vector<1x8xf32> to vector<256x8xf32>
    %98 = arith.addf %93, %97 : vector<256x8xf32>
    %cst_108 = arith.constant dense<0.000000e+00> : vector<8xf32>
    %99 = vector.multi_reduction <add>, %98, %cst_108 [0] : vector<256x8xf32> to vector<8xf32>
    %100 = vector.shape_cast %99 : vector<8xf32> to vector<1x8xf32>
    %cst_109 = arith.constant 3.906250e-03 : f32
    %101 = vector.broadcast %cst_109 : f32 to vector<1x8xf32>
    %102 = arith.mulf %100, %101 : vector<1x8xf32>
    %103 = arith.mulf %98, %98 : vector<256x8xf32>
    %cst_110 = arith.constant dense<0.000000e+00> : vector<8xf32>
    %104 = vector.multi_reduction <add>, %103, %cst_110 [0] : vector<256x8xf32> to vector<8xf32>
    %105 = vector.shape_cast %104 : vector<8xf32> to vector<1x8xf32>
    %cst_111 = arith.constant 3.906250e-03 : f32
    %106 = vector.broadcast %cst_111 : f32 to vector<1x8xf32>
    %107 = arith.mulf %105, %106 : vector<1x8xf32>
    %108 = arith.mulf %102, %102 : vector<1x8xf32>
    %109 = arith.subf %107, %108 : vector<1x8xf32>
    %cst_112 = arith.constant 0.000000e+00 : f32
    %110 = vector.broadcast %cst_112 : f32 to vector<1x8xf32>
    %111 = arith.maximumf %109, %110 : vector<1x8xf32>
    %112 = vector.broadcast %102 : vector<1x8xf32> to vector<256x8xf32>
    %113 = arith.subf %98, %112 : vector<256x8xf32>
    %cst_113 = arith.constant 9.99999974E-6 : f32
    %114 = vector.broadcast %cst_113 : f32 to vector<1x8xf32>
    %115 = arith.addf %111, %114 : vector<1x8xf32>
    %116 = math.rsqrt %115 : vector<1x8xf32>
    %117 = vector.broadcast %116 : vector<1x8xf32> to vector<256x8xf32>
    %118 = arith.mulf %113, %117 : vector<256x8xf32>
    %119 = arith.negf %118 : vector<256x8xf32>
    %120 = math.exp %119 : vector<256x8xf32>
    %cst_114 = arith.constant 1.000000e+00 : f32
    %121 = vector.broadcast %cst_114 : f32 to vector<256x8xf32>
    %122 = arith.addf %121, %120 : vector<256x8xf32>
    %123 = arith.divf %121, %122 : vector<256x8xf32>
    %124 = arith.mulf %118, %123 : vector<256x8xf32>
    %125 = vector.shape_cast %17 : vector<16x16x4xf32> to vector<256x4xf32>
    %c0_115 = arith.constant 0 : index
    %c0_116 = arith.constant 0 : index
    %126 = vector.load %arg6[%c0_115, %c0_116] : memref<4x8xf32, #tpu.memory_space<vmem>>, vector<4x8xf32>
    %cst_117 = arith.constant dense<0.000000e+00> : vector<256x8xf32>
    %127 = tpu.matmul %125, %126, %cst_117 {dimension_numbers = #tpu.dot_dimension_numbers<[1], [0], [0], [1], [0, 0, 1, 1], [], []>} : vector<256x4xf32>, vector<4x8xf32>, vector<256x8xf32> -> vector<256x8xf32>
    %c0_118 = arith.constant 0 : index
    %c0_119 = arith.constant 0 : index
    %128 = vector.load %arg7[%c0_118, %c0_119] : memref<1x8xf32, #tpu.memory_space<vmem>>, vector<1x8xf32>
    %129 = vector.shape_cast %128 : vector<1x8xf32> to vector<8xf32>
    %130 = vector.shape_cast %129 : vector<8xf32> to vector<1x8xf32>
    %131 = vector.broadcast %130 : vector<1x8xf32> to vector<256x8xf32>
    %132 = arith.addf %127, %131 : vector<256x8xf32>
    %133 = arith.addf %124, %132 : vector<256x8xf32>
    %134 = vector.shape_cast %133 : vector<256x8xf32> to vector<16x16x8xf32>
    %c0_120 = arith.constant 0 : index
    %c0_121 = arith.constant 0 : index
    %c0_122 = arith.constant 0 : index
    %c0_123 = arith.constant 0 : index
    %135 = vector.load %arg8[%c0_120, %c0_121, %c0_122, %c0_123] : memref<1x16x16x8xf32, #tpu.memory_space<vmem>>, vector<1x16x16x8xf32>
    %136 = vector.shape_cast %135 : vector<1x16x16x8xf32> to vector<16x16x8xf32>
    %137 = vector.shape_cast %134 : vector<16x16x8xf32> to vector<1x16x16x8xf32>
    tpu.vector_store %arg8[%c0_120, %c0_121, %c0_122, %c0_123], %137 {strides = array<i32>} : memref<1x16x16x8xf32, #tpu.memory_space<vmem>>, vector<1x16x16x8xf32>,
    return
  }
  func.func @transform_0(%arg0: i32) -> (i32, i32, i32, i32) {
    %c0_i32 = arith.constant 0 : i32
    %c0_i32_0 = arith.constant 0 : i32
    %c0_i32_1 = arith.constant 0 : i32
    %c0_i32_2 = arith.constant 0 : i32
    return %arg0, %c0_i32, %c0_i32_0, %c0_i32_1 : i32, i32, i32, i32
  }
  func.func @transform_1(%arg0: i32) -> (i32, i32) {
    %c0_i32 = arith.constant 0 : i32
    %c0_i32_0 = arith.constant 0 : i32
    %c0_i32_1 = arith.constant 0 : i32
    return %c0_i32, %c0_i32_0 : i32, i32
  }
  func.func @transform_2(%arg0: i32) -> (i32, i32) {
    %c0_i32 = arith.constant 0 : i32
    %c0_i32_0 = arith.constant 0 : i32
    %c0_i32_1 = arith.constant 0 : i32
    return %c0_i32, %c0_i32_0 : i32, i32
  }
  func.func @transform_3(%arg0: i32) -> (i32, i32) {
    %c0_i32 = arith.constant 0 : i32
    %c0_i32_0 = arith.constant 0 : i32
    %c0_i32_1 = arith.constant 0 : i32
    return %c0_i32, %c0_i32_0 : i32, i32
  }
  func.func @transform_4(%arg0: i32) -> (i32, i32) {
    %c0_i32 = arith.constant 0 : i32
    %c0_i32_0 = arith.constant 0 : i32
    %c0_i32_1 = arith.constant 0 : i32
    return %c0_i32, %c0_i32_0 : i32, i32
  }
  func.func @transform_5(%arg0: i32) -> (i32, i32) {
    %c0_i32 = arith.constant 0 : i32
    %c0_i32_0 = arith.constant 0 : i32
    %c0_i32_1 = arith.constant 0 : i32
    return %c0_i32, %c0_i32_0 : i32, i32
  }
  func.func @transform_6(%arg0: i32) -> (i32, i32) {
    %c0_i32 = arith.constant 0 : i32
    %c0_i32_0 = arith.constant 0 : i32
    %c0_i32_1 = arith.constant 0 : i32
    return %c0_i32, %c0_i32_0 : i32, i32
  }
  func.func @transform_7(%arg0: i32) -> (i32, i32, i32, i32) {
    %c0_i32 = arith.constant 0 : i32
    %c0_i32_0 = arith.constant 0 : i32
    %c0_i32_1 = arith.constant 0 : i32
    %c0_i32_2 = arith.constant 0 : i32
    return %arg0, %c0_i32, %c0_i32_0, %c0_i32_1 : i32, i32, i32, i32
  }
}

</mosaic_0001>

<bundles_post_ra>
// kernel: tpu_custom_call.1
= control target key start
LH: loop header
LB: loop body
LE: loop exit
PB: predicated region body
PF: predicated region fallthrough
CT: control target
= control target key end

     0   :  { %s6754_s24 = smov 0   ;;  %s13225_s0 = inlined_call_operand.vmem [shape: f32[2,16,16,4], index: 0, kind: input, shape index: {}]   ;;  %s13226_s1 = inlined_call_operand.vmem [shape: f32[36,8], index: 1, kind: input, shape index: {}]   ;;  %s13227_s2 = inlined_call_operand.vmem [shape: f32[1,8], index: 2, kind: input, shape index: {}]   ;;  %s13228_s3 = inlined_call_operand.vmem [shape: f32[72,8], index: 3, kind: input, shape index: {}]   ;;  %s13229_s4 = inlined_call_operand.vmem [shape: f32[1,8], index: 4, kind: input, shape index: {}]   ;;  %s13230_s5 = inlined_call_operand.vmem [shape: f32[4,8], index: 5, kind: input, shape index: {}]   ;;  %s13231_s6 = inlined_call_operand.vmem [shape: f32[1,8], index: 6, kind: input, shape index: {}]   ;;  %s13232_s7 = inlined_call_operand.vmem [shape: f32[2,16,16,8], index: 7, kind: output, shape index: {}]  }
   0x1 LB: > { %s6171_s25 = sadd.s32 4294967295, %s6699_s24   ;;  %p6175_p0 = scmp.ge.s32.totalorder %s6699_s24, 1  ;;  %s6699_s24 = sphi %s6754_s24, %s17_s24  }
   0x2   : > { %p237_p1 = scmp.lt.s32.totalorder %s6699_s24, 3 }
   0x4   : > { %p238_p2 = pnand %p6175_p0, %p237_p1 }
   0x6   : > { %241 = sbr.rel (%p238_p2) target bundleno = 2378 (0x94a), region = 48 }
   0xb   : > { %vm13373_vm0 = vcmask 31744   ;;  %p269_p3 = scmp.lt.s32.totalorder %s6171_s25, 1  ;;  %v13235_v0 = vmov 0.0   ;;  %vm282_vm1 = vcmask 25600   ;;  %s6702_s30 = smov 4   ;;  %vm289_vm2 = vcmask 24576  }
   0xc   : > { %280 = vst.msk [vmem:[#allocation2] sm:$0xff] %vm13373_vm0, %v13235_v0  ;;  %s6703_s8 = smov 8   ;;  %vm13387_vm3 = vcmask 64512   ;;  %s6704_s9 = smov 12   ;;  %vm13374_vm4 = vcmask 1043456   ;;  %vm1806_vm5 = vcmask 97280  }
   0xd   : > { %281 = vst.msk [vmem:[#allocation2 + $0x8] sm:$0xff] %vm13373_vm0, %v13235_v0  ;;  %s14816_s25 = smov (!%p269_p3, %s6171_s25), 1  ;;  %s6705_s10 = smov 16   ;;  %vm1872_vm6 = vcmask 162816   ;;  %vm13377_vm7 = vcmask 130048   ;;  %vm13376_vm8 = vcmask 195584  }
   0xe   : > { %285 = vst.msk [vmem:[#allocation2 + $0x198] sm:$0xff] %vm13373_vm0, %v13235_v0  ;;  %s6344_s26 = sshll.u32 %s14816_s25, 8  ;;  %s6706_s11 = smov 20   ;;  %vm13375_vm9 = vcmask 261120   ;;  %vm1938_vm10 = vcmask 228352   ;;  %vm2013_vm11 = vcmask 293888  }
   0xf   : > { %286 = vst.msk [vmem:[#allocation2 + $0x1a0] sm:$0xff] %vm13373_vm0, %v13235_v0  ;;  %s6778_s29 = scalar_lea.vmem %s13225_s0, %s6344_s26  ;;  %s6707_s12 = smov 24   ;;  %vm325_vm15 = vcmask 58368  }
  0x10   : > { %283 = vst.msk [vmem:[#allocation2 + $0x10] sm:$0x3] %vm282_vm1, %v13235_v0  ;;  %v6782_v1 = vld [vmem:[%s6778_s29 + $0x10] sm:$0xff]  ;;  %v6785_v2 = vld [vmem:[%s6778_s29] sm:$0xff]  ;;  %v6789_v3 = vld [vmem:[%s6778_s29 + $0x18] sm:$0xff]  ;;  %s6708_s13 = smov 28   ;;  %s12724_s18 = scalar_lea.vmem %s13232_s7, %s6344_s26 }
  0x11   : > { %13427 = vst [vmem:[#allocation4_spill] sm:$0xff] %v6782_v1  ;;  %v6794_v4 = vld [vmem:[%s6778_s29 + $0x8] sm:$0xff]  ;;  %v6799_v5 = vld [vmem:[%s6778_s29 + $0x20] sm:$0xff]  ;;  %v6804_v7 = vld [vmem:[%s6778_s29 + $0x30] sm:$0xff]  ;;  %s6709_s14 = smov 32  }
  0x12   : > { %13428 = vst [vmem:[#allocation5_spill] sm:$0xff] %v6785_v2  ;;  %v6810_v8 = vld [vmem:[%s6778_s29 + $0x28] sm:$0xff]  ;;  %v6815_v9 = vld [vmem:[%s6778_s29 + $0x38] sm:$0xff]  ;;  %v6825_v11 = vld [vmem:[%s6778_s29 + $0x40] sm:$0xff] }
  0x13   : > { %287 = vst.msk [vmem:[#allocation2 + $0x1a8] sm:$0x3] %vm282_vm1, %v13235_v0  ;;  %v6820_v10 = vld [vmem:[%s6778_s29 + $0x48] sm:$0xff]  ;;  %v6832_v13 = vld [vmem:[%s6778_s29 + $0x50] sm:$0xff]  ;;  %v6841_v16 = vld [vmem:[%s6778_s29 + $0x60] sm:$0xff] }
  0x14   : > { %13429 = vst [vmem:[#allocation6_spill] sm:$0xff] %v6789_v3  ;;  %v461_v6 = vld [vmem:[#allocation2 + $0x1] sm:$0xff]  ;;  %v6848_v17 = vld [vmem:[%s6778_s29 + $0x58] sm:$0xff]  ;;  %v6864_v20 = vld [vmem:[%s6778_s29 + $0x70] sm:$0xff] }
  0x15   : > { %399 = vst.msk [vmem:[#allocation2 + $0x31] sm:$0xff] %vm13373_vm0, %v6782_v1  ;;  %750 = vrot.lane.b32.xlu0 %v461_v6, %s6702_s30  ;;  %v6853_v18 = vld [vmem:[%s6778_s29 + $0x68] sm:$0xff]  ;;  %v6859_v19 = vld [vmem:[%s6778_s29 + $0x78] sm:$0xff]  ;;  %v6871_v22 = vld [vmem:[%s6778_s29 + $0x80] sm:$0xff] }
  0x16   : > { %13430 = vst [vmem:[#allocation7_spill] sm:$0xff] %v6794_v4  ;;  %v6886_v25 = vld [vmem:[%s6778_s29 + $0x90] sm:$0xff]  ;;  %v6889_v26 = vld [vmem:[%s6778_s29 + $0x88] sm:$0xff]  ;;  %v6898_v27 = vld [vmem:[%s6778_s29 + $0x98] sm:$0xff] }
  0x17   : > { %397 = vst.msk [vmem:[#allocation2 + $0x19] sm:$0xff] %vm13373_vm0, %v6785_v2  ;;  %v462_v15 = vld [vmem:[#allocation2 + $0x9] sm:$0xff]  ;;  %v6916_v32 = vld [vmem:[%s6778_s29 + $0xa0] sm:$0xff]  ;;  %v6943_v38 = vld [vmem:[%s6778_s29 + $0xb8] sm:$0xff] }
  0x18   : > { %13431 = vst [vmem:[#allocation8_spill] sm:$0xff] %v6799_v5  ;;  %v6913_v31 = vld [vmem:[%s6778_s29 + $0xa8] sm:$0xff]  ;;  %v6925_v33 = vld [vmem:[%s6778_s29 + $0xb0] sm:$0xff]  ;;  %v6940_v37 = vld [vmem:[%s6778_s29 + $0xc0] sm:$0xff] }
  0x19   : > { %400 = vst.msk [vmem:[#allocation2 + $0x39] sm:$0xff] %vm13373_vm0, %v6789_v3  ;;  %v6952_v39 = vld [vmem:[%s6778_s29 + $0xc8] sm:$0xff]  ;;  %v6967_v43 = vld [vmem:[%s6778_s29 + $0xd8] sm:$0xff]  ;;  %v6970_v44 = vld [vmem:[%s6778_s29 + $0xd0] sm:$0xff] }
  0x1a   : > { %13432 = vst [vmem:[#allocation9_spill] sm:$0xff] %v6804_v7  ;;  %v6979_v45 = vld [vmem:[%s6778_s29 + $0xe0] sm:$0xff]  ;;  %v6994_v49 = vld [vmem:[%s6778_s29 + $0xe8] sm:$0xff] }
  0x1b   : > { %398 = vst.msk [vmem:[#allocation2 + $0x21] sm:$0xff] %vm13373_vm0, %v6794_v4  ;;  %v493_v62 = vld [vmem:[#allocation2 + $0x2] sm:$0xff]  ;;  %v494_v6 = vld [vmem:[#allocation2 + $0xa] sm:$0xff] }
  0x1c   : > { %13433 = vst [vmem:[#allocation10_spill] sm:$0xff] %v6810_v8  ;;  %v6827_v12 = vld [vmem:[#allocation2 + $0x31] sm:$0xff] }
  0x1d   : > { %401 = vst.msk [vmem:[#allocation2 + $0x49] sm:$0xff] %vm13373_vm0, %v6799_v5  ;;  %758 = vrot.lane.b32.xlu2 %v6827_v12, %s6702_s30  ;;  %752 = vrot.lane.b32.xlu0 %v462_v15, %s6702_s30 }
  0x1e   : > { %13434 = vst [vmem:[#allocation11_spill] sm:$0xff] %v6815_v9  ;;  %v6836_v14 = vld [vmem:[#allocation2 + $0x19] sm:$0xff] }
  0x1f   : > { %403 = vst.msk [vmem:[#allocation2 + $0x61] sm:$0xff] %vm13373_vm0, %v6804_v7  ;;  %754 = vrot.lane.b32.xlu1 %v6836_v14, %s6702_s30 }
  0x20   : > { %13435 = vst [vmem:[#allocation12_spill] sm:$0xff] %v6820_v10  ;;  %v6866_v21 = vld [vmem:[#allocation2 + $0x39] sm:$0xff] }
  0x21   : > { %402 = vst.msk [vmem:[#allocation2 + $0x51] sm:$0xff] %vm13373_vm0, %v6810_v8 }
  0x22   : > { %13436 = vst [vmem:[#allocation13_spill] sm:$0xff] %v6825_v11  ;;  %v6873_v23 = vld [vmem:[#allocation2 + $0x21] sm:$0xff] }
  0x23   : > { %404 = vst.msk [vmem:[#allocation2 + $0x69] sm:$0xff] %vm13373_vm0, %v6815_v9 }
  0x24   : > { %13437 = vst [vmem:[#allocation14_spill] sm:$0xff] %v6832_v13  ;;  %v6881_v24 = vld [vmem:[#allocation2 + $0x49] sm:$0xff] }
  0x25   : > { %406 = vst.msk [vmem:[#allocation2 + $0x81] sm:$0xff] %vm13373_vm0, %v6820_v10  ;;  %760 = vrot.lane.b32.xlu2 %v6866_v21, %s6702_s30  ;;  %762 = vrot.lane.b32.xlu0 %v6881_v24, %s6702_s30 }
  0x26   : > { %13438 = vst [vmem:[#allocation15_spill] sm:$0xff] %v6841_v16  ;;  %v6904_v28 = vld [vmem:[#allocation2 + $0x61] sm:$0xff] }
  0x27   : > { %405 = vst.msk [vmem:[#allocation2 + $0x79] sm:$0xff] %vm13373_vm0, %v6825_v11  ;;  %756 = vrot.lane.b32.xlu1 %v6873_v23, %s6702_s30 }
  0x28   : > { %13439 = vst [vmem:[#allocation16_spill] sm:$0xff] %v6848_v17  ;;  %v6906_v29 = vld [vmem:[#allocation2 + $0x51] sm:$0xff] }
  0x29   : > { %407 = vst.msk [vmem:[#allocation2 + $0x91] sm:$0xff] %vm13373_vm0, %v6832_v13 }
  0x2a   : > { %13440 = vst [vmem:[#allocation17_spill] sm:$0xff] %v6853_v18  ;;  %v6910_v30 = vld [vmem:[#allocation2 + $0x69] sm:$0xff] }
  0x2b   : > { %409 = vst.msk [vmem:[#allocation2 + $0xa9] sm:$0xff] %vm13373_vm0, %v6841_v16 }
  0x2c   : > { %13441 = vst [vmem:[#allocation18_spill] sm:$0xff] %v6859_v19  ;;  %v6931_v34 = vld [vmem:[#allocation2 + $0x81] sm:$0xff] }
  0x2d   : > { %408 = vst.msk [vmem:[#allocation2 + $0x99] sm:$0xff] %vm13373_vm0, %v6848_v17  ;;  %766 = vrot.lane.b32.xlu2 %v6904_v28, %s6702_s30  ;;  %768 = vrot.lane.b32.xlu0 %v6910_v30, %s6702_s30 }
  0x2e   : > { %13442 = vst [vmem:[#allocation19_spill] sm:$0xff] %v6864_v20  ;;  %v6933_v35 = vld [vmem:[#allocation2 + $0x79] sm:$0xff] }
  0x2f   : > { %410 = vst.msk [vmem:[#allocation2 + $0xb1] sm:$0xff] %vm13373_vm0, %v6853_v18  ;;  %764 = vrot.lane.b32.xlu1 %v6906_v29, %s6702_s30 }
  0x30   : > { %13443 = vst [vmem:[#allocation20_spill] sm:$0xff] %v6871_v22  ;;  %v6937_v36 = vld [vmem:[#allocation2 + $0x91] sm:$0xff] }
  0x31   : > { %412 = vst.msk [vmem:[#allocation2 + $0xc9] sm:$0xff] %vm13373_vm0, %v6859_v19 }
  0x32   : > { %411 = vst.msk [vmem:[#allocation2 + $0xc1] sm:$0xff] %vm13373_vm0, %v6864_v20  ;;  %v6958_v40 = vld [vmem:[#allocation2 + $0xa9] sm:$0xff] }
  0x33   : > { %413 = vst.msk [vmem:[#allocation2 + $0xd9] sm:$0xff] %vm13373_vm0, %v6871_v22 }
  0x34   : > { %13444 = vst [vmem:[#allocation21_spill] sm:$0xff] %v6886_v25  ;;  %v6960_v41 = vld [vmem:[#allocation2 + $0x99] sm:$0xff] }
  0x35   : > { %13445 = vst [vmem:[#allocation22_spill] sm:$0xff] %v6889_v26  ;;  %772 = vrot.lane.b32.xlu2 %v6931_v34, %s6702_s30  ;;  %774 = vrot.lane.b32.xlu0 %v6937_v36, %s6702_s30 }
  0x36   : > { %415 = vst.msk [vmem:[#allocation2 + $0xf1] sm:$0xff] %vm13373_vm0, %v6886_v25  ;;  %v6964_v42 = vld [vmem:[#allocation2 + $0xb1] sm:$0xff] }
  0x37   : > { %414 = vst.msk [vmem:[#allocation2 + $0xe1] sm:$0xff] %vm13373_vm0, %v6889_v26  ;;  %770 = vrot.lane.b32.xlu1 %v6933_v35, %s6702_s30  ;;  %v7184_v18 = vld [vmem:[#allocation2 + $0xaa] sm:$0xff] }
  0x38   : > { %13446 = vst [vmem:[#allocation23_spill] sm:$0xff] %v6898_v27  ;;  %v6985_v46 = vld [vmem:[#allocation2 + $0xc9] sm:$0xff] }
  0x39   : > { %416 = vst.msk [vmem:[#allocation2 + $0xf9] sm:$0xff] %vm13373_vm0, %v6898_v27  ;;  %v6987_v47 = vld [vmem:[#allocation2 + $0xc1] sm:$0xff] }
  0x3a   : > { %13447 = vst [vmem:[#allocation24_spill] sm:$0xff] %v6913_v31  ;;  %v6991_v48 = vld [vmem:[#allocation2 + $0xd9] sm:$0xff]  ;;  %v7188_v16 = vld [vmem:[#allocation2 + $0xc2] sm:$0xff] }
  0x3b   : > { %13448 = vst [vmem:[#allocation25_spill] sm:$0xff] %v6916_v32 }
  0x3c   : > { %418 = vst.msk [vmem:[#allocation2 + $0x111] sm:$0xff] %vm13373_vm0, %v6913_v31  ;;  %v7154_v31 = vld [vmem:[#allocation2 + $0x7a] sm:$0xff] }
  0x3d   : > { %417 = vst.msk [vmem:[#allocation2 + $0x109] sm:$0xff] %vm13373_vm0, %v6916_v32  ;;  %778 = vrot.lane.b32.xlu2 %v6958_v40, %s6702_s30  ;;  %780 = vrot.lane.b32.xlu0 %v6964_v42, %s6702_s30  ;;  %v7002_v50 = vld [vmem:[#allocation2 + $0xf1] sm:$0xff] }
  0x3e   : > { %13449 = vst [vmem:[#allocation26_spill] sm:$0xff] %v6925_v33  ;;  %v7004_v51 = vld [vmem:[#allocation2 + $0xe1] sm:$0xff] }
  0x3f   : > { %419 = vst.msk [vmem:[#allocation2 + $0x121] sm:$0xff] %vm13373_vm0, %v6925_v33  ;;  %776 = vrot.lane.b32.xlu1 %v6960_v41, %s6702_s30  ;;  %v7200_v11 = vld [vmem:[#allocation2 + $0xda] sm:$0xff] }
  0x40   : > { %13450 = vst [vmem:[#allocation27_spill] sm:$0xff] %v6940_v37  ;;  %v7008_v52 = vld [vmem:[#allocation2 + $0xf9] sm:$0xff] }
  0x41   : > { %13451 = vst [vmem:[#allocation28_spill] sm:$0xff] %v6943_v38  ;;  %v7220_v4 = vld [vmem:[#allocation2 + $0xf2] sm:$0xff] }
  0x42   : > { %421 = vst.msk [vmem:[#allocation2 + $0x139] sm:$0xff] %vm13373_vm0, %v6940_v37  ;;  %v7122_v37 = vld [vmem:[#allocation2 + $0x1a] sm:$0xff] }
  0x43   : > { %420 = vst.msk [vmem:[#allocation2 + $0x129] sm:$0xff] %vm13373_vm0, %v6943_v38  ;;  %v7022_v53 = vld [vmem:[#allocation2 + $0x111] sm:$0xff] }
  0x44   : > { %13452 = vst [vmem:[#allocation29_spill] sm:$0xff] %v6952_v39  ;;  %v7026_v54 = vld [vmem:[#allocation2 + $0x109] sm:$0xff] }
  0x45   : > { %422 = vst.msk [vmem:[#allocation2 + $0x141] sm:$0xff] %vm13373_vm0, %v6952_v39  ;;  %784 = vrot.lane.b32.xlu2 %v6985_v46, %s6702_s30  ;;  %786 = vrot.lane.b32.xlu0 %v6991_v48, %s6702_s30  ;;  %v7164_v39 = vld [vmem:[#allocation2 + $0x92] sm:$0xff]  ;;  %v7224_v2 = vld [vmem:[#allocation2 + $0x10a] sm:$0xff] }
  0x46   : > { %13453 = vst [vmem:[#allocation30_spill] sm:$0xff] %v6967_v43  ;;  %v7034_v55 = vld [vmem:[#allocation2 + $0x121] sm:$0xff] }
  0x47   : > { %13454 = vst [vmem:[#allocation31_spill] sm:$0xff] %v6970_v44  ;;  %782 = vrot.lane.b32.xlu1 %v6987_v47, %s6702_s30 }
  0x48   : > { %424 = vst.msk [vmem:[#allocation2 + $0x159] sm:$0xff] %vm13373_vm0, %v6967_v43  ;;  %v7150_v43 = vld [vmem:[#allocation2 + $0x62] sm:$0xff] }
  0x49   : > { %423 = vst.msk [vmem:[#allocation2 + $0x151] sm:$0xff] %vm13373_vm0, %v6970_v44  ;;  %v7050_v56 = vld [vmem:[#allocation2 + $0x139] sm:$0xff] }
  0x4a   : > { %13455 = vst [vmem:[#allocation32_spill] sm:$0xff] %v6979_v45  ;;  %v7054_v57 = vld [vmem:[#allocation2 + $0x129] sm:$0xff] }
  0x4b   : > { %425 = vst.msk [vmem:[#allocation2 + $0x169] sm:$0xff] %vm13373_vm0, %v6979_v45 }
  0x4c   : > { %13456 = vst [vmem:[#allocation33_spill] sm:$0xff] %v6994_v49  ;;  %v7062_v58 = vld [vmem:[#allocation2 + $0x141] sm:$0xff] }
  0x4d   : > { %426 = vst.msk [vmem:[#allocation2 + $0x171] sm:$0xff] %vm13373_vm0, %v6994_v49  ;;  %790 = vrot.lane.b32.xlu2 %v7002_v50, %s6702_s30  ;;  %792 = vrot.lane.b32.xlu0 %v7008_v52, %s6702_s30  ;;  %v7126_v49 = vld [vmem:[#allocation2 + $0x32] sm:$0xff] }
  0x4e   : > { %306 = vst.msk [vmem:[#allocation2 + $0x29] sm:$0x1] %vm289_vm2, %v13235_v0 }
  0x4f   : > { %788 = vrot.lane.b32.xlu1 %v7004_v51, %s6702_s30  ;;  %290 = vst.msk [vmem:[#allocation2 + $0x18] sm:$0x1] %vm289_vm2, %v13235_v0  ;;  %v7078_v59 = vld [vmem:[#allocation2 + $0x159] sm:$0xff] }
  0x50   : > { %291 = vst.msk [vmem:[#allocation2 + $0x30] sm:$0x1] %vm289_vm2, %v13235_v0  ;;  %v7082_v60 = vld [vmem:[#allocation2 + $0x151] sm:$0xff] }
  0x51   : > { %292 = vst.msk [vmem:[#allocation2 + $0x48] sm:$0x1] %vm289_vm2, %v13235_v0 }
  0x52   : > { %293 = vst.msk [vmem:[#allocation2 + $0x60] sm:$0x1] %vm289_vm2, %v13235_v0  ;;  %v7090_v61 = vld [vmem:[#allocation2 + $0x169] sm:$0xff] }
  0x53   : > { %294 = vst.msk [vmem:[#allocation2 + $0x78] sm:$0x1] %vm289_vm2, %v13235_v0 }
  0x54   : > { %295 = vst.msk [vmem:[#allocation2 + $0x90] sm:$0x1] %vm289_vm2, %v13235_v0  ;;  %v7108_v63 = vld [vmem:[#allocation2 + $0x171] sm:$0xff] }
  0x55   : > { %796 = vrot.lane.b32.xlu2 %v7022_v53, %s6702_s30  ;;  %296 = vst.msk [vmem:[#allocation2 + $0xa8] sm:$0x1] %vm289_vm2, %v13235_v0  ;;  %798 = vrot.lane.b32.xlu0 %v7034_v55, %s6702_s30  ;;  %v7120_v15 = vld [vmem:[#allocation2 + $0x22] sm:$0xff] }
  0x56   : > { %297 = vst.msk [vmem:[#allocation2 + $0xc0] sm:$0x1] %vm289_vm2, %v13235_v0 }
  0x57   : > { %794 = vrot.lane.b32.xlu1 %v7026_v54, %s6702_s30  ;;  %298 = vst.msk [vmem:[#allocation2 + $0xd8] sm:$0x1] %vm289_vm2, %v13235_v0 }
  0x58   : > { %299 = vst.msk [vmem:[#allocation2 + $0xf0] sm:$0x1] %vm289_vm2, %v13235_v0 }
  0x59   : > { %300 = vst.msk [vmem:[#allocation2 + $0x108] sm:$0x1] %vm289_vm2, %v13235_v0 }
  0x5a   : > { %301 = vst.msk [vmem:[#allocation2 + $0x120] sm:$0x1] %vm289_vm2, %v13235_v0 }
  0x5b   : > { %302 = vst.msk [vmem:[#allocation2 + $0x138] sm:$0x1] %vm289_vm2, %v13235_v0 }
  0x5c   : > { %303 = vst.msk [vmem:[#allocation2 + $0x150] sm:$0x1] %vm289_vm2, %v13235_v0 }
  0x5d   : > { %802 = vrot.lane.b32.xlu2 %v7050_v56, %s6702_s30  ;;  %304 = vst.msk [vmem:[#allocation2 + $0x168] sm:$0x1] %vm289_vm2, %v13235_v0  ;;  %804 = vrot.lane.b32.xlu0 %v7062_v58, %s6702_s30 }
  0x5e   : > { %305 = vst.msk [vmem:[#allocation2 + $0x180] sm:$0x1] %vm289_vm2, %v13235_v0 }
  0x5f   : > { %800 = vrot.lane.b32.xlu1 %v7054_v57, %s6702_s30  ;;  %307 = vst.msk [vmem:[#allocation2 + $0x41] sm:$0x1] %vm289_vm2, %v13235_v0 }
  0x60   : > { %308 = vst.msk [vmem:[#allocation2 + $0x59] sm:$0x1] %vm289_vm2, %v13235_v0 }
  0x61   : > { %309 = vst.msk [vmem:[#allocation2 + $0x71] sm:$0x1] %vm289_vm2, %v13235_v0 }
  0x62   : > { %310 = vst.msk [vmem:[#allocation2 + $0x89] sm:$0x1] %vm289_vm2, %v13235_v0 }
  0x63   : > { %311 = vst.msk [vmem:[#allocation2 + $0xa1] sm:$0x1] %vm289_vm2, %v13235_v0 }
  0x64   : > { %312 = vst.msk [vmem:[#allocation2 + $0xb9] sm:$0x1] %vm289_vm2, %v13235_v0 }
  0x65   : > { %808 = vrot.lane.b32.xlu2 %v7078_v59, %s6702_s30  ;;  %313 = vst.msk [vmem:[#allocation2 + $0xd1] sm:$0x1] %vm289_vm2, %v13235_v0  ;;  %810 = vrot.lane.b32.xlu0 %v7090_v61, %s6702_s30 }
  0x66   : > { %314 = vst.msk [vmem:[#allocation2 + $0xe9] sm:$0x1] %vm289_vm2, %v13235_v0 }
  0x67   : > { %806 = vrot.lane.b32.xlu1 %v7082_v60, %s6702_s30  ;;  %315 = vst.msk [vmem:[#allocation2 + $0x101] sm:$0x1] %vm289_vm2, %v13235_v0  ;;  %v7140_v38 = vld [vmem:[#allocation2 + $0x52] sm:$0xff] }
  0x68   : > { %316 = vst.msk [vmem:[#allocation2 + $0x119] sm:$0x1] %vm289_vm2, %v13235_v0  ;;  %v7148_v33 = vld [vmem:[#allocation2 + $0x6a] sm:$0xff] }
  0x69   : > { %317 = vst.msk [vmem:[#allocation2 + $0x131] sm:$0x1] %vm289_vm2, %v13235_v0  ;;  %v7166_v27 = vld [vmem:[#allocation2 + $0x82] sm:$0xff] }
  0x6a   : > { %318 = vst.msk [vmem:[#allocation2 + $0x149] sm:$0x1] %vm289_vm2, %v13235_v0  ;;  %v7170_v25 = vld [vmem:[#allocation2 + $0x9a] sm:$0xff] }
  0x6b   : > { %319 = vst.msk [vmem:[#allocation2 + $0x161] sm:$0x1] %vm289_vm2, %v13235_v0  ;;  %v7182_v20 = vld [vmem:[#allocation2 + $0xb2] sm:$0xff] }
  0x6c   : > { %320 = vst.msk [vmem:[#allocation2 + $0x179] sm:$0x1] %vm289_vm2, %v13235_v0  ;;  %v7202_v9 = vld [vmem:[#allocation2 + $0xca] sm:$0xff] }
  0x6d   : > { %878 = vrot.lane.b32.xlu2 %v493_v62, %s6703_s8  ;;  %321 = vst.msk [vmem:[#allocation2 + $0x191] sm:$0x1] %vm289_vm2, %v13235_v0  ;;  %880 = vrot.lane.b32.xlu0 %v494_v6, %s6703_s8  ;;  %v7134_v0 = vld [vmem:[#allocation2 + $0x4a] sm:$0xff]  ;;  %v7136_v6 = vld [vmem:[#allocation2 + $0x3a] sm:$0xff]  ;;  %v7206_v7 = vld [vmem:[#allocation2 + $0xe2] sm:$0xff] }
  0x6e   : > { %v7218_v1 = vld [vmem:[#allocation2 + $0xfa] sm:$0xff] }
  0x6f   : > { %812 = vrot.lane.b32.xlu1 %v7108_v63, %s6702_s30  ;;  %s6710_s30 = smov 40  }
  0x75   : > { %884 = vrot.lane.b32.xlu2 %v7120_v15, %s6703_s8  ;;  %886 = vrot.lane.b32.xlu0 %v7126_v49, %s6703_s8 }
  0x77   : > { %882 = vrot.lane.b32.xlu1 %v7122_v37, %s6703_s8  ;;  %v7130_v62 = vpop.permute.xlu2 %758 }
  0x78   : > { %13457 = vst [vmem:[#allocation34_spill] sm:$0xff] %v7130_v62  ;;  %v7268_v62 = vld [vmem:[#allocation2 + $0x152] sm:$0xff] }
  0x79   : > { %13478 = vst [vmem:[#allocation54_spill] sm:$0xff] %v7268_v62 }
  0x7d   : > { %890 = vrot.lane.b32.xlu2 %v7134_v0, %s6703_s8  ;;  %892 = vrot.lane.b32.xlu0 %v7140_v38, %s6703_s8 }
  0x7f   : > { %888 = vrot.lane.b32.xlu1 %v7136_v6, %s6703_s8  ;;  %v7144_v45 = vpop.permute.xlu2 %760 }
  0x80   : > { %13458 = vst [vmem:[#allocation35_spill] sm:$0xff] %v7144_v45  ;;  %v7262_v45 = vld [vmem:[#allocation2 + $0x142] sm:$0xff] }
  0x81   : > { %13477 = vst [vmem:[#allocation53_spill] sm:$0xff] %v7262_v45 }
  0x85   : > { %896 = vrot.lane.b32.xlu2 %v7148_v33, %s6703_s8  ;;  %898 = vrot.lane.b32.xlu0 %v7154_v31, %s6703_s8 }
  0x87   : > { %894 = vrot.lane.b32.xlu1 %v7150_v43, %s6703_s8  ;;  %v7158_v44 = vpop.permute.xlu2 %766  ;;  %v7162_v32 = vpop.permute.xlu0 %750 }
  0x88   : > { %13459 = vst [vmem:[#allocation36_spill] sm:$0xff] %v7158_v44  ;;  %v7238_v44 = vld [vmem:[#allocation2 + $0x122] sm:$0xff] }
  0x89   : > { %13460 = vst [vmem:[#allocation37_spill] sm:$0xff] %v7162_v32  ;;  %v432_v32 = vld [vmem:[#allocation2 + $0x20] sm:$0xff] }
  0x8d   : > { %902 = vrot.lane.b32.xlu2 %v7164_v39, %s6703_s8  ;;  %904 = vrot.lane.b32.xlu0 %v7170_v25, %s6703_s8 }
  0x8f   : > { %900 = vrot.lane.b32.xlu1 %v7166_v27, %s6703_s8  ;;  %v7174_v26 = vpop.permute.xlu2 %772  ;;  %v7180_v19 = vpop.permute.xlu0 %752 }
  0x90   : > { %13461 = vst [vmem:[#allocation38_spill] sm:$0xff] %v7174_v26  ;;  %v13472_v26 = vmov 0.0  }
  0x91   : > { %v7178_v22 = vpop.permute.xlu1 %754  ;;  %13463 = vst [vmem:[#allocation40_spill] sm:$0xff] %v7180_v19  ;;  %v7286_v19 = vld [vmem:[#allocation2 + $0x172] sm:$0xff] }
  0x92   : > { %13462 = vst [vmem:[#allocation39_spill] sm:$0xff] %v7178_v22  ;;  %v7282_v22 = vld [vmem:[#allocation2 + $0x15a] sm:$0xff] }
  0x93   : > { %323 = vst.msk [vmem:[#allocation3] sm:$0xff] %vm13387_vm3, %v13472_v26 }
  0x94   : > { %324 = vst.msk [vmem:[#allocation3 + $0x8] sm:$0xff] %vm13387_vm3, %v13472_v26 }
  0x95   : > { %908 = vrot.lane.b32.xlu2 %v7182_v20, %s6703_s8  ;;  %910 = vrot.lane.b32.xlu0 %v7188_v16, %s6703_s8  ;;  %328 = vst.msk [vmem:[#allocation3 + $0x198] sm:$0xff] %vm13387_vm3, %v13472_v26 }
  0x96   : > { %329 = vst.msk [vmem:[#allocation3 + $0x1a0] sm:$0xff] %vm13387_vm3, %v13472_v26  ;;  %v7264_v26 = vld [vmem:[#allocation2 + $0x13a] sm:$0xff] }
  0x97   : > { %906 = vrot.lane.b32.xlu1 %v7184_v18, %s6703_s8  ;;  %v7192_v17 = vpop.permute.xlu2 %778  ;;  %v7198_v10 = vpop.permute.xlu0 %762  ;;  %13483 = vst [vmem:[#allocation59_spill] sm:$0xff] %v7282_v22 }
  0x98   : > { %13464 = vst [vmem:[#allocation41_spill] sm:$0xff] %v7192_v17 }
  0x99   : > { %v7196_v13 = vpop.permute.xlu1 %756  ;;  %13466 = vst [vmem:[#allocation43_spill] sm:$0xff] %v7198_v10 }
  0x9a   : > { %13465 = vst [vmem:[#allocation42_spill] sm:$0xff] %v7196_v13  ;;  %v7280_v13 = vld [vmem:[#allocation2 + $0x16a] sm:$0xff] }
  0x9b   : > { %13482 = vst [vmem:[#allocation58_spill] sm:$0xff] %v7280_v13 }
  0x9c   : > { %13484 = vst [vmem:[#allocation60_spill] sm:$0xff] %v7286_v19 }
  0x9d   : > { %914 = vrot.lane.b32.xlu2 %v7200_v11, %s6703_s8  ;;  %916 = vrot.lane.b32.xlu0 %v7206_v7, %s6703_s8 }
  0x9f   : > { %912 = vrot.lane.b32.xlu1 %v7202_v9, %s6703_s8  ;;  %v7210_v8 = vpop.permute.xlu2 %784  ;;  %v7216_v3 = vpop.permute.xlu0 %768 }
  0xa0   : > { %13467 = vst [vmem:[#allocation44_spill] sm:$0xff] %v7210_v8 }
  0xa1   : > { %v7214_v5 = vpop.permute.xlu1 %764  ;;  %13469 = vst [vmem:[#allocation46_spill] sm:$0xff] %v7216_v3 }
  0xa2   : > { %13468 = vst [vmem:[#allocation45_spill] sm:$0xff] %v7214_v5  ;;  %v7242_v5 = vld [vmem:[#allocation2 + $0x112] sm:$0xff] }
  0xa5   : > { %920 = vrot.lane.b32.xlu2 %v7218_v1, %s6703_s8  ;;  %922 = vrot.lane.b32.xlu0 %v7224_v2, %s6703_s8 }
  0xa7   : > { %918 = vrot.lane.b32.xlu1 %v7220_v4, %s6703_s8  ;;  %v7228_v8 = vpop.permute.xlu2 %790  ;;  %v7236_v3 = vpop.permute.xlu0 %774 }
  0xa8   : > { %13470 = vst [vmem:[#allocation47_spill] sm:$0xff] %v7228_v8  ;;  %v7250_v8 = vld [vmem:[#allocation2 + $0x12a] sm:$0xff] }
  0xa9   : > { %v7232_v17 = vpop.permute.xlu1 %770  ;;  %13473 = vst [vmem:[#allocation49_spill] sm:$0xff] %v7236_v3 }
  0xaa   : > { %13471 = vst [vmem:[#allocation48_spill] sm:$0xff] %v7232_v17 }
  0xad   : > { %926 = vrot.lane.b32.xlu2 %v7238_v44, %s6703_s8  ;;  %928 = vrot.lane.b32.xlu0 %v7250_v8, %s6703_s8 }
  0xaf   : > { %924 = vrot.lane.b32.xlu1 %v7242_v5, %s6703_s8  ;;  %v7254_v3 = vpop.permute.xlu2 %796  ;;  %v7260_v10 = vpop.permute.xlu0 %780 }
  0xb0   : > { %13474 = vst [vmem:[#allocation50_spill] sm:$0xff] %v7254_v3 }
  0xb1   : > { %v7258_v17 = vpop.permute.xlu1 %776  ;;  %13476 = vst [vmem:[#allocation52_spill] sm:$0xff] %v7260_v10 }
  0xb2   : > { %13475 = vst [vmem:[#allocation51_spill] sm:$0xff] %v7258_v17 }
  0xb5   : > { %932 = vrot.lane.b32.xlu2 %v7262_v45, %s6703_s8  ;;  %934 = vrot.lane.b32.xlu0 %v7268_v62, %s6703_s8  ;;  %v431_v62 = vld [vmem:[#allocation2 + $0x18] sm:$0xff] }
  0xb7   : > { %930 = vrot.lane.b32.xlu1 %v7264_v26, %s6703_s8  ;;  %v7272_v3 = vpop.permute.xlu2 %802  ;;  %v7278_v10 = vpop.permute.xlu0 %786 }
  0xb8   : > { %13479 = vst [vmem:[#allocation55_spill] sm:$0xff] %v7272_v3 }
  0xb9   : > { %v7276_v17 = vpop.permute.xlu1 %782  ;;  %13481 = vst [vmem:[#allocation57_spill] sm:$0xff] %v7278_v10 }
  0xba   : > { %13480 = vst [vmem:[#allocation56_spill] sm:$0xff] %v7276_v17 }
  0xbd   : > { %938 = vrot.lane.b32.xlu2 %v7280_v13, %s6703_s8  ;;  %940 = vrot.lane.b32.xlu0 %v7286_v19, %s6703_s8  ;;  %v433_v13 = vld [vmem:[#allocation2 + $0x30] sm:$0xff]  ;;  %v7307_v19 = vld [vmem:[#allocation2 + $0x48] sm:$0xff] }
  0xbf   : > { %936 = vrot.lane.b32.xlu1 %v7282_v22, %s6703_s8  ;;  %v7290_v3 = vpop.permute.xlu2 %808  ;;  %v7296_v10 = vpop.permute.xlu0 %792 }
  0xc0   : > { %13485 = vst [vmem:[#allocation61_spill] sm:$0xff] %v7290_v3 }
  0xc1   : > { %v7294_v17 = vpop.permute.xlu1 %788  ;;  %13487 = vst [vmem:[#allocation63_spill] sm:$0xff] %v7296_v10  ;;  %v7322_v10 = vld [vmem:[#allocation2 + $0x68] sm:$0xff] }
  0xc2   : > { %13486 = vst [vmem:[#allocation62_spill] sm:$0xff] %v7294_v17  ;;  %v434_v17 = vld [vmem:[#allocation2 + $0x38] sm:$0xff] }
  0xc3   : > { %13495 = vst [vmem:[#allocation71_spill] sm:$0xff] %v7322_v10 }
  0xc5   : > { %1008 = vrot.lane.b32.xlu2 %v432_v32, %s6704_s9  ;;  %1010 = vrot.lane.b32.xlu0 %v433_v13, %s6704_s9  ;;  %v7312_v32 = vld [vmem:[#allocation2 + $0x50] sm:$0xff] }
  0xc6   : > { %13491 = vst [vmem:[#allocation67_spill] sm:$0xff] %v7312_v32 }
  0xc7   : > { %1006 = vrot.lane.b32.xlu1 %v431_v62, %s6704_s9  ;;  %v7300_v45 = vpop.permute.xlu2 %878  ;;  %v7305_v22 = vpop.permute.xlu0 %798 }
  0xc8   : > { %13488 = vst [vmem:[#allocation64_spill] sm:$0xff] %v7300_v45 }
  0xc9   : > { %v7303_v3 = vpop.permute.xlu1 %794  ;;  %13490 = vst [vmem:[#allocation66_spill] sm:$0xff] %v7305_v22  ;;  %v437_v22 = vld [vmem:[#allocation2 + $0x60] sm:$0xff] }
  0xca   : > { %13489 = vst [vmem:[#allocation65_spill] sm:$0xff] %v7303_v3 }
  0xcd   : > { %1014 = vrot.lane.b32.xlu2 %v7307_v19, %s6704_s9  ;;  %1016 = vrot.lane.b32.xlu0 %v7312_v32, %s6704_s9  ;;  %v440_v32 = vld [vmem:[#allocation2 + $0x80] sm:$0xff] }
  0xcf   : > { %1012 = vrot.lane.b32.xlu1 %v434_v17, %s6704_s9  ;;  %v7314_v62 = vpop.permute.xlu2 %884  ;;  %v7320_v3 = vpop.permute.xlu0 %804  ;;  %v7327_v17 = vld [vmem:[#allocation2 + $0x78] sm:$0xff] }
  0xd0   : > { %13492 = vst [vmem:[#allocation68_spill] sm:$0xff] %v7314_v62 }
  0xd1   : > { %v7318_v13 = vpop.permute.xlu1 %800  ;;  %13494 = vst [vmem:[#allocation70_spill] sm:$0xff] %v7320_v3  ;;  %v7337_v3 = vld [vmem:[#allocation2 + $0x90] sm:$0xff] }
  0xd2   : > { %13493 = vst [vmem:[#allocation69_spill] sm:$0xff] %v7318_v13 }
  0xd3   : > { %13496 = vst [vmem:[#allocation72_spill] sm:$0xff] %v7327_v17 }
  0xd4   : > { %13500 = vst [vmem:[#allocation76_spill] sm:$0xff] %v7337_v3 }
  0xd5   : > { %1020 = vrot.lane.b32.xlu2 %v7322_v10, %s6704_s9  ;;  %1022 = vrot.lane.b32.xlu0 %v7327_v17, %s6704_s9  ;;  %v443_v17 = vld [vmem:[#allocation2 + $0xa8] sm:$0xff] }
  0xd7   : > { %1018 = vrot.lane.b32.xlu1 %v437_v22, %s6704_s9  ;;  %v7329_v45 = vpop.permute.xlu2 %890  ;;  %v7335_v13 = vpop.permute.xlu0 %810  ;;  %v7342_v22 = vld [vmem:[#allocation2 + $0x98] sm:$0xff] }
  0xd8   : > { %13497 = vst [vmem:[#allocation73_spill] sm:$0xff] %v7329_v45  ;;  %v7352_v45 = vld [vmem:[#allocation2 + $0xb0] sm:$0xff] }
  0xd9   : > { %v7333_v62 = vpop.permute.xlu1 %806  ;;  %13499 = vst [vmem:[#allocation75_spill] sm:$0xff] %v7335_v13 }
  0xda   : > { %13498 = vst [vmem:[#allocation74_spill] sm:$0xff] %v7333_v62 }
  0xdb   : > { %13501 = vst [vmem:[#allocation77_spill] sm:$0xff] %v7342_v22 }
  0xdc   : > { %13505 = vst [vmem:[#allocation81_spill] sm:$0xff] %v7352_v45 }
  0xdd   : > { %1026 = vrot.lane.b32.xlu2 %v7337_v3, %s6704_s9  ;;  %1028 = vrot.lane.b32.xlu0 %v7342_v22, %s6704_s9  ;;  %v446_v3 = vld [vmem:[#allocation2 + $0xc8] sm:$0xff] }
  0xdf   : > { %1024 = vrot.lane.b32.xlu1 %v440_v32, %s6704_s9  ;;  %v7344_v10 = vpop.permute.xlu2 %896  ;;  %v7350_v13 = vpop.permute.xlu0 %880  ;;  %v7357_v32 = vld [vmem:[#allocation2 + $0xc0] sm:$0xff] }
  0xe0   : > { %13502 = vst [vmem:[#allocation78_spill] sm:$0xff] %v7344_v10 }
  0xe1   : > { %v7348_v62 = vpop.permute.xlu1 %812  ;;  %13504 = vst [vmem:[#allocation80_spill] sm:$0xff] %v7350_v13  ;;  %v7367_v13 = vld [vmem:[#allocation2 + $0xd8] sm:$0xff] }
  0xe2   : > { %13503 = vst [vmem:[#allocation79_spill] sm:$0xff] %v7348_v62 }
  0xe3   : > { %13506 = vst [vmem:[#allocation82_spill] sm:$0xff] %v7357_v32 }
  0xe4   : > { %13510 = vst [vmem:[#allocation86_spill] sm:$0xff] %v7367_v13 }
  0xe5   : > { %1032 = vrot.lane.b32.xlu2 %v7352_v45, %s6704_s9  ;;  %1034 = vrot.lane.b32.xlu0 %v7357_v32, %s6704_s9  ;;  %v7372_v45 = vld [vmem:[%s6778_s29 + $0xf0] sm:$0xff]  ;;  %v7392_v32 = vld [vmem:[#allocation2 + $0xf8] sm:$0xff] }
  0xe6   : > { %13511 = vst [vmem:[#allocation87_spill] sm:$0xff] %v7372_v45 }
  0xe7   : > { %1030 = vrot.lane.b32.xlu1 %v443_v17, %s6704_s9  ;;  %v7359_v10 = vpop.permute.xlu2 %902  ;;  %v7365_v62 = vpop.permute.xlu0 %886  ;;  %v7375_v17 = vld [vmem:[%s6778_s29 + $0xf8] sm:$0xff]  ;;  %427 = vst.msk [vmem:[#allocation2 + $0x181] sm:$0xff] %vm13373_vm0, %v7372_v45  ;;  %v7397_v45 = vld [vmem:[#allocation2 + $0x108] sm:$0xff] }
  0xe8   : > { %13507 = vst [vmem:[#allocation83_spill] sm:$0xff] %v7359_v10  ;;  %v7380_v10 = vld [vmem:[#allocation2 + $0xe0] sm:$0xff] }
  0xe9   : > { %v7363_v22 = vpop.permute.xlu1 %882  ;;  %13509 = vst [vmem:[#allocation85_spill] sm:$0xff] %v7365_v62 }
  0xea   : > { %13508 = vst [vmem:[#allocation84_spill] sm:$0xff] %v7363_v22 }
  0xeb   : > { %13512 = vst [vmem:[#allocation88_spill] sm:$0xff] %v7375_v17 }
  0xec   : > { %13513 = vst [vmem:[#allocation89_spill] sm:$0xff] %v7380_v10 }
  0xed   : > { %1038 = vrot.lane.b32.xlu2 %v7367_v13, %s6704_s9  ;;  %428 = vst.msk [vmem:[#allocation2 + $0x189] sm:$0xff] %vm13373_vm0, %v7375_v17  ;;  %1040 = vrot.lane.b32.xlu0 %v7380_v10, %s6704_s9  ;;  %v452_v10 = vld [vmem:[#allocation2 + $0x110] sm:$0xff] }
  0xee   : > { %13517 = vst [vmem:[#allocation93_spill] sm:$0xff] %v7392_v32 }
  0xef   : > { %1036 = vrot.lane.b32.xlu1 %v446_v3, %s6704_s9  ;;  %v7382_v22 = vpop.permute.xlu2 %908  ;;  %v7390_v13 = vpop.permute.xlu0 %892  ;;  %v449_v3 = vld [vmem:[#allocation2 + $0xf0] sm:$0xff]  ;;  %13518 = vst [vmem:[#allocation94_spill] sm:$0xff] %v7397_v45 }
  0xf0   : > { %13514 = vst [vmem:[#allocation90_spill] sm:$0xff] %v7382_v22 }
  0xf1   : > { %v7388_v62 = vpop.permute.xlu1 %888  ;;  %13516 = vst [vmem:[#allocation92_spill] sm:$0xff] %v7390_v13  ;;  %v7407_v13 = vld [vmem:[#allocation2 + $0x120] sm:$0xff] }
  0xf2   : > { %13515 = vst [vmem:[#allocation91_spill] sm:$0xff] %v7388_v62 }
  0xf3   : > { %13522 = vst [vmem:[#allocation98_spill] sm:$0xff] %v7407_v13 }
  0xf5   : > { %1044 = vrot.lane.b32.xlu2 %v7392_v32, %s6704_s9  ;;  %1046 = vrot.lane.b32.xlu0 %v7397_v45, %s6704_s9  ;;  %v455_v45 = vld [vmem:[#allocation2 + $0x138] sm:$0xff] }
  0xf7   : > { %1042 = vrot.lane.b32.xlu1 %v449_v3, %s6704_s9  ;;  %v7399_v22 = vpop.permute.xlu2 %914  ;;  %v7405_v62 = vpop.permute.xlu0 %898  ;;  %v7412_v3 = vld [vmem:[#allocation2 + $0x128] sm:$0xff] }
  0xf8   : > { %13519 = vst [vmem:[#allocation95_spill] sm:$0xff] %v7399_v22 }
  0xf9   : > { %v7403_v17 = vpop.permute.xlu1 %894  ;;  %13521 = vst [vmem:[#allocation97_spill] sm:$0xff] %v7405_v62  ;;  %v7422_v62 = vld [vmem:[#allocation2 + $0x140] sm:$0xff] }
  0xfa   : > { %13520 = vst [vmem:[#allocation96_spill] sm:$0xff] %v7403_v17 }
  0xfb   : > { %13523 = vst [vmem:[#allocation99_spill] sm:$0xff] %v7412_v3 }
  0xfc   : > { %13527 = vst [vmem:[#allocation103_spill] sm:$0xff] %v7422_v62 }
  0xfd   : > { %1050 = vrot.lane.b32.xlu2 %v7407_v13, %s6704_s9  ;;  %1052 = vrot.lane.b32.xlu0 %v7412_v3, %s6704_s9  ;;  %v7439_v3 = vld [vmem:[#allocation2 + $0x158] sm:$0xff] }
  0xff   : > { %1048 = vrot.lane.b32.xlu1 %v452_v10, %s6704_s9  ;;  %v7414_v32 = vpop.permute.xlu2 %920  ;;  %v7420_v17 = vpop.permute.xlu0 %904  ;;  %v7427_v10 = vld [vmem:[#allocation2 + $0x150] sm:$0xff] }
 0x100   : > { %13524 = vst [vmem:[#allocation100_spill] sm:$0xff] %v7414_v32 }
 0x101   : > { %v7418_v22 = vpop.permute.xlu1 %900  ;;  %13526 = vst [vmem:[#allocation102_spill] sm:$0xff] %v7420_v17  ;;  %v7437_v17 = vld [vmem:[#allocation2 + $0x168] sm:$0xff] }
 0x102   : > { %13525 = vst [vmem:[#allocation101_spill] sm:$0xff] %v7418_v22 }
 0x103   : > { %13528 = vst [vmem:[#allocation104_spill] sm:$0xff] %v7427_v10 }
 0x104   : > { %13532 = vst [vmem:[#allocation108_spill] sm:$0xff] %v7437_v17 }
 0x105   : > { %1056 = vrot.lane.b32.xlu2 %v7422_v62, %s6704_s9  ;;  %1058 = vrot.lane.b32.xlu0 %v7427_v10, %s6704_s9  ;;  %v7455_v10 = vld [vmem:[#allocation2 + $0x188] sm:$0xff]  ;;  %v7457_v62 = vld [vmem:[#allocation2 + $0x180] sm:$0xff] }
 0x106   : > { %13536 = vst [vmem:[#allocation112_spill] sm:$0xff] %v7455_v10 }
 0x107   : > { %1054 = vrot.lane.b32.xlu1 %v455_v45, %s6704_s9  ;;  %v7429_v13 = vpop.permute.xlu2 %926  ;;  %v7435_v22 = vpop.permute.xlu0 %910  ;;  %v7445_v45 = vld [vmem:[#allocation2 + $0x170] sm:$0xff] }
 0x108   : > { %13529 = vst [vmem:[#allocation105_spill] sm:$0xff] %v7429_v13 }
 0x109   : > { %v7433_v32 = vpop.permute.xlu1 %906  ;;  %13531 = vst [vmem:[#allocation107_spill] sm:$0xff] %v7435_v22 }
 0x10a   : > { %13530 = vst [vmem:[#allocation106_spill] sm:$0xff] %v7433_v32 }
 0x10d   : > { %1062 = vrot.lane.b32.xlu2 %v7437_v17, %s6704_s9  ;;  %1064 = vrot.lane.b32.xlu0 %v7445_v45, %s6704_s9 }
 0x10f   : > { %1060 = vrot.lane.b32.xlu1 %v7439_v3, %s6704_s9  ;;  %v7447_v13 = vpop.permute.xlu2 %932  ;;  %v7453_v22 = vpop.permute.xlu0 %916 }
 0x110   : > { %13533 = vst [vmem:[#allocation109_spill] sm:$0xff] %v7447_v13 }
 0x111   : > { %v7451_v32 = vpop.permute.xlu1 %912  ;;  %13535 = vst [vmem:[#allocation111_spill] sm:$0xff] %v7453_v22 }
 0x112   : > { %13534 = vst [vmem:[#allocation110_spill] sm:$0xff] %v7451_v32 }
 0x115   : > { %1068 = vrot.lane.b32.xlu2 %v7455_v10, %s6704_s9  ;;  %1134 = vrot.lane.b32.xlu0 %v6836_v14, %s6705_s10 }
 0x117   : > { %1066 = vrot.lane.b32.xlu1 %v7457_v62, %s6704_s9  ;;  %v7463_v17 = vpop.permute.xlu2 %938  ;;  %v7469_v32 = vpop.permute.xlu0 %922  ;;  %s6712_s9 = smov 56  }
 0x118   : > { %13537 = vst [vmem:[#allocation113_spill] sm:$0xff] %v7463_v17 }
 0x119   : > { %v7467_v13 = vpop.permute.xlu1 %918  ;;  %13539 = vst [vmem:[#allocation115_spill] sm:$0xff] %v7469_v32 }
 0x11a   : > { %13538 = vst [vmem:[#allocation114_spill] sm:$0xff] %v7467_v13  ;;  %v7719_v13 = vld [vmem:[#allocation2 + $0x18a] sm:$0xff] }
 0x11d   : > { %1138 = vrot.lane.b32.xlu2 %v6827_v12, %s6705_s10  ;;  %1140 = vrot.lane.b32.xlu0 %v6866_v21, %s6705_s10 }
 0x11f   : > { %1136 = vrot.lane.b32.xlu1 %v6873_v23, %s6705_s10  ;;  %v7475_v22 = vpop.permute.xlu2 %1008  ;;  %v7481_v10 = vpop.permute.xlu0 %928 }
 0x120   : > { %13541 = vst [vmem:[#allocation117_spill] sm:$0xff] %v7481_v10  ;;  %v700_v10 = vld [vmem:[#allocation2 + $0xda] sm:$0xff] }
 0x121   : > { %v7479_v17 = vpop.permute.xlu1 %924 }
 0x122   : > { %13540 = vst [vmem:[#allocation116_spill] sm:$0xff] %v7479_v17  ;;  %v7593_v17 = vld [vmem:[#allocation2 + $0x189] sm:$0xff] }
 0x125   : > { %1144 = vrot.lane.b32.xlu2 %v6906_v29, %s6705_s10  ;;  %1146 = vrot.lane.b32.xlu0 %v6904_v28, %s6705_s10 }
 0x127   : > { %1142 = vrot.lane.b32.xlu1 %v6881_v24, %s6705_s10  ;;  %v7487_v14 = vpop.permute.xlu2 %1014  ;;  %v7493_v23 = vpop.permute.xlu0 %934 }
 0x128   : > { %13543 = vst [vmem:[#allocation119_spill] sm:$0xff] %v7493_v23  ;;  %v13609_v23 = vld [vmem:[#allocation99_spill] sm:$0xff] }
 0x129   : > { %v7491_v12 = vpop.permute.xlu1 %930 }
 0x12a   : > { %13542 = vst [vmem:[#allocation118_spill] sm:$0xff] %v7491_v12 }
 0x12d   : > { %1150 = vrot.lane.b32.xlu2 %v6933_v35, %s6705_s10  ;;  %1152 = vrot.lane.b32.xlu0 %v6931_v34, %s6705_s10 }
 0x12f   : > { %1148 = vrot.lane.b32.xlu1 %v6910_v30, %s6705_s10  ;;  %v7499_v21 = vpop.permute.xlu2 %1020  ;;  %v7505_v29 = vpop.permute.xlu0 %940 }
 0x130   : > { %13545 = vst [vmem:[#allocation121_spill] sm:$0xff] %v7505_v29  ;;  %v626_v29 = vld [vmem:[#allocation2 + $0x60] sm:$0xff] }
 0x131   : > { %v7503_v24 = vpop.permute.xlu1 %936 }
 0x132   : > { %13544 = vst [vmem:[#allocation120_spill] sm:$0xff] %v7503_v24 }
 0x135   : > { %1156 = vrot.lane.b32.xlu2 %v6960_v41, %s6705_s10  ;;  %1158 = vrot.lane.b32.xlu0 %v6958_v40, %s6705_s10 }
 0x137   : > { %1154 = vrot.lane.b32.xlu1 %v6937_v36, %s6705_s10  ;;  %v7511_v28 = vpop.permute.xlu2 %1026  ;;  %v7517_v35 = vpop.permute.xlu0 %1010 }
 0x138   : > { %13546 = vst [vmem:[#allocation122_spill] sm:$0xff] %v7511_v28 }
 0x139   : > { %v7515_v30 = vpop.permute.xlu1 %1006 }
 0x13d   : > { %1162 = vrot.lane.b32.xlu2 %v6987_v47, %s6705_s10  ;;  %1164 = vrot.lane.b32.xlu0 %v6985_v46, %s6705_s10 }
 0x13f   : > { %1160 = vrot.lane.b32.xlu1 %v6964_v42, %s6705_s10  ;;  %v7523_v34 = vpop.permute.xlu2 %1032  ;;  %v7529_v41 = vpop.permute.xlu0 %1016 }
 0x140   : > { %13547 = vst [vmem:[#allocation123_spill] sm:$0xff] %v7523_v34 }
 0x141   : > { %v7527_v36 = vpop.permute.xlu1 %1012 }
 0x145   : > { %1168 = vrot.lane.b32.xlu2 %v7004_v51, %s6705_s10  ;;  %1170 = vrot.lane.b32.xlu0 %v7002_v50, %s6705_s10 }
 0x147   : > { %1166 = vrot.lane.b32.xlu1 %v6991_v48, %s6705_s10  ;;  %v7535_v40 = vpop.permute.xlu2 %1038  ;;  %v7541_v47 = vpop.permute.xlu0 %1022 }
 0x148   : > { %13548 = vst [vmem:[#allocation124_spill] sm:$0xff] %v7535_v40  ;;  %v13596_v40 = vld [vmem:[#allocation77_spill] sm:$0xff] }
 0x149   : > { %v7539_v42 = vpop.permute.xlu1 %1018 }
 0x14d   : > { %1174 = vrot.lane.b32.xlu2 %v7026_v54, %s6705_s10  ;;  %1176 = vrot.lane.b32.xlu0 %v7022_v53, %s6705_s10 }
 0x14f   : > { %1172 = vrot.lane.b32.xlu1 %v7008_v52, %s6705_s10  ;;  %v7547_v46 = vpop.permute.xlu2 %1044  ;;  %v7553_v51 = vpop.permute.xlu0 %1028 }
 0x150   : > { %13549 = vst [vmem:[#allocation125_spill] sm:$0xff] %v7547_v46 }
 0x151   : > { %v7551_v48 = vpop.permute.xlu1 %1024  ;;  %13550 = vst [vmem:[#allocation126_spill] sm:$0xff] %v7553_v51 }
 0x155   : > { %1180 = vrot.lane.b32.xlu2 %v7054_v57, %s6705_s10  ;;  %1182 = vrot.lane.b32.xlu0 %v7050_v56, %s6705_s10  ;;  %v7581_v56 = vld [vmem:[#allocation2 + $0x181] sm:$0xff] }
 0x157   : > { %1178 = vrot.lane.b32.xlu1 %v7034_v55, %s6705_s10  ;;  %v7559_v50 = vpop.permute.xlu2 %1050  ;;  %v7565_v54 = vpop.permute.xlu0 %1034 }
 0x158   : > { %13551 = vst [vmem:[#allocation127_spill] sm:$0xff] %v7559_v50 }
 0x159   : > { %v7563_v52 = vpop.permute.xlu1 %1030  ;;  %13553 = vst [vmem:[#allocation129_spill] sm:$0xff] %v7565_v54 }
 0x15a   : > { %13552 = vst [vmem:[#allocation128_spill] sm:$0xff] %v7563_v52  ;;  %v675_v52 = vld [vmem:[#allocation2 + $0x129] sm:$0xff] }
 0x15d   : > { %1186 = vrot.lane.b32.xlu2 %v7082_v60, %s6705_s10  ;;  %1188 = vrot.lane.b32.xlu0 %v7078_v59, %s6705_s10 }
 0x15f   : > { %1184 = vrot.lane.b32.xlu1 %v7062_v58, %s6705_s10  ;;  %v7571_v53 = vpop.permute.xlu2 %1056  ;;  %v7577_v57 = vpop.permute.xlu0 %1040 }
 0x160   : > { %13554 = vst [vmem:[#allocation130_spill] sm:$0xff] %v7571_v53  ;;  %v679_v53 = vld [vmem:[#allocation2 + $0x159] sm:$0xff] }
 0x161   : > { %v7575_v55 = vpop.permute.xlu1 %1036  ;;  %13556 = vst [vmem:[#allocation132_spill] sm:$0xff] %v7577_v57 }
 0x162   : > { %13555 = vst [vmem:[#allocation131_spill] sm:$0xff] %v7575_v55 }
 0x165   : > { %1192 = vrot.lane.b32.xlu2 %v7108_v63, %s6705_s10  ;;  %1194 = vrot.lane.b32.xlu0 %v7581_v56, %s6705_s10 }
 0x167   : > { %1190 = vrot.lane.b32.xlu1 %v7090_v61, %s6705_s10  ;;  %v7585_v60 = vpop.permute.xlu2 %1062  ;;  %v7591_v59 = vpop.permute.xlu0 %1046 }
 0x168   : > { %13557 = vst [vmem:[#allocation133_spill] sm:$0xff] %v7585_v60  ;;  %v13605_v60 = vld [vmem:[#allocation94_spill] sm:$0xff] }
 0x169   : > { %v7589_v58 = vpop.permute.xlu1 %1042  ;;  %13559 = vst [vmem:[#allocation135_spill] sm:$0xff] %v7591_v59 }
 0x16a   : > { %13558 = vst [vmem:[#allocation134_spill] sm:$0xff] %v7589_v58  ;;  %v622_v58 = vld [vmem:[#allocation2 + $0x30] sm:$0xff] }
 0x16d   : > { %1262 = vrot.lane.b32.xlu2 %v7122_v37, %s6706_s11  ;;  %1264 = vrot.lane.b32.xlu0 %v7120_v15, %s6706_s11 }
 0x16f   : > { %1196 = vrot.lane.b32.xlu1 %v7593_v17, %s6705_s10  ;;  %v7599_v63 = vpop.permute.xlu2 %1068  ;;  %v7605_v50 = vpop.permute.xlu0 %1052 }
 0x170   : > { %13560 = vst [vmem:[#allocation136_spill] sm:$0xff] %v7599_v63 }
 0x171   : > { %v7603_v61 = vpop.permute.xlu1 %1048  ;;  %13562 = vst [vmem:[#allocation138_spill] sm:$0xff] %v7605_v50 }
 0x172   : > { %13561 = vst [vmem:[#allocation137_spill] sm:$0xff] %v7603_v61  ;;  %v13578_v61 = vld [vmem:[#allocation54_spill] sm:$0xff] }
 0x175   : > { %1268 = vrot.lane.b32.xlu2 %v7136_v6, %s6706_s11  ;;  %1270 = vrot.lane.b32.xlu0 %v7134_v0, %s6706_s11 }
 0x177   : > { %1266 = vrot.lane.b32.xlu1 %v7126_v49, %s6706_s11  ;;  %v7611_v32 = vpop.permute.xlu2 %1138  ;;  %v7617_v59 = vpop.permute.xlu0 %1058 }
 0x178   : > { %13563 = vst [vmem:[#allocation139_spill] sm:$0xff] %v7617_v59  ;;  %v670_v59 = vld [vmem:[#allocation2 + $0xf1] sm:$0xff] }
 0x179   : > { %v7615_v37 = vpop.permute.xlu1 %1054 }
 0x17d   : > { %1274 = vrot.lane.b32.xlu2 %v7150_v43, %s6706_s11  ;;  %1276 = vrot.lane.b32.xlu0 %v7148_v33, %s6706_s11 }
 0x17f   : > { %1272 = vrot.lane.b32.xlu1 %v7140_v38, %s6706_s11  ;;  %v7623_v15 = vpop.permute.xlu2 %1144  ;;  %v7629_v6 = vpop.permute.xlu0 %1064 }
 0x180   : > { %13565 = vst [vmem:[#allocation141_spill] sm:$0xff] %v7629_v6 }
 0x181   : > { %v7627_v49 = vpop.permute.xlu1 %1060 }
 0x182   : > { %13564 = vst [vmem:[#allocation140_spill] sm:$0xff] %v7627_v49  ;;  %v652_v49 = vld [vmem:[#allocation2 + $0x198] sm:$0xff] }
 0x185   : > { %1280 = vrot.lane.b32.xlu2 %v7166_v27, %s6706_s11  ;;  %1282 = vrot.lane.b32.xlu0 %v7164_v39, %s6706_s11 }
 0x187   : > { %1278 = vrot.lane.b32.xlu1 %v7154_v31, %s6706_s11  ;;  %v7635_v0 = vpop.permute.xlu2 %1150  ;;  %v7641_v43 = vpop.permute.xlu0 %1134 }
 0x189   : > { %v7639_v38 = vpop.permute.xlu1 %1066 }
 0x18a   : > { %13566 = vst [vmem:[#allocation142_spill] sm:$0xff] %v7639_v38 }
 0x18d   : > { %1286 = vrot.lane.b32.xlu2 %v7184_v18, %s6706_s11  ;;  %1288 = vrot.lane.b32.xlu0 %v7182_v20, %s6706_s11 }
 0x18f   : > { %1284 = vrot.lane.b32.xlu1 %v7170_v25, %s6706_s11  ;;  %v7647_v33 = vpop.permute.xlu2 %1156  ;;  %v7653_v31 = vpop.permute.xlu0 %1140 }
 0x190   : > { %13567 = vst [vmem:[#allocation143_spill] sm:$0xff] %v7647_v33  ;;  %v697_v33 = vld [vmem:[#allocation2 + $0xb2] sm:$0xff] }
 0x191   : > { %v7651_v27 = vpop.permute.xlu1 %1136 }
 0x195   : > { %1292 = vrot.lane.b32.xlu2 %v7202_v9, %s6706_s11  ;;  %1294 = vrot.lane.b32.xlu0 %v7200_v11, %s6706_s11 }
 0x197   : > { %1290 = vrot.lane.b32.xlu1 %v7188_v16, %s6706_s11  ;;  %v7659_v39 = vpop.permute.xlu2 %1162  ;;  %v7665_v25 = vpop.permute.xlu0 %1146 }
 0x198   : > { %13568 = vst [vmem:[#allocation144_spill] sm:$0xff] %v7659_v39 }
 0x199   : > { %v7663_v18 = vpop.permute.xlu1 %1142 }
 0x19d   : > { %1298 = vrot.lane.b32.xlu2 %v7220_v4, %s6706_s11  ;;  %1300 = vrot.lane.b32.xlu0 %v7218_v1, %s6706_s11 }
 0x19f   : > { %1296 = vrot.lane.b32.xlu1 %v7206_v7, %s6706_s11  ;;  %v7671_v20 = vpop.permute.xlu2 %1168  ;;  %v7677_v16 = vpop.permute.xlu0 %1152 }
 0x1a0   : > { %13569 = vst [vmem:[#allocation145_spill] sm:$0xff] %v7671_v20 }
 0x1a1   : > { %v7675_v9 = vpop.permute.xlu1 %1148 }
 0x1a5   : > { %1304 = vrot.lane.b32.xlu2 %v7242_v5, %s6706_s11  ;;  %1306 = vrot.lane.b32.xlu0 %v7238_v44, %s6706_s11  ;;  %v13574_v5 = vld [vmem:[#allocation53_spill] sm:$0xff]  ;;  %v13577_v44 = vld [vmem:[#allocation59_spill] sm:$0xff] }
 0x1a7   : > { %1302 = vrot.lane.b32.xlu1 %v7224_v2, %s6706_s11  ;;  %v7683_v11 = vpop.permute.xlu2 %1174  ;;  %v7689_v7 = vpop.permute.xlu0 %1158 }
 0x1a8   : > { %13570 = vst [vmem:[#allocation146_spill] sm:$0xff] %v7683_v11 }
 0x1a9   : > { %v7687_v4 = vpop.permute.xlu1 %1154  ;;  %13572 = vst [vmem:[#allocation148_spill] sm:$0xff] %v7689_v7  ;;  %v672_v7 = vld [vmem:[#allocation2 + $0x109] sm:$0xff] }
 0x1aa   : > { %13571 = vst [vmem:[#allocation147_spill] sm:$0xff] %v7687_v4 }
 0x1ad   : > { %1310 = vrot.lane.b32.xlu2 %v7264_v26, %s6706_s11  ;;  %1312 = vrot.lane.b32.xlu0 %v13574_v5, %s6706_s11  ;;  %v13580_v26 = vld [vmem:[#allocation58_spill] sm:$0xff]  ;;  %v7715_v5 = vld [vmem:[#allocation2 + $0x182] sm:$0xff] }
 0x1af   : > { %1308 = vrot.lane.b32.xlu1 %v7250_v8, %s6706_s11  ;;  %v7695_v1 = vpop.permute.xlu2 %1180  ;;  %v7701_v50 = vpop.permute.xlu0 %1164 }
 0x1b0   : > { %13573 = vst [vmem:[#allocation149_spill] sm:$0xff] %v7695_v1 }
 0x1b1   : > { %v7699_v2 = vpop.permute.xlu1 %1160  ;;  %13576 = vst [vmem:[#allocation150_spill] sm:$0xff] %v7701_v50 }
 0x1b2   : > { %13575 = vst [vmem:[#allocation53_spill] sm:$0xff] %v7699_v2  ;;  %v661_v2 = vld [vmem:[#allocation2 + $0x81] sm:$0xff] }
 0x1b5   : > { %1316 = vrot.lane.b32.xlu2 %v13577_v44, %s6706_s11  ;;  %1318 = vrot.lane.b32.xlu0 %v13580_v26, %s6706_s11  ;;  %v13583_v44 = vld [vmem:[#allocation60_spill] sm:$0xff] }
 0x1b7   : > { %1314 = vrot.lane.b32.xlu1 %v13578_v61, %s6706_s11  ;;  %v7707_v11 = vpop.permute.xlu2 %1186  ;;  %v7713_v1 = vpop.permute.xlu0 %1170 }
 0x1b8   : > { %13579 = vst [vmem:[#allocation59_spill] sm:$0xff] %v7707_v11  ;;  %v664_v11 = vld [vmem:[#allocation2 + $0xa9] sm:$0xff] }
 0x1b9   : > { %v7711_v8 = vpop.permute.xlu1 %1166  ;;  %13582 = vst [vmem:[#allocation58_spill] sm:$0xff] %v7713_v1  ;;  %v623_v1 = vld [vmem:[#allocation2 + $0x38] sm:$0xff] }
 0x1ba   : > { %13581 = vst [vmem:[#allocation54_spill] sm:$0xff] %v7711_v8 }
 0x1bd   : > { %1322 = vrot.lane.b32.xlu2 %v7715_v5, %s6706_s11  ;;  %1324 = vrot.lane.b32.xlu0 %v7719_v13, %s6706_s11 }
 0x1bf   : > { %1320 = vrot.lane.b32.xlu1 %v13583_v44, %s6706_s11  ;;  %v7723_v61 = vpop.permute.xlu2 %1192  ;;  %v7729_v46 = vpop.permute.xlu0 %1176 }
 0x1c0   : > { %13584 = vst [vmem:[#allocation60_spill] sm:$0xff] %v7723_v61 }
 0x1c1   : > { %v7727_v26 = vpop.permute.xlu1 %1172  ;;  %13586 = vst [vmem:[#allocation152_spill] sm:$0xff] %v7729_v46  ;;  %v13588_v46 = vld [vmem:[#allocation67_spill] sm:$0xff] }
 0x1c2   : > { %13585 = vst [vmem:[#allocation151_spill] sm:$0xff] %v7727_v26 }
 0x1c5   : > { %1392 = vrot.lane.b32.xlu2 %v623_v1, %s6707_s12  ;;  %1394 = vrot.lane.b32.xlu0 %v7307_v19, %s6707_s12  ;;  %v13589_v1 = vld [vmem:[#allocation71_spill] sm:$0xff]  ;;  %v629_v19 = vld [vmem:[#allocation2 + $0x80] sm:$0xff] }
 0x1c7   : > { %1390 = vrot.lane.b32.xlu1 %v622_v58, %s6707_s12  ;;  %v7733_v63 = vpop.permute.xlu2 %1262  ;;  %v7739_v20 = vpop.permute.xlu0 %1182 }
 0x1c9   : > { %v7737_v44 = vpop.permute.xlu1 %1178 }
 0x1ca   : > { %13587 = vst [vmem:[#allocation153_spill] sm:$0xff] %v7737_v44  ;;  %v13592_v44 = vld [vmem:[#allocation72_spill] sm:$0xff] }
 0x1cd   : > { %1398 = vrot.lane.b32.xlu2 %v626_v29, %s6707_s12  ;;  %1400 = vrot.lane.b32.xlu0 %v13589_v1, %s6707_s12  ;;  %v13593_v29 = vld [vmem:[#allocation76_spill] sm:$0xff]  ;;  %v632_v1 = vld [vmem:[#allocation2 + $0xa8] sm:$0xff] }
 0x1cf   : > { %1396 = vrot.lane.b32.xlu1 %v13588_v46, %s6707_s12  ;;  %v7744_v26 = vpop.permute.xlu2 %1268  ;;  %v7750_v57 = vpop.permute.xlu0 %1188 }
 0x1d0   : > { %13591 = vst [vmem:[#allocation71_spill] sm:$0xff] %v7750_v57 }
 0x1d1   : > { %v7748_v58 = vpop.permute.xlu1 %1184 }
 0x1d2   : > { %13590 = vst [vmem:[#allocation67_spill] sm:$0xff] %v7748_v58  ;;  %v677_v58 = vld [vmem:[#allocation2 + $0x141] sm:$0xff] }
 0x1d5   : > { %1404 = vrot.lane.b32.xlu2 %v629_v19, %s6707_s12  ;;  %1406 = vrot.lane.b32.xlu0 %v13593_v29, %s6707_s12  ;;  %v13597_v19 = vld [vmem:[#allocation81_spill] sm:$0xff] }
 0x1d6   : > { %v635_v29 = vld [vmem:[#allocation2 + $0xc8] sm:$0xff] }
 0x1d7   : > { %1402 = vrot.lane.b32.xlu1 %v13592_v44, %s6707_s12  ;;  %v7755_v38 = vpop.permute.xlu2 %1274  ;;  %v7761_v8 = vpop.permute.xlu0 %1194 }
 0x1d8   : > { %13595 = vst [vmem:[#allocation76_spill] sm:$0xff] %v7761_v8  ;;  %v13599_v8 = vld [vmem:[#allocation82_spill] sm:$0xff] }
 0x1d9   : > { %v7759_v46 = vpop.permute.xlu1 %1190 }
 0x1da   : > { %13594 = vst [vmem:[#allocation72_spill] sm:$0xff] %v7759_v46 }
 0x1dd   : > { %1410 = vrot.lane.b32.xlu2 %v632_v1, %s6707_s12  ;;  %1412 = vrot.lane.b32.xlu0 %v13597_v19, %s6707_s12  ;;  %v13601_v1 = vld [vmem:[#allocation86_spill] sm:$0xff] }
 0x1de   : > { %v638_v19 = vld [vmem:[#allocation2 + $0xf0] sm:$0xff] }
 0x1df   : > { %1408 = vrot.lane.b32.xlu1 %v13596_v40, %s6707_s12  ;;  %v7766_v61 = vpop.permute.xlu2 %1280  ;;  %v7772_v6 = vpop.permute.xlu0 %1264 }
 0x1e1   : > { %v7770_v44 = vpop.permute.xlu1 %1196 }
 0x1e2   : > { %13598 = vst [vmem:[#allocation77_spill] sm:$0xff] %v7770_v44  ;;  %v13602_v44 = vld [vmem:[#allocation89_spill] sm:$0xff] }
 0x1e5   : > { %1416 = vrot.lane.b32.xlu2 %v635_v29, %s6707_s12  ;;  %1418 = vrot.lane.b32.xlu0 %v13601_v1, %s6707_s12  ;;  %v13604_v29 = vld [vmem:[#allocation93_spill] sm:$0xff]  ;;  %v641_v1 = vld [vmem:[#allocation2 + $0x110] sm:$0xff] }
 0x1e7   : > { %1414 = vrot.lane.b32.xlu1 %v13599_v8, %s6707_s12  ;;  %v7777_v50 = vpop.permute.xlu2 %1286  ;;  %v7783_v24 = vpop.permute.xlu0 %1270 }
 0x1e8   : > { %13600 = vst [vmem:[#allocation81_spill] sm:$0xff] %v7777_v50  ;;  %v667_v50 = vld [vmem:[#allocation2 + $0xc9] sm:$0xff] }
 0x1e9   : > { %v7781_v40 = vpop.permute.xlu1 %1266 }
 0x1ed   : > { %1422 = vrot.lane.b32.xlu2 %v638_v19, %s6707_s12  ;;  %1424 = vrot.lane.b32.xlu0 %v13604_v29, %s6707_s12  ;;  %v13607_v19 = vld [vmem:[#allocation98_spill] sm:$0xff]  ;;  %v644_v29 = vld [vmem:[#allocation2 + $0x138] sm:$0xff] }
 0x1ef   : > { %1420 = vrot.lane.b32.xlu1 %v13602_v44, %s6707_s12  ;;  %v7788_v55 = vpop.permute.xlu2 %1292  ;;  %v7794_v46 = vpop.permute.xlu0 %1276 }
 0x1f0   : > { %13603 = vst [vmem:[#allocation82_spill] sm:$0xff] %v7788_v55 }
 0x1f1   : > { %v7792_v8 = vpop.permute.xlu1 %1272 }
 0x1f5   : > { %1428 = vrot.lane.b32.xlu2 %v641_v1, %s6707_s12  ;;  %1430 = vrot.lane.b32.xlu0 %v13607_v19, %s6707_s12  ;;  %v13611_v1 = vld [vmem:[#allocation103_spill] sm:$0xff]  ;;  %v13614_v19 = vld [vmem:[#allocation104_spill] sm:$0xff] }
 0x1f7   : > { %1426 = vrot.lane.b32.xlu1 %v13605_v60, %s6707_s12  ;;  %v7799_v39 = vpop.permute.xlu2 %1298  ;;  %v7805_v55 = vpop.permute.xlu0 %1282 }
 0x1f8   : > { %13606 = vst [vmem:[#allocation86_spill] sm:$0xff] %v7799_v39 }
 0x1f9   : > { %v7803_v44 = vpop.permute.xlu1 %1278  ;;  %13608 = vst [vmem:[#allocation89_spill] sm:$0xff] %v7805_v55 }
 0x1fd   : > { %1434 = vrot.lane.b32.xlu2 %v644_v29, %s6707_s12  ;;  %1436 = vrot.lane.b32.xlu0 %v13611_v1, %s6707_s12  ;;  %v13615_v29 = vld [vmem:[#allocation108_spill] sm:$0xff] }
 0x1ff   : > { %1432 = vrot.lane.b32.xlu1 %v13609_v23, %s6707_s12  ;;  %v7810_v54 = vpop.permute.xlu2 %1304  ;;  %v7816_v39 = vpop.permute.xlu0 %1288 }
 0x200   : > { %13610 = vst [vmem:[#allocation93_spill] sm:$0xff] %v7810_v54 }
 0x201   : > { %v7814_v60 = vpop.permute.xlu1 %1284  ;;  %13613 = vst [vmem:[#allocation98_spill] sm:$0xff] %v7816_v39 }
 0x202   : > { %13612 = vst [vmem:[#allocation94_spill] sm:$0xff] %v7814_v60  ;;  %v687_v60 = vld [vmem:[#allocation2 + $0x3a] sm:$0xff] }
 0x205   : > { %1440 = vrot.lane.b32.xlu2 %v7439_v3, %s6707_s12  ;;  %1442 = vrot.lane.b32.xlu0 %v13615_v29, %s6707_s12  ;;  %v13619_v3 = vld [vmem:[#allocation112_spill] sm:$0xff] }
 0x206   : > { %v653_v29 = vld [vmem:[#allocation2 + $0x1a0] sm:$0xff] }
 0x207   : > { %1438 = vrot.lane.b32.xlu1 %v13614_v19, %s6707_s12  ;;  %v7822_v57 = vpop.permute.xlu2 %1310  ;;  %v7828_v54 = vpop.permute.xlu0 %1294 }
 0x208   : > { %13617 = vst [vmem:[#allocation103_spill] sm:$0xff] %v7828_v54  ;;  %v654_v54 = vld [vmem:[#allocation2 + $0x31] sm:$0xff] }
 0x209   : > { %v7826_v23 = vpop.permute.xlu1 %1290 }
 0x20a   : > { %13616 = vst [vmem:[#allocation99_spill] sm:$0xff] %v7826_v23 }
 0x20d   : > { %1446 = vrot.lane.b32.xlu2 %v7457_v62, %s6707_s12  ;;  %1448 = vrot.lane.b32.xlu0 %v13619_v3, %s6707_s12  ;;  %v656_v3 = vld [vmem:[#allocation2 + $0x49] sm:$0xff] }
 0x20f   : > { %1444 = vrot.lane.b32.xlu1 %v7445_v45, %s6707_s12  ;;  %v7834_v1 = vpop.permute.xlu2 %1316  ;;  %v7840_v39 = vpop.permute.xlu0 %1300 }
 0x210   : > { %13618 = vst [vmem:[#allocation104_spill] sm:$0xff] %v7834_v1  ;;  %v658_v1 = vld [vmem:[#allocation2 + $0x61] sm:$0xff] }
 0x211   : > { %v7838_v19 = vpop.permute.xlu1 %1296  ;;  %13621 = vst [vmem:[#allocation112_spill] sm:$0xff] %v7840_v39  ;;  %v657_v39 = vld [vmem:[#allocation2 + $0x51] sm:$0xff] }
 0x212   : > { %13620 = vst [vmem:[#allocation108_spill] sm:$0xff] %v7838_v19  ;;  %v655_v19 = vld [vmem:[#allocation2 + $0x39] sm:$0xff] }
 0x215   : > { %1452 = vrot.lane.b32.xlu2 %v653_v29, %s6707_s12  ;;  %1518 = vrot.lane.b32.xlu0 %v654_v54, %s6708_s13  ;;  %v659_v54 = vld [vmem:[#allocation2 + $0x69] sm:$0xff] }
 0x217   : > { %1450 = vrot.lane.b32.xlu1 %v652_v49, %s6707_s12  ;;  %v7844_v62 = vpop.permute.xlu2 %1322  ;;  %v7849_v23 = vpop.permute.xlu0 %1306 }
 0x218   : > { %13622 = vst [vmem:[#allocation154_spill] sm:$0xff] %v7844_v62 }
 0x219   : > { %v7847_v45 = vpop.permute.xlu1 %1302  ;;  %13624 = vst [vmem:[#allocation156_spill] sm:$0xff] %v7849_v23  ;;  %v660_v23 = vld [vmem:[#allocation2 + $0x79] sm:$0xff] }
 0x21a   : > { %13623 = vst [vmem:[#allocation155_spill] sm:$0xff] %v7847_v45 }
 0x21d   : > { %1522 = vrot.lane.b32.xlu2 %v656_v3, %s6708_s13  ;;  %1524 = vrot.lane.b32.xlu0 %v657_v39, %s6708_s13  ;;  %v662_v39 = vld [vmem:[#allocation2 + $0x91] sm:$0xff] }
 0x21f   : > { %1520 = vrot.lane.b32.xlu1 %v655_v19, %s6708_s13  ;;  %v7853_v29 = vpop.permute.xlu2 %1392  ;;  %v7858_v62 = vpop.permute.xlu0 %1312 }
 0x220   : > { %13626 = vst [vmem:[#allocation158_spill] sm:$0xff] %v7858_v62 }
 0x221   : > { %v7856_v49 = vpop.permute.xlu1 %1308 }
 0x222   : > { %13625 = vst [vmem:[#allocation157_spill] sm:$0xff] %v7856_v49  ;;  %v663_v49 = vld [vmem:[#allocation2 + $0x99] sm:$0xff] }
 0x225   : > { %1528 = vrot.lane.b32.xlu2 %v659_v54, %s6708_s13  ;;  %1530 = vrot.lane.b32.xlu0 %v660_v23, %s6708_s13  ;;  %v665_v23 = vld [vmem:[#allocation2 + $0xb1] sm:$0xff] }
 0x227   : > { %1526 = vrot.lane.b32.xlu1 %v658_v1, %s6708_s13  ;;  %v7862_v45 = vpop.permute.xlu2 %1398  ;;  %v7867_v3 = vpop.permute.xlu0 %1318 }
 0x228   : > { %13628 = vst [vmem:[#allocation160_spill] sm:$0xff] %v7867_v3  ;;  %v666_v3 = vld [vmem:[#allocation2 + $0xc1] sm:$0xff] }
 0x229   : > { %v7865_v19 = vpop.permute.xlu1 %1314 }
 0x22a   : > { %13627 = vst [vmem:[#allocation159_spill] sm:$0xff] %v7865_v19 }
 0x22d   : > { %1534 = vrot.lane.b32.xlu2 %v662_v39, %s6708_s13  ;;  %1536 = vrot.lane.b32.xlu0 %v663_v49, %s6708_s13  ;;  %v668_v49 = vld [vmem:[#allocation2 + $0xd9] sm:$0xff] }
 0x22f   : > { %1532 = vrot.lane.b32.xlu1 %v661_v2, %s6708_s13  ;;  %v7871_v34 = vpop.permute.xlu2 %1404  ;;  %v7876_v54 = vpop.permute.xlu0 %1324 }
 0x230   : > { %13630 = vst [vmem:[#allocation162_spill] sm:$0xff] %v7876_v54  ;;  %v669_v54 = vld [vmem:[#allocation2 + $0xe1] sm:$0xff] }
 0x231   : > { %v7874_v1 = vpop.permute.xlu1 %1320 }
 0x232   : > { %13629 = vst [vmem:[#allocation161_spill] sm:$0xff] %v7874_v1 }
 0x235   : > { %1540 = vrot.lane.b32.xlu2 %v665_v23, %s6708_s13  ;;  %1542 = vrot.lane.b32.xlu0 %v666_v3, %s6708_s13  ;;  %v671_v3 = vld [vmem:[#allocation2 + $0xf9] sm:$0xff] }
 0x237   : > { %1538 = vrot.lane.b32.xlu1 %v664_v11, %s6708_s13  ;;  %v7880_v19 = vpop.permute.xlu2 %1410  ;;  %v7885_v39 = vpop.permute.xlu0 %1394 }
 0x238   : > { %13631 = vst [vmem:[#allocation163_spill] sm:$0xff] %v7880_v19  ;;  %v705_v19 = vld [vmem:[#allocation2 + $0x112] sm:$0xff] }
 0x239   : > { %v7883_v2 = vpop.permute.xlu1 %1390 }
 0x23d   : > { %1546 = vrot.lane.b32.xlu2 %v668_v49, %s6708_s13  ;;  %1548 = vrot.lane.b32.xlu0 %v669_v54, %s6708_s13  ;;  %v674_v54 = vld [vmem:[#allocation2 + $0x121] sm:$0xff] }
 0x23f   : > { %1544 = vrot.lane.b32.xlu1 %v667_v50, %s6708_s13  ;;  %v7889_v1 = vpop.permute.xlu2 %1416  ;;  %v7894_v23 = vpop.permute.xlu0 %1400 }
 0x240   : > { %13632 = vst [vmem:[#allocation164_spill] sm:$0xff] %v7889_v1  ;;  %v673_v1 = vld [vmem:[#allocation2 + $0x111] sm:$0xff] }
 0x241   : > { %v7892_v11 = vpop.permute.xlu1 %1396 }
 0x245   : > { %1552 = vrot.lane.b32.xlu2 %v671_v3, %s6708_s13  ;;  %1554 = vrot.lane.b32.xlu0 %v672_v7, %s6708_s13  ;;  %v676_v7 = vld [vmem:[#allocation2 + $0x139] sm:$0xff] }
 0x247   : > { %1550 = vrot.lane.b32.xlu1 %v670_v59, %s6708_s13  ;;  %v7898_v12 = vpop.permute.xlu2 %1422  ;;  %v7903_v49 = vpop.permute.xlu0 %1406 }
 0x248   : > { %13633 = vst [vmem:[#allocation165_spill] sm:$0xff] %v7898_v12  ;;  %v686_v12 = vld [vmem:[#allocation2 + $0x32] sm:$0xff] }
 0x249   : > { %v7901_v50 = vpop.permute.xlu1 %1402 }
 0x24d   : > { %1558 = vrot.lane.b32.xlu2 %v674_v54, %s6708_s13  ;;  %1560 = vrot.lane.b32.xlu0 %v675_v52, %s6708_s13  ;;  %v678_v52 = vld [vmem:[#allocation2 + $0x151] sm:$0xff] }
 0x24f   : > { %1556 = vrot.lane.b32.xlu1 %v673_v1, %s6708_s13  ;;  %v7907_v62 = vpop.permute.xlu2 %1428  ;;  %v7912_v3 = vpop.permute.xlu0 %1412 }
 0x250   : > { %13634 = vst [vmem:[#allocation166_spill] sm:$0xff] %v7907_v62 }
 0x251   : > { %v7910_v59 = vpop.permute.xlu1 %1408  ;;  %13636 = vst [vmem:[#allocation168_spill] sm:$0xff] %v7912_v3  ;;  %v688_v3 = vld [vmem:[#allocation2 + $0x4a] sm:$0xff] }
 0x252   : > { %13635 = vst [vmem:[#allocation167_spill] sm:$0xff] %v7910_v59  ;;  %v709_v59 = vld [vmem:[#allocation2 + $0x142] sm:$0xff] }
 0x255   : > { %1562 = vrot.lane.b32.xlu2 %v676_v7, %s6708_s13  ;;  %1564 = vrot.lane.b32.xlu0 %v677_v58, %s6708_s13  ;;  %v680_v58 = vld [vmem:[#allocation2 + $0x169] sm:$0xff] }
 0x257   : > { %1646 = vrot.lane.b32.xlu1 %v686_v12, %s6709_s14  ;;  %v7916_v54 = vpop.permute.xlu2 %1434  ;;  %v7921_v62 = vpop.permute.xlu0 %1418 }
 0x258   : > { %13637 = vst [vmem:[#allocation169_spill] sm:$0xff] %v7916_v54 }
 0x259   : > { %v7919_v1 = vpop.permute.xlu1 %1414  ;;  %13639 = vst [vmem:[#allocation171_spill] sm:$0xff] %v7921_v62  ;;  %v689_v62 = vld [vmem:[#allocation2 + $0x52] sm:$0xff] }
 0x25a   : > { %13638 = vst [vmem:[#allocation170_spill] sm:$0xff] %v7919_v1 }
 0x25d   : > { %1566 = vrot.lane.b32.xlu2 %v678_v52, %s6708_s13  ;;  %1650 = vrot.lane.b32.xlu0 %v688_v3, %s6709_s14  ;;  %v681_v3 = vld [vmem:[#allocation2 + $0x171] sm:$0xff] }
 0x25f   : > { %1648 = vrot.lane.b32.xlu1 %v687_v60, %s6709_s14  ;;  %v7925_v7 = vpop.permute.xlu2 %1440  ;;  %v7930_v54 = vpop.permute.xlu0 %1424 }
 0x260   : > { %13640 = vst [vmem:[#allocation172_spill] sm:$0xff] %v7925_v7 }
 0x261   : > { %v7928_v12 = vpop.permute.xlu1 %1420  ;;  %13642 = vst [vmem:[#allocation174_spill] sm:$0xff] %v7930_v54  ;;  %v690_v54 = vld [vmem:[#allocation2 + $0x62] sm:$0xff] }
 0x262   : > { %13641 = vst [vmem:[#allocation173_spill] sm:$0xff] %v7928_v12 }
 0x265   : > { %1570 = vrot.lane.b32.xlu2 %v680_v58, %s6708_s13  ;;  %1652 = vrot.lane.b32.xlu0 %v689_v62, %s6709_s14  ;;  %v691_v62 = vld [vmem:[#allocation2 + $0x6a] sm:$0xff] }
 0x267   : > { %1568 = vrot.lane.b32.xlu1 %v679_v53, %s6708_s13  ;;  %v7934_v1 = vpop.permute.xlu2 %1446  ;;  %v7939_v52 = vpop.permute.xlu0 %1430 }
 0x268   : > { %13643 = vst [vmem:[#allocation175_spill] sm:$0xff] %v7934_v1  ;;  %v694_v1 = vld [vmem:[#allocation2 + $0x92] sm:$0xff] }
 0x269   : > { %v7937_v60 = vpop.permute.xlu1 %1426  ;;  %13645 = vst [vmem:[#allocation177_spill] sm:$0xff] %v7939_v52 }
 0x26a   : > { %13644 = vst [vmem:[#allocation176_spill] sm:$0xff] %v7937_v60  ;;  %v684_v60 = vld [vmem:[#allocation2 + $0x199] sm:$0xff] }
 0x26d   : > { %1574 = vrot.lane.b32.xlu2 %v7581_v56, %s6708_s13  ;;  %1654 = vrot.lane.b32.xlu0 %v690_v54, %s6709_s14  ;;  %v692_v54 = vld [vmem:[#allocation2 + $0x7a] sm:$0xff] }
 0x26f   : > { %1572 = vrot.lane.b32.xlu1 %v681_v3, %s6708_s13  ;;  %v7944_v12 = vpop.permute.xlu2 %1452  ;;  %v7949_v58 = vpop.permute.xlu0 %1436 }
 0x270   : > { %13646 = vst [vmem:[#allocation178_spill] sm:$0xff] %v7944_v12  ;;  %v685_v12 = vld [vmem:[#allocation2 + $0x1a1] sm:$0xff] }
 0x271   : > { %v7947_v53 = vpop.permute.xlu1 %1432  ;;  %13648 = vst [vmem:[#allocation180_spill] sm:$0xff] %v7949_v58  ;;  %v693_v58 = vld [vmem:[#allocation2 + $0x82] sm:$0xff] }
 0x272   : > { %13647 = vst [vmem:[#allocation179_spill] sm:$0xff] %v7947_v53 }
 0x275   : > { %1656 = vrot.lane.b32.xlu2 %v691_v62, %s6709_s14  ;;  %1578 = vrot.lane.b32.xlu0 %v684_v60, %s6708_s13  ;;  %v695_v60 = vld [vmem:[#allocation2 + $0x9a] sm:$0xff] }
 0x277   : > { %1576 = vrot.lane.b32.xlu1 %v7593_v17, %s6708_s13  ;;  %v7954_v52 = vpop.permute.xlu2 %1522  ;;  %v7959_v3 = vpop.permute.xlu0 %1442 }
 0x278   : > { %13649 = vst [vmem:[#allocation181_spill] sm:$0xff] %v7959_v3  ;;  %v696_v3 = vld [vmem:[#allocation2 + $0xaa] sm:$0xff] }
 0x279   : > { %v7957_v56 = vpop.permute.xlu1 %1438 }
 0x27d   : > { %1658 = vrot.lane.b32.xlu2 %v692_v54, %s6709_s14  ;;  %1660 = vrot.lane.b32.xlu0 %v693_v58, %s6709_s14  ;;  %v698_v58 = vld [vmem:[#allocation2 + $0xc2] sm:$0xff] }
 0x27f   : > { %1580 = vrot.lane.b32.xlu1 %v685_v12, %s6708_s13  ;;  %v7963_v62 = vpop.permute.xlu2 %1528  ;;  %v7968_v53 = vpop.permute.xlu0 %1448 }
 0x280   : > { %13651 = vst [vmem:[#allocation183_spill] sm:$0xff] %v7968_v53  ;;  %v699_v53 = vld [vmem:[#allocation2 + $0xca] sm:$0xff] }
 0x281   : > { %v7966_v17 = vpop.permute.xlu1 %1444 }
 0x282   : > { %13650 = vst [vmem:[#allocation182_spill] sm:$0xff] %v7966_v17 }
 0x285   : > { %1664 = vrot.lane.b32.xlu2 %v695_v60, %s6709_s14  ;;  %1666 = vrot.lane.b32.xlu0 %v696_v3, %s6709_s14  ;;  %v701_v3 = vld [vmem:[#allocation2 + $0xe2] sm:$0xff] }
 0x287   : > { %1662 = vrot.lane.b32.xlu1 %v694_v1, %s6709_s14  ;;  %v7972_v7 = vpop.permute.xlu2 %1534  ;;  %v7977_v54 = vpop.permute.xlu0 %1518 }
 0x289   : > { %v7975_v12 = vpop.permute.xlu1 %1450 }
 0x28a   : > { %13652 = vst [vmem:[#allocation184_spill] sm:$0xff] %v7975_v12  ;;  %v702_v12 = vld [vmem:[#allocation2 + $0xf2] sm:$0xff] }
 0x28d   : > { %1670 = vrot.lane.b32.xlu2 %v698_v58, %s6709_s14  ;;  %1672 = vrot.lane.b32.xlu0 %v699_v53, %s6709_s14  ;;  %v704_v53 = vld [vmem:[#allocation2 + $0x10a] sm:$0xff] }
 0x28f   : > { %1668 = vrot.lane.b32.xlu1 %v697_v33, %s6709_s14  ;;  %v7981_v17 = vpop.permute.xlu2 %1540  ;;  %v7986_v60 = vpop.permute.xlu0 %1524 }
 0x290   : > { %13653 = vst [vmem:[#allocation185_spill] sm:$0xff] %v7981_v17  ;;  %v703_v17 = vld [vmem:[#allocation2 + $0xfa] sm:$0xff] }
 0x291   : > { %v7984_v1 = vpop.permute.xlu1 %1520 }
 0x295   : > { %1676 = vrot.lane.b32.xlu2 %v701_v3, %s6709_s14  ;;  %1678 = vrot.lane.b32.xlu0 %v702_v12, %s6709_s14  ;;  %v2008_v12 = vld [vmem:[%s13226_s1 + $0x20] sm:$0xf] }
 0x296   : > { %6180 = vmatpush.msk.msra.mxu0 %vm13374_vm4, %v2008_v12  ;;  %6346 = vmatpush.msk.msra.mxu3 %vm13374_vm4, %v2008_v12  ;;  %v708_v12 = vld [vmem:[#allocation2 + $0x13a] sm:$0xff] }
 0x297   : > { %1674 = vrot.lane.b32.xlu1 %v700_v10, %s6709_s14  ;;  %v7990_v51 = vpop.permute.xlu2 %1546  ;;  %v7995_v58 = vpop.permute.xlu0 %1530 }
 0x298   : > { %13654 = vst [vmem:[#allocation186_spill] sm:$0xff] %v7990_v51  ;;  %v2005_v51 = vld [vmem:[%s13226_s1 + $0x8] sm:$0xff] }
 0x299   : > { %v7993_v33 = vpop.permute.xlu1 %1526 }
 0x29d   : > { %1682 = vrot.lane.b32.xlu2 %v704_v53, %s6709_s14  ;;  %1684 = vrot.lane.b32.xlu0 %v705_v19, %s6709_s14  ;;  %v707_v53 = vld [vmem:[#allocation2 + $0x12a] sm:$0xff] }
 0x29e   : > { %v2006_v19 = vld [vmem:[%s13226_s1 + $0x10] sm:$0xff] }
 0x29f   : > { %1680 = vrot.lane.b32.xlu1 %v703_v17, %s6709_s14  ;;  %v7999_v55 = vpop.permute.xlu2 %1552  ;;  %v8009_v3 = vpop.permute.xlu0 %1536  ;;  %v2007_v17 = vld [vmem:[%s13226_s1 + $0x18] sm:$0xff] }
 0x2a0   : > { %13655 = vst [vmem:[#allocation187_spill] sm:$0xff] %v7999_v55  ;;  %v706_v55 = vld [vmem:[#allocation2 + $0x122] sm:$0xff]  ;;  %2126 = vmatpush.msra.mxu0 %v2007_v17  ;;  %6347 = vmatpush.msra.mxu3 %v2007_v17 }
 0x2a1   : > { %v8002_v10 = vpop.permute.xlu1 %1532  ;;  %13656 = vst [vmem:[#allocation188_spill] sm:$0xff] %v8009_v3  ;;  %v2004_v17 = vld [vmem:[%s13226_s1] sm:$0xff] }
 0x2a2   : > { %2127 = vmatpush.msra.mxu0 %v2006_v19  ;;  %6348 = vmatpush.msra.mxu3 %v2006_v19 }
 0x2a4   : > { %2128 = vmatpush.msra.mxu0 %v2005_v51  ;;  %6349 = vmatpush.msra.mxu3 %v2005_v51  ;;  %v713_v51 = vld [vmem:[#allocation2 + $0x172] sm:$0xff] }
 0x2a5   : > { %1688 = vrot.lane.b32.xlu2 %v707_v53, %s6709_s14  ;;  %1690 = vrot.lane.b32.xlu0 %v708_v12, %s6709_s14  ;;  %v710_v53 = vld [vmem:[#allocation2 + $0x152] sm:$0xff] }
 0x2a6   : > { %2129 = vmatpush.msra.mxu0 %v2004_v17  ;;  %6350 = vmatpush.msra.mxu3 %v2004_v17 }
 0x2a7   : > { %1686 = vrot.lane.b32.xlu1 %v706_v55, %s6709_s14  ;;  %v8022_v4 = vpop.permute.xlu2 %1558  ;;  %v8030_v3 = vpop.permute.xlu0 %1542  ;;  %v711_v55 = vld [vmem:[#allocation2 + $0x15a] sm:$0xff] }
 0x2a8   : > { %13657 = vst [vmem:[#allocation189_spill] sm:$0xff] %v8022_v4 }
 0x2a9   : > { %v8025_v28 = vpop.permute.xlu1 %1538  ;;  %13659 = vst [vmem:[#allocation191_spill] sm:$0xff] %v8030_v3 }
 0x2aa   : > { %13658 = vst [vmem:[#allocation190_spill] sm:$0xff] %v8025_v28  ;;  %v712_v28 = vld [vmem:[#allocation2 + $0x16a] sm:$0xff] }
 0x2ad   : > { %1694 = vrot.lane.b32.xlu2 %v710_v53, %s6709_s14  ;;  %1696 = vrot.lane.b32.xlu0 %v711_v55, %s6709_s14  ;;  %v716_v55 = vld [vmem:[#allocation2 + $0x19a] sm:$0xff] }
 0x2af   : > { %1692 = vrot.lane.b32.xlu1 %v709_v59, %s6709_s14  ;;  %v8034_v19 = vpop.permute.xlu2 %1562  ;;  %v8039_v4 = vpop.permute.xlu0 %1548 }
 0x2b0   : > { %13660 = vst [vmem:[#allocation192_spill] sm:$0xff] %v8034_v19  ;;  %v717_v19 = vld [vmem:[#allocation2 + $0x1a2] sm:$0xff] }
 0x2b1   : > { %v8037_v12 = vpop.permute.xlu1 %1544  ;;  %13662 = vst [vmem:[#allocation194_spill] sm:$0xff] %v8039_v4  ;;  %v429_v4 = vld [vmem:[#allocation2] sm:$0xff] }
 0x2b2   : > { %13661 = vst [vmem:[#allocation193_spill] sm:$0xff] %v8037_v12  ;;  %v13665_v12 = vld [vmem:[#allocation37_spill] sm:$0xff] }
 0x2b5   : > { %1700 = vrot.lane.b32.xlu2 %v713_v51, %s6709_s14  ;;  %1702 = vrot.lane.b32.xlu0 %v7715_v5, %s6709_s14  ;;  %v1742_v5 = vsel %vm13373_vm0, %v429_v4, %v13665_v12  ;;  %v430_v4 = vld [vmem:[#allocation2 + $0x8] sm:$0xff] }
 0x2b7   : > { %1698 = vrot.lane.b32.xlu1 %v712_v28, %s6709_s14  ;;  %v8043_v17 = vpop.permute.xlu2 %1566  ;;  %v8049_v53 = vpop.permute.xlu0 %1554 }
 0x2b8   : > { %13664 = vst [vmem:[#allocation196_spill] sm:$0xff] %v8049_v53  ;;  %v13667_v53 = vld [vmem:[#allocation64_spill] sm:$0xff] }
 0x2b9   : > { %v8047_v59 = vpop.permute.xlu1 %1550  ;;  %v1774_v3 = vsel %vm13387_vm3, %v1742_v5, %v13667_v53 }
 0x2ba   : > { %13663 = vst [vmem:[#allocation195_spill] sm:$0xff] %v8047_v59 }
 0x2bd   : > { %1706 = vrot.lane.b32.xlu2 %v716_v55, %s6709_s14  ;;  %1708 = vrot.lane.b32.xlu0 %v717_v19, %s6709_s14 }
 0x2bf   : > { %1704 = vrot.lane.b32.xlu1 %v7719_v13, %s6709_s14  ;;  %v8054_v51 = vpop.permute.xlu2 %1570  ;;  %v8061_v59 = vpop.permute.xlu0 %1560  ;;  %v1807_v13 = vsel %vm1806_vm5, %v1774_v3, %v7515_v30 }
 0x2c0   : > { %13666 = vst [vmem:[#allocation37_spill] sm:$0xff] %v8061_v59  ;;  %v1840_v55 = vsel %vm13377_vm7, %v1807_v13, %v7641_v43  ;;  %v13668_v43 = vld [vmem:[#allocation40_spill] sm:$0xff] }
 0x2c1   : > { %v8057_v28 = vpop.permute.xlu1 %1556  ;;  %v1873_v19 = vsel %vm1872_vm6, %v1840_v55, %v7733_v63  ;;  %v1743_v13 = vsel %vm13373_vm0, %v430_v4, %v13668_v43  ;;  %v13669_v55 = vld [vmem:[#allocation80_spill] sm:$0xff]  ;;  %v6645_v43 = vld [vmem:[#allocation2 + $0x18] sm:$0xff] }
 0x2c2   : > { %v1906_v12 = vsel %vm13376_vm8, %v1873_v19, %v7883_v2  ;;  %v1775_v2 = vsel %vm13387_vm3, %v1743_v13, %v13669_v55  ;;  %v13670_v13 = vld [vmem:[#allocation39_spill] sm:$0xff] }
 0x2c3   : > { %v1939_v30 = vsel %vm1938_vm10, %v1906_v12, %v7977_v54  ;;  %v1808_v19 = vsel %vm1806_vm5, %v1775_v2, %v7475_v22  ;;  %v1744_v22 = vsel %vm13373_vm0, %v6645_v43, %v13670_v13 }
 0x2c4   : > { %v1841_v59 = vsel %vm13377_vm7, %v1808_v19, %v7651_v27  ;;  %v13671_v27 = vld [vmem:[#allocation84_spill] sm:$0xff] }
 0x2c5   : > { %v1874_v54 = vsel %vm1872_vm6, %v1841_v59, %v7772_v6  ;;  %v1776_v6 = vsel %vm13387_vm3, %v1744_v22, %v13671_v27 }
 0x2c6   : > { %v1907_v12 = vsel %vm13376_vm8, %v1874_v54, %v7853_v29  ;;  %v1809_v29 = vsel %vm1806_vm5, %v1776_v6, %v7517_v35 }
 0x2c7   : > { %v8073_v53 = vpop.permute.xlu2 %1574  ;;  %v8080_v63 = vpop.permute.xlu0 %1564  ;;  %v1842_v59 = vsel %vm13377_vm7, %v1809_v29, %v7611_v32  ;;  %v13673_v32 = vld [vmem:[#allocation68_spill] sm:$0xff] }
 0x2c9   : > { %v1647_v3 = vpop.permute.xlu1 %1646 }
 0x2ca   : > { %v1972_v5 = vsel %vm13375_vm9, %v1939_v30, %v1647_v3  ;;  %v1940_v30 = vsel %vm1938_vm10, %v1907_v12, %v7984_v1  ;;  %v1875_v1 = vsel %vm1872_vm6, %v1842_v59, %v7781_v40  ;;  %v6647_v59 = vld [vmem:[#allocation2 + $0x30] sm:$0xff] }
 0x2cb   : > { %6181 = vmatmul.msk.f32.vlgmr.msra.gmra.mxu0 %vm2013_vm11, %v1972_v5  ;;  %v1908_v2 = vsel %vm13376_vm8, %v1875_v1, %v7885_v39 }
 0x2cc   : > { %v1941_v54 = vsel %vm1938_vm10, %v1908_v2, %v7954_v52 }
 0x2cf   : > { %v1657_v4 = vpop.permute.xlu2 %1656  ;;  %v1651_v55 = vpop.permute.xlu0 %1650 }
 0x2d1   : > { %v1649_v3 = vpop.permute.xlu1 %1648 }
 0x2d2   : > { %v1973_v5 = vsel %vm13375_vm9, %v1940_v30, %v1649_v3  ;;  %v1974_v30 = vsel %vm13375_vm9, %v1941_v54, %v1651_v55  ;;  %v6646_v3 = vld [vmem:[#allocation2 + $0x20] sm:$0xff] }
 0x2d3   : > { %6182 = vmatmul.msk.f32.gmra.mxu0 %vm2013_vm11, %v1973_v5  ;;  %v13672_v5 = vld [vmem:[#allocation42_spill] sm:$0xff] }
 0x2d4   : > { %v1745_v35 = vsel %vm13373_vm0, %v6646_v3, %v13672_v5 }
 0x2d5   : > { %v1777_v40 = vsel %vm13387_vm3, %v1745_v35, %v13673_v32  ;;  %v6648_v32 = vld [vmem:[#allocation2 + $0x38] sm:$0xff] }
 0x2d6   : > { %v1810_v39 = vsel %vm1806_vm5, %v1777_v40, %v7527_v36  ;;  %v13674_v36 = vld [vmem:[#allocation34_spill] sm:$0xff] }
 0x2d7   : > { %v1659_v19 = vpop.permute.xlu2 %1658  ;;  %v1653_v43 = vpop.permute.xlu0 %1652  ;;  %v1843_v52 = vsel %vm13377_vm7, %v1810_v39, %v7653_v31  ;;  %v1746_v1 = vsel %vm13373_vm0, %v6647_v59, %v13674_v36  ;;  %v6649_v36 = vld [vmem:[#allocation2 + $0x48] sm:$0xff] }
 0x2d8   : > { %v1876_v13 = vsel %vm1872_vm6, %v1843_v52, %v7744_v26  ;;  %v13675_v26 = vld [vmem:[#allocation85_spill] sm:$0xff] }
 0x2d9   : > { %v8111_v12 = vpop.permute.xlu1 %1568  ;;  %v1909_v22 = vsel %vm13376_vm8, %v1876_v13, %v7892_v11  ;;  %v1778_v2 = vsel %vm13387_vm3, %v1746_v1, %v13675_v26 }
 0x2da   : > { %v1942_v27 = vsel %vm1938_vm10, %v1909_v22, %v7986_v60  ;;  %v1811_v11 = vsel %vm1806_vm5, %v1778_v2, %v7487_v14  ;;  %v13676_v14 = vld [vmem:[#allocation35_spill] sm:$0xff] }
 0x2db   : > { %6183 = vmatmul.msk.f32.gmra.mxu0 %vm2013_vm11, %v1974_v30  ;;  %v1975_v29 = vsel %vm13375_vm9, %v1942_v27, %v1653_v43  ;;  %v1844_v60 = vsel %vm13377_vm7, %v1811_v11, %v7663_v18  ;;  %v1747_v40 = vsel %vm13373_vm0, %v6648_v32, %v13676_v14 }
 0x2dc   : > { %v1877_v54 = vsel %vm1872_vm6, %v1844_v60, %v7783_v24  ;;  %v13677_v24 = vld [vmem:[#allocation91_spill] sm:$0xff] }
 0x2dd   : > { %v1910_v30 = vsel %vm13376_vm8, %v1877_v54, %v7862_v45  ;;  %v1779_v45 = vsel %vm13387_vm3, %v1747_v40, %v13677_v24 }
 0x2de   : > { %v1943_v5 = vsel %vm1938_vm10, %v1910_v30, %v7993_v33  ;;  %v1812_v39 = vsel %vm1806_vm5, %v1779_v45, %v7529_v41  ;;  %v13678_v41 = vld [vmem:[#allocation43_spill] sm:$0xff]  ;;  %v6650_v30 = vld [vmem:[#allocation2 + $0x50] sm:$0xff]  ;;  %v6651_v45 = vld [vmem:[#allocation2 + $0x120] sm:$0xff] }
 0x2df   : > { %v8127_v55 = vpop.permute.xlu2 %1664  ;;  %v1655_v31 = vpop.permute.xlu0 %1654  ;;  %v1845_v33 = vsel %vm13377_vm7, %v1812_v39, %v7623_v15  ;;  %v1748_v1 = vsel %vm13373_vm0, %v6649_v36, %v13678_v41  ;;  %v13682_v39 = vld [vmem:[#allocation66_spill] sm:$0xff] }
 0x2e0   : > { %v1976_v43 = vsel %vm13375_vm9, %v1943_v5, %v1655_v31  ;;  %v1878_v52 = vsel %vm1872_vm6, %v1845_v33, %v7792_v8  ;;  %v13679_v8 = vld [vmem:[#allocation73_spill] sm:$0xff] }
 0x2e1   : > { %v8131_v6 = vpop.permute.xlu1 %1572  ;;  %v1911_v13 = vsel %vm13376_vm8, %v1878_v52, %v7894_v23  ;;  %v1780_v31 = vsel %vm13387_vm3, %v1748_v1, %v13679_v8  ;;  %v13680_v5 = vld [vmem:[#allocation45_spill] sm:$0xff]  ;;  %v13683_v52 = vld [vmem:[#allocation36_spill] sm:$0xff] }
 0x2e2   : > { %v1944_v27 = vsel %vm1938_vm10, %v1911_v13, %v7963_v62  ;;  %v1813_v23 = vsel %vm1806_vm5, %v1780_v31, %v7539_v42  ;;  %v1749_v42 = vsel %vm13373_vm0, %v6650_v30, %v13680_v5  ;;  %v13684_v13 = vld [vmem:[#allocation105_spill] sm:$0xff]  ;;  %v13688_v30 = vld [vmem:[#allocation167_spill] sm:$0xff] }
 0x2e3   : > { %6184 = vmatmul.msk.f32.gmra.mxu0 %vm2013_vm11, %v1975_v29  ;;  %v1977_v59 = vsel %vm13375_vm9, %v1944_v27, %v1657_v4  ;;  %v1846_v62 = vsel %vm13377_vm7, %v1813_v23, %v7665_v25  ;;  %v13681_v25 = vld [vmem:[#allocation92_spill] sm:$0xff] }
 0x2e4   : > { %v1879_v26 = vsel %vm1872_vm6, %v1846_v62, %v7755_v38  ;;  %v1781_v38 = vsel %vm13387_vm3, %v1749_v42, %v13681_v25  ;;  %v13689_v42 = vld [vmem:[#allocation188_spill] sm:$0xff] }
 0x2e5   : > { %v1912_v4 = vsel %vm13376_vm8, %v1879_v26, %v7901_v50  ;;  %v1814_v50 = vsel %vm1806_vm5, %v1781_v38, %v7499_v21  ;;  %v1766_v21 = vsel %vm13373_vm0, %v6651_v45, %v13682_v39  ;;  %v13693_v39 = vld [vmem:[#allocation147_spill] sm:$0xff] }
 0x2e6   : > { %v1945_v11 = vsel %vm1938_vm10, %v1912_v4, %v7995_v58  ;;  %v1847_v32 = vsel %vm13377_vm7, %v1814_v50, %v7675_v9  ;;  %v6652_v9 = vld [vmem:[#allocation2 + $0x60] sm:$0xff] }
 0x2e7   : > { %v8147_v3 = vpop.permute.xlu2 %1670  ;;  %v8156_v18 = vpop.permute.xlu0 %1578  ;;  %v1978_v54 = vsel %vm13375_vm9, %v1945_v11, %v1659_v19  ;;  %v1880_v58 = vsel %vm1872_vm6, %v1847_v32, %v7794_v46  ;;  %v1750_v46 = vsel %vm13373_vm0, %v6652_v9, %v13683_v52  ;;  %v6654_v32 = vld [vmem:[#allocation2 + $0x78] sm:$0xff] }
 0x2e8   : > { %v1913_v19 = vsel %vm13376_vm8, %v1880_v58, %v7871_v34  ;;  %v1798_v34 = vsel %vm13387_vm3, %v1766_v21, %v13684_v13  ;;  %v13690_v58 = vld [vmem:[#allocation48_spill] sm:$0xff]  ;;  %v13695_v9 = vld [vmem:[#allocation163_spill] sm:$0xff] }
 0x2e9   : > { %v8151_v35 = vpop.permute.xlu1 %1576  ;;  %v1946_v40 = vsel %vm1938_vm10, %v1913_v19, %v8002_v10  ;;  %v13685_v10 = vld [vmem:[#allocation96_spill] sm:$0xff]  ;;  %v1831_v36 = vsel %vm1806_vm5, %v1798_v34, %v7615_v37 }
 0x2ea   : > { %v1864_v1 = vsel %vm13377_vm7, %v1831_v36, %v7739_v20  ;;  %v13697_v36 = vld [vmem:[#allocation38_spill] sm:$0xff] }
 0x2eb   : > { %6185 = vmatmul.msk.f32.gmra.mxu0 %vm2013_vm11, %v1976_v43  ;;  %v1897_v8 = vsel %vm1872_vm6, %v1864_v1, %v7822_v57 }
 0x2ec   : > { %v1930_v23 = vsel %vm13376_vm8, %v1897_v8, %v7957_v56  ;;  %v13686_v56 = vld [vmem:[#allocation46_spill] sm:$0xff] }
 0x2ef   : > { %v8169_v22 = vpop.permute.xlu2 %1676  ;;  %v1661_v15 = vpop.permute.xlu0 %1660 }
 0x2f0   : > { %v1979_v33 = vsel %vm13375_vm9, %v1946_v40, %v1661_v15  ;;  %v13692_v40 = vld [vmem:[#allocation122_spill] sm:$0xff] }
 0x2f1   : > { %v8173_v29 = vpop.permute.xlu1 %1580 }
 0x2f3   : > { %6186 = vmatmul.msk.f32.gmra.mxu0 %vm2013_vm11, %v1977_v59  ;;  %v1782_v59 = vsel %vm13387_vm3, %v1750_v46, %v13685_v10  ;;  %v13696_v46 = vld [vmem:[#allocation190_spill] sm:$0xff] }
 0x2f4   : > { %v1815_v41 = vsel %vm1806_vm5, %v1782_v59, %v7541_v47  ;;  %v1963_v47 = vsel %vm1938_vm10, %v1930_v23, %v8043_v17  ;;  %v13687_v17 = vld [vmem:[#allocation78_spill] sm:$0xff]  ;;  %v6655_v59 = vld [vmem:[#allocation2 + $0x80] sm:$0xff]  ;;  %v13699_v23 = vld [vmem:[#allocation69_spill] sm:$0xff] }
 0x2f5   : > { %v1848_v15 = vsel %vm13377_vm7, %v1815_v41, %v7635_v0  ;;  %v1753_v41 = vsel %vm13373_vm0, %v6655_v59, %v13697_v36  ;;  %v13715_v59 = vld [vmem:[#allocation148_spill] sm:$0xff] }
 0x2f6   : > { %v1881_v31 = vsel %vm1872_vm6, %v1848_v15, %v7803_v44  ;;  %v6653_v44 = vld [vmem:[#allocation2 + $0x68] sm:$0xff] }
 0x2f7   : > { %v8189_v2 = vpop.permute.xlu2 %1682  ;;  %v1667_v43 = vpop.permute.xlu0 %1666  ;;  %v1914_v37 = vsel %vm13376_vm8, %v1881_v31, %v7903_v49  ;;  %v1751_v4 = vsel %vm13373_vm0, %v6653_v44, %v13686_v56  ;;  %v13698_v15 = vld [vmem:[#allocation101_spill] sm:$0xff]  ;;  %v13703_v44 = vld [vmem:[#allocation130_spill] sm:$0xff] }
 0x2f8   : > { %v1947_v20 = vsel %vm1938_vm10, %v1914_v37, %v7972_v7  ;;  %v1783_v11 = vsel %vm13387_vm3, %v1751_v4, %v13687_v17  ;;  %v1785_v8 = vsel %vm13387_vm3, %v1753_v41, %v13698_v15  ;;  %v6656_v31 = vld [vmem:[#allocation2 + $0x128] sm:$0xff]  ;;  %v13704_v4 = vld [vmem:[#allocation94_spill] sm:$0xff]  ;;  %v13716_v41 = vld [vmem:[#allocation139_spill] sm:$0xff] }
 0x2f9   : > { %v1663_v60 = vpop.permute.xlu1 %1662  ;;  %v1816_v7 = vsel %vm1806_vm5, %v1783_v11, %v7551_v48  ;;  %v1752_v48 = vsel %vm13373_vm0, %v6654_v32, %v13690_v58  ;;  %v1767_v37 = vsel %vm13373_vm0, %v6656_v31, %v13699_v23  ;;  %v13705_v11 = vld [vmem:[#allocation67_spill] sm:$0xff]  ;;  %v13709_v32 = vld [vmem:[#allocation172_spill] sm:$0xff] }
 0x2fa   : > { %v1980_v26 = vsel %vm13375_vm9, %v1947_v20, %v1663_v60  ;;  %v13701_v20 = vld [vmem:[#allocation117_spill] sm:$0xff]  ;;  %v13718_v23 = vld [vmem:[#allocation59_spill] sm:$0xff] }
 0x2fb   : > { %6187 = vmatmul.msk.f32.gmra.mxu0 %vm2013_vm11, %v1978_v54  ;;  %v1849_v54 = vsel %vm13377_vm7, %v1816_v7, %v7677_v16  ;;  %v13691_v16 = vld [vmem:[#allocation97_spill] sm:$0xff] }
 0x2fc   : > { %v1882_v60 = vsel %vm1872_vm6, %v1849_v54, %v7766_v61  ;;  %v1784_v61 = vsel %vm13387_vm3, %v1752_v48, %v13691_v16  ;;  %v13706_v54 = vld [vmem:[#allocation168_spill] sm:$0xff]  ;;  %v6657_v16 = vld [vmem:[#allocation2 + $0x90] sm:$0xff] }
 0x2fd   : > { %v1915_v5 = vsel %vm13376_vm8, %v1882_v60, %v13688_v30  ;;  %v1817_v45 = vsel %vm1806_vm5, %v1784_v61, %v13692_v40  ;;  %v13707_v30 = vld [vmem:[#allocation158_spill] sm:$0xff]  ;;  %v13710_v61 = vld [vmem:[#allocation49_spill] sm:$0xff] }
 0x2fe   : > { %v1948_v25 = vsel %vm1938_vm10, %v1915_v5, %v13689_v42  ;;  %v1850_v21 = vsel %vm13377_vm7, %v1817_v45, %v13693_v39  ;;  %v13708_v42 = vld [vmem:[#allocation185_spill] sm:$0xff]  ;;  %v1754_v40 = vsel %vm13373_vm0, %v6657_v16, %v13710_v61 }
 0x2ff   : > { %v8207_v14 = vpop.permute.xlu2 %1688  ;;  %v8220_v27 = vpop.permute.xlu0 %1672  ;;  %v1981_v50 = vsel %vm13375_vm9, %v1948_v25, %v8127_v55  ;;  %v13727_v16 = vld [vmem:[#allocation109_spill] sm:$0xff] }
 0x301   : > { %v8211_v24 = vpop.permute.xlu1 %1668 }
 0x303   : > { %6188 = vmatmul.msk.f32.gmra.mxu0 %vm2013_vm11, %v1979_v33  ;;  %v13694_v33 = vld [vmem:[#allocation89_spill] sm:$0xff] }
 0x304   : > { %v1883_v55 = vsel %vm1872_vm6, %v1850_v21, %v13694_v33  ;;  %v13711_v21 = vld [vmem:[#allocation83_spill] sm:$0xff] }
 0x305   : > { %v1916_v52 = vsel %vm13376_vm8, %v1883_v55, %v13695_v9  ;;  %v1786_v33 = vsel %vm13387_vm3, %v1754_v40, %v13711_v21  ;;  %v6658_v9 = vld [vmem:[#allocation2 + $0x138] sm:$0xff]  ;;  %v13730_v21 = vld [vmem:[#allocation98_spill] sm:$0xff] }
 0x306   : > { %v1949_v13 = vsel %vm1938_vm10, %v1916_v52, %v13696_v46  ;;  %v13712_v52 = vld [vmem:[#allocation55_spill] sm:$0xff] }
 0x307   : > { %v1695_v62 = vpop.permute.xlu2 %1694  ;;  %v8252_v49 = vpop.permute.xlu0 %1678  ;;  %v1982_v10 = vsel %vm13375_vm9, %v1949_v13, %v1667_v43  ;;  %v1799_v43 = vsel %vm13387_vm3, %v1767_v37, %v13701_v20  ;;  %v1768_v46 = vsel %vm13373_vm0, %v6658_v9, %v13712_v52  ;;  %v13720_v20 = vld [vmem:[#allocation159_spill] sm:$0xff]  ;;  %v13732_v52 = vld [vmem:[#allocation164_spill] sm:$0xff] }
 0x308   : > { %v1996_v57 = vsel %vm13375_vm9, %v1963_v47, %v1695_v62  ;;  %v13700_v47 = vld [vmem:[#allocation126_spill] sm:$0xff]  ;;  %v1832_v56 = vsel %vm1806_vm5, %v1799_v43, %v13703_v44 }
 0x309   : > { %v8245_v0 = vpop.permute.xlu1 %1674  ;;  %6205 = vmatmul.msk.f32.vlgmr.msra.gmra.mxu3 %vm2013_vm11, %v1996_v57  ;;  %v1818_v62 = vsel %vm1806_vm5, %v1785_v8, %v13700_v47  ;;  %v13702_v57 = vld [vmem:[#allocation143_spill] sm:$0xff]  ;;  %v1865_v7 = vsel %vm13377_vm7, %v1832_v56, %v13705_v11  ;;  %v13717_v8 = vld [vmem:[#allocation81_spill] sm:$0xff]  ;;  %v13719_v47 = vld [vmem:[#allocation170_spill] sm:$0xff] }
 0x30a   : > { %v1898_v5 = vsel %vm1872_vm6, %v1865_v7, %v13707_v30  ;;  %v13722_v56 = vld [vmem:[#allocation181_spill] sm:$0xff]  ;;  %v6659_v11 = vld [vmem:[#allocation2 + $0x98] sm:$0xff]  ;;  %v13724_v30 = vld [vmem:[#allocation102_spill] sm:$0xff] }
 0x30b   : > { %6189 = vmatmul.msk.f32.gmra.mxu0 %vm2013_vm11, %v1980_v26  ;;  %v1851_v26 = vsel %vm13377_vm7, %v1818_v62, %v13702_v57  ;;  %v1931_v58 = vsel %vm13376_vm8, %v1898_v5, %v13709_v32  ;;  %v13721_v57 = vld [vmem:[#allocation191_spill] sm:$0xff]  ;;  %v13725_v32 = vld [vmem:[#allocation70_spill] sm:$0xff] }
 0x30c   : > { %v1884_v17 = vsel %vm1872_vm6, %v1851_v26, %v13704_v4  ;;  %v1964_v45 = vsel %vm1938_vm10, %v1931_v58, %v8111_v12  ;;  %v13723_v7 = vld [vmem:[#allocation51_spill] sm:$0xff] }
 0x30d   : > { %v1917_v60 = vsel %vm13376_vm8, %v1884_v17, %v13706_v54  ;;  %v1755_v54 = vsel %vm13373_vm0, %v6659_v11, %v13723_v7  ;;  %v13742_v11 = vld [vmem:[#allocation133_spill] sm:$0xff] }
 0x30e   : > { %v1950_v25 = vsel %vm1938_vm10, %v1917_v60, %v13708_v42  ;;  %v1787_v5 = vsel %vm13387_vm3, %v1755_v54, %v13724_v30  ;;  %v13743_v54 = vld [vmem:[#allocation99_spill] sm:$0xff]  ;;  %v13744_v30 = vld [vmem:[#allocation72_spill] sm:$0xff] }
 0x30f   : > { %v8273_v19 = vpop.permute.xlu0 %1684  ;;  %v1983_v48 = vsel %vm13375_vm9, %v1950_v25, %v8211_v24  ;;  %v13713_v24 = vld [vmem:[#allocation128_spill] sm:$0xff] }
 0x310   : > { %v1819_v13 = vsel %vm1806_vm5, %v1786_v33, %v13713_v24  ;;  %v6660_v25 = vld [vmem:[#allocation2 + $0x140] sm:$0xff] }
 0x311   : > { %v8267_v38 = vpop.permute.xlu1 %1680  ;;  %v1852_v36 = vsel %vm13377_vm7, %v1819_v13, %v13715_v59  ;;  %v1769_v58 = vsel %vm13373_vm0, %v6660_v25, %v13725_v32  ;;  %v13733_v24 = vld [vmem:[#allocation104_spill] sm:$0xff]  ;;  %v1701_v59 = vpop.permute.xlu2 %1700 }
 0x312   : > { %v1885_v31 = vsel %vm1872_vm6, %v1852_v36, %v13717_v8  ;;  %v1801_v61 = vsel %vm13387_vm3, %v1769_v58, %v13727_v16  ;;  %v13735_v36 = vld [vmem:[#allocation182_spill] sm:$0xff]  ;;  %v6661_v8 = vld [vmem:[#allocation2 + $0xa8] sm:$0xff]  ;;  %v13746_v32 = vld [vmem:[#allocation160_spill] sm:$0xff] }
 0x313   : > { %6190 = vmatmul.msk.f32.gmra.mxu0 %vm2013_vm11, %v1981_v50  ;;  %v1918_v62 = vsel %vm13376_vm8, %v1885_v31, %v13719_v47  ;;  %v13736_v31 = vld [vmem:[#allocation41_spill] sm:$0xff]  ;;  %v13737_v47 = vld [vmem:[#allocation106_spill] sm:$0xff] }
 0x314   : > { %v1951_v26 = vsel %vm1938_vm10, %v1918_v62, %v13721_v57  ;;  %v13738_v57 = vld [vmem:[#allocation74_spill] sm:$0xff] }
 0x315   : > { %v1984_v17 = vsel %vm13375_vm9, %v1951_v26, %v8147_v3 }
 0x317   : > { %v8293_v1 = vpop.permute.xlu0 %1690 }
 0x319   : > { %v8288_v34 = vpop.permute.xlu1 %1686 }
 0x31b   : > { %6191 = vmatmul.msk.f32.gmra.mxu0 %vm2013_vm11, %v1982_v10  ;;  %v13714_v10 = vld [vmem:[#allocation118_spill] sm:$0xff] }
 0x31c   : > { %v1800_v12 = vsel %vm13387_vm3, %v1768_v46, %v13714_v10  ;;  %v13734_v10 = vld [vmem:[#allocation193_spill] sm:$0xff] }
 0x31d   : > { %v1833_v15 = vsel %vm1806_vm5, %v1800_v12, %v13716_v41 }
 0x31e   : > { %v1866_v37 = vsel %vm13377_vm7, %v1833_v15, %v13718_v23  ;;  %v1756_v23 = vsel %vm13373_vm0, %v6661_v8, %v13736_v31  ;;  %v13756_v8 = vld [vmem:[#allocation82_spill] sm:$0xff] }
 0x31f   : > { %v1697_v39 = vpop.permute.xlu0 %1696  ;;  %v1899_v43 = vsel %vm1872_vm6, %v1866_v37, %v13720_v20  ;;  %v1788_v62 = vsel %vm13387_vm3, %v1756_v23, %v13737_v47  ;;  %v13757_v23 = vld [vmem:[#allocation60_spill] sm:$0xff]  ;;  %v13758_v47 = vld [vmem:[#allocation173_spill] sm:$0xff] }
 0x320   : > { %v1997_v55 = vsel %vm13375_vm9, %v1964_v45, %v1697_v39  ;;  %v1932_v4 = vsel %vm13376_vm8, %v1899_v43, %v13722_v56  ;;  %v13729_v45 = vld [vmem:[#allocation140_spill] sm:$0xff]  ;;  %v6662_v43 = vld [vmem:[#allocation2 + $0x150] sm:$0xff]  ;;  %v13740_v56 = vld [vmem:[#allocation119_spill] sm:$0xff] }
 0x321   : > { %v8318_v50 = vpop.permute.xlu1 %1692  ;;  %6206 = vmatmul.msk.f32.gmra.mxu3 %vm2013_vm11, %v1997_v55  ;;  %v1965_v60 = vsel %vm1938_vm10, %v1932_v4, %v8054_v51  ;;  %v13728_v51 = vld [vmem:[#allocation53_spill] sm:$0xff]  ;;  %v1834_v39 = vsel %vm1806_vm5, %v1801_v61, %v13729_v45  ;;  %v13731_v55 = vld [vmem:[#allocation71_spill] sm:$0xff]  ;;  %v1770_v26 = vsel %vm13373_vm0, %v6662_v43, %v13738_v57  ;;  %v6663_v45 = vld [vmem:[#allocation2 + $0xb0] sm:$0xff] }
 0x322   : > { %v1867_v9 = vsel %vm13377_vm7, %v1834_v39, %v13731_v55  ;;  %v1802_v4 = vsel %vm13387_vm3, %v1770_v26, %v13740_v56  ;;  %v13748_v61 = vld [vmem:[#allocation175_spill] sm:$0xff]  ;;  %v13749_v39 = vld [vmem:[#allocation52_spill] sm:$0xff]  ;;  %v13750_v55 = vld [vmem:[#allocation90_spill] sm:$0xff] }
 0x323   : > { %6192 = vmatmul.msk.f32.gmra.mxu0 %vm2013_vm11, %v1983_v48  ;;  %v13726_v48 = vld [vmem:[#allocation123_spill] sm:$0xff]  ;;  %v1900_v13 = vsel %vm1872_vm6, %v1867_v9, %v13733_v24  ;;  %v1835_v7 = vsel %vm1806_vm5, %v1802_v4, %v13742_v11  ;;  %v13751_v24 = vld [vmem:[#allocation61_spill] sm:$0xff]  ;;  %v13760_v57 = vld [vmem:[#allocation194_spill] sm:$0xff] }
 0x324   : > { %v1820_v3 = vsel %vm1806_vm5, %v1787_v5, %v13726_v48  ;;  %v1933_v41 = vsel %vm13376_vm8, %v1900_v13, %v13735_v36  ;;  %v1868_v5 = vsel %vm13377_vm7, %v1835_v7, %v13744_v30  ;;  %v13747_v48 = vld [vmem:[#allocation186_spill] sm:$0xff] }
 0x325   : > { %v1853_v40 = vsel %vm13377_vm7, %v1820_v3, %v13728_v51  ;;  %v1966_v37 = vsel %vm1938_vm10, %v1933_v41, %v8131_v6  ;;  %v13741_v6 = vld [vmem:[#allocation144_spill] sm:$0xff]  ;;  %v1901_v58 = vsel %vm1872_vm6, %v1868_v5, %v13746_v32  ;;  %v13755_v41 = vld [vmem:[#allocation141_spill] sm:$0xff] }
 0x326   : > { %v1886_v33 = vsel %vm1872_vm6, %v1853_v40, %v13730_v21  ;;  %v1999_v20 = vsel %vm13375_vm9, %v1966_v37, %v1701_v59  ;;  %v1934_v51 = vsel %vm13376_vm8, %v1901_v58, %v13748_v61  ;;  %v1757_v21 = vsel %vm13373_vm0, %v6663_v45, %v13749_v39  ;;  %v6666_v5 = vld [vmem:[#allocation2 + $0x168] sm:$0xff]  ;;  %v13765_v32 = vld [vmem:[#allocation124_spill] sm:$0xff] }
 0x327   : > { %v1919_v46 = vsel %vm13376_vm8, %v1886_v33, %v13732_v52  ;;  %v1703_v16 = vpop.permute.xlu0 %1702  ;;  %v1967_v33 = vsel %vm1938_vm10, %v1934_v51, %v8073_v53  ;;  %v1789_v9 = vsel %vm13387_vm3, %v1757_v21, %v13750_v55  ;;  %v13754_v53 = vld [vmem:[#allocation150_spill] sm:$0xff]  ;;  %v13766_v58 = vld [vmem:[#allocation113_spill] sm:$0xff]  ;;  %v13769_v51 = vld [vmem:[#allocation103_spill] sm:$0xff] }
 0x328   : > { %v1952_v12 = vsel %vm1938_vm10, %v1919_v46, %v13734_v10  ;;  %v2000_v52 = vsel %vm13375_vm9, %v1967_v33, %v1703_v16  ;;  %v6664_v46 = vld [vmem:[#allocation2 + $0x158] sm:$0xff]  ;;  %v13768_v16 = vld [vmem:[#allocation142_spill] sm:$0xff]  ;;  %v13770_v45 = vld [vmem:[#allocation76_spill] sm:$0xff] }
 0x329   : > { %v1699_v44 = vpop.permute.xlu1 %1698  ;;  %v1985_v15 = vsel %vm13375_vm9, %v1952_v12, %v8220_v27  ;;  %v1771_v13 = vsel %vm13373_vm0, %v6664_v46, %v13751_v24  ;;  %v13752_v10 = vld [vmem:[#allocation131_spill] sm:$0xff]  ;;  %v13753_v12 = vld [vmem:[#allocation120_spill] sm:$0xff]  ;;  %v13771_v21 = vld [vmem:[#allocation165_spill] sm:$0xff] }
 0x32a   : > { %v1998_v42 = vsel %vm13375_vm9, %v1965_v60, %v1699_v44  ;;  %v13739_v44 = vld [vmem:[#allocation129_spill] sm:$0xff]  ;;  %v1803_v59 = vsel %vm13387_vm3, %v1771_v13, %v13753_v12  ;;  %v13773_v46 = vld [vmem:[#allocation195_spill] sm:$0xff]  ;;  %v1707_v13 = vpop.permute.xlu2 %1706 }
 0x32b   : > { %6193 = vmatmul.msk.f32.gmra.mxu0 %vm2013_vm11, %v1984_v17  ;;  %6207 = vmatmul.msk.f32.gmra.mxu3 %vm2013_vm11, %v1998_v42  ;;  %v1821_v27 = vsel %vm1806_vm5, %v1788_v62, %v13739_v44  ;;  %v13745_v42 = vld [vmem:[#allocation171_spill] sm:$0xff] }
 0x32c   : > { %v1854_v17 = vsel %vm13377_vm7, %v1821_v27, %v13741_v6  ;;  %v13761_v27 = vld [vmem:[#allocation183_spill] sm:$0xff]  ;;  %v6665_v6 = vld [vmem:[#allocation2 + $0xc0] sm:$0xff] }
 0x32d   : > { %v1887_v60 = vsel %vm1872_vm6, %v1854_v17, %v13743_v54  ;;  %v13762_v17 = vld [vmem:[#allocation56_spill] sm:$0xff]  ;;  %v13763_v54 = vld [vmem:[#allocation107_spill] sm:$0xff] }
 0x32e   : > { %v1920_v25 = vsel %vm13376_vm8, %v1887_v60, %v13745_v42  ;;  %v1758_v11 = vsel %vm13373_vm0, %v6665_v6, %v13762_v17  ;;  %v13764_v42 = vld [vmem:[#allocation75_spill] sm:$0xff]  ;;  %v13784_v17 = vld [vmem:[#allocation174_spill] sm:$0xff] }
 0x32f   : > { %v1953_v3 = vsel %vm1938_vm10, %v1920_v25, %v13747_v48  ;;  %v1790_v60 = vsel %vm13387_vm3, %v1758_v11, %v13763_v54  ;;  %v1772_v25 = vsel %vm13373_vm0, %v6666_v5, %v13764_v42  ;;  %v13785_v54 = vld [vmem:[#allocation162_spill] sm:$0xff]  ;;  %v1709_v42 = vpop.permute.xlu0 %1708 }
 0x330   : > { %v1986_v40 = vsel %vm13375_vm9, %v1953_v3, %v8245_v0  ;;  %v1822_v0 = vsel %vm1806_vm5, %v1789_v9, %v13752_v10  ;;  %v1804_v48 = vsel %vm13387_vm3, %v1772_v25, %v13766_v58  ;;  %v13772_v9 = vld [vmem:[#allocation154_spill] sm:$0xff]  ;;  %v13774_v10 = vld [vmem:[#allocation184_spill] sm:$0xff]  ;;  %v6669_v58 = vld [vmem:[#allocation2 + $0xd8] sm:$0xff] }
 0x331   : > { %v1855_v36 = vsel %vm13377_vm7, %v1822_v0, %v13754_v53  ;;  %v1705_v44 = vpop.permute.xlu1 %1704  ;;  %v1837_v61 = vsel %vm1806_vm5, %v1804_v48, %v13768_v16  ;;  %v13775_v53 = vld [vmem:[#allocation44_spill] sm:$0xff]  ;;  %v13787_v25 = vld [vmem:[#allocation178_spill] sm:$0xff]  ;;  %v13788_v48 = vld [vmem:[#allocation57_spill] sm:$0xff] }
 0x332   : > { %v1888_v31 = vsel %vm1872_vm6, %v1855_v36, %v13756_v8  ;;  %v1870_v39 = vsel %vm13377_vm7, %v1837_v61, %v13770_v45  ;;  %v13789_v16 = vld [vmem:[#allocation95_spill] sm:$0xff] }
 0x333   : > { %6194 = vmatmul.msk.f32.gmra.mxu0 %vm2013_vm11, %v1985_v15  ;;  %6208 = vmatmul.msk.f32.gmra.mxu3 %vm2013_vm11, %v1999_v20  ;;  %v1836_v15 = vsel %vm1806_vm5, %v1803_v59, %v13755_v41  ;;  %v1921_v62 = vsel %vm13376_vm8, %v1888_v31, %v13758_v47  ;;  %v13759_v20 = vld [vmem:[#allocation161_spill] sm:$0xff] }
 0x334   : > { %v1869_v37 = vsel %vm13377_vm7, %v1836_v15, %v13757_v23  ;;  %v1954_v26 = vsel %vm1938_vm10, %v1921_v62, %v13760_v57  ;;  %v6667_v59 = vld [vmem:[#allocation2 + $0xc8] sm:$0xff]  ;;  %v13776_v15 = vld [vmem:[#allocation110_spill] sm:$0xff]  ;;  %v13778_v62 = vld [vmem:[#allocation132_spill] sm:$0xff] }
 0x335   : > { %v1902_v43 = vsel %vm1872_vm6, %v1869_v37, %v13759_v20  ;;  %v1987_v4 = vsel %vm13375_vm9, %v1954_v26, %v8169_v22  ;;  %v1823_v22 = vsel %vm1806_vm5, %v1790_v60, %v13765_v32  ;;  %v1759_v36 = vsel %vm13373_vm0, %v6667_v59, %v13775_v53  ;;  %v6668_v23 = vld [vmem:[#allocation2 + $0x170] sm:$0xff]  ;;  %v13777_v37 = vld [vmem:[#allocation79_spill] sm:$0xff]  ;;  %v13779_v20 = vld [vmem:[#allocation121_spill] sm:$0xff] }
 0x336   : > { %v1935_v56 = vsel %vm13376_vm8, %v1902_v43, %v13761_v27  ;;  %v1791_v8 = vsel %vm13387_vm3, %v1759_v36, %v13776_v15  ;;  %v1773_v47 = vsel %vm13373_vm0, %v6668_v23, %v13777_v37  ;;  %v13781_v26 = vld [vmem:[#allocation136_spill] sm:$0xff]  ;;  %v13796_v59 = vld [vmem:[#allocation111_spill] sm:$0xff]  ;;  %v13797_v36 = vld [vmem:[#allocation125_spill] sm:$0xff] }
 0x337   : > { %v1968_v7 = vsel %vm1938_vm10, %v1935_v56, %v8151_v35  ;;  %v13767_v35 = vld [vmem:[#allocation54_spill] sm:$0xff]  ;;  %v1805_v43 = vsel %vm13387_vm3, %v1773_v47, %v13779_v20  ;;  %v13782_v27 = vld [vmem:[#allocation108_spill] sm:$0xff]  ;;  %v13798_v15 = vld [vmem:[#allocation151_spill] sm:$0xff] }
 0x338   : > { %v2001_v30 = vsel %vm13375_vm9, %v1968_v7, %v1705_v44  ;;  %v1856_v3 = vsel %vm13377_vm7, %v1823_v22, %v13767_v35  ;;  %v1838_v44 = vsel %vm1806_vm5, %v1805_v43, %v13781_v26  ;;  %v1760_v35 = vsel %vm13373_vm0, %v6669_v58, %v13788_v48  ;;  %v13800_v37 = vld [vmem:[#allocation166_spill] sm:$0xff]  ;;  %v13801_v43 = vld [vmem:[#allocation47_spill] sm:$0xff]  ;;  %v13810_v58 = vld [vmem:[#allocation137_spill] sm:$0xff] }
 0x339   : > { %v1792_v61 = vsel %vm13387_vm3, %v1760_v35, %v13789_v16  ;;  %v6671_v20 = vld [vmem:[#allocation2 + $0xf0] sm:$0xff]  ;;  %v13811_v35 = vld [vmem:[#allocation152_spill] sm:$0xff]  ;;  %v13812_v16 = vld [vmem:[#allocation93_spill] sm:$0xff] }
 0x33b   : > { %6195 = vmatmul.msk.f32.gmra.mxu0 %vm2013_vm11, %v1986_v40  ;;  %6209 = vmatmul.msk.f32.gmra.mxu3 %vm2013_vm11, %v2000_v52  ;;  %v1889_v40 = vsel %vm1872_vm6, %v1856_v3, %v13769_v51  ;;  %v1903_v52 = vsel %vm1872_vm6, %v1870_v39, %v13772_v9  ;;  %v13793_v9 = vld [vmem:[#allocation176_spill] sm:$0xff] }
 0x33c   : > { %v1922_v33 = vsel %vm13376_vm8, %v1889_v40, %v13771_v21  ;;  %v1936_v0 = vsel %vm13376_vm8, %v1903_v52, %v13774_v10  ;;  %v13790_v40 = vld [vmem:[#allocation134_spill] sm:$0xff]  ;;  %v6670_v10 = vld [vmem:[#allocation2 + $0xe0] sm:$0xff] }
 0x33d   : > { %v1955_v24 = vsel %vm1938_vm10, %v1922_v33, %v13773_v46  ;;  %v1969_v41 = vsel %vm1938_vm10, %v1936_v0, %v8156_v18  ;;  %v13780_v18 = vld [vmem:[#allocation145_spill] sm:$0xff]  ;;  %v1825_v45 = vsel %vm1806_vm5, %v1792_v61, %v13790_v40  ;;  %v13792_v21 = vld [vmem:[#allocation86_spill] sm:$0xff]  ;;  %v13794_v46 = vld [vmem:[#allocation196_spill] sm:$0xff] }
 0x33e   : > { %v1988_v12 = vsel %vm13375_vm9, %v1955_v24, %v8252_v49  ;;  %v2002_v31 = vsel %vm13375_vm9, %v1969_v41, %v1707_v13  ;;  %v1824_v49 = vsel %vm1806_vm5, %v1791_v8, %v13778_v62  ;;  %v13795_v0 = vld [vmem:[#allocation62_spill] sm:$0xff] }
 0x33f   : > { %v1857_v57 = vsel %vm13377_vm7, %v1824_v49, %v13780_v18  ;;  %v1762_v18 = vsel %vm13373_vm0, %v6671_v20, %v13801_v43  ;;  %v13825_v43 = vld [vmem:[#allocation149_spill] sm:$0xff] }
 0x340   : > { %v1890_v56 = vsel %vm1872_vm6, %v1857_v57, %v13782_v27  ;;  %v13802_v57 = vld [vmem:[#allocation114_spill] sm:$0xff] }
 0x341   : > { %v1923_v11 = vsel %vm13376_vm8, %v1890_v56, %v13784_v17  ;;  %v1794_v26 = vsel %vm13387_vm3, %v1762_v18, %v13802_v57  ;;  %v13804_v56 = vld [vmem:[#allocation146_spill] sm:$0xff]  ;;  %v13806_v17 = vld [vmem:[#allocation177_spill] sm:$0xff] }
 0x342   : > { %v13826_v57 = vld [vmem:[#allocation157_spill] sm:$0xff] }
 0x343   : > { %6196 = vmatmul.msk.f32.gmra.mxu0 %vm2013_vm11, %v1987_v4  ;;  %6210 = vmatmul.msk.f32.gmra.mxu3 %vm2013_vm11, %v2001_v30  ;;  %v13783_v4 = vld [vmem:[#allocation77_spill] sm:$0xff]  ;;  %v13786_v30 = vld [vmem:[#allocation187_spill] sm:$0xff] }
 0x344   : > { %v1871_v6 = vsel %vm13377_vm7, %v1838_v44, %v13783_v4  ;;  %v1956_v5 = vsel %vm1938_vm10, %v1923_v11, %v13786_v30  ;;  %v13803_v44 = vld [vmem:[#allocation135_spill] sm:$0xff] }
 0x345   : > { %v1904_v60 = vsel %vm1872_vm6, %v1871_v6, %v13785_v54  ;;  %v1989_v22 = vsel %vm13375_vm9, %v1956_v5, %v8267_v38  ;;  %v13791_v38 = vld [vmem:[#allocation58_spill] sm:$0xff]  ;;  %v1827_v27 = vsel %vm1806_vm5, %v1794_v26, %v13803_v44  ;;  %v13805_v6 = vld [vmem:[#allocation155_spill] sm:$0xff]  ;;  %v13807_v54 = vld [vmem:[#allocation189_spill] sm:$0xff] }
 0x346   : > { %v1937_v32 = vsel %vm13376_vm8, %v1904_v60, %v13787_v25  ;;  %v1858_v39 = vsel %vm13377_vm7, %v1825_v45, %v13791_v38  ;;  %v1860_v4 = vsel %vm13377_vm7, %v1827_v27, %v13804_v56  ;;  %v6672_v5 = vld [vmem:[#allocation2 + $0xf8] sm:$0xff]  ;;  %v13814_v45 = vld [vmem:[#allocation37_spill] sm:$0xff]  ;;  %v13827_v44 = vld [vmem:[#allocation180_spill] sm:$0xff] }
 0x347   : > { %v1970_v3 = vsel %vm1938_vm10, %v1937_v32, %v8173_v29  ;;  %v1891_v33 = vsel %vm1872_vm6, %v1858_v39, %v13792_v21  ;;  %v13809_v32 = vld [vmem:[#allocation100_spill] sm:$0xff]  ;;  %v6673_v21 = vld [vmem:[#allocation2 + $0x108] sm:$0xff] }
 0x348   : > { %v8481_v55 = vpop.f32.mrf.mxu0  ;;  %v2003_v51 = vsel %vm13375_vm9, %v1970_v3, %v1709_v42  ;;  %v1924_v29 = vsel %vm13376_vm8, %v1891_v33, %v13793_v9  ;;  %v13808_v42 = vld [vmem:[#allocation63_spill] sm:$0xff]  ;;  %v13815_v33 = vld [vmem:[#allocation65_spill] sm:$0xff] }
 0x349   : > { %v1957_v24 = vsel %vm1938_vm10, %v1924_v29, %v13794_v46  ;;  %v1763_v25 = vsel %vm13373_vm0, %v6672_v5, %v13808_v42  ;;  %v1764_v9 = vsel %vm13373_vm0, %v6673_v21, %v13815_v33  ;;  %v13816_v29 = vld [vmem:[#allocation115_spill] sm:$0xff] }
 0x34a   : > { %v1990_v13 = vsel %vm13375_vm9, %v1957_v24, %v8189_v2  ;;  %v1796_v46 = vsel %vm13387_vm3, %v1764_v9, %v13816_v29  ;;  %v13817_v24 = vld [vmem:[#allocation127_spill] sm:$0xff] }
 0x34b   : > { %6197 = vmatmul.msk.f32.gmra.mxu0 %vm2013_vm11, %v1988_v12  ;;  %6211 = vmatmul.msk.f32.gmra.mxu3 %vm2013_vm11, %v2002_v31  ;;  %v1761_v12 = vsel %vm13373_vm0, %v6670_v10, %v13795_v0  ;;  %v13799_v31 = vld [vmem:[#allocation112_spill] sm:$0xff]  ;;  %v13818_v10 = vld [vmem:[#allocation153_spill] sm:$0xff] }
 0x34c   : > { %v1793_v53 = vsel %vm13387_vm3, %v1761_v12, %v13796_v59  ;;  %v13819_v12 = vld [vmem:[#allocation156_spill] sm:$0xff] }
 0x34d   : > { %v1826_v41 = vsel %vm1806_vm5, %v1793_v53, %v13797_v36  ;;  %v13820_v53 = vld [vmem:[#allocation169_spill] sm:$0xff] }
 0x34e   : > { %v1859_v8 = vsel %vm13377_vm7, %v1826_v41, %v13798_v15  ;;  %v13821_v41 = vld [vmem:[#allocation192_spill] sm:$0xff] }
 0x34f   : > { %v1892_v23 = vsel %vm1872_vm6, %v1859_v8, %v13799_v31  ;;  %v6674_v31 = vld [vmem:[#allocation2 + $0x110] sm:$0xff] }
 0x350   : > { %v8516_v7 = vpop.f32.mrf.mxu0  ;;  %v1925_v2 = vsel %vm13376_vm8, %v1892_v23, %v13800_v37  ;;  %v13822_v23 = vld [vmem:[#allocation50_spill] sm:$0xff] }
 0x351   : > { %v1958_v62 = vsel %vm1938_vm10, %v1925_v2, %v8057_v28  ;;  %v1893_v28 = vsel %vm1872_vm6, %v1860_v4, %v13805_v6  ;;  %v1765_v37 = vsel %vm13373_vm0, %v6674_v31, %v13822_v23  ;;  %v13823_v2 = vld [vmem:[#allocation116_spill] sm:$0xff] }
 0x352   : > { %v1991_v49 = vsel %vm13375_vm9, %v1958_v62, %v8273_v19  ;;  %v1926_v19 = vsel %vm13376_vm8, %v1893_v28, %v13806_v17  ;;  %v1797_v62 = vsel %vm13387_vm3, %v1765_v37, %v13823_v2 }
 0x353   : > { %6198 = vmatmul.msk.f32.gmra.mxu0 %vm2013_vm11, %v1989_v22  ;;  %6212 = vmatmul.msk.f32.gmra.mxu3 %vm2013_vm11, %v2003_v51  ;;  %v1959_v60 = vsel %vm1938_vm10, %v1926_v19, %v13807_v54  ;;  %v1795_v22 = vsel %vm13387_vm3, %v1763_v25, %v13809_v32  ;;  %v13813_v51 = vld [vmem:[#allocation179_spill] sm:$0xff] }
 0x354   : > { %v1992_v30 = vsel %vm13375_vm9, %v1959_v60, %v8288_v34  ;;  %v1828_v48 = vsel %vm1806_vm5, %v1795_v22, %v13810_v58 }
 0x355   : > { %v1861_v3 = vsel %vm13377_vm7, %v1828_v48, %v13811_v35 }
 0x356   : > { %v1894_v61 = vsel %vm1872_vm6, %v1861_v3, %v13812_v16 }
 0x357   : > { %v1927_v34 = vsel %vm13376_vm8, %v1894_v61, %v13813_v51 }
 0x358   : > { %v8543_v52 = vpop.f32.mrf.mxu0  ;;  %v1960_v38 = vsel %vm1938_vm10, %v1927_v34, %v13814_v45 }
 0x359   : > { %v1993_v39 = vsel %vm13375_vm9, %v1960_v38, %v8207_v14 }
 0x35b   : > { %6199 = vmatmul.msk.f32.gmra.mxu0 %vm2013_vm11, %v1990_v13  ;;  %v1829_v13 = vsel %vm1806_vm5, %v1796_v46, %v13817_v24 }
 0x35c   : > { %v1862_v0 = vsel %vm13377_vm7, %v1829_v13, %v13818_v10 }
 0x35d   : > { %v1895_v59 = vsel %vm1872_vm6, %v1862_v0, %v13819_v12 }
 0x35e   : > { %v1928_v14 = vsel %vm13376_vm8, %v1895_v59, %v13820_v53 }
 0x35f   : > { %v1961_v15 = vsel %vm1938_vm10, %v1928_v14, %v13821_v41 }
 0x360   : > { %v8562_v47 = vpop.f32.mrf.mxu0  ;;  %v1994_v8 = vsel %vm13375_vm9, %v1961_v15, %v8293_v1 }
 0x363   : > { %6200 = vmatmul.msk.f32.gmra.mxu0 %vm2013_vm11, %v1991_v49  ;;  %v13824_v49 = vld [vmem:[#allocation138_spill] sm:$0xff] }
 0x364   : > { %v1830_v20 = vsel %vm1806_vm5, %v1797_v62, %v13824_v49 }
 0x365   : > { %v1863_v18 = vsel %vm13377_vm7, %v1830_v20, %v13825_v43 }
 0x366   : > { %v1896_v26 = vsel %vm1872_vm6, %v1863_v18, %v13826_v57 }
 0x367   : > { %v1929_v1 = vsel %vm13376_vm8, %v1896_v26, %v13827_v44 }
 0x368   : > { %v2143_v11 = vpop.f32.mrf.mxu0  ;;  %v1962_v56 = vsel %vm1938_vm10, %v1929_v1, %v8080_v63 }
 0x369   : > { %v1995_v4 = vsel %vm13375_vm9, %v1962_v56, %v8318_v50  ;;  %v8654_v50 = vld [vmem:[%s13227_s2] ss:$0 sm:$0xff] }
 0x36a   : > { %v8660_v32 = vadd.f32 %v8654_v50, %v8516_v7  ;;  %v8664_v22 = vadd.f32 %v8654_v50, %v8481_v55  ;;  %v8670_v48 = vadd.f32 %v8654_v50, %v8543_v52  ;;  %v8676_v3 = vadd.f32 %v8654_v50, %v8562_v47 }
 0x36b   : > { %6201 = vmatmul.msk.f32.gmra.mxu0 %vm2013_vm11, %v1992_v30  ;;  %v8685_v61 = vadd.f32 %v8654_v50, %v2143_v11 }
 0x36c   : > { %v2298_v35 = vmul.f32 %v8660_v32, %v8660_v32  ;;  %v2297_v7 = vmul.f32 %v8664_v22, %v8664_v22  ;;  %v2228_v55 = vsel %vm13387_vm3, %v8660_v32, 0.0  ;;  %v2299_v16 = vmul.f32 %v8670_v48, %v8670_v48 }
 0x36d   : > { %v2227_v52 = vsel %vm13387_vm3, %v8664_v22, 0.0  ;;  %v2230_v47 = vsel %vm13387_vm3, %v8670_v48, 0.0  ;;  %v2300_v34 = vmul.f32 %v8676_v3, %v8676_v3  ;;  %v2232_v9 = vsel %vm13387_vm3, %v8676_v3, 0.0 }
 0x36e   : > { %v2330_v51 = vsel %vm13387_vm3, %v2298_v35, 0.0  ;;  %v2329_v38 = vsel %vm13387_vm3, %v2297_v7, 0.0  ;;  %v2332_v33 = vsel %vm13387_vm3, %v2299_v16, 0.0  ;;  %v2301_v29 = vmul.f32 %v8685_v61, %v8685_v61 }
 0x36f   : > { %v2334_v13 = vsel %vm13387_vm3, %v2300_v34, 0.0  ;;  %v2234_v10 = vsel %vm13387_vm3, %v8685_v61, 0.0 }
 0x370   : > { %v2146_v40 = vpop.f32.mrf.mxu0  ;;  %v2336_v14 = vsel %vm13387_vm3, %v2301_v29, 0.0 }
 0x371   : > { %v8695_v45 = vadd.f32 %v8654_v50, %v2146_v40  ;;  %v2331_v40 = vadd.f32 %v2330_v51, %v2329_v38 }
 0x373   : > { %6202 = vmatmul.msk.f32.gmra.mxu0 %vm2013_vm11, %v1993_v39  ;;  %v2229_v39 = vadd.f32 %v2228_v55, %v2227_v52  ;;  %v2302_v0 = vmul.f32 %v8695_v45, %v8695_v45  ;;  %v2333_v59 = vadd.f32 %v2332_v33, %v2331_v40 }
 0x375   : > { %v2231_v24 = vadd.f32 %v2230_v47, %v2229_v39  ;;  %v2338_v23 = vsel %vm13387_vm3, %v2302_v0, 0.0 }
 0x377   : > { %v2233_v53 = vadd.f32 %v2232_v9, %v2231_v24 }
 0x378   : > { %v2149_v36 = vpop.f32.mrf.mxu0 }
 0x379   : > { %v8708_v46 = vadd.f32 %v8654_v50, %v2149_v36  ;;  %v2236_v36 = vsel %vm13387_vm3, %v8695_v45, 0.0  ;;  %v2235_v31 = vadd.f32 %v2234_v10, %v2233_v53 }
 0x37b   : > { %6203 = vmatmul.msk.f32.gmra.mxu0 %vm2013_vm11, %v1994_v8  ;;  %v2303_v41 = vmul.f32 %v8708_v46, %v8708_v46  ;;  %v2335_v8 = vadd.f32 %v2334_v13, %v2333_v59  ;;  %v2238_v37 = vsel %vm13387_vm3, %v8708_v46, 0.0  ;;  %v2237_v20 = vadd.f32 %v2236_v36, %v2235_v31 }
 0x37d   : > { %v2337_v49 = vadd.f32 %v2336_v14, %v2335_v8  ;;  %v2340_v18 = vsel %vm13387_vm3, %v2303_v41, 0.0 }
 0x37f   : > { %v2339_v1 = vadd.f32 %v2338_v23, %v2337_v49 }
 0x380   : > { %v2152_v27 = vpop.f32.mrf.mxu0 }
 0x381   : > { %v8716_v12 = vadd.f32 %v8654_v50, %v2152_v27  ;;  %v2239_v27 = vadd.f32 %v2238_v37, %v2237_v20  ;;  %v2341_v7 = vadd.f32 %v2340_v18, %v2339_v1 }
 0x383   : > { %6204 = vmatmul.msk.f32.gmra.mxu0 %vm2013_vm11, %v1995_v4  ;;  %v2304_v2 = vmul.f32 %v8716_v12, %v8716_v12  ;;  %v2240_v57 = vsel %vm13387_vm3, %v8716_v12, 0.0 }
 0x384   : > { %v2241_v55 = vadd.f32 %v2240_v57, %v2239_v27 }
 0x385   : > { %v2342_v4 = vsel %vm13387_vm3, %v2304_v2, 0.0 }
 0x386   : > { %v2343_v47 = vadd.f32 %v2342_v4, %v2341_v7 }
 0x388   : > { %v2155_v6 = vpop.f32.mrf.mxu0 }
 0x389   : > { %v8724_v15 = vadd.f32 %v8654_v50, %v2155_v6 }
 0x38b   : > { %v2305_v26 = vmul.f32 %v8724_v15, %v8724_v15  ;;  %v2242_v6 = vsel %vm13387_vm3, %v8724_v15, 0.0 }
 0x38c   : > { %v8647_v42 = vpop.f32.mrf.mxu3  ;;  %v2243_v34 = vadd.f32 %v2242_v6, %v2241_v55 }
 0x390   : > { %v2158_v28 = vpop.f32.mrf.mxu0 }
 0x391   : > { %v8732_v62 = vadd.f32 %v8654_v50, %v2158_v28 }
 0x393   : > { %v2306_v28 = vmul.f32 %v8732_v62, %v8732_v62  ;;  %v2244_v16 = vsel %vm13387_vm3, %v8732_v62, 0.0 }
 0x394   : > { %v2245_v29 = vadd.f32 %v2244_v16, %v2243_v34 }
 0x395   : > { %v2346_v38 = vsel %vm13387_vm3, %v2306_v28, 0.0 }
 0x398   : > { %v2161_v17 = vpop.f32.mrf.mxu0 }
 0x399   : > { %v8740_v44 = vadd.f32 %v8654_v50, %v2161_v17  ;;  %v2344_v17 = vsel %vm13387_vm3, %v2305_v26, 0.0 }
 0x39a   : > { %v2345_v9 = vadd.f32 %v2344_v17, %v2343_v47 }
 0x39b   : > { %v2307_v52 = vmul.f32 %v8740_v44, %v8740_v44 }
 0x39c   : > { %v2347_v0 = vadd.f32 %v2346_v38, %v2345_v9 }
 0x3a0   : > { %v8637_v19 = vpop.f32.mrf.mxu0 }
 0x3a1   : > { %v8751_v35 = vadd.f32 %v8654_v50, %v8637_v19  ;;  %v2246_v19 = vsel %vm13387_vm3, %v8740_v44, 0.0 }
 0x3a2   : > { %v2247_v59 = vadd.f32 %v2246_v19, %v2245_v29 }
 0x3a3   : > { %v2308_v39 = vmul.f32 %v8751_v35, %v8751_v35  ;;  %v2248_v24 = vsel %vm13387_vm3, %v8751_v35, 0.0 }
 0x3a4   : > { %v8656_v25 = vpop.f32.mrf.mxu3  ;;  %v2249_v8 = vadd.f32 %v2248_v24, %v2247_v59 }
 0x3a8   : > { %v8639_v54 = vpop.f32.mrf.mxu0 }
 0x3a9   : > { %v8760_v51 = vadd.f32 %v8654_v50, %v8639_v54  ;;  %v2348_v54 = vsel %vm13387_vm3, %v2307_v52, 0.0 }
 0x3aa   : > { %v2349_v41 = vadd.f32 %v2348_v54, %v2347_v0 }
 0x3ab   : > { %v2309_v13 = vmul.f32 %v8760_v51, %v8760_v51  ;;  %v2250_v53 = vsel %vm13387_vm3, %v8760_v51, 0.0 }
 0x3ac   : > { %v2251_v20 = vadd.f32 %v2250_v53, %v2249_v8 }
 0x3ae   : > { %v8698_v21 = vpop.f32.mrf.mxu3 }
 0x3b0   : > { %v8641_v60 = vpop.f32.mrf.mxu0 }
 0x3b1   : > { %v8769_v33 = vadd.f32 %v8654_v50, %v8641_v60  ;;  %v2350_v60 = vsel %vm13387_vm3, %v2308_v39, 0.0 }
 0x3b2   : > { %v2351_v49 = vadd.f32 %v2350_v60, %v2349_v41 }
 0x3b3   : > { %v2310_v14 = vmul.f32 %v8769_v33, %v8769_v33  ;;  %v2252_v23 = vsel %vm13387_vm3, %v8769_v33, 0.0 }
 0x3b4   : > { %v2253_v27 = vadd.f32 %v2252_v23, %v2251_v20 }
 0x3b6   : > { %v8742_v56 = vpop.f32.mrf.mxu3 }
 0x3b8   : > { %v8643_v30 = vpop.f32.mrf.mxu0 }
 0x3b9   : > { %v8778_v10 = vadd.f32 %v8654_v50, %v8643_v30  ;;  %v2352_v30 = vsel %vm13387_vm3, %v2309_v13, 0.0 }
 0x3ba   : > { %v2353_v1 = vadd.f32 %v2352_v30, %v2351_v49 }
 0x3bb   : > { %v2311_v37 = vmul.f32 %v8778_v10, %v8778_v10  ;;  %v2254_v18 = vsel %vm13387_vm3, %v8778_v10, 0.0 }
 0x3bc   : > { %v2255_v17 = vadd.f32 %v2254_v18, %v2253_v27 }
 0x3be   : > { %v8789_v31 = vpop.f32.mrf.mxu3 }
 0x3c0   : > { %v8645_v5 = vpop.f32.mrf.mxu0 }
 0x3c1   : > { %v8787_v36 = vadd.f32 %v8654_v50, %v8645_v5  ;;  %v2354_v5 = vsel %vm13387_vm3, %v2310_v14, 0.0 }
 0x3c2   : > { %v2355_v55 = vadd.f32 %v2354_v5, %v2353_v1 }
 0x3c3   : > { %v2312_v57 = vmul.f32 %v8787_v36, %v8787_v36  ;;  %v2256_v6 = vsel %vm13387_vm3, %v8787_v36, 0.0 }
 0x3c4   : > { %v2257_v38 = vadd.f32 %v2256_v6, %v2255_v17 }
 0x3c6   : > { %v2218_v24 = vpop.f32.mrf.mxu3 }
 0x3c8   : > { %v8649_v63 = vpop.f32.mrf.mxu0 }
 0x3c9   : > { %v8798_v2 = vadd.f32 %v8654_v50, %v8649_v63  ;;  %v2356_v63 = vsel %vm13387_vm3, %v2311_v37, 0.0 }
 0x3ca   : > { %v2357_v34 = vadd.f32 %v2356_v63, %v2355_v55 }
 0x3cb   : > { %v2313_v28 = vmul.f32 %v8798_v2, %v8798_v2  ;;  %v2258_v16 = vsel %vm13387_vm3, %v8798_v2, 0.0 }
 0x3cc   : > { %v2259_v54 = vadd.f32 %v2258_v16, %v2257_v38  ;;  %v8869_v38 = vadd.f32 %v8654_v50, %v8656_v25 }
 0x3cd   : > { %v2360_v19 = vsel %vm13387_vm3, %v2313_v28, 0.0  ;;  %v8862_v28 = vadd.f32 %v8654_v50, %v8647_v42 }
 0x3d0   : > { %v8666_v58 = vpop.f32.mrf.mxu0 }
 0x3d1   : > { %v8807_v26 = vadd.f32 %v8654_v50, %v8666_v58  ;;  %v2358_v58 = vsel %vm13387_vm3, %v2312_v57, 0.0 }
 0x3d2   : > { %v2359_v29 = vadd.f32 %v2358_v58, %v2357_v34  ;;  %v2221_v58 = vpop.f32.mrf.mxu3 }
 0x3d3   : > { %v2314_v52 = vmul.f32 %v8807_v26, %v8807_v26 }
 0x3d4   : > { %v2361_v60 = vadd.f32 %v2360_v19, %v2359_v29  ;;  %v2321_v29 = vmul.f32 %v8862_v28, %v8862_v28 }
 0x3d5   : > { %v2362_v13 = vsel %vm13387_vm3, %v2314_v52, 0.0 }
 0x3d6   : > { %v2363_v23 = vadd.f32 %v2362_v13, %v2361_v60  ;;  %v2274_v60 = vsel %vm13387_vm3, %v8862_v28, 0.0 }
 0x3d8   : > { %v8700_v11 = vpop.f32.mrf.mxu0 }
 0x3d9   : > { %v8816_v7 = vadd.f32 %v8654_v50, %v8700_v11  ;;  %v2260_v11 = vsel %vm13387_vm3, %v8807_v26, 0.0 }
 0x3da   : > { %v2261_v53 = vadd.f32 %v2260_v11, %v2259_v54  ;;  %v8879_v54 = vadd.f32 %v8654_v50, %v8698_v21 }
 0x3db   : > { %v2315_v39 = vmul.f32 %v8816_v7, %v8816_v7 }
 0x3e0   : > { %v2188_v43 = vpop.f32.mrf.mxu0 }
 0x3e1   : > { %v8824_v47 = vadd.f32 %v8654_v50, %v2188_v43  ;;  %v2262_v43 = vsel %vm13387_vm3, %v8816_v7, 0.0 }
 0x3e2   : > { %v2263_v37 = vadd.f32 %v2262_v43, %v2261_v53  ;;  %v2322_v53 = vmul.f32 %v8869_v38, %v8869_v38 }
 0x3e3   : > { %v2316_v0 = vmul.f32 %v8824_v47, %v8824_v47  ;;  %v2264_v41 = vsel %vm13387_vm3, %v8824_v47, 0.0 }
 0x3e4   : > { %v2265_v57 = vadd.f32 %v2264_v41, %v2263_v37  ;;  %v2323_v37 = vmul.f32 %v8879_v54, %v8879_v54 }
 0x3e5   : > { %v2366_v49 = vsel %vm13387_vm3, %v2316_v0, 0.0 }
 0x3e8   : > { %v2191_v40 = vpop.f32.mrf.mxu0 }
 0x3e9   : > { %v8832_v9 = vadd.f32 %v8654_v50, %v2191_v40  ;;  %v2364_v40 = vsel %vm13387_vm3, %v2315_v39, 0.0 }
 0x3ea   : > { %v2365_v18 = vadd.f32 %v2364_v40, %v2363_v23  ;;  %v2276_v23 = vsel %vm13387_vm3, %v8869_v38, 0.0 }
 0x3eb   : > { %v2317_v8 = vmul.f32 %v8832_v9, %v8832_v9  ;;  %v2266_v20 = vsel %vm13387_vm3, %v8832_v9, 0.0 }
 0x3ec   : > { %v2367_v63 = vadd.f32 %v2366_v49, %v2365_v18  ;;  %v2267_v6 = vadd.f32 %v2266_v20, %v2265_v57  ;;  %v8901_v49 = vadd.f32 %v8654_v50, %v8789_v31  ;;  %v2278_v18 = vsel %vm13387_vm3, %v8879_v54, 0.0 }
 0x3ed   : > { %v2368_v1 = vsel %vm13387_vm3, %v2317_v8, 0.0  ;;  %v2376_v8 = vsel %vm13387_vm3, %v2321_v29, 0.0 }
 0x3ee   : > { %v2369_v16 = vadd.f32 %v2368_v1, %v2367_v63  ;;  %v8909_v1 = vadd.f32 %v8654_v50, %v2218_v24  ;;  %v2282_v24 = vsel %vm13387_vm3, %v8901_v49, 0.0 }
 0x3f0   : > { %v2194_v4 = vpop.f32.mrf.mxu0 }
 0x3f1   : > { %v8840_v59 = vadd.f32 %v8654_v50, %v2194_v4 }
 0x3f3   : > { %v2318_v5 = vmul.f32 %v8840_v59, %v8840_v59  ;;  %v2268_v27 = vsel %vm13387_vm3, %v8840_v59, 0.0 }
 0x3f4   : > { %v2269_v52 = vadd.f32 %v2268_v27, %v2267_v6  ;;  %v2224_v27 = vpop.f32.mrf.mxu3  ;;  %v2380_v6 = vsel %vm13387_vm3, %v2323_v37, 0.0 }
 0x3f5   : > { %v2370_v55 = vsel %vm13387_vm3, %v2318_v5, 0.0 }
 0x3f6   : > { %v2371_v42 = vadd.f32 %v2370_v55, %v2369_v16  ;;  %v2325_v55 = vmul.f32 %v8901_v49, %v8901_v49 }
 0x3f8   : > { %v2197_v14 = vpop.f32.mrf.mxu0 }
 0x3f9   : > { %v8848_v30 = vadd.f32 %v8654_v50, %v2197_v14  ;;  %v8891_v14 = vadd.f32 %v8654_v50, %v8742_v56  ;;  %v2378_v56 = vsel %vm13387_vm3, %v2322_v53, 0.0 }
 0x3fb   : > { %v2319_v4 = vmul.f32 %v8848_v30, %v8848_v30  ;;  %v2270_v17 = vsel %vm13387_vm3, %v8848_v30, 0.0  ;;  %v2324_v57 = vmul.f32 %v8891_v14, %v8891_v14  ;;  %v2280_v31 = vsel %vm13387_vm3, %v8891_v14, 0.0 }
 0x3fc   : > { %v2271_v39 = vadd.f32 %v2270_v17, %v2269_v52  ;;  %v8917_v17 = vadd.f32 %v8654_v50, %v2221_v58  ;;  %v2284_v58 = vsel %vm13387_vm3, %v8909_v1, 0.0 }
 0x3fd   : > { %v2372_v19 = vsel %vm13387_vm3, %v2319_v4, 0.0 }
 0x3fe   : > { %v2373_v43 = vadd.f32 %v2372_v19, %v2371_v42  ;;  %v2326_v19 = vmul.f32 %v8909_v1, %v8909_v1  ;;  %v8925_v42 = vadd.f32 %v8654_v50, %v2224_v27  ;;  %v2286_v53 = vsel %vm13387_vm3, %v8917_v17, 0.0 }
 0x400   : > { %v2200_v34 = vpop.f32.mrf.mxu0 }
 0x401   : > { %v8873_v11 = vadd.f32 %v8654_v50, %v2200_v34  ;;  %v2382_v34 = vsel %vm13387_vm3, %v2324_v57, 0.0  ;;  %v2328_v50 = vmul.f32 %v8925_v42, %v8925_v42 }
 0x403   : > { %v2272_v13 = vsel %vm13387_vm3, %v8873_v11, 0.0  ;;  %v2320_v25 = vmul.f32 %v8873_v11, %v8873_v11 }
 0x404   : > { %v2273_v0 = vadd.f32 %v2272_v13, %v2271_v39  ;;  %v2384_v13 = vsel %vm13387_vm3, %v2325_v55, 0.0 }
 0x405   : > { %v2374_v21 = vsel %vm13387_vm3, %v2320_v25, 0.0  ;;  %v2327_v25 = vmul.f32 %v8917_v17, %v8917_v17 }
 0x406   : > { %v2275_v40 = vadd.f32 %v2274_v60, %v2273_v0  ;;  %v2375_v41 = vadd.f32 %v2374_v21, %v2373_v43  ;;  %v2386_v60 = vsel %vm13387_vm3, %v2326_v19, 0.0 }
 0x408   : > { %v2277_v20 = vadd.f32 %v2276_v23, %v2275_v40  ;;  %v2377_v5 = vadd.f32 %v2376_v8, %v2375_v41  ;;  %v2388_v41 = vsel %vm13387_vm3, %v2327_v25, 0.0  ;;  %v2288_v8 = vsel %vm13387_vm3, %v8925_v42, 0.0 }
 0x40a   : > { %v2279_v4 = vadd.f32 %v2278_v18, %v2277_v20  ;;  %v2379_v63 = vadd.f32 %v2378_v56, %v2377_v5  ;;  %v2390_v20 = vsel %vm13387_vm3, %v2328_v50, 0.0 }
 0x40c   : > { %v2281_v16 = vadd.f32 %v2280_v31, %v2279_v4  ;;  %v2381_v52 = vadd.f32 %v2380_v6, %v2379_v63 }
 0x40e   : > { %v2283_v39 = vadd.f32 %v2282_v24, %v2281_v16  ;;  %v2383_v29 = vadd.f32 %v2382_v34, %v2381_v52 }
 0x410   : > { %v2285_v43 = vadd.f32 %v2284_v58, %v2283_v39  ;;  %v2385_v0 = vadd.f32 %v2384_v13, %v2383_v29 }
 0x412   : > { %v2287_v21 = vadd.f32 %v2286_v53, %v2285_v43  ;;  %v2387_v40 = vadd.f32 %v2386_v60, %v2385_v0 }
 0x414   : > { %v2289_v23 = vadd.f32 %v2288_v8, %v2287_v21  ;;  %v2389_v37 = vadd.f32 %v2388_v41, %v2387_v40 }
 0x416   : > { %v2290_v5 = vrot.slane %v2289_v23, 4  ;;  %v2391_v56 = vadd.f32 %v2390_v20, %v2389_v37 }
 0x418   : > { %v2291_v18 = vadd.f32 %v2290_v5, %v2289_v23  ;;  %v2392_v57 = vrot.slane %v2391_v56, 4 }
 0x41a   : > { %v2292_v27 = vrot.slane %v2291_v18, 2  ;;  %v2393_v4 = vadd.f32 %v2392_v57, %v2391_v56 }
 0x41c   : > { %v2293_v63 = vadd.f32 %v2292_v27, %v2291_v18  ;;  %v2394_v6 = vrot.slane %v2393_v4, 2  ;;  %v13828_v27 = vmov 0.0  }
 0x41d   : > { %326 = vst.msk [vmem:[#allocation3 + $0x10] sm:$0x3] %vm325_vm15, %v13828_v27 }
 0x41e   : > { %v2294_v31 = vrot.slane %v2293_v63, 1  ;;  %v2395_v55 = vadd.f32 %v2394_v6, %v2393_v4  ;;  %330 = vst.msk [vmem:[#allocation3 + $0x1a8] sm:$0x3] %vm325_vm15, %v13828_v27 }
 0x420   : > { %v2295_v16 = vadd.f32 %v2294_v31, %v2293_v63  ;;  %v2396_v52 = vrot.slane %v2395_v55, 1 }
 0x422   : > { %v8941_v34 = vmul.f32 0.00390625, %v2295_v16  ;;  %v2397_v24 = vadd.f32 %v2396_v52, %v2395_v55 }
 0x424   : > { %v2398_v19 = vmul.f32 0.00390625, %v2397_v24  ;;  %v2399_v39 = vmul.f32 %v8941_v34, %v8941_v34  ;;  %v2422_v25 = vsub.f32 %v8832_v9, %v8941_v34  ;;  %v2423_v43 = vsub.f32 %v8840_v59, %v8941_v34 }
 0x425   : > { %v2424_v0 = vsub.f32 %v8848_v30, %v8941_v34  ;;  %v2425_v21 = vsub.f32 %v8873_v11, %v8941_v34  ;;  %v2404_v41 = vsub.f32 %v8670_v48, %v8941_v34  ;;  %v2405_v8 = vsub.f32 %v8676_v3, %v8941_v34 }
 0x426   : > { %v2400_v29 = vsub.f32 %v2398_v19, %v2399_v39  ;;  %v2406_v23 = vsub.f32 %v8685_v61, %v8941_v34  ;;  %v2408_v37 = vsub.f32 %v8708_v46, %v8941_v34  ;;  %v2409_v20 = vsub.f32 %v8716_v12, %v8941_v34 }
 0x427   : > { %v2410_v5 = vsub.f32 %v8724_v15, %v8941_v34  ;;  %v2411_v11 = vsub.f32 %v8732_v62, %v8941_v34  ;;  %v2412_v48 = vsub.f32 %v8740_v44, %v8941_v34  ;;  %v2413_v3 = vsub.f32 %v8751_v35, %v8941_v34 }
 0x428   : > { %v2401_v13 = vmax.f32 %v2400_v29, 0.0  ;;  %v2414_v61 = vsub.f32 %v8760_v51, %v8941_v34  ;;  %v2415_v46 = vsub.f32 %v8769_v33, %v8941_v34  ;;  %v2416_v12 = vsub.f32 %v8778_v10, %v8941_v34 }
 0x429   : > { %v2417_v15 = vsub.f32 %v8787_v36, %v8941_v34  ;;  %v2418_v44 = vsub.f32 %v8798_v2, %v8941_v34  ;;  %v2419_v35 = vsub.f32 %v8807_v26, %v8941_v34  ;;  %v2420_v51 = vsub.f32 %v8816_v7, %v8941_v34 }
 0x42a   : > { %v2434_v58 = vadd.f32 1e-05, %v2401_v13  ;;  %v2421_v33 = vsub.f32 %v8824_v47, %v8941_v34  ;;  %v2426_v10 = vsub.f32 %v8862_v28, %v8941_v34  ;;  %v2427_v36 = vsub.f32 %v8869_v38, %v8941_v34  ;;  %v3181_v38 = vld [vmem:[#allocation3 + $0x1] sm:$0xff] }
 0x42b   : > { %v2428_v2 = vsub.f32 %v8879_v54, %v8941_v34  ;;  %v2429_v26 = vsub.f32 %v8891_v14, %v8941_v34  ;;  %v2430_v7 = vsub.f32 %v8901_v49, %v8941_v34  ;;  %v2431_v47 = vsub.f32 %v8909_v1, %v8941_v34  ;;  %3470 = vrot.lane.b32.xlu1 %v3181_v38, %s6703_s8 }
 0x42c   : > { %6385 = vrsqrt.f32 %v2434_v58  ;;  %vm2441_vm13 = vweird.f32 %v2434_v58  ;;  %v2432_v28 = vsub.f32 %v8917_v17, %v8941_v34  ;;  %v2433_v54 = vsub.f32 %v8925_v42, %v8941_v34 }
 0x432   : > { %v6386_v60 = vpop.eup %6385 }
 0x433   : > { %v2436_v53 = vmul.f32 %v6386_v60, %v2434_v58  ;;  %vm2442_vm12 = vweird.f32 %v6386_v60 }
 0x434   : > { %vm2443_vm14 = vmor %vm2441_vm13, %vm2442_vm12 }
 0x435   : > { %v2437_v50 = vmul.f32 %v6386_v60, %v2436_v53 }
 0x437   : > { %v2438_v40 = vmul.f32 0.5, %v2437_v50 }
 0x439   : > { %v2439_v56 = vsub.f32 1.5, %v2438_v40  ;;  %v3182_v40 = vld [vmem:[#allocation3 + $0x9] sm:$0xff] }
 0x43a   : > { %3472 = vrot.lane.b32.xlu2 %v3182_v40, %s6703_s8 }
 0x43b   : > { %v2440_v62 = vmul.f32 %v6386_v60, %v2439_v56 }
 0x43d   : > { %v8991_v18 = vsel %vm2443_vm14, %v6386_v60, %v2440_v62 }
 0x43e   : > { %v9000_v57 = vmul.f32 %v8991_v18, %v2425_v21  ;;  %v9010_v14 = vmul.f32 %v8991_v18, %v2404_v41  ;;  %v9013_v49 = vmul.f32 %v8991_v18, %v2405_v8  ;;  %v9016_v4 = vmul.f32 %v8991_v18, %v2406_v23 }
 0x43f   : > { %v9021_v17 = vmul.f32 %v8991_v18, %v2408_v37  ;;  %v9024_v42 = vmul.f32 %v8991_v18, %v2409_v20  ;;  %v9027_v63 = vmul.f32 %v8991_v18, %v2410_v5  ;;  %v9031_v6 = vmul.f32 %v8991_v18, %v2411_v11 }
 0x440   : > { %13829 = vst [vmem:[#allocation64_spill] sm:$0xff] %v9013_v49  ;;  %v6236_v1 = vmul.f32 -1.442695, %v9000_v57  ;;  %v9034_v31 = vmul.f32 %v8991_v18, %v2412_v48  ;;  %v9037_v55 = vmul.f32 %v8991_v18, %v2413_v3  ;;  %v9040_v16 = vmul.f32 %v8991_v18, %v2414_v61 }
 0x441   : > { %13830 = vst [vmem:[#allocation40_spill] sm:$0xff] %v9021_v17  ;;  %v9043_v52 = vmul.f32 %v8991_v18, %v2415_v46  ;;  %v9046_v24 = vmul.f32 %v8991_v18, %v2416_v12  ;;  %v9049_v19 = vmul.f32 %v8991_v18, %v2417_v15  ;;  %v9052_v39 = vmul.f32 %v8991_v18, %v2418_v44 }
 0x442   : > { %13831 = vst [vmem:[#allocation80_spill] sm:$0xff] %v9024_v42  ;;  %6387 = vpow2.f32 %v6236_v1  ;;  %v9055_v29 = vmul.f32 %v8991_v18, %v2419_v35  ;;  %v9058_v13 = vmul.f32 %v8991_v18, %v2420_v51  ;;  %v9061_v58 = vmul.f32 %v8991_v18, %v2421_v33 }
 0x443   : > { %13832 = vst [vmem:[#allocation39_spill] sm:$0xff] %v9027_v63  ;;  %v9067_v60 = vmul.f32 %v8991_v18, %v2422_v25  ;;  %v9073_v53 = vmul.f32 %v8991_v18, %v2423_v43  ;;  %v9079_v50 = vmul.f32 %v8991_v18, %v2424_v0  ;;  %v9082_v21 = vmul.f32 %v8991_v18, %v2426_v10 }
 0x444   : > { %13833 = vst [vmem:[#allocation84_spill] sm:$0xff] %v9031_v6  ;;  %v9085_v9 = vmul.f32 %v8991_v18, %v2427_v36  ;;  %v9088_v25 = vmul.f32 %v8991_v18, %v2428_v2  ;;  %v9091_v59 = vmul.f32 %v8991_v18, %v2429_v26  ;;  %v9094_v43 = vmul.f32 %v8991_v18, %v2430_v7 }
 0x445   : > { %13834 = vst [vmem:[#allocation42_spill] sm:$0xff] %v9034_v31  ;;  %v9097_v30 = vmul.f32 %v8991_v18, %v2431_v47  ;;  %v9100_v0 = vmul.f32 %v8991_v18, %v2432_v28  ;;  %v9103_v41 = vmul.f32 %v8991_v18, %v2433_v54  ;;  %v6215_v8 = vmul.f32 -1.442695, %v9010_v14 }
 0x446   : > { %13835 = vst [vmem:[#allocation68_spill] sm:$0xff] %v9037_v55  ;;  %v2403_v3 = vsub.f32 %v8660_v32, %v8941_v34  ;;  %v2402_v46 = vsub.f32 %v8664_v22, %v8941_v34  ;;  %v2407_v1 = vsub.f32 %v8695_v45, %v8941_v34 }
 0x447   : > { %13836 = vst [vmem:[#allocation34_spill] sm:$0xff] %v9040_v16  ;;  %6389 = vpow2.f32 %v6215_v8 }
 0x448   : > { %13837 = vst [vmem:[#allocation85_spill] sm:$0xff] %v9043_v52  ;;  %v6388_v23 = vpop.eup %6387  ;;  %v9112_v62 = vmul.f32 %v8991_v18, %v2403_v3  ;;  %v9115_v44 = vmul.f32 %v8991_v18, %v2402_v46  ;;  %v6219_v3 = vmul.f32 -1.442695, %v9021_v17  ;;  %v6223_v46 = vmul.f32 -1.442695, %v9034_v31 }
 0x449   : > { %13838 = vst [vmem:[#allocation35_spill] sm:$0xff] %v9046_v24  ;;  %v2596_v37 = vadd.f32 1.0, %v6388_v23 }
 0x44a   : > { %13839 = vst [vmem:[#allocation91_spill] sm:$0xff] %v9049_v19  ;;  %v6214_v32 = vmul.f32 -1.442695, %v9112_v62  ;;  %v6213_v36 = vmul.f32 -1.442695, %v9115_v44 }
 0x44b   : > { %13840 = vst [vmem:[#allocation43_spill] sm:$0xff] %v9052_v39  ;;  %6391 = vrcp.f32 %v2596_v37  ;;  %v2961_v61 = vand.u32 2147483648, %v2596_v37  ;;  %v2959_v15 = vand.u32 2147483647, %v2596_v37  ;;  %vm2955_vm2 = vweird.f32 %v2596_v37 }
 0x44c   : > { %13841 = vst [vmem:[#allocation73_spill] sm:$0xff] %v9055_v29 }
 0x44d   : > { %13842 = vst [vmem:[#allocation45_spill] sm:$0xff] %v9058_v13  ;;  %v6390_v20 = vpop.eup %6389  ;;  %v2962_v51 = vor.u32 1.1754944e-38, %v2961_v61  ;;  %vm2960_vm6 = vcmp.eq.f32.partialorder %v2959_v15, 8.507059e+37  ;;  %v6221_v61 = vmul.f32 -1.442695, %v9027_v63 }
 0x44e   : > { %13843 = vst [vmem:[#allocation92_spill] sm:$0xff] %v9061_v58  ;;  %v2575_v56 = vadd.f32 1.0, %v6390_v20  ;;  %v6216_v20 = vmul.f32 -1.442695, %v9013_v49  ;;  %v6224_v15 = vmul.f32 -1.442695, %v9037_v55 }
 0x44f   : > { %13844 = vst [vmem:[#allocation66_spill] sm:$0xff] %v9067_v60 }
 0x450   : > { %13845 = vst [vmem:[#allocation36_spill] sm:$0xff] %v9073_v53  ;;  %6393 = vrcp.f32 %v2575_v56  ;;  %v2646_v47 = vand.u32 2147483648, %v2575_v56  ;;  %v2644_v38 = vand.u32 2147483647, %v2575_v56  ;;  %vm2640_vm11 = vweird.f32 %v2575_v56 }
 0x451   : > { %13846 = vst [vmem:[#allocation105_spill] sm:$0xff] %v9079_v50  ;;  %v6392_v5 = vpop.eup %6391  ;;  %6395 = vpow2.f32 %v6214_v32  ;;  %v6226_v32 = vmul.f32 -1.442695, %v9043_v52 }
 0x452   : > { %13847 = vst [vmem:[#allocation96_spill] sm:$0xff] %v9082_v21  ;;  %v2951_v11 = vmul.f32 %v6392_v5, %v2596_v37  ;;  %vm2956_vm1 = vweird.f32 %v6392_v5  ;;  %6397 = vpow2.f32 %v6213_v36  ;;  %v2647_v40 = vor.u32 1.1754944e-38, %v2646_v47 }
 0x453   : > { %13848 = vst [vmem:[#allocation46_spill] sm:$0xff] %v9085_v9  ;;  %vm2957_vm5 = vmor %vm2955_vm2, %vm2956_vm1  ;;  %vm2645_vm13 = vcmp.eq.f32.partialorder %v2644_v38, 8.507059e+37  ;;  %v9124_v37 = vmul.f32 %v8991_v18, %v2407_v1  ;;  %6399 = vpow2.f32 %v6216_v20  ;;  %v6220_v18 = vmul.f32 -1.442695, %v9024_v42 }
 0x454   : > { %13849 = vst [vmem:[#allocation78_spill] sm:$0xff] %v9088_v25  ;;  %v2952_v48 = vsub.f32 1.0, %v2951_v11  ;;  %v6217_v11 = vmul.f32 -1.442695, %v9016_v4  ;;  %v6228_v36 = vmul.f32 -1.442695, %v9049_v19 }
 0x455   : > { %13850 = vst [vmem:[#allocation167_spill] sm:$0xff] %v9091_v59  ;;  %v6218_v34 = vmul.f32 -1.442695, %v9124_v37  ;;  %v6231_v47 = vmul.f32 -1.442695, %v9058_v13 }
 0x456   : > { %13851 = vst [vmem:[#allocation188_spill] sm:$0xff] %v9094_v43  ;;  %v2953_v12 = vmul.f32 %v6392_v5, %v2952_v48  ;;  %v6394_v10 = vpop.eup %6393  ;;  %6401 = vpow2.f32 %v6217_v11  ;;  %v6233_v1 = vmul.f32 -1.442695, %v9067_v60  ;;  %v6235_v11 = vmul.f32 -1.442695, %v9079_v50 }
 0x457   : > { %13852 = vst [vmem:[#allocation48_spill] sm:$0xff] %v9097_v30  ;;  %v2636_v26 = vmul.f32 %v6394_v10, %v2575_v56  ;;  %vm2641_vm10 = vweird.f32 %v6394_v10  ;;  %v6396_v8 = vpop.eup %6395 }
 0x458   : > { %13853 = vst [vmem:[#allocation97_spill] sm:$0xff] %v9100_v0  ;;  %v2954_v35 = vadd.f32 %v6392_v5, %v2953_v12  ;;  %vm2642_vm12 = vmor %vm2640_vm11, %vm2641_vm10  ;;  %v9129_v56 = vadd.f32 1.0, %v6396_v8 }
 0x459   : > { %13854 = vst [vmem:[#allocation122_spill] sm:$0xff] %v9103_v41  ;;  %v2637_v7 = vsub.f32 1.0, %v2636_v26 }
 0x45a   : > { %v2958_v33 = vsel %vm2957_vm5, %v6392_v5, %v2954_v35  ;;  %6403 = vrcp.f32 %v9129_v56  ;;  %v2629_v20 = vand.u32 2147483647, %v9129_v56  ;;  %vm2625_vm1 = vweird.f32 %v9129_v56 }
 0x45b   : > { %v2963_v22 = vsel %vm2960_vm6, %v2962_v51, %v2958_v33  ;;  %v2638_v28 = vmul.f32 %v6394_v10, %v2637_v7  ;;  %v6225_v33 = vmul.f32 -1.442695, %v9040_v16  ;;  %v6230_v7 = vmul.f32 -1.442695, %v9055_v29 }
 0x45c   : > { %v3108_v2 = vmul.f32 %v2963_v22, %v9000_v57  ;;  %v6398_v57 = vpop.eup %6397  ;;  %v6227_v22 = vmul.f32 -1.442695, %v9046_v24  ;;  %vm2630_vm2 = vcmp.eq.f32.partialorder %v2629_v20, 8.507059e+37 }
 0x45d   : > { %v2639_v54 = vadd.f32 %v6394_v10, %v2638_v28  ;;  %v9132_v45 = vadd.f32 1.0, %v6398_v57  ;;  %v9142_v12 = vpop.eup %6399 }
 0x45e   : > { %3140 = vst.msk [vmem:[#allocation3 + $0x129] sm:$0xff] %vm13387_vm3, %v3108_v2  ;;  %v9145_v51 = vpop.eup %6401  ;;  %v6229_v2 = vmul.f32 -1.442695, %v9052_v39 }
 0x45f   : > { %v2643_v23 = vsel %vm2642_vm12, %v6394_v10, %v2639_v54  ;;  %6405 = vrcp.f32 %v9132_v45  ;;  %v6232_v54 = vmul.f32 -1.442695, %v9061_v58  ;;  %vm2610_vm6 = vweird.f32 %v9132_v45 }
 0x460   : > { %v2648_v5 = vsel %vm2645_vm13, %v2647_v40, %v2643_v23  ;;  %6407 = vpow2.f32 %v6218_v34  ;;  %v6404_v10 = vpop.eup %6403  ;;  %v6234_v23 = vmul.f32 -1.442695, %v9073_v53 }
 0x461   : > { %v3087_v48 = vmul.f32 %v2648_v5, %v9010_v14  ;;  %v6222_v14 = vmul.f32 -1.442695, %v9031_v6  ;;  %6409 = vpow2.f32 %v6219_v3  ;;  %v2621_v28 = vmul.f32 %v6404_v10, %v9129_v56 }
 0x462   : > { %6411 = vpow2.f32 %v6220_v18  ;;  %vm2626_vm14 = vweird.f32 %v6404_v10 }
 0x463   : > { %3119 = vst.msk [vmem:[#allocation3 + $0x31] sm:$0xff] %vm13387_vm3, %v3087_v48  ;;  %6413 = vpow2.f32 %v6221_v61  ;;  %v2622_v57 = vsub.f32 1.0, %v2621_v28  ;;  %v2631_v48 = vand.u32 2147483648, %v9129_v56  ;;  %v2616_v61 = vand.u32 2147483648, %v9132_v45  ;;  %vm2627_vm5 = vmor %vm2625_vm1, %vm2626_vm14 }
 0x464   : > { %6415 = vpow2.f32 %v6222_v14 }
 0x465   : > { %v6406_v26 = vpop.eup %6405  ;;  %6417 = vpow2.f32 %v6223_v46  ;;  %v2623_v18 = vmul.f32 %v6404_v10, %v2622_v57 }
 0x466   : > { %v6408_v38 = vpop.eup %6407  ;;  %6419 = vpow2.f32 %v6224_v15  ;;  %v2606_v40 = vmul.f32 %v6406_v26, %v9132_v45  ;;  %vm2611_vm15 = vweird.f32 %v6406_v26  ;;  %v2614_v15 = vand.u32 2147483647, %v9132_v45 }
 0x467   : > { %v9159_v8 = vpop.eup %6409  ;;  %6421 = vpow2.f32 %v6225_v33  ;;  %v2624_v33 = vadd.f32 %v6404_v10, %v2623_v18  ;;  %v9175_v57 = vadd.f32 1.0, %v6408_v38  ;;  %vm2612_vm10 = vmor %vm2610_vm6, %vm2611_vm15 }
 0x468   : > { %v9163_v5 = vpop.eup %6411  ;;  %6423 = vpow2.f32 %v6226_v32  ;;  %v2607_v34 = vsub.f32 1.0, %v2606_v40  ;;  %vm2615_vm11 = vcmp.eq.f32.partialorder %v2614_v15, 8.507059e+37 }
 0x469   : > { %v9167_v3 = vpop.eup %6413  ;;  %6425 = vpow2.f32 %v6227_v22  ;;  %v2632_v22 = vor.u32 1.1754944e-38, %v2631_v48  ;;  %vm2685_vm12 = vweird.f32 %v9175_v57 }
 0x46a   : > { %v3185_v35 = vld [vmem:[#allocation3 + $0x31] sm:$0xff]  ;;  %v9170_v14 = vpop.eup %6415  ;;  %6427 = vpow2.f32 %v6228_v36  ;;  %v2608_v46 = vmul.f32 %v6406_v26, %v2607_v34  ;;  %v2628_v36 = vsel %vm2627_vm5, %v6404_v10, %v2624_v33  ;;  %v2617_v34 = vor.u32 1.1754944e-38, %v2616_v61 }
 0x46b   : > { %3478 = vrot.lane.b32.xlu2 %v3185_v35, %s6703_s8  ;;  %v6418_v35 = vpop.eup %6417  ;;  %6429 = vpow2.f32 %v6229_v2  ;;  %v2633_v18 = vsel %vm2630_vm2, %v2632_v22, %v2628_v36  ;;  %v6238_v10 = vmul.f32 -1.442695, %v9085_v9  ;;  %v6239_v61 = vmul.f32 -1.442695, %v9088_v25 }
 0x46c   : > { %v6420_v32 = vpop.eup %6419  ;;  %6431 = vpow2.f32 %v6230_v7  ;;  %v2609_v28 = vadd.f32 %v6406_v26, %v2608_v46  ;;  %v6237_v7 = vmul.f32 -1.442695, %v9082_v21  ;;  %v3086_v48 = vmul.f32 %v2633_v18, %v9112_v62 }
 0x46d   : > { %v6422_v40 = vpop.eup %6421  ;;  %6433 = vpow2.f32 %v6231_v47  ;;  %v9191_v33 = vadd.f32 1.0, %v9142_v12  ;;  %v9195_v36 = vadd.f32 1.0, %v9145_v51  ;;  %v9198_v18 = vadd.f32 1.0, %v9159_v8 }
 0x46e   : > { %v6424_v2 = vpop.eup %6423  ;;  %6435 = vpow2.f32 %v6232_v54  ;;  %v2613_v56 = vsel %vm2612_vm10, %v6406_v26, %v2609_v28  ;;  %3118 = vst.msk [vmem:[#allocation3 + $0x21] sm:$0xff] %vm13387_vm3, %v3086_v48  ;;  %v6240_v54 = vmul.f32 -1.442695, %v9091_v59  ;;  %v6244_v28 = vmul.f32 -1.442695, %v9103_v41 }
 0x46f   : > { %v6426_v20 = vpop.eup %6425  ;;  %6437 = vpow2.f32 %v6233_v1  ;;  %v2618_v45 = vsel %vm2615_vm11, %v2617_v34, %v2613_v56  ;;  %v6241_v1 = vmul.f32 -1.442695, %v9094_v43  ;;  %13855 = vst [vmem:[#allocation147_spill] sm:$0xff] %v9198_v18  ;;  %v9201_v56 = vadd.f32 1.0, %v9163_v5 }
 0x470   : > { %v6428_v46 = vpop.eup %6427  ;;  %6439 = vpow2.f32 %v6234_v23  ;;  %v3085_v47 = vmul.f32 %v2618_v45, %v9115_v44  ;;  %v6242_v44 = vmul.f32 -1.442695, %v9097_v30  ;;  %v9209_v45 = vadd.f32 1.0, %v9170_v14 }
 0x471   : > { %v6430_v38 = vpop.eup %6429  ;;  %6441 = vpow2.f32 %v6235_v11  ;;  %v6243_v11 = vmul.f32 -1.442695, %v9100_v0  ;;  %v9211_v51 = vadd.f32 1.0, %v6418_v35  ;;  %v9216_v8 = vadd.f32 1.0, %v6422_v40 }
 0x472   : > { %v6432_v26 = vpop.eup %6431  ;;  %3117 = vst.msk [vmem:[#allocation3 + $0x19] sm:$0xff] %vm13387_vm3, %v3085_v47  ;;  %6443 = vrcp.f32 %v9175_v57  ;;  %v9218_v5 = vadd.f32 1.0, %v6424_v2  ;;  %v9223_v14 = vadd.f32 1.0, %v6428_v46  ;;  %vm2670_vm1 = vweird.f32 %v9195_v36 }
 0x473   : > { %v6434_v62 = vpop.eup %6433  ;;  %6445 = vpow2.f32 %v6237_v7  ;;  %v9204_v7 = vadd.f32 1.0, %v9167_v3  ;;  %13856 = vst [vmem:[#allocation89_spill] sm:$0xff] %v9209_v45  ;;  %v13882_v13 = vand.u32 2147483648, %v9191_v33  ;;  %v13884_v16 = vand.u32 2147483648, %v9195_v36 }
 0x474   : > { %v6436_v23 = vpop.eup %6435  ;;  %6447 = vpow2.f32 %v6238_v10  ;;  %13857 = vst [vmem:[#allocation163_spill] sm:$0xff] %v9211_v51  ;;  %v9213_v10 = vadd.f32 1.0, %v6420_v32  ;;  %v13885_v27 = vand.u32 2147483647, %v9195_v36  ;;  %vm2655_vm10 = vweird.f32 %v9191_v33 }
 0x475   : > { %v6438_v15 = vpop.eup %6437  ;;  %6449 = vpow2.f32 %v6239_v61  ;;  %v3184_v48 = vld [vmem:[#allocation3 + $0x21] sm:$0xff]  ;;  %13859 = vst [vmem:[#allocation38_spill] sm:$0xff] %v9216_v8  ;;  %v9242_v40 = vadd.f32 1.0, %v6436_v23  ;;  %v9403_v52 = vor.u32 1.1754944e-38, %v13882_v13  ;;  %v2677_v31 = vor.u32 1.1754944e-38, %v13884_v16 }
 0x476   : > { %v6440_v22 = vpop.eup %6439  ;;  %6451 = vpow2.f32 %v6240_v54  ;;  %13858 = vst [vmem:[#allocation190_spill] sm:$0xff] %v9213_v10  ;;  %3476 = vrot.lane.b32.xlu1 %v3184_v48, %s6703_s8  ;;  %v9238_v48 = vadd.f32 1.0, %v6434_v62  ;;  %v9244_v35 = vadd.f32 1.0, %v6438_v15  ;;  %vm9412_vm5 = vcmp.eq.f32.partialorder %v13885_v27, 8.507059e+37 }
 0x477   : > { %v6442_v34 = vpop.eup %6441  ;;  %6453 = vpow2.f32 %v6241_v1  ;;  %13860 = vst [vmem:[#allocation101_spill] sm:$0xff] %v9218_v5  ;;  %v9221_v1 = vadd.f32 1.0, %v6426_v20  ;;  %v13889_v13 = vand.u32 2147483648, %v9198_v18  ;;  %v13891_v16 = vand.u32 2147483648, %v9201_v56 }
 0x478   : > { %v9206_v12 = vpop.eup %6443  ;;  %6455 = vpow2.f32 %v6242_v44  ;;  %13861 = vst [vmem:[#allocation69_spill] sm:$0xff] %v9223_v14  ;;  %v9227_v44 = vadd.f32 1.0, %v6430_v38  ;;  %v2689_v38 = vand.u32 2147483647, %v9175_v57  ;;  %v9259_v30 = vadd.f32 1.0, %v6442_v34 }
 0x479   : > { %v6446_v47 = vpop.eup %6445  ;;  %6457 = vpow2.f32 %v6243_v11  ;;  %v3183_v3 = vld [vmem:[#allocation3 + $0x19] sm:$0xff]  ;;  %v2681_v2 = vmul.f32 %v9206_v12, %v9175_v57  ;;  %13863 = vst [vmem:[#allocation117_spill] sm:$0xff] %v9238_v48  ;;  %vm2686_vm13 = vweird.f32 %v9206_v12  ;;  %v9422_v17 = vor.u32 1.1754944e-38, %v13889_v13 }
 0x47a   : > { %v6448_v54 = vpop.eup %6447  ;;  %6459 = vpow2.f32 %v6244_v28  ;;  %3474 = vrot.lane.b32.xlu0 %v3183_v3, %s6703_s8  ;;  %13862 = vst [vmem:[#allocation126_spill] sm:$0xff] %v9227_v44  ;;  %v9233_v28 = vadd.f32 1.0, %v6432_v26  ;;  %v2691_v26 = vand.u32 2147483648, %v9175_v57  ;;  %vm2687_vm14 = vmor %vm2685_vm12, %vm2686_vm13  ;;  %vm2690_vm15 = vcmp.eq.f32.partialorder %v2689_v38, 8.507059e+37 }
 0x47b   : > { %v6450_v32 = vpop.eup %6449  ;;  %6461 = vrcp.f32 %v9191_v33  ;;  %v2682_v3 = vsub.f32 1.0, %v2681_v2  ;;  %13864 = vst [vmem:[#allocation143_spill] sm:$0xff] %v9242_v40  ;;  %v9252_v2 = vadd.f32 1.0, %v6440_v22  ;;  %v9266_v22 = vadd.f32 1.0, %v6446_v47 }
 0x47c   : > { %v6452_v11 = vpop.eup %6451  ;;  %6463 = vrcp.f32 %v9195_v36  ;;  %13865 = vst [vmem:[#allocation130_spill] sm:$0xff] %v9244_v35  ;;  %v2692_v34 = vor.u32 1.1754944e-38, %v2691_v26  ;;  %v9281_v23 = vadd.f32 1.0, %v6448_v54  ;;  %v9287_v26 = vadd.f32 1.0, %v6450_v32 }
 0x47d   : > { %v6454_v46 = vpop.eup %6453  ;;  %6465 = vrcp.f32 %v9198_v18  ;;  %v2683_v62 = vmul.f32 %v9206_v12, %v2682_v3  ;;  %13866 = vst [vmem:[#allocation94_spill] sm:$0xff] %v9252_v2  ;;  %v9430_v63 = vor.u32 1.1754944e-38, %v13891_v16 }
 0x47e   : > { %v6456_v61 = vpop.eup %6455  ;;  %6467 = vrcp.f32 %v9201_v56  ;;  %13867 = vst [vmem:[#allocation67_spill] sm:$0xff] %v9259_v30  ;;  %v9301_v32 = vadd.f32 1.0, %v6454_v46 }
 0x47f   : > { %v6458_v20 = vpop.eup %6457  ;;  %6469 = vrcp.f32 %v9204_v7  ;;  %v2684_v3 = vadd.f32 %v9206_v12, %v2683_v62  ;;  %13868 = vst [vmem:[#allocation168_spill] sm:$0xff] %v9266_v22 }
 0x480   : > { %v6460_v41 = vpop.eup %6459  ;;  %6471 = vrcp.f32 %v9209_v45  ;;  %13870 = vst [vmem:[#allocation185_spill] sm:$0xff] %v9281_v23 }
 0x481   : > { %v9257_v0 = vpop.eup %6461  ;;  %6473 = vrcp.f32 %v9211_v51  ;;  %v2688_v62 = vsel %vm2687_vm14, %v9206_v12, %v2684_v3  ;;  %13871 = vst [vmem:[#allocation172_spill] sm:$0xff] %v9287_v26  ;;  %v9294_v3 = vadd.f32 1.0, %v6452_v11  ;;  %v9310_v11 = vadd.f32 1.0, %v6458_v20 }
 0x482   : > { %v9264_v43 = vpop.eup %6463  ;;  %6475 = vrcp.f32 %v9213_v10  ;;  %v2693_v57 = vsel %vm2690_vm15, %v2692_v34, %v2688_v62  ;;  %13875 = vst [vmem:[#allocation128_spill] sm:$0xff] %v9301_v32  ;;  %v9303_v62 = vadd.f32 1.0, %v6456_v61  ;;  %v9317_v61 = vadd.f32 1.0, %v6460_v41 }
 0x483   : > { %v9274_v15 = vpop.eup %6465  ;;  %6477 = vrcp.f32 %v9216_v8  ;;  %v3090_v12 = vmul.f32 %v2693_v57, %v9124_v37  ;;  %13873 = vst [vmem:[#allocation83_spill] sm:$0xff] %v9294_v3  ;;  %v2666_v41 = vmul.f32 %v9264_v43, %v9195_v36  ;;  %v2651_v54 = vmul.f32 %v9257_v0, %v9191_v33 }
 0x484   : > { %13869 = vst [vmem:[#allocation158_spill] sm:$0xff] %v9274_v15  ;;  %v9279_v47 = vpop.eup %6467  ;;  %6479 = vrcp.f32 %v9218_v5  ;;  %vm2671_vm2 = vweird.f32 %v9264_v43  ;;  %v9418_v55 = vmul.f32 %v9274_v15, %v9198_v18  ;;  %vm2656_vm6 = vweird.f32 %v9257_v0 }
 0x485   : > { %v9285_v25 = vpop.eup %6469  ;;  %6481 = vrcp.f32 %v9221_v1  ;;  %13876 = vst [vmem:[#allocation118_spill] sm:$0xff] %v9303_v62  ;;  %v9426_v42 = vmul.f32 %v9279_v47, %v9201_v56  ;;  %vm2672_vm13 = vmor %vm2670_vm1, %vm2671_vm2  ;;  %vm2730_vm14 = vweird.f32 %v9204_v7  ;;  %vm2716_vm1 = vweird.f32 %v9279_v47 }
 0x486   : > { %v9292_v38 = vpop.eup %6471  ;;  %6483 = vrcp.f32 %v9223_v14  ;;  %3122 = vst.msk [vmem:[#allocation3 + $0x51] sm:$0xff] %vm13387_vm3, %v3090_v12  ;;  %v9436_v49 = vmul.f32 %v9285_v25, %v9204_v7  ;;  %vm2731_vm12 = vweird.f32 %v9285_v25  ;;  %vm2657_vm2 = vmor %vm2655_vm10, %vm2656_vm6 }
 0x487   : > { %13872 = vst [vmem:[#allocation49_spill] sm:$0xff] %v9292_v38  ;;  %v9299_v34 = vpop.eup %6473  ;;  %6485 = vrcp.f32 %v9227_v44  ;;  %v9444_v13 = vmul.f32 %v9292_v38, %v9209_v45  ;;  %v2667_v38 = vsub.f32 1.0, %v2666_v41  ;;  %v13908_v41 = vand.u32 2147483648, %v9218_v5  ;;  %vm9678_vm9 = vmor %vm2730_vm14, %vm2731_vm12 }
 0x488   : > { %13874 = vst [vmem:[#allocation55_spill] sm:$0xff] %v9299_v34  ;;  %v9308_v37 = vpop.eup %6475  ;;  %6487 = vrcp.f32 %v9233_v28 }
 0x489   : > { %13877 = vst [vmem:[#allocation148_spill] sm:$0xff] %v9310_v11  ;;  %v9315_v46 = vpop.eup %6477  ;;  %6489 = vrcp.f32 %v9238_v48 }
 0x48a   : > { %13878 = vst [vmem:[#allocation139_spill] sm:$0xff] %v9315_v46  ;;  %v9322_v12 = vpop.eup %6479  ;;  %6491 = vrcp.f32 %v9242_v40 }
 0x48b   : > { %13879 = vst [vmem:[#allocation81_spill] sm:$0xff] %v9317_v61  ;;  %v9328_v9 = vpop.eup %6481  ;;  %6493 = vrcp.f32 %v9244_v35 }
 0x48c   : > { %13880 = vst [vmem:[#allocation59_spill] sm:$0xff] %v9322_v12  ;;  %v9334_v21 = vpop.eup %6483  ;;  %6495 = vrcp.f32 %v9252_v2 }
 0x48d   : > { %v9340_v50 = vpop.eup %6485  ;;  %6497 = vrcp.f32 %v9259_v30  ;;  %v3188_v60 = vld [vmem:[#allocation3 + $0x51] sm:$0xff]  ;;  %13883 = vst [vmem:[#allocation159_spill] sm:$0xff] %v9403_v52  ;;  %v13894_v52 = vand.u32 2147483648, %v9204_v7 }
 0x48e   : > { %13881 = vst [vmem:[#allocation170_spill] sm:$0xff] %v9340_v50  ;;  %v9346_v53 = vpop.eup %6487  ;;  %6499 = vrcp.f32 %v9266_v22  ;;  %3484 = vrot.lane.b32.xlu2 %v3188_v60, %s6703_s8 }
 0x48f   : > { %v9352_v58 = vpop.eup %6489  ;;  %6501 = vrcp.f32 %v9281_v23  ;;  %13888 = vst [vmem:[#allocation191_spill] sm:$0xff] %v9418_v55  ;;  %v9440_v15 = vor.u32 1.1754944e-38, %v13894_v52  ;;  %v13900_v55 = vand.u32 2147483648, %v9211_v51 }
 0x490   : > { %v9359_v20 = vpop.eup %6491  ;;  %6503 = vrcp.f32 %v9287_v26  ;;  %13890 = vst [vmem:[#allocation181_spill] sm:$0xff] %v9422_v17  ;;  %v13897_v17 = vand.u32 2147483648, %v9209_v45 }
 0x491   : > { %v9365_v29 = vpop.eup %6493  ;;  %6505 = vrcp.f32 %v9294_v3  ;;  %13892 = vst [vmem:[#allocation51_spill] sm:$0xff] %v9430_v63  ;;  %v9455_v63 = vmul.f32 %v9299_v34, %v9211_v51  ;;  %v9459_v52 = vor.u32 1.1754944e-38, %v13900_v55  ;;  %v13905_v34 = vand.u32 2147483648, %v9216_v8 }
 0x492   : > { %v9371_v60 = vpop.eup %6495  ;;  %6507 = vrcp.f32 %v9301_v32  ;;  %13895 = vst [vmem:[#allocation70_spill] sm:$0xff] %v9440_v15  ;;  %v9448_v18 = vor.u32 1.1754944e-38, %v13897_v17  ;;  %v9463_v15 = vmul.f32 %v9308_v37, %v9213_v10  ;;  %v13903_v17 = vand.u32 2147483648, %v9213_v10 }
 0x493   : > { %v9377_v39 = vpop.eup %6497  ;;  %6509 = vrcp.f32 %v9303_v62  ;;  %13896 = vst [vmem:[#allocation123_spill] sm:$0xff] %v9444_v13  ;;  %v9473_v13 = vmul.f32 %v9315_v46, %v9216_v8  ;;  %v9477_v51 = vor.u32 1.1754944e-38, %v13905_v34  ;;  %v9481_v55 = vmul.f32 %v9322_v12, %v9218_v5 }
 0x494   : > { %v9383_v19 = vpop.eup %6499  ;;  %6511 = vrcp.f32 %v9310_v11  ;;  %13898 = vst [vmem:[#allocation109_spill] sm:$0xff] %v9448_v18  ;;  %v9469_v18 = vor.u32 1.1754944e-38, %v13903_v17  ;;  %v9488_v17 = vor.u32 1.1754944e-38, %v13908_v41  ;;  %v13910_v8 = vand.u32 2147483648, %v9221_v1 }
 0x495   : > { %v9389_v24 = vpop.eup %6501  ;;  %6513 = vrcp.f32 %v9317_v61  ;;  %13901 = vst [vmem:[#allocation140_spill] sm:$0xff] %v9459_v52  ;;  %v9501_v12 = vmul.f32 %v9334_v21, %v9223_v14  ;;  %v13912_v10 = vand.u32 2147483648, %v9223_v14  ;;  %v9509_v41 = vmul.f32 %v9340_v50, %v9227_v44 }
 0x496   : > { %v9397_v57 = vpop.eup %6503  ;;  %13904 = vst [vmem:[#allocation71_spill] sm:$0xff] %v9469_v18  ;;  %v9492_v18 = vmul.f32 %v9328_v9, %v9221_v1  ;;  %v9496_v34 = vor.u32 1.1754944e-38, %v13910_v8  ;;  %v13916_v8 = vand.u32 2147483647, %v9191_v33  ;;  %v2652_v50 = vsub.f32 1.0, %v2651_v54 }
 0x497   : > { %v9408_v59 = vpop.eup %6505  ;;  %13906 = vst [vmem:[#allocation164_spill] sm:$0xff] %v9477_v51  ;;  %v2668_v51 = vmul.f32 %v9264_v43, %v2667_v38  ;;  %v9505_v46 = vor.u32 1.1754944e-38, %v13912_v10  ;;  %v13919_v10 = vand.u32 2147483648, %v9233_v28  ;;  %v13925_v54 = vand.u32 2147483648, %v9244_v35  ;;  %v13952_v38 = vld [vmem:[#allocation55_spill] sm:$0xff] }
 0x498   : > { %v9432_v27 = vpop.eup %6507  ;;  %13909 = vst [vmem:[#allocation193_spill] sm:$0xff] %v9488_v17  ;;  %v13914_v17 = vand.u32 2147483648, %v9227_v44  ;;  %vm9517_vm11 = vcmp.eq.f32.partialorder %v13916_v8, 8.507059e+37  ;;  %v13921_v8 = vand.u32 2147483648, %v9238_v48  ;;  %v9541_v44 = vmul.f32 %v9359_v20, %v9242_v40 }
 0x499   : > { %13893 = vst [vmem:[#allocation102_spill] sm:$0xff] %v9432_v27  ;;  %v9450_v16 = vpop.eup %6509  ;;  %v2669_v14 = vadd.f32 %v9264_v43, %v2668_v51  ;;  %v9553_v51 = vmul.f32 %v9365_v29, %v9244_v35  ;;  %v13929_v35 = vand.u32 2147483648, %v9259_v30 }
 0x49a   : > { %13899 = vst [vmem:[#allocation53_spill] sm:$0xff] %v9450_v16  ;;  %v9465_v45 = vpop.eup %6511  ;;  %v9513_v5 = vor.u32 1.1754944e-38, %v13914_v17  ;;  %v9533_v17 = vmul.f32 %v9352_v58, %v9238_v48  ;;  %v13944_v33 = vld [vmem:[#allocation123_spill] sm:$0xff] }
 0x49b   : > { %13902 = vst [vmem:[#allocation98_spill] sm:$0xff] %v9465_v45  ;;  %v9483_v52 = vpop.eup %6513  ;;  %v9578_v48 = vor.u32 1.1754944e-38, %v13929_v35  ;;  %v13936_v35 = vand.u32 2147483648, %v9281_v23 }
 0x49c   : > { %13907 = vst [vmem:[#allocation104_spill] sm:$0xff] %v9483_v52 }
 0x49d   : > { %13911 = vst [vmem:[#allocation182_spill] sm:$0xff] %v9496_v34  ;;  %v9523_v34 = vmul.f32 %v9346_v53, %v9233_v28 }
 0x49e   : > { %13913 = vst [vmem:[#allocation41_spill] sm:$0xff] %v9505_v46  ;;  %v9527_v46 = vor.u32 1.1754944e-38, %v13919_v10  ;;  %v13923_v10 = vand.u32 2147483648, %v9242_v40  ;;  %v9571_v40 = vmul.f32 %v9377_v39, %v9259_v30  ;;  %v13953_v30 = vld [vmem:[#allocation89_spill] sm:$0xff] }
 0x49f   : > { %13915 = vst [vmem:[#allocation106_spill] sm:$0xff] %v9513_v5  ;;  %v9537_v5 = vor.u32 1.1754944e-38, %v13921_v8  ;;  %v9557_v8 = vor.u32 1.1754944e-38, %v13925_v54  ;;  %vm2745_vm0 = vweird.f32 %v13953_v30 }
 0x4a0   : > { %13920 = vst [vmem:[#allocation74_spill] sm:$0xff] %v9527_v46  ;;  %v9545_v46 = vor.u32 1.1754944e-38, %v13923_v10  ;;  %v2673_v10 = vsel %vm2672_vm13, %v9264_v43, %v2669_v14  ;;  %v9582_v43 = vmul.f32 %v9383_v19, %v9266_v22 }
 0x4a1   : > { %13922 = vst [vmem:[#allocation129_spill] sm:$0xff] %v9537_v5  ;;  %v9561_v5 = vmul.f32 %v9371_v60, %v9252_v2  ;;  %v2678_v54 = vsel %vm9412_vm5, %v2677_v31, %v2673_v10  ;;  %v9598_v31 = vmul.f32 %v9389_v24, %v9281_v23  ;;  %v9602_v10 = vor.u32 1.1754944e-38, %v13936_v35 }
 0x4a2   : > { %13924 = vst [vmem:[#allocation119_spill] sm:$0xff] %v9545_v46  ;;  %v13927_v46 = vand.u32 2147483648, %v9252_v2  ;;  %v3089_v14 = vmul.f32 %v2678_v54, %v9016_v4  ;;  %v9606_v4 = vmul.f32 %v9397_v57, %v9287_v26  ;;  %v9615_v54 = vmul.f32 %v9408_v59, %v9294_v3 }
 0x4a3   : > { %13926 = vst [vmem:[#allocation144_spill] sm:$0xff] %v9557_v8  ;;  %v2727_v8 = vsub.f32 1.0, %v9436_v49  ;;  %v13934_v49 = vand.u32 2147483648, %v9266_v22  ;;  %vm2715_vm5 = vweird.f32 %v9201_v56  ;;  %v13946_v23 = vand.u32 2147483647, %v9201_v56 }
 0x4a4   : > { %v9567_v36 = vor.u32 1.1754944e-38, %v13927_v46  ;;  %13930 = vst [vmem:[#allocation99_spill] sm:$0xff] %v9578_v48  ;;  %v2653_v46 = vmul.f32 %v9257_v0, %v2652_v50  ;;  %v13938_v50 = vand.u32 2147483648, %v9287_v26  ;;  %v9626_v48 = vmul.f32 %v9432_v27, %v9301_v32  ;;  %v13945_v26 = vld [vmem:[#allocation159_spill] sm:$0xff]  ;;  %v13963_v27 = vld [vmem:[#allocation101_spill] sm:$0xff]  ;;  %vm9728_vm7 = vmor %vm2715_vm5, %vm2716_vm1 }
 0x4a5   : > { %v9594_v6 = vor.u32 1.1754944e-38, %v13934_v49  ;;  %13937 = vst [vmem:[#allocation171_spill] sm:$0xff] %v9602_v10  ;;  %v2712_v49 = vsub.f32 1.0, %v9426_v42  ;;  %v13940_v10 = vand.u32 2147483648, %v9294_v3  ;;  %v2728_v42 = vmul.f32 %v9285_v25, %v2727_v8 }
 0x4a6   : > { %13928 = vst [vmem:[#allocation133_spill] sm:$0xff] %v9567_v36  ;;  %v13931_v36 = vand.u32 2147483647, %v9204_v7  ;;  %v2654_v35 = vadd.f32 %v9257_v0, %v2653_v46  ;;  %v9644_v46 = vmul.f32 %v9483_v52, %v9317_v61  ;;  %v2742_v32 = vsub.f32 1.0, %v13944_v33  ;;  %v13950_v33 = vld [vmem:[#allocation64_spill] sm:$0xff]  ;;  %v13951_v52 = vld [vmem:[#allocation147_spill] sm:$0xff] }
 0x4a7   : > { %13935 = vst [vmem:[#allocation72_spill] sm:$0xff] %v9594_v6  ;;  %v9622_v6 = vor.u32 1.1754944e-38, %v13940_v10  ;;  %v13942_v10 = vld [vmem:[#allocation191_spill] sm:$0xff]  ;;  %v2757_v8 = vsub.f32 1.0, %v9455_v63  ;;  %v2772_v3 = vsub.f32 1.0, %v9463_v15  ;;  %vm9657_vm6 = vcmp.eq.f32.partialorder %v13946_v23, 8.507059e+37 }
 0x4a8   : > { %vm9588_vm15 = vcmp.eq.f32.partialorder %v13931_v36, 8.507059e+37  ;;  %v9611_v36 = vor.u32 1.1754944e-38, %v13938_v50  ;;  %3121 = vst.msk [vmem:[#allocation3 + $0x49] sm:$0xff] %vm13387_vm3, %v3089_v14  ;;  %v9630_v50 = vmul.f32 %v9450_v16, %v9303_v62  ;;  %v9640_v14 = vmul.f32 %v9465_v45, %v9310_v11  ;;  %v13943_v62 = vld [vmem:[#allocation158_spill] sm:$0xff] }
 0x4a9   : > { %13941 = vst [vmem:[#allocation186_spill] sm:$0xff] %v9622_v6  ;;  %v2697_v6 = vsub.f32 1.0, %v13942_v10  ;;  %vm2701_vm13 = vweird.f32 %v13943_v62  ;;  %v13949_v10 = vld [vmem:[#allocation49_spill] sm:$0xff]  ;;  %v2713_v15 = vmul.f32 %v9279_v47, %v2712_v49  ;;  %v2832_v23 = vsub.f32 1.0, %v9501_v12  ;;  %v13957_v49 = vld [vmem:[#allocation139_spill] sm:$0xff]  ;;  %v13960_v16 = vld [vmem:[#allocation70_spill] sm:$0xff] }
 0x4aa   : > { %13939 = vst [vmem:[#allocation160_spill] sm:$0xff] %v9611_v36  ;;  %v2658_v36 = vsel %vm2657_vm2, %v9257_v0, %v2654_v35  ;;  %vm2746_vm10 = vweird.f32 %v13949_v10  ;;  %v2787_v0 = vsub.f32 1.0, %v9473_v13  ;;  %v2802_v35 = vsub.f32 1.0, %v9481_v55  ;;  %v13961_v45 = vld [vmem:[#allocation38_spill] sm:$0xff] }
 0x4ab   : > { %v2663_v11 = vsel %vm9517_vm11, %v13945_v26, %v2658_v36  ;;  %vm2700_vm2 = vweird.f32 %v13951_v52  ;;  %vm2761_vm11 = vweird.f32 %v13952_v38  ;;  %v2817_v26 = vsub.f32 1.0, %v9492_v18 }
 0x4ac   : > { %v3088_v63 = vmul.f32 %v2663_v11, %v13950_v33  ;;  %v2847_v36 = vsub.f32 1.0, %v9509_v41  ;;  %v2729_v22 = vadd.f32 %v9285_v25, %v2728_v42  ;;  %v2862_v18 = vsub.f32 1.0, %v9523_v34  ;;  %v13956_v41 = vld [vmem:[#allocation163_spill] sm:$0xff]  ;;  %vm9786_vm4 = vmor %vm2700_vm2, %vm2701_vm13 }
 0x4ad   : > { %v2877_v12 = vsub.f32 1.0, %v9533_v17  ;;  %v2892_v13 = vsub.f32 1.0, %v9541_v44  ;;  %v2907_v55 = vsub.f32 1.0, %v9553_v51  ;;  %vm2760_vm8 = vweird.f32 %v13956_v41  ;;  %v13958_v44 = vld [vmem:[#allocation190_spill] sm:$0xff]  ;;  %v13959_v17 = vld [vmem:[#allocation59_spill] sm:$0xff]  ;;  %vm9810_vm2 = vmor %vm2745_vm0, %vm2746_vm10 }
 0x4ae   : > { %3120 = vst.msk [vmem:[#allocation3 + $0x39] sm:$0xff] %vm13387_vm3, %v3088_v63  ;;  %v2922_v7 = vsub.f32 1.0, %v9561_v5  ;;  %v2937_v33 = vsub.f32 1.0, %v9571_v40  ;;  %v2733_v34 = vsel %vm9678_vm9, %v9285_v25, %v2729_v22  ;;  %v2982_v51 = vsub.f32 1.0, %v9598_v31  ;;  %vm9832_vm10 = vmor %vm2760_vm8, %vm2761_vm11 }
 0x4af   : > { %v3187_v42 = vld [vmem:[#allocation3 + $0x49] sm:$0xff]  ;;  %v2698_v63 = vmul.f32 %v13943_v62, %v2697_v6  ;;  %v2738_v5 = vsel %vm9588_vm15, %v13960_v16, %v2733_v34  ;;  %v2714_v40 = vadd.f32 %v9279_v47, %v2713_v15  ;;  %v13964_v6 = vand.u32 2147483647, %v13951_v52  ;;  %v13970_v16 = vld [vmem:[#allocation69_spill] sm:$0xff] }
 0x4b0   : > { %3482 = vrot.lane.b32.xlu1 %v3187_v42, %s6703_s8  ;;  %v13962_v42 = vld [vmem:[#allocation39_spill] sm:$0xff]  ;;  %v2743_v11 = vmul.f32 %v13949_v10, %v2742_v32  ;;  %v2773_v15 = vmul.f32 %v9308_v37, %v2772_v3  ;;  %v2788_v34 = vmul.f32 %v13957_v49, %v2787_v0  ;;  %v2803_v32 = vmul.f32 %v13959_v17, %v2802_v35 }
 0x4b1   : > { %v3093_v31 = vmul.f32 %v2738_v5, %v13962_v42  ;;  %vm9713_vm12 = vcmp.eq.f32.partialorder %v13964_v6, 8.507059e+37  ;;  %v13967_v5 = vld [vmem:[#allocation170_spill] sm:$0xff]  ;;  %v2758_v6 = vmul.f32 %v13952_v38, %v2757_v8  ;;  %v2818_v56 = vmul.f32 %v9328_v9, %v2817_v26 }
 0x4b2   : > { %v2833_v22 = vmul.f32 %v9334_v21, %v2832_v23  ;;  %v9742_v25 = vadd.f32 %v13943_v62, %v2698_v63  ;;  %v2718_v3 = vsel %vm9728_vm7, %v9279_v47, %v2714_v40  ;;  %v13971_v8 = vld [vmem:[#allocation126_spill] sm:$0xff]  ;;  %v13972_v0 = vand.u32 2147483647, %v13953_v30 }
 0x4b3   : > { %3125 = vst.msk [vmem:[#allocation3 + $0x79] sm:$0xff] %vm13387_vm3, %v3093_v31  ;;  %v13973_v35 = vmov 0  ;;  %v13976_v31 = vand.u32 2147483647, %v13956_v41  ;;  %v13977_v26 = vmov 0  ;;  %v2848_v40 = vmul.f32 %v13967_v5, %v2847_v36 }
 0x4b4   : > { %vm9750_vm5 = vcmp.eq.f32.partialorder %v13972_v0, 8.507059e+37  ;;  %v13980_v23 = vand.u32 2147483647, %v13958_v44  ;;  %v2863_v42 = vmul.f32 %v9346_v53, %v2862_v18  ;;  %v9769_v0 = vmul.f32 %v9352_v58, %v2877_v12 }
 0x4b5   : > { %v13974_v35 = vsel %vm9750_vm5, 4294967295, %v13973_v35  ;;  %vm9756_vm15 = vcmp.eq.f32.partialorder %v13976_v31, 8.507059e+37  ;;  %v3186_v47 = vld [vmem:[#allocation3 + $0x39] sm:$0xff]  ;;  %v2893_v61 = vmul.f32 %v9359_v20, %v2892_v13  ;;  %v9793_v18 = vmul.f32 %v9365_v29, %v2907_v55  ;;  %v14053_v13 = vld [vmem:[#allocation40_spill] sm:$0xff] }
 0x4b6   : > { %13975 = vst [vmem:[#allocation175_spill] sm:$0xff] %v13974_v35  ;;  %v13978_v26 = vsel %vm9756_vm15, 4294967295, %v13977_v26  ;;  %vm9762_vm14 = vcmp.eq.f32.partialorder %v13980_v23, 8.507059e+37  ;;  %v13983_v35 = vld [vmem:[#allocation51_spill] sm:$0xff]  ;;  %3480 = vrot.lane.b32.xlu0 %v3186_v47, %s6703_s8  ;;  %v9796_v12 = vmul.f32 %v9371_v60, %v2922_v7  ;;  %v13991_v52 = vmov 0 }
 0x4b7   : > { %13979 = vst [vmem:[#allocation52_spill] sm:$0xff] %v13978_v26  ;;  %v2723_v31 = vsel %vm9657_vm6, %v13983_v35, %v2718_v3  ;;  %v13984_v26 = vand.u32 2147483647, %v13961_v45  ;;  %v13989_v3 = vld [vmem:[#allocation80_spill] sm:$0xff]  ;;  %v9815_v55 = vmul.f32 %v9377_v39, %v2937_v33  ;;  %v2744_v7 = vadd.f32 %v13949_v10, %v2743_v11 }
 0x4b8   : > { %v3092_v35 = vmul.f32 %v2723_v31, %v13989_v3  ;;  %v2759_v47 = vadd.f32 %v13952_v38, %v2758_v6  ;;  %v2774_v31 = vadd.f32 %v9308_v37, %v2773_v15  ;;  %v13996_v3 = vld [vmem:[#allocation117_spill] sm:$0xff]  ;;  %v14002_v33 = vsub.f32 1.0, %v9582_v43 }
 0x4b9   : > { %vm9777_vm1 = vcmp.eq.f32.partialorder %v13984_v26, 8.507059e+37  ;;  %v13990_v26 = vand.u32 2147483647, %v13963_v27  ;;  %v9842_v15 = vmul.f32 %v9389_v24, %v2982_v51  ;;  %v9845_v6 = vadd.f32 %v13957_v49, %v2788_v34 }
 0x4ba   : > { %v9839_v11 = vmul.f32 %v9383_v19, %v14002_v33  ;;  %3124 = vst.msk [vmem:[#allocation3 + $0x69] sm:$0xff] %vm13387_vm3, %v3092_v35  ;;  %v2703_v41 = vsel %vm9786_vm4, %v13943_v62, %v9742_v25  ;;  %v14006_v43 = vand.u32 2147483647, %v13970_v16  ;;  %v14007_v33 = vmov 0 }
 0x4bb   : > { %vm9801_vm6 = vcmp.eq.f32.partialorder %v13990_v26, 8.507059e+37  ;;  %v13997_v26 = vand.u32 2147483647, %v9221_v1  ;;  %14004 = vst [vmem:[#allocation131_spill] sm:$0xff] %v9842_v15  ;;  %vm14010_vm9 = vweird.f32 %v9308_v37  ;;  %vm14011_vm7 = vweird.f32 %v13958_v44 }
 0x4bc   : > { %v13992_v52 = vsel %vm9801_vm6, 4294967295, %v13991_v52  ;;  %14003 = vst [vmem:[#allocation61_spill] sm:$0xff] %v9839_v11  ;;  %vm9855_vm11 = vcmp.eq.f32.partialorder %v14006_v43, 8.507059e+37  ;;  %vm9864_vm3 = vmor %vm14011_vm7, %vm14010_vm9  ;;  %v14014_v62 = vsub.f32 1.0, %v9606_v4  ;;  %v14016_v34 = vsub.f32 1.0, %v9615_v54  ;;  %v14019_v43 = vld [vmem:[#allocation102_spill] sm:$0xff] }
 0x4bd   : > { %13993 = vst [vmem:[#allocation90_spill] sm:$0xff] %v13992_v52  ;;  %vm9823_vm13 = vcmp.eq.f32.partialorder %v13997_v26, 8.507059e+37  ;;  %v13998_v52 = vmov 0  ;;  %v14005_v26 = vld [vmem:[#allocation143_spill] sm:$0xff]  ;;  %v14008_v33 = vsel %vm9855_vm11, 4294967295, %v14007_v33  ;;  %v14018_v35 = vsub.f32 1.0, %v9626_v48 }
 0x4be   : > { %v13999_v52 = vsel %vm9823_vm13, 4294967295, %v13998_v52  ;;  %14009 = vst [vmem:[#allocation120_spill] sm:$0xff] %v14008_v33  ;;  %v9871_v25 = vmul.f32 %v9397_v57, %v14014_v62  ;;  %v9876_v36 = vmul.f32 %v9408_v59, %v14016_v34  ;;  %v2804_v44 = vadd.f32 %v13959_v17, %v2803_v32  ;;  %v14021_v33 = vld [vmem:[#allocation130_spill] sm:$0xff]  ;;  %v14031_v32 = vld [vmem:[#allocation53_spill] sm:$0xff] }
 0x4bf   : > { %v9881_v15 = vmul.f32 %v14019_v43, %v14018_v35  ;;  %v14022_v11 = vand.u32 2147483647, %v13971_v8  ;;  %v14023_v4 = vmov 0  ;;  %vm14026_vm0 = vweird.f32 %v13957_v49  ;;  %v14033_v34 = vld [vmem:[#allocation98_spill] sm:$0xff] }
 0x4c0   : > { %14015 = vst [vmem:[#allocation150_spill] sm:$0xff] %v9871_v25  ;;  %vm14027_vm8 = vweird.f32 %v13961_v45  ;;  %v14030_v54 = vsub.f32 1.0, %v9630_v50  ;;  %v9914_v45 = vadd.f32 %v9334_v21, %v2833_v22  ;;  %v14036_v25 = vld [vmem:[#allocation94_spill] sm:$0xff]  ;;  %vm14040_vm4 = vweird.f32 %v13959_v17 }
 0x4c1   : > { %14017 = vst [vmem:[#allocation141_spill] sm:$0xff] %v9876_v36  ;;  %vm9887_vm9 = vcmp.eq.f32.partialorder %v14022_v11, 8.507059e+37  ;;  %vm9896_vm11 = vmor %vm14027_vm8, %vm14026_vm0  ;;  %v14032_v11 = vsub.f32 1.0, %v9640_v14  ;;  %v2819_v36 = vadd.f32 %v9328_v9, %v2818_v56  ;;  %v2748_v22 = vsel %vm9810_vm2, %v13949_v10, %v2744_v7  ;;  %v14075_v14 = vld [vmem:[#allocation140_spill] sm:$0xff] }
 0x4c2   : > { %14020 = vst [vmem:[#allocation82_spill] sm:$0xff] %v9881_v15  ;;  %v14024_v4 = vsel %vm9887_vm9, 4294967295, %v14023_v4  ;;  %v9903_v62 = vmul.f32 %v14031_v32, %v14030_v54  ;;  %v9910_v15 = vld [vmem:[#allocation3 + $0x79] sm:$0xff]  ;;  %vm14041_vm9 = vweird.f32 %v13963_v27  ;;  %v2763_v56 = vsel %vm9832_vm10, %v13952_v38, %v2759_v47  ;;  %v14054_v47 = vld [vmem:[#allocation168_spill] sm:$0xff] }
 0x4c3   : > { %14025 = vst [vmem:[#allocation60_spill] sm:$0xff] %v14024_v4  ;;  %v9908_v35 = vmul.f32 %v14033_v34, %v14032_v11  ;;  %v14037_v4 = vand.u32 2147483647, %v9233_v28  ;;  %vm9928_vm13 = vmor %vm14041_vm9, %vm14040_vm4  ;;  %3490 = vrot.lane.b32.xlu2 %v9910_v15, %s6703_s8  ;;  %v14044_v27 = vld [vmem:[#allocation181_spill] sm:$0xff]  ;;  %v14045_v11 = vld [vmem:[#allocation67_spill] sm:$0xff]  ;;  %vm14049_vm10 = vweird.f32 %v9328_v9  ;;  %vm14050_vm7 = vweird.f32 %v9221_v1 }
 0x4c4   : > { %14035 = vst [vmem:[#allocation161_spill] sm:$0xff] %v9910_v15  ;;  %v2708_v54 = vsel %vm9713_vm12, %v14044_v27, %v2703_v41  ;;  %v14046_v15 = vand.u32 2147483647, %v13996_v3  ;;  %vm9958_vm0 = vmor %vm14050_vm7, %vm14049_vm10  ;;  %v2849_v10 = vadd.f32 %v13967_v5, %v2848_v40  ;;  %v9964_v38 = vadd.f32 %v9346_v53, %v2863_v42  ;;  %v14063_v42 = vld [vmem:[#allocation104_spill] sm:$0xff]  ;;  %v14064_v41 = vld [vmem:[#allocation185_spill] sm:$0xff] }
 0x4c5   : > { %14034 = vst [vmem:[#allocation173_spill] sm:$0xff] %v9908_v35  ;;  %vm9919_vm8 = vcmp.eq.f32.partialorder %v14037_v4, 8.507059e+37  ;;  %v2778_v4 = vsel %vm9864_vm3, %v9308_v37, %v2774_v31  ;;  %v2793_v2 = vsel %vm9896_vm11, %v13957_v49, %v9845_v6  ;;  %v3091_v7 = vmul.f32 %v2708_v54, %v14053_v13  ;;  %v14077_v13 = vld [vmem:[#allocation71_spill] sm:$0xff]  ;;  %v14105_v27 = vld [vmem:[#allocation42_spill] sm:$0xff] }
 0x4c6   : > { %vm9949_vm9 = vcmp.eq.f32.partialorder %v14046_v15, 8.507059e+37  ;;  %v14055_v1 = vand.u32 2147483647, %v14005_v26  ;;  %v14056_v31 = vmov 0  ;;  %vm14058_vm10 = vweird.f32 %v9334_v21  ;;  %v14160_v35 = vld [vmem:[#allocation119_spill] sm:$0xff] }
 0x4c7   : > { %vm14059_vm2 = vweird.f32 %v13970_v16  ;;  %v14062_v49 = vsub.f32 1.0, %v9644_v46  ;;  %v9994_v15 = vadd.f32 %v9352_v58, %v9769_v0  ;;  %v9997_v6 = vadd.f32 %v9359_v20, %v2893_v61  ;;  %v14073_v61 = vld [vmem:[#allocation109_spill] sm:$0xff]  ;;  %v14104_v0 = vld [vmem:[#allocation84_spill] sm:$0xff] }
 0x4c8   : > { %vm9974_vm12 = vcmp.eq.f32.partialorder %v14055_v1, 8.507059e+37  ;;  %vm9983_vm4 = vmor %vm14059_vm2, %vm14058_vm10  ;;  %v2808_v16 = vsel %vm9928_vm13, %v13959_v17, %v2804_v44  ;;  %v14065_v51 = vand.u32 2147483647, %v14021_v33  ;;  %vm14068_vm7 = vweird.f32 %v13967_v5  ;;  %v14078_v1 = vld [vmem:[#allocation172_spill] sm:$0xff]  ;;  %v14152_v50 = vld [vmem:[#allocation141_spill] sm:$0xff] }
 0x4c9   : > { %v14057_v31 = vsel %vm9974_vm12, 4294967295, %v14056_v31  ;;  %v9990_v30 = vmul.f32 %v14063_v42, %v14062_v49  ;;  %vm14069_vm3 = vweird.f32 %v13971_v8  ;;  %v2823_v17 = vsel %vm9958_vm0, %v9328_v9, %v2819_v36  ;;  %v14176_v46 = vld [vmem:[#allocation133_spill] sm:$0xff]  ;;  %v14184_v9 = vld [vmem:[#allocation99_spill] sm:$0xff] }
 0x4ca   : > { %vm10005_vm2 = vcmp.eq.f32.partialorder %v14065_v51, 8.507059e+37  ;;  %vm10014_vm12 = vmor %vm14069_vm3, %vm14068_vm7  ;;  %vm14072_vm13 = vcmask 64512   ;;  %v2753_v48 = vsel %vm9750_vm5, %v14073_v61, %v2748_v22  ;;  %v2768_v54 = vsel %vm9756_vm15, %v14075_v14, %v2763_v56  ;;  %v10055_v56 = vld [vmem:[#allocation3 + $0x69] sm:$0xff] }
 0x4cb   : > { %3123 = vst.msk [vmem:[#allocation3 + $0x61] sm:$0xff] %vm14072_vm13, %v3091_v7  ;;  %v2783_v8 = vsel %vm9762_vm14, %v14077_v13, %v2778_v4  ;;  %v14079_v49 = vand.u32 2147483647, %v14036_v25  ;;  %vm14082_vm5 = vweird.f32 %v9346_v53  ;;  %vm14083_vm13 = vweird.f32 %v9233_v28  ;;  %v14086_v28 = vld [vmem:[#allocation164_spill] sm:$0xff]  ;;  %v14087_v7 = vld [vmem:[#allocation83_spill] sm:$0xff]  ;;  %3488 = vrot.lane.b32.xlu1 %v10055_v56, %s6703_s8 }
 0x4cc   : > { %vm10043_vm10 = vmor %vm14083_vm13, %vm14082_vm5  ;;  %v10049_v63 = vadd.f32 %v9365_v29, %v9793_v18  ;;  %v10053_v22 = vadd.f32 %v9371_v60, %v9796_v12  ;;  %v2838_v4 = vsel %vm9983_vm4, %v9334_v21, %v9914_v45  ;;  %v2798_v37 = vsel %vm9777_vm1, %v14086_v28, %v2793_v2  ;;  %v14091_v45 = vld [vmem:[#allocation193_spill] sm:$0xff]  ;;  %v14093_v61 = vld [vmem:[#allocation128_spill] sm:$0xff] }
 0x4cd   : > { %vm10034_vm7 = vcmp.eq.f32.partialorder %v14079_v49, 8.507059e+37  ;;  %v14088_v18 = vand.u32 2147483647, %v14045_v11  ;;  %v10074_v12 = vadd.f32 %v9377_v39, %v9815_v55  ;;  %v2853_v21 = vsel %vm10014_vm12, %v13967_v5, %v2849_v10  ;;  %v14101_v5 = vld [vmem:[#allocation182_spill] sm:$0xff]  ;;  %v14116_v28 = vld [vmem:[#allocation120_spill] sm:$0xff]  ;;  %v14199_v44 = vld [vmem:[#allocation171_spill] sm:$0xff] }
 0x4ce   : > { %v2868_v23 = vsel %vm10043_vm10, %v9346_v53, %v9964_v38  ;;  %v2813_v40 = vsel %vm9801_vm6, %v14091_v45, %v2808_v16  ;;  %v14094_v55 = vand.u32 2147483647, %v14054_v47  ;;  %vm14097_vm12 = vweird.f32 %v9352_v58  ;;  %v14103_v38 = vld [vmem:[#allocation68_spill] sm:$0xff]  ;;  %v14106_v49 = vld [vmem:[#allocation118_spill] sm:$0xff] }
 0x4cf   : > { %vm10067_vm15 = vcmp.eq.f32.partialorder %v14088_v18, 8.507059e+37  ;;  %vm14098_vm5 = vweird.f32 %v13996_v3  ;;  %vm14102_vm6 = vnez %v13999_v52  ;;  %v3096_v16 = vmul.f32 %v2783_v8, %v14103_v38  ;;  %v14115_v8 = vld [vmem:[#allocation41_spill] sm:$0xff]  ;;  %v14118_v45 = vld [vmem:[#allocation34_spill] sm:$0xff]  ;;  %v14129_v38 = vld [vmem:[#allocation60_spill] sm:$0xff] }
 0x4d0   : > { %vm10091_vm4 = vcmp.eq.f32.partialorder %v14094_v55, 8.507059e+37  ;;  %vm10100_vm0 = vmor %vm14098_vm5, %vm14097_vm12  ;;  %v2828_v10 = vsel %vm14102_vm6, %v14101_v5, %v2823_v17  ;;  %v3094_v14 = vmul.f32 %v2753_v48, %v14104_v0  ;;  %v3095_v13 = vmul.f32 %v2768_v54, %v14105_v27  ;;  %v14114_v17 = vld [vmem:[#allocation61_spill] sm:$0xff]  ;;  %v14119_v55 = vld [vmem:[#allocation148_spill] sm:$0xff] }
 0x4d1   : > { %v14107_v36 = vand.u32 2147483647, %v14064_v41  ;;  %vm14110_vm5 = vweird.f32 %v9359_v20  ;;  %vm14111_vm12 = vweird.f32 %v14005_v26  ;;  %v2969_v48 = vadd.f32 %v9383_v19, %v14114_v17  ;;  %v14128_v53 = vld [vmem:[#allocation106_spill] sm:$0xff]  ;;  %v14132_v27 = vld [vmem:[#allocation85_spill] sm:$0xff]  ;;  %v14191_v51 = vld [vmem:[#allocation72_spill] sm:$0xff] }
 0x4d2   : > { %vm10121_vm1 = vmor %vm14111_vm12, %vm14110_vm5  ;;  %v2883_v54 = vsel %vm10100_vm0, %v9352_v58, %v9994_v15  ;;  %vm14117_vm6 = vnez %v14116_v28  ;;  %v3097_v2 = vmul.f32 %v2798_v37, %v14118_v45  ;;  %v14120_v26 = vand.u32 2147483647, %v14078_v1  ;;  %v14127_v15 = vld [vmem:[#allocation131_spill] sm:$0xff] }
 0x4d3   : > { %vm10113_vm13 = vcmp.eq.f32.partialorder %v14107_v36, 8.507059e+37  ;;  %v2843_v18 = vsel %vm14117_vm6, %v14115_v8, %v2838_v4  ;;  %vm14123_vm12 = vweird.f32 %v9365_v29  ;;  %vm14124_vm14 = vweird.f32 %v14021_v33  ;;  %v14133_v36 = vld [vmem:[#allocation81_spill] sm:$0xff]  ;;  %v14143_v28 = vld [vmem:[#allocation35_spill] sm:$0xff] }
 0x4d4   : > { %vm10138_vm5 = vcmp.eq.f32.partialorder %v14120_v26, 8.507059e+37  ;;  %vm10146_vm3 = vmor %vm14124_vm14, %vm14123_vm12  ;;  %v2984_v4 = vadd.f32 %v9389_v24, %v14127_v15  ;;  %v2898_v37 = vsel %vm10121_vm1, %v9359_v20, %v9997_v6  ;;  %vm14130_vm0 = vnez %v14129_v38  ;;  %v14141_v6 = vld [vmem:[#allocation150_spill] sm:$0xff]  ;;  %v14154_v15 = vld [vmem:[#allocation91_spill] sm:$0xff] }
 0x4d5   : > { %v2858_v0 = vsel %vm14130_vm0, %v14128_v53, %v2853_v21  ;;  %vm14131_vm6 = vcmask 64512   ;;  %v3098_v33 = vmul.f32 %v2813_v40, %v14132_v27  ;;  %v14134_v17 = vand.u32 2147483647, %v14087_v7  ;;  %v14177_v27 = vld [vmem:[#allocation45_spill] sm:$0xff]  ;;  %v14185_v20 = vld [vmem:[#allocation92_spill] sm:$0xff] }
 0x4d6   : > { %3128 = vst.msk [vmem:[#allocation3 + $0x99] sm:$0xff] %vm14131_vm6, %v3096_v16  ;;  %vm14137_vm10 = vweird.f32 %v9371_v60  ;;  %vm14138_vm1 = vweird.f32 %v14036_v25  ;;  %v2999_v21 = vadd.f32 %v9397_v57, %v14141_v6  ;;  %v2913_v40 = vsel %vm10146_vm3, %v9365_v29, %v10049_v63  ;;  %v14142_v16 = vld [vmem:[#allocation74_spill] sm:$0xff]  ;;  %vm14144_vm0 = vmmov %vm14131_vm6 }
 0x4d7   : > { %vm10164_vm12 = vcmp.eq.f32.partialorder %v14134_v17, 8.507059e+37  ;;  %vm10172_vm11 = vmor %vm14138_vm1, %vm14137_vm10  ;;  %v2873_v52 = vsel %vm9919_vm8, %v14142_v16, %v2868_v23  ;;  %v3099_v45 = vmul.f32 %v2828_v10, %v14143_v28  ;;  %3127 = vst.msk [vmem:[#allocation3 + $0x91] sm:$0xff] %vm14144_vm0, %v3095_v13  ;;  %v14145_v25 = vand.u32 2147483647, %v14093_v61  ;;  %v10207_v10 = vld [vmem:[#allocation3 + $0x61] sm:$0xff]  ;;  %v14153_v13 = vld [vmem:[#allocation129_spill] sm:$0xff] }
 0x4d8   : > { %vm14148_vm6 = vweird.f32 %v9377_v39  ;;  %vm14149_vm1 = vweird.f32 %v14045_v11  ;;  %v3014_v63 = vadd.f32 %v9408_v59, %v14152_v50  ;;  %v2928_v23 = vsel %vm10172_vm11, %v9371_v60, %v10053_v22  ;;  %vm14155_vm8 = vmmov %vm14144_vm0  ;;  %3486 = vrot.lane.b32.xlu0 %v10207_v10, %s6703_s8 }
 0x4d9   : > { %vm10189_vm10 = vcmp.eq.f32.partialorder %v14145_v25, 8.507059e+37  ;;  %vm10197_vm14 = vmor %vm14149_vm1, %vm14148_vm6  ;;  %v2888_v58 = vsel %vm9949_vm9, %v14153_v13, %v2883_v54  ;;  %v3100_v11 = vmul.f32 %v2843_v18, %v14154_v15  ;;  %3126 = vst.msk [vmem:[#allocation3 + $0x81] sm:$0xff] %vm14155_vm8, %v3094_v14  ;;  %vm3076_vm3 = vweird.f32 %v14063_v42  ;;  %v14162_v14 = vld [vmem:[#allocation43_spill] sm:$0xff]  ;;  %v14169_v18 = vld [vmem:[#allocation144_spill] sm:$0xff]  ;;  %v10493_v13 = vpop.permute.xlu2 %3472 }
 0x4da   : > { %vm14156_vm0 = vweird.f32 %v9383_v19  ;;  %vm14157_vm6 = vweird.f32 %v14054_v47  ;;  %v2943_v60 = vsel %vm10197_vm14, %v9377_v39, %v10074_v12  ;;  %vm14161_vm9 = vnez %v14057_v31  ;;  %vm14163_vm11 = vmmov %vm14155_vm8  ;;  %v14168_v39 = vld [vmem:[#allocation82_spill] sm:$0xff] }
 0x4db   : > { %vm10219_vm1 = vmor %vm14157_vm6, %vm14156_vm0  ;;  %v2903_v22 = vsel %vm14161_vm9, %v14160_v35, %v2898_v37  ;;  %v3101_v54 = vmul.f32 %v2858_v0, %v14162_v14  ;;  %3129 = vst.msk [vmem:[#allocation3 + $0xa9] sm:$0xff] %vm14163_vm11, %v3097_v2  ;;  %vm14164_vm8 = vweird.f32 %v9389_v24  ;;  %vm14165_vm0 = vweird.f32 %v14064_v41  ;;  %v14170_v2 = vld [vmem:[#allocation73_spill] sm:$0xff] }
 0x4dc   : > { %vm10238_vm6 = vmor %vm14165_vm0, %vm14164_vm8  ;;  %v3029_v12 = vadd.f32 %v14019_v43, %v14168_v39  ;;  %v2973_v31 = vsel %vm10219_vm1, %v9383_v19, %v2969_v48  ;;  %v2918_v37 = vsel %vm10005_vm2, %v14169_v18, %v2913_v40  ;;  %v3102_v38 = vmul.f32 %v2873_v52, %v14170_v2  ;;  %v14192_v52 = vld [vmem:[#allocation66_spill] sm:$0xff] }
 0x4dd   : > { %vm14171_vm14 = vmmov %vm14163_vm11  ;;  %vm14172_vm9 = vweird.f32 %v9397_v57  ;;  %vm14173_vm11 = vweird.f32 %v14078_v1  ;;  %v3044_v0 = vadd.f32 %v14031_v32, %v9903_v62  ;;  %v2988_v19 = vsel %vm10238_vm6, %v9389_v24, %v2984_v4  ;;  %v14183_v62 = vld [vmem:[#allocation173_spill] sm:$0xff]  ;;  %v14220_v18 = vld [vmem:[#allocation46_spill] sm:$0xff] }
 0x4de   : > { %3130 = vst.msk [vmem:[#allocation3 + $0xb1] sm:$0xff] %vm14171_vm14, %v3098_v33  ;;  %vm10256_vm8 = vmor %vm14173_vm11, %vm14172_vm9  ;;  %v2933_v48 = vsel %vm10034_vm7, %v14176_v46, %v2928_v23  ;;  %v3103_v33 = vmul.f32 %v2888_v58, %v14177_v27  ;;  %vm14179_vm1 = vweird.f32 %v9408_v59  ;;  %vm14180_vm0 = vweird.f32 %v14087_v7  ;;  %v10304_v16 = vld [vmem:[#allocation3 + $0x99] sm:$0xff]  ;;  %v14209_v58 = vld [vmem:[#allocation160_spill] sm:$0xff] }
 0x4df   : > { %vm14178_vm2 = vmmov %vm14171_vm14  ;;  %v3059_v17 = vadd.f32 %v14033_v34, %v14183_v62  ;;  %v3003_v24 = vsel %vm10256_vm8, %v9397_v57, %v2999_v21  ;;  %v2948_v4 = vsel %vm10067_vm15, %v14184_v9, %v2943_v60  ;;  %v3104_v6 = vmul.f32 %v2903_v22, %v14185_v20  ;;  %3496 = vrot.lane.b32.xlu2 %v10304_v16, %s6703_s8  ;;  %v14216_v22 = vld [vmem:[#allocation186_spill] sm:$0xff]  ;;  %v14227_v46 = vld [vmem:[#allocation167_spill] sm:$0xff] }
 0x4e0   : > { %3131 = vst.msk [vmem:[#allocation3 + $0xc1] sm:$0xff] %vm14178_vm2, %v3099_v45  ;;  %vm10274_vm14 = vmor %vm14180_vm0, %vm14179_vm1  ;;  %vm14187_vm6 = vweird.f32 %v14019_v43  ;;  %vm14188_vm9 = vweird.f32 %v14093_v61  ;;  %v3074_v40 = vadd.f32 %v14063_v42, %v9990_v30  ;;  %v2978_v21 = vsel %vm10091_vm4, %v14191_v51, %v2973_v31  ;;  %v14229_v27 = vld [vmem:[#allocation188_spill] sm:$0xff] }
 0x4e1   : > { %vm14186_vm7 = vmmov %vm14178_vm2  ;;  %v3018_v57 = vsel %vm10274_vm14, %v9408_v59, %v3014_v63  ;;  %v3105_v28 = vmul.f32 %v2918_v37, %v14192_v52  ;;  %v14194_v45 = vand.u32 2147483648, %v14093_v61  ;;  %vm14195_vm8 = vweird.f32 %v14031_v32  ;;  %v14200_v61 = vld [vmem:[#allocation36_spill] sm:$0xff] }
 0x4e2   : > { %3132 = vst.msk [vmem:[#allocation3 + $0xc9] sm:$0xff] %vm14186_vm7, %v3100_v11  ;;  %vm10292_vm11 = vmor %vm14188_vm9, %vm14187_vm6  ;;  %v2993_v29 = vsel %vm10113_vm13, %v14199_v44, %v2988_v19  ;;  %v3106_v50 = vmul.f32 %v2933_v48, %v14200_v61  ;;  %v10327_v63 = vld [vmem:[#allocation3 + $0x91] sm:$0xff]  ;;  %v14202_v23 = vand.u32 2147483647, %v14106_v49  ;;  %vm14205_vm14 = vweird.f32 %v14033_v34 }
 0x4e3   : > { %vm14193_vm15 = vmmov %vm14178_vm2  ;;  %v3037_v25 = vor.u32 1.1754944e-38, %v14194_v45  ;;  %vm14196_vm2 = vweird.f32 %v14106_v49  ;;  %v3033_v59 = vsel %vm10292_vm11, %v14019_v43, %v3029_v12  ;;  %v3008_v15 = vsel %vm10138_vm5, %v14209_v58, %v3003_v24  ;;  %v14210_v11 = vld [vmem:[#allocation105_spill] sm:$0xff]  ;;  %3494 = vrot.lane.b32.xlu1 %v10327_v63, %s6703_s8  ;;  %v14231_v1 = vld [vmem:[#allocation48_spill] sm:$0xff] }
 0x4e4   : > { %3133 = vst.msk [vmem:[#allocation3 + $0xd9] sm:$0xff] %vm14193_vm15, %v3101_v54  ;;  %vm10314_vm1 = vmor %vm14196_vm2, %vm14195_vm8  ;;  %vm10332_vm0 = vcmp.eq.f32.partialorder %v14202_v23, 8.507059e+37  ;;  %v3107_v53 = vmul.f32 %v2948_v4, %v14210_v11  ;;  %v14212_v60 = vand.u32 2147483648, %v14106_v49  ;;  %vm14213_vm9 = vweird.f32 %v14133_v36  ;;  %v14217_v54 = vld [vmem:[#allocation96_spill] sm:$0xff]  ;;  %v10372_v49 = vld [vmem:[#allocation3 + $0x81] sm:$0xff] }
 0x4e5   : > { %vm14201_vm4 = vmmov %vm14186_vm7  ;;  %vm14206_vm7 = vweird.f32 %v14119_v55  ;;  %v3048_v3 = vsel %vm10314_vm1, %v14031_v32, %v3044_v0  ;;  %v3023_v14 = vsel %vm10164_vm12, %v14216_v22, %v3018_v57  ;;  %v3109_v47 = vmul.f32 %v2978_v21, %v14217_v54  ;;  %3492 = vrot.lane.b32.xlu0 %v10372_v49, %s6703_s8  ;;  %v14233_v24 = vld [vmem:[#allocation97_spill] sm:$0xff]  ;;  %v14235_v4 = vld [vmem:[#allocation122_spill] sm:$0xff] }
 0x4e6   : > { %3134 = vst.msk [vmem:[#allocation3 + $0xe1] sm:$0xff] %vm14201_vm4, %v3102_v38  ;;  %vm10340_vm13 = vmor %vm14206_vm7, %vm14205_vm14  ;;  %v3052_v35 = vor.u32 1.1754944e-38, %v14212_v60  ;;  %v14219_v39 = vand.u32 2147483648, %v14119_v55  ;;  %v3110_v37 = vmul.f32 %v2993_v29, %v14220_v18  ;;  %v14222_v8 = vand.u32 2147483647, %v14119_v55  ;;  %v3206_v45 = vld [vmem:[#allocation3 + $0x129] sm:$0xff] }
 0x4e7   : > { %vm14211_vm6 = vmmov %vm14201_vm4  ;;  %v3063_v5 = vsel %vm10340_vm13, %v14033_v34, %v3059_v17  ;;  %v3038_v34 = vsel %vm10189_vm10, %v3037_v25, %v3033_v59  ;;  %v14223_v2 = vand.u32 2147483648, %v14133_v36  ;;  %v14226_v26 = vand.u32 2147483647, %v14133_v36  ;;  %v3197_v17 = vld [vmem:[#allocation3 + $0xc1] sm:$0xff]  ;;  %v3196_v36 = vld [vmem:[#allocation3 + $0xb1] sm:$0xff] }
 0x4e8   : > { %3135 = vst.msk [vmem:[#allocation3 + $0xf1] sm:$0xff] %vm14211_vm6, %v3103_v33  ;;  %vm10360_vm11 = vmor %vm14213_vm9, %vm3076_vm3  ;;  %v3067_v12 = vor.u32 1.1754944e-38, %v14219_v39  ;;  %vm3065_vm12 = vcmp.eq.f32.partialorder %v14222_v8, 8.507059e+37  ;;  %v3053_v41 = vsel %vm10332_vm0, %v3052_v35, %v3048_v3  ;;  %v3112_v48 = vmul.f32 %v3023_v14, %v14227_v46  ;;  %3502 = vrot.lane.b32.xlu2 %v3197_v17, %s6703_s8  ;;  %v3214_v43 = vld [vmem:[#allocation3 + $0xa] sm:$0xff]  ;;  %v10496_v3 = vld [vmem:[#allocation3 + $0x1a] sm:$0xff]  ;;  %v10530_v14 = vpop.permute.xlu1 %3470 }
 0x4e9   : > { %vm14218_vm5 = vmmov %vm14201_vm4  ;;  %v3078_v31 = vsel %vm10360_vm11, %v14063_v42, %v3074_v40  ;;  %v3082_v38 = vor.u32 1.1754944e-38, %v14223_v2  ;;  %v14224_v42 = vld [vmem:[#allocation78_spill] sm:$0xff]  ;;  %vm3080_vm10 = vcmp.eq.f32.partialorder %v14226_v26, 8.507059e+37  ;;  %v3113_v33 = vmul.f32 %v3038_v34, %v14229_v27  ;;  %v3198_v51 = vld [vmem:[#allocation3 + $0xc9] sm:$0xff] }
 0x4ea   : > { %3136 = vst.msk [vmem:[#allocation3 + $0xf9] sm:$0xff] %vm14218_vm5, %v3104_v6  ;;  %vm14221_vm3 = vmmov %vm14201_vm4  ;;  %v3111_v0 = vmul.f32 %v3008_v15, %v14224_v42  ;;  %v3068_v19 = vsel %vm3065_vm12, %v3067_v12, %v3063_v5  ;;  %v3114_v62 = vmul.f32 %v3053_v41, %v14231_v1  ;;  %v10408_v6 = vld [vmem:[#allocation3 + $0xa9] sm:$0xff]  ;;  %vm332_vm13 = vcmask 57344   ;;  %v10502_v15 = vpop.permute.xlu2 %3478  ;;  %v10558_v8 = vld [vmem:[#allocation3 + $0x92] sm:$0xff] }
 0x4eb   : > { %3137 = vst.msk [vmem:[#allocation3 + $0x109] sm:$0xff] %vm14221_vm3, %v3105_v28  ;;  %vm14225_vm15 = vmmov %vm14221_vm3  ;;  %v3083_v55 = vsel %vm3080_vm10, %v3082_v38, %v3078_v31  ;;  %v3115_v9 = vmul.f32 %v3068_v19, %v14233_v24  ;;  %3500 = vrot.lane.b32.xlu1 %v3196_v36, %s6703_s8  ;;  %v14241_v7 = vmov 0.0   ;;  %v3199_v57 = vld [vmem:[#allocation3 + $0xd9] sm:$0xff]  ;;  %v3213_v58 = vld [vmem:[#allocation3 + $0x2] sm:$0xff]  ;;  %vm14322_vm5 = vcmask 130048  }
 0x4ec   : > { %3138 = vst.msk [vmem:[#allocation3 + $0x111] sm:$0xff] %vm14225_vm15, %v3106_v50  ;;  %vm14228_vm8 = vmmov %vm14221_vm3  ;;  %v3116_v20 = vmul.f32 %v3083_v55, %v14235_v4  ;;  %v10518_v32 = vld [vmem:[#allocation3 + $0x62] sm:$0xff]  ;;  %v10526_v22 = vld [vmem:[#allocation3 + $0x4a] sm:$0xff]  ;;  %vm14323_vm12 = vcmask 195584   ;;  %vm4623_vm15 = vcmask 392192   ;;  %vm14324_vm10 = vcmask 261120  }
 0x4ed   : > { %3139 = vst.msk [vmem:[#allocation3 + $0x121] sm:$0xff] %vm14228_vm8, %v3107_v53  ;;  %vm14230_vm2 = vmmov %vm14221_vm3  ;;  %3498 = vrot.lane.b32.xlu0 %v10408_v6, %s6703_s8  ;;  %v3200_v40 = vld [vmem:[#allocation3 + $0xe1] sm:$0xff]  ;;  %v10506_v53 = vld [vmem:[#allocation3 + $0x32] sm:$0xff]  ;;  %vm4590_vm3 = vcmask 326656   ;;  %vm4656_vm8 = vcmask 457728  }
 0x4ee   : > { %3141 = vst.msk [vmem:[#allocation3 + $0x139] sm:$0xff] %vm14230_vm2, %v3109_v47  ;;  %vm14232_vm1 = vmmov %vm14230_vm2  ;;  %v10534_v47 = vld [vmem:[#allocation3 + $0x7a] sm:$0xff]  ;;  %v10548_v34 = vld [vmem:[#allocation3 + $0xaa] sm:$0xff]  ;;  %vm4689_vm2 = vcmask 523264  }
 0x4ef   : > { %3142 = vst.msk [vmem:[#allocation3 + $0x141] sm:$0xff] %vm14232_vm1, %v3110_v37  ;;  %vm14234_vm4 = vmmov %vm14232_vm1  ;;  %v3201_v28 = vld [vmem:[#allocation3 + $0xf1] sm:$0xff]  ;;  %v10556_v37 = vpop.permute.xlu0 %3474  ;;  %v10566_v42 = vld [vmem:[#allocation3 + $0xc2] sm:$0xff] }
 0x4f0   : > { %3143 = vst.msk [vmem:[#allocation3 + $0x151] sm:$0xff] %vm14234_vm4, %v3111_v0  ;;  %vm14236_vm0 = vmmov %vm14232_vm1  ;;  %3508 = vrot.lane.b32.xlu2 %v3200_v40, %s6703_s8  ;;  %v10546_v31 = vpop.permute.xlu1 %3476  ;;  %v3231_v27 = vld [vmem:[#allocation3 + $0xda] sm:$0xff]  ;;  %vm4735_vm1 = vcmask 588800  }
 0x4f1   : > { %3144 = vst.msk [vmem:[#allocation3 + $0x159] sm:$0xff] %vm14236_vm0, %v3112_v48  ;;  %vm14237_vm14 = vmmov %vm14236_vm0  ;;  %v3202_v52 = vld [vmem:[#allocation3 + $0xf9] sm:$0xff] }
 0x4f2   : > { %3145 = vst.msk [vmem:[#allocation3 + $0x169] sm:$0xff] %vm14237_vm14, %v3113_v33  ;;  %vm14238_vm7 = vmmov %vm14236_vm0  ;;  %v3203_v21 = vld [vmem:[#allocation3 + $0x109] sm:$0xff]  ;;  %v10516_v35 = vpop.permute.xlu2 %3484  ;;  %v3233_v46 = vld [vmem:[#allocation3 + $0xf2] sm:$0xff] }
 0x4f3   : > { %3146 = vst.msk [vmem:[#allocation3 + $0x171] sm:$0xff] %vm14238_vm7, %v3114_v62  ;;  %vm14239_vm6 = vmmov %vm14236_vm0  ;;  %3506 = vrot.lane.b32.xlu1 %v3199_v57, %s6703_s8  ;;  %v3204_v30 = vld [vmem:[#allocation3 + $0x111] sm:$0xff] }
 0x4f4   : > { %3147 = vst.msk [vmem:[#allocation3 + $0x181] sm:$0xff] %vm14239_vm6, %v3115_v9  ;;  %vm14240_vm9 = vmmov %vm14236_vm0  ;;  %v3205_v25 = vld [vmem:[#allocation3 + $0x121] sm:$0xff]  ;;  %v3235_v17 = vld [vmem:[#allocation3 + $0x10a] sm:$0xff] }
 0x4f5   : > { %3148 = vst.msk [vmem:[#allocation3 + $0x189] sm:$0xff] %vm14240_vm9, %v3116_v20  ;;  %3504 = vrot.lane.b32.xlu0 %v3198_v51, %s6703_s8  ;;  %v3207_v29 = vld [vmem:[#allocation3 + $0x139] sm:$0xff]  ;;  %v3237_v40 = vld [vmem:[#allocation3 + $0x122] sm:$0xff]  ;;  %vm14321_vm11 = vmmov %vm14236_vm0 }
 0x4f6   : > { %350 = vst.msk [vmem:[#allocation3 + $0x41] sm:$0x1] %vm332_vm13, %v14241_v7  ;;  %v3208_v44 = vld [vmem:[#allocation3 + $0x141] sm:$0xff]  ;;  %vm14325_vm4 = vmmov %vm14236_vm0 }
 0x4f7   : > { %333 = vst.msk [vmem:[#allocation3 + $0x18] sm:$0x1] %vm332_vm13, %v14241_v7  ;;  %v3209_v59 = vld [vmem:[#allocation3 + $0x151] sm:$0xff]  ;;  %v3239_v20 = vld [vmem:[#allocation3 + $0x13a] sm:$0xff]  ;;  %vm14326_vm0 = vmmov %vm14322_vm5 }
 0x4f8   : > { %334 = vst.msk [vmem:[#allocation3 + $0x30] sm:$0x1] %vm332_vm13, %v14241_v7  ;;  %3514 = vrot.lane.b32.xlu2 %v3203_v21, %s6703_s8  ;;  %v3210_v23 = vld [vmem:[#allocation3 + $0x159] sm:$0xff]  ;;  %vm14327_vm14 = vmmov %vm14323_vm12 }
 0x4f9   : > { %335 = vst.msk [vmem:[#allocation3 + $0x48] sm:$0x1] %vm332_vm13, %v14241_v7  ;;  %v3211_v50 = vld [vmem:[#allocation3 + $0x169] sm:$0xff]  ;;  %vm14328_vm7 = vmmov %vm14324_vm10 }
 0x4fa   : > { %336 = vst.msk [vmem:[#allocation3 + $0x60] sm:$0x1] %vm332_vm13, %v14241_v7  ;;  %v3212_v61 = vld [vmem:[#allocation3 + $0x171] sm:$0xff]  ;;  %vm14330_vm6 = vmmov %vm14326_vm0 }
 0x4fb   : > { %337 = vst.msk [vmem:[#allocation3 + $0x78] sm:$0x1] %vm332_vm13, %v14241_v7  ;;  %3512 = vrot.lane.b32.xlu1 %v3202_v52, %s6703_s8  ;;  %vm14331_vm9 = vmmov %vm14323_vm12 }
 0x4fc   : > { %338 = vst.msk [vmem:[#allocation3 + $0x90] sm:$0x1] %vm332_vm13, %v14241_v7 }
 0x4fd   : > { %339 = vst.msk [vmem:[#allocation3 + $0xa8] sm:$0x1] %vm332_vm13, %v14241_v7  ;;  %3510 = vrot.lane.b32.xlu0 %v3201_v28, %s6703_s8  ;;  %v10504_v11 = vld [vmem:[#allocation3 + $0x3a] sm:$0xff]  ;;  %v3241_v28 = vld [vmem:[#allocation3 + $0x152] sm:$0xff] }
 0x4fe   : > { %340 = vst.msk [vmem:[#allocation3 + $0xc0] sm:$0x1] %vm332_vm13, %v14241_v7 }
 0x4ff   : > { %341 = vst.msk [vmem:[#allocation3 + $0xd8] sm:$0x1] %vm332_vm13, %v14241_v7 }
 0x500   : > { %342 = vst.msk [vmem:[#allocation3 + $0xf0] sm:$0x1] %vm332_vm13, %v14241_v7  ;;  %3520 = vrot.lane.b32.xlu2 %v3206_v45, %s6703_s8 }
 0x501   : > { %343 = vst.msk [vmem:[#allocation3 + $0x108] sm:$0x1] %vm332_vm13, %v14241_v7 }
 0x502   : > { %344 = vst.msk [vmem:[#allocation3 + $0x120] sm:$0x1] %vm332_vm13, %v14241_v7 }
 0x503   : > { %345 = vst.msk [vmem:[#allocation3 + $0x138] sm:$0x1] %vm332_vm13, %v14241_v7  ;;  %3518 = vrot.lane.b32.xlu1 %v3205_v25, %s6703_s8 }
 0x504   : > { %346 = vst.msk [vmem:[#allocation3 + $0x150] sm:$0x1] %vm332_vm13, %v14241_v7 }
 0x505   : > { %347 = vst.msk [vmem:[#allocation3 + $0x168] sm:$0x1] %vm332_vm13, %v14241_v7  ;;  %3516 = vrot.lane.b32.xlu0 %v3204_v30, %s6703_s8 }
 0x506   : > { %348 = vst.msk [vmem:[#allocation3 + $0x180] sm:$0x1] %vm332_vm13, %v14241_v7 }
 0x507   : > { %349 = vst.msk [vmem:[#allocation3 + $0x29] sm:$0x1] %vm332_vm13, %v14241_v7 }
 0x508   : > { %351 = vst.msk [vmem:[#allocation3 + $0x59] sm:$0x1] %vm332_vm13, %v14241_v7  ;;  %3526 = vrot.lane.b32.xlu2 %v3209_v59, %s6703_s8 }
 0x509   : > { %352 = vst.msk [vmem:[#allocation3 + $0x71] sm:$0x1] %vm332_vm13, %v14241_v7 }
 0x50a   : > { %353 = vst.msk [vmem:[#allocation3 + $0x89] sm:$0x1] %vm332_vm13, %v14241_v7 }
 0x50b   : > { %354 = vst.msk [vmem:[#allocation3 + $0xa1] sm:$0x1] %vm332_vm13, %v14241_v7  ;;  %3524 = vrot.lane.b32.xlu1 %v3208_v44, %s6703_s8  ;;  %v10615_v44 = vld [vmem:[#allocation3 + $0x18] sm:$0xff] }
 0x50c   : > { %355 = vst.msk [vmem:[#allocation3 + $0xb9] sm:$0x1] %vm332_vm13, %v14241_v7 }
 0x50d   : > { %356 = vst.msk [vmem:[#allocation3 + $0xd1] sm:$0x1] %vm332_vm13, %v14241_v7  ;;  %3522 = vrot.lane.b32.xlu0 %v3207_v29, %s6703_s8 }
 0x50e   : > { %357 = vst.msk [vmem:[#allocation3 + $0xe9] sm:$0x1] %vm332_vm13, %v14241_v7  ;;  %v10512_v60 = vld [vmem:[#allocation3 + $0x22] sm:$0xff] }
 0x50f   : > { %358 = vst.msk [vmem:[#allocation3 + $0x101] sm:$0x1] %vm332_vm13, %v14241_v7  ;;  %v10520_v5 = vld [vmem:[#allocation3 + $0x52] sm:$0xff] }
 0x510   : > { %359 = vst.msk [vmem:[#allocation3 + $0x119] sm:$0x1] %vm332_vm13, %v14241_v7  ;;  %3532 = vrot.lane.b32.xlu2 %v3212_v61, %s6703_s8  ;;  %v10542_v12 = vld [vmem:[#allocation3 + $0x6a] sm:$0xff] }
 0x511   : > { %360 = vst.msk [vmem:[#allocation3 + $0x131] sm:$0x1] %vm332_vm13, %v14241_v7  ;;  %v10532_v54 = vld [vmem:[#allocation3 + $0x82] sm:$0xff]  ;;  %v3243_v61 = vld [vmem:[#allocation3 + $0x16a] sm:$0xff] }
 0x512   : > { %361 = vst.msk [vmem:[#allocation3 + $0x149] sm:$0x1] %vm332_vm13, %v14241_v7  ;;  %v10550_v18 = vld [vmem:[#allocation3 + $0x9a] sm:$0xff] }
 0x513   : > { %362 = vst.msk [vmem:[#allocation3 + $0x161] sm:$0x1] %vm332_vm13, %v14241_v7  ;;  %3530 = vrot.lane.b32.xlu1 %v3211_v50, %s6703_s8  ;;  %v10571_v0 = vld [vmem:[#allocation3 + $0xb2] sm:$0xff] }
 0x514   : > { %363 = vst.msk [vmem:[#allocation3 + $0x179] sm:$0x1] %vm332_vm13, %v14241_v7  ;;  %v3230_v38 = vld [vmem:[#allocation3 + $0xca] sm:$0xff] }
 0x515   : > { %364 = vst.msk [vmem:[#allocation3 + $0x191] sm:$0x1] %vm332_vm13, %v14241_v7  ;;  %3528 = vrot.lane.b32.xlu0 %v3210_v23, %s6703_s8  ;;  %v3232_v48 = vld [vmem:[#allocation3 + $0xe2] sm:$0xff]  ;;  %s6711_s8 = smov 64   ;;  %vm14329_vm13 = vmmov %vm14325_vm4 }
 0x516   : > { %14242 = vst [vmem:[#allocation194_spill] sm:$0xff] %v10516_v35  ;;  %v3234_v24 = vld [vmem:[#allocation3 + $0xfa] sm:$0xff] }
 0x517   : > { %v3236_v62 = vld [vmem:[#allocation3 + $0x112] sm:$0xff] }
 0x518   : > { %3602 = vrot.lane.b32.xlu2 %v10496_v3, %s6705_s10  ;;  %v3238_v7 = vld [vmem:[#allocation3 + $0x12a] sm:$0xff] }
 0x519   : > { %v3240_v45 = vld [vmem:[#allocation3 + $0x142] sm:$0xff] }
 0x51a   : > { %v3242_v52 = vld [vmem:[#allocation3 + $0x15a] sm:$0xff] }
 0x51b   : > { %3600 = vrot.lane.b32.xlu1 %v3214_v43, %s6705_s10  ;;  %v3244_v29 = vld [vmem:[#allocation3 + $0x172] sm:$0xff] }
 0x51d   : > { %3598 = vrot.lane.b32.xlu0 %v3213_v58, %s6705_s10  ;;  %v10538_v39 = vpop.permute.xlu2 %3490  ;;  %v10627_v58 = vld [vmem:[#allocation3 + $0x38] sm:$0xff] }
 0x51e   : > { %14243 = vst [vmem:[#allocation183_spill] sm:$0xff] %v10538_v39 }
 0x520   : > { %3608 = vrot.lane.b32.xlu2 %v10504_v11, %s6705_s10 }
 0x522   : > { %v10564_v41 = vpop.permute.xlu1 %3482 }
 0x523   : > { %3606 = vrot.lane.b32.xlu1 %v10506_v53, %s6705_s10 }
 0x525   : > { %3604 = vrot.lane.b32.xlu0 %v10512_v60, %s6705_s10 }
 0x528   : > { %3614 = vrot.lane.b32.xlu2 %v10518_v32, %s6705_s10  ;;  %v10577_v19 = vpop.permute.xlu0 %3480 }
 0x52b   : > { %3612 = vrot.lane.b32.xlu1 %v10520_v5, %s6705_s10 }
 0x52d   : > { %3610 = vrot.lane.b32.xlu0 %v10526_v22, %s6705_s10 }
 0x530   : > { %3620 = vrot.lane.b32.xlu2 %v10532_v54, %s6705_s10 }
 0x533   : > { %3618 = vrot.lane.b32.xlu1 %v10534_v47, %s6705_s10 }
 0x535   : > { %3616 = vrot.lane.b32.xlu0 %v10542_v12, %s6705_s10 }
 0x538   : > { %3626 = vrot.lane.b32.xlu2 %v10548_v34, %s6705_s10 }
 0x539   : > { %v10560_v2 = vpop.permute.xlu2 %3496 }
 0x53a   : > { %14244 = vst [vmem:[#allocation56_spill] sm:$0xff] %v10560_v2 }
 0x53b   : > { %3624 = vrot.lane.b32.xlu1 %v10550_v18, %s6705_s10 }
 0x53d   : > { %3622 = vrot.lane.b32.xlu0 %v10558_v8, %s6705_s10  ;;  %v10581_v55 = vpop.permute.xlu1 %3488 }
 0x53e   : > { %14246 = vst [vmem:[#allocation75_spill] sm:$0xff] %v10581_v55  ;;  %v3175_v55 = vld [vmem:[#allocation3 + $0x138] sm:$0xff] }
 0x540   : > { %3632 = vrot.lane.b32.xlu2 %v3230_v38, %s6705_s10  ;;  %v10629_v38 = vld [vmem:[#allocation3 + $0x30] sm:$0xff] }
 0x542   : > { %v10573_v26 = vpop.permute.xlu2 %3502 }
 0x543   : > { %3630 = vrot.lane.b32.xlu1 %v10566_v42, %s6705_s10  ;;  %14245 = vst [vmem:[#allocation107_spill] sm:$0xff] %v10573_v26  ;;  %v10717_v26 = vld [vmem:[#allocation3 + $0xf0] sm:$0xff] }
 0x544   : > { %14274 = vst [vmem:[#allocation86_spill] sm:$0xff] %v10717_v26 }
 0x545   : > { %3628 = vrot.lane.b32.xlu0 %v10571_v0, %s6705_s10 }
 0x548   : > { %3638 = vrot.lane.b32.xlu2 %v3233_v46, %s6705_s10  ;;  %v10635_v46 = vld [vmem:[#allocation3 + $0x20] sm:$0xff] }
 0x54a   : > { %v10583_v33 = vpop.permute.xlu2 %3508  ;;  %v10586_v1 = vpop.permute.xlu0 %3486 }
 0x54b   : > { %3636 = vrot.lane.b32.xlu1 %v3232_v48, %s6705_s10  ;;  %14247 = vst [vmem:[#allocation124_spill] sm:$0xff] %v10583_v33  ;;  %v10699_v33 = vld [vmem:[#allocation3 + $0xc8] sm:$0xff] }
 0x54c   : > { %14248 = vst [vmem:[#allocation113_spill] sm:$0xff] %v10586_v1  ;;  %v3173_v1 = vld [vmem:[#allocation3 + $0x120] sm:$0xff] }
 0x54d   : > { %3634 = vrot.lane.b32.xlu0 %v3231_v27, %s6705_s10 }
 0x550   : > { %3644 = vrot.lane.b32.xlu2 %v3236_v62, %s6705_s10 }
 0x552   : > { %v10590_v9 = vpop.permute.xlu2 %3514 }
 0x553   : > { %3642 = vrot.lane.b32.xlu1 %v3235_v17, %s6705_s10  ;;  %14249 = vst [vmem:[#allocation54_spill] sm:$0xff] %v10590_v9  ;;  %v10645_v17 = vld [vmem:[#allocation3 + $0x60] sm:$0xff] }
 0x555   : > { %3640 = vrot.lane.b32.xlu0 %v3234_v24, %s6705_s10  ;;  %v10593_v36 = vpop.permute.xlu1 %3494  ;;  %v10647_v24 = vld [vmem:[#allocation3 + $0x50] sm:$0xff] }
 0x556   : > { %14250 = vst [vmem:[#allocation142_spill] sm:$0xff] %v10593_v36  ;;  %v3172_v36 = vld [vmem:[#allocation3 + $0x110] sm:$0xff] }
 0x557   : > { %v10595_v4 = vpop.permute.xlu0 %3492 }
 0x558   : > { %14251 = vst [vmem:[#allocation103_spill] sm:$0xff] %v10595_v4  ;;  %3650 = vrot.lane.b32.xlu2 %v3239_v20, %s6705_s10  ;;  %v10653_v20 = vld [vmem:[#allocation3 + $0x48] sm:$0xff]  ;;  %v3170_v4 = vld [vmem:[#allocation3 + $0xf8] sm:$0xff] }
 0x55a   : > { %v10599_v57 = vpop.permute.xlu2 %3520 }
 0x55b   : > { %3648 = vrot.lane.b32.xlu1 %v3238_v7, %s6705_s10  ;;  %14252 = vst [vmem:[#allocation76_spill] sm:$0xff] %v10599_v57 }
 0x55d   : > { %3646 = vrot.lane.b32.xlu0 %v3237_v40, %s6705_s10  ;;  %v10602_v51 = vpop.permute.xlu1 %3500 }
 0x55e   : > { %14253 = vst [vmem:[#allocation165_spill] sm:$0xff] %v10602_v51  ;;  %v10722_v51 = vld [vmem:[#allocation3 + $0xd8] sm:$0xff] }
 0x55f   : > { %v10604_v21 = vpop.permute.xlu0 %3498 }
 0x560   : > { %14254 = vst [vmem:[#allocation154_spill] sm:$0xff] %v10604_v21  ;;  %3656 = vrot.lane.b32.xlu2 %v3242_v52, %s6705_s10 }
 0x562   : > { %v10608_v25 = vpop.permute.xlu2 %3526 }
 0x563   : > { %3654 = vrot.lane.b32.xlu1 %v3241_v28, %s6705_s10  ;;  %14255 = vst [vmem:[#allocation195_spill] sm:$0xff] %v10608_v25  ;;  %v10663_v28 = vld [vmem:[#allocation3 + $0x80] sm:$0xff]  ;;  %v10683_v25 = vld [vmem:[#allocation3 + $0x98] sm:$0xff] }
 0x564   : > { %14265 = vst [vmem:[#allocation77_spill] sm:$0xff] %v10663_v28 }
 0x565   : > { %3652 = vrot.lane.b32.xlu0 %v3240_v45, %s6705_s10  ;;  %v10611_v30 = vpop.permute.xlu1 %3506  ;;  %v10665_v45 = vld [vmem:[#allocation3 + $0x78] sm:$0xff]  ;;  %14270 = vst [vmem:[#allocation57_spill] sm:$0xff] %v10683_v25 }
 0x566   : > { %14256 = vst [vmem:[#allocation184_spill] sm:$0xff] %v10611_v30  ;;  %v10707_v30 = vld [vmem:[#allocation3 + $0xb0] sm:$0xff] }
 0x567   : > { %v10613_v59 = vpop.permute.xlu0 %3504 }
 0x568   : > { %14257 = vst [vmem:[#allocation44_spill] sm:$0xff] %v10613_v59  ;;  %3726 = vrot.lane.b32.xlu2 %v10615_v44, %s6707_s12 }
 0x56a   : > { %v10620_v50 = vpop.permute.xlu2 %3532 }
 0x56b   : > { %3660 = vrot.lane.b32.xlu1 %v3244_v29, %s6705_s10  ;;  %14258 = vst [vmem:[#allocation110_spill] sm:$0xff] %v10620_v50  ;;  %v10671_v29 = vld [vmem:[#allocation3 + $0x68] sm:$0xff] }
 0x56d   : > { %3658 = vrot.lane.b32.xlu0 %v3243_v61, %s6705_s10  ;;  %v10623_v23 = vpop.permute.xlu1 %3512  ;;  %s6713_s10 = smov 48  }
 0x56e   : > { %14259 = vst [vmem:[#allocation79_spill] sm:$0xff] %v10623_v23  ;;  %v10681_v23 = vld [vmem:[#allocation3 + $0xa8] sm:$0xff] }
 0x56f   : > { %v10625_v43 = vpop.permute.xlu0 %3510  ;;  %14269 = vst [vmem:[#allocation178_spill] sm:$0xff] %v10681_v23 }
 0x570   : > { %14260 = vst [vmem:[#allocation132_spill] sm:$0xff] %v10625_v43  ;;  %3732 = vrot.lane.b32.xlu2 %v10627_v58, %s6707_s12  ;;  %v10689_v43 = vld [vmem:[#allocation3 + $0x90] sm:$0xff] }
 0x571   : > { %14271 = vst [vmem:[#allocation95_spill] sm:$0xff] %v10689_v43 }
 0x572   : > { %v10637_v48 = vpop.permute.xlu2 %3602 }
 0x573   : > { %3730 = vrot.lane.b32.xlu1 %v10629_v38, %s6707_s12 }
 0x575   : > { %3728 = vrot.lane.b32.xlu0 %v10635_v46, %s6707_s12  ;;  %v10641_v27 = vpop.permute.xlu1 %3518 }
 0x576   : > { %14261 = vst [vmem:[#allocation121_spill] sm:$0xff] %v10641_v27 }
 0x577   : > { %v10643_v62 = vpop.permute.xlu0 %3516 }
 0x578   : > { %14262 = vst [vmem:[#allocation145_spill] sm:$0xff] %v10643_v62  ;;  %3738 = vrot.lane.b32.xlu2 %v10645_v17, %s6707_s12  ;;  %v3168_v62 = vld [vmem:[#allocation3 + $0xe0] sm:$0xff] }
 0x57a   : > { %v10655_v7 = vpop.permute.xlu2 %3608 }
 0x57b   : > { %3736 = vrot.lane.b32.xlu1 %v10647_v24, %s6707_s12 }
 0x57d   : > { %3734 = vrot.lane.b32.xlu0 %v10653_v20, %s6707_s12  ;;  %v10659_v40 = vpop.permute.xlu1 %3524 }
 0x57e   : > { %14263 = vst [vmem:[#allocation136_spill] sm:$0xff] %v10659_v40 }
 0x57f   : > { %v10661_v52 = vpop.permute.xlu0 %3522 }
 0x580   : > { %14264 = vst [vmem:[#allocation108_spill] sm:$0xff] %v10661_v52  ;;  %3744 = vrot.lane.b32.xlu2 %v10663_v28, %s6707_s12  ;;  %v10701_v52 = vld [vmem:[#allocation3 + $0xc0] sm:$0xff] }
 0x582   : > { %v10673_v61 = vpop.permute.xlu2 %3614 }
 0x583   : > { %3742 = vrot.lane.b32.xlu1 %v10665_v45, %s6707_s12  ;;  %14266 = vst [vmem:[#allocation174_spill] sm:$0xff] %v10673_v61  ;;  %v3174_v61 = vld [vmem:[#allocation3 + $0x128] sm:$0xff] }
 0x585   : > { %3740 = vrot.lane.b32.xlu0 %v10671_v29, %s6707_s12  ;;  %v10677_v50 = vpop.permute.xlu1 %3530 }
 0x586   : > { %14267 = vst [vmem:[#allocation162_spill] sm:$0xff] %v10677_v50 }
 0x587   : > { %v10679_v9 = vpop.permute.xlu0 %3528 }
 0x588   : > { %14268 = vst [vmem:[#allocation187_spill] sm:$0xff] %v10679_v9  ;;  %3750 = vrot.lane.b32.xlu2 %v10681_v23, %s6707_s12 }
 0x58a   : > { %v10691_v40 = vpop.permute.xlu2 %3620 }
 0x58b   : > { %3748 = vrot.lane.b32.xlu1 %v10683_v25, %s6707_s12  ;;  %14272 = vst [vmem:[#allocation134_spill] sm:$0xff] %v10691_v40  ;;  %v3171_v40 = vld [vmem:[#allocation3 + $0x108] sm:$0xff] }
 0x58d   : > { %3746 = vrot.lane.b32.xlu0 %v10689_v43, %s6707_s12  ;;  %v10695_v50 = vpop.permute.xlu1 %3600 }
 0x58f   : > { %v10697_v9 = vpop.permute.xlu0 %3598 }
 0x590   : > { %3756 = vrot.lane.b32.xlu2 %v10699_v33, %s6707_s12 }
 0x592   : > { %v10709_v57 = vpop.permute.xlu2 %3626 }
 0x593   : > { %3754 = vrot.lane.b32.xlu1 %v10701_v52, %s6707_s12  ;;  %14273 = vst [vmem:[#allocation58_spill] sm:$0xff] %v10709_v57 }
 0x595   : > { %3752 = vrot.lane.b32.xlu0 %v10707_v30, %s6707_s12  ;;  %v10713_v59 = vpop.permute.xlu1 %3606 }
 0x597   : > { %v10715_v27 = vpop.permute.xlu0 %3604 }
 0x598   : > { %3762 = vrot.lane.b32.xlu2 %v10717_v26, %s6707_s12 }
 0x59a   : > { %v10724_v21 = vpop.permute.xlu2 %3632 }
 0x59b   : > { %3760 = vrot.lane.b32.xlu1 %v3168_v62, %s6707_s12  ;;  %14275 = vst [vmem:[#allocation176_spill] sm:$0xff] %v10724_v21 }
 0x59d   : > { %3758 = vrot.lane.b32.xlu0 %v10722_v51, %s6707_s12  ;;  %v10728_v57 = vpop.permute.xlu1 %3612 }
 0x59e   : > { %14276 = vst [vmem:[#allocation196_spill] sm:$0xff] %v10728_v57  ;;  %v3277_v57 = vld [vmem:[#allocation3 + $0x19] sm:$0xff] }
 0x59f   : > { %v10730_v2 = vpop.permute.xlu0 %3610 }
 0x5a0   : > { %3768 = vrot.lane.b32.xlu2 %v3172_v36, %s6707_s12 }
 0x5a2   : > { %v10734_v39 = vpop.permute.xlu2 %3638 }
 0x5a3   : > { %3766 = vrot.lane.b32.xlu1 %v3171_v40, %s6707_s12  ;;  %14277 = vst [vmem:[#allocation62_spill] sm:$0xff] %v10734_v39  ;;  %v3177_v39 = vld [vmem:[#allocation3 + $0x150] sm:$0xff] }
 0x5a5   : > { %3764 = vrot.lane.b32.xlu0 %v3170_v4, %s6707_s12  ;;  %v10737_v62 = vpop.permute.xlu1 %3618  ;;  %v3178_v4 = vld [vmem:[#allocation3 + $0x158] sm:$0xff] }
 0x5a6   : > { %14278 = vst [vmem:[#allocation111_spill] sm:$0xff] %v10737_v62  ;;  %v10752_v62 = vld [vmem:[#allocation3 + $0x140] sm:$0xff] }
 0x5a7   : > { %v10739_v21 = vpop.permute.xlu0 %3616 }
 0x5a8   : > { %14279 = vst [vmem:[#allocation125_spill] sm:$0xff] %v10739_v21  ;;  %3774 = vrot.lane.b32.xlu2 %v3175_v55, %s6707_s12  ;;  %v3278_v21 = vld [vmem:[#allocation3 + $0x21] sm:$0xff] }
 0x5aa   : > { %v10743_v26 = vpop.permute.xlu2 %3644 }
 0x5ab   : > { %3772 = vrot.lane.b32.xlu1 %v3174_v61, %s6707_s12  ;;  %14280 = vst [vmem:[#allocation151_spill] sm:$0xff] %v10743_v26  ;;  %v3275_v26 = vld [vmem:[#allocation3 + $0x180] sm:$0xff] }
 0x5ad   : > { %3770 = vrot.lane.b32.xlu0 %v3173_v1, %s6707_s12  ;;  %v10746_v36 = vpop.permute.xlu1 %3624 }
 0x5ae   : > { %14281 = vst [vmem:[#allocation112_spill] sm:$0xff] %v10746_v36  ;;  %v3180_v36 = vld [vmem:[#allocation3 + $0x170] sm:$0xff] }
 0x5af   : > { %v10748_v40 = vpop.permute.xlu0 %3622 }
 0x5b0   : > { %14282 = vst [vmem:[#allocation166_spill] sm:$0xff] %v10748_v40  ;;  %3780 = vrot.lane.b32.xlu2 %v3178_v4, %s6707_s12  ;;  %v3179_v4 = vld [vmem:[#allocation3 + $0x168] sm:$0xff] }
 0x5b2   : > { %v10754_v55 = vpop.permute.xlu2 %3650 }
 0x5b3   : > { %3778 = vrot.lane.b32.xlu1 %v3177_v39, %s6707_s12  ;;  %14283 = vst [vmem:[#allocation47_spill] sm:$0xff] %v10754_v55 }
 0x5b5   : > { %3776 = vrot.lane.b32.xlu0 %v10752_v62, %s6707_s12  ;;  %v10758_v61 = vpop.permute.xlu1 %3630 }
 0x5b6   : > { %14284 = vst [vmem:[#allocation114_spill] sm:$0xff] %v10758_v61  ;;  %v3276_v61 = vld [vmem:[#allocation3 + $0x188] sm:$0xff] }
 0x5b7   : > { %v10760_v1 = vpop.permute.xlu0 %3628 }
 0x5b8   : > { %14285 = vst [vmem:[#allocation135_spill] sm:$0xff] %v10760_v1  ;;  %3786 = vrot.lane.b32.xlu2 %v3275_v26, %s6707_s12 }
 0x5ba   : > { %v10764_v40 = vpop.permute.xlu2 %3656 }
 0x5bb   : > { %3784 = vrot.lane.b32.xlu1 %v3180_v36, %s6707_s12  ;;  %14286 = vst [vmem:[#allocation146_spill] sm:$0xff] %v10764_v40  ;;  %v3280_v40 = vld [vmem:[#allocation3 + $0x39] sm:$0xff] }
 0x5bd   : > { %3782 = vrot.lane.b32.xlu0 %v3179_v4, %s6707_s12  ;;  %v10767_v39 = vpop.permute.xlu1 %3636  ;;  %v3281_v4 = vld [vmem:[#allocation3 + $0x49] sm:$0xff] }
 0x5be   : > { %14287 = vst [vmem:[#allocation155_spill] sm:$0xff] %v10767_v39  ;;  %v3279_v39 = vld [vmem:[#allocation3 + $0x31] sm:$0xff] }
 0x5bf   : > { %v10769_v55 = vpop.permute.xlu0 %3634 }
 0x5c0   : > { %14288 = vst [vmem:[#allocation177_spill] sm:$0xff] %v10769_v55  ;;  %3856 = vrot.lane.b32.xlu2 %v3278_v21, %s6709_s14 }
 0x5c2   : > { %v10773_v1 = vpop.permute.xlu2 %3726 }
 0x5c3   : > { %3854 = vrot.lane.b32.xlu1 %v3277_v57, %s6709_s14 }
 0x5c5   : > { %3788 = vrot.lane.b32.xlu0 %v3276_v61, %s6707_s12  ;;  %v10776_v26 = vpop.permute.xlu1 %3642  ;;  %v3282_v61 = vld [vmem:[#allocation3 + $0x51] sm:$0xff] }
 0x5c6   : > { %14289 = vst [vmem:[#allocation189_spill] sm:$0xff] %v10776_v26 }
 0x5c7   : > { %v10778_v36 = vpop.permute.xlu0 %3640 }
 0x5c8   : > { %14290 = vst [vmem:[#allocation63_spill] sm:$0xff] %v10778_v36  ;;  %3862 = vrot.lane.b32.xlu2 %v3281_v4, %s6709_s14 }
 0x5ca   : > { %v10782_v55 = vpop.permute.xlu2 %3732 }
 0x5cb   : > { %3860 = vrot.lane.b32.xlu1 %v3280_v40, %s6709_s14 }
 0x5cd   : > { %3858 = vrot.lane.b32.xlu0 %v3279_v39, %s6709_s14  ;;  %v10785_v57 = vpop.permute.xlu1 %3648 }
 0x5ce   : > { %14291 = vst [vmem:[#allocation100_spill] sm:$0xff] %v10785_v57 }
 0x5cf   : > { %v10787_v21 = vpop.permute.xlu0 %3646 }
 0x5d0   : > { %14292 = vst [vmem:[#allocation137_spill] sm:$0xff] %v10787_v21  ;;  %3868 = vrot.lane.b32.xlu2 %v10055_v56, %s6709_s14  ;;  %v14295_v56 = vld [vmem:[#allocation161_spill] sm:$0xff] }
 0x5d2   : > { %v10793_v26 = vpop.permute.xlu2 %3738 }
 0x5d3   : > { %3866 = vrot.lane.b32.xlu1 %v10207_v10, %s6709_s14 }
 0x5d5   : > { %3864 = vrot.lane.b32.xlu0 %v3282_v61, %s6709_s14  ;;  %v10796_v36 = vpop.permute.xlu1 %3654 }
 0x5d6   : > { %14293 = vst [vmem:[#allocation152_spill] sm:$0xff] %v10796_v36 }
 0x5d7   : > { %v10798_v35 = vpop.permute.xlu0 %3652 }
 0x5d8   : > { %14294 = vst [vmem:[#allocation93_spill] sm:$0xff] %v10798_v35  ;;  %3874 = vrot.lane.b32.xlu2 %v10327_v63, %s6709_s14 }
 0x5da   : > { %v10804_v57 = vpop.permute.xlu2 %3744 }
 0x5db   : > { %3872 = vrot.lane.b32.xlu1 %v10372_v49, %s6709_s14 }
 0x5dd   : > { %3870 = vrot.lane.b32.xlu0 %v14295_v56, %s6709_s14  ;;  %v10808_v10 = vpop.permute.xlu1 %3660 }
 0x5de   : > { %14296 = vst [vmem:[#allocation179_spill] sm:$0xff] %v10808_v10 }
 0x5df   : > { %v10810_v21 = vpop.permute.xlu0 %3658 }
 0x5e0   : > { %14297 = vst [vmem:[#allocation37_spill] sm:$0xff] %v10810_v21  ;;  %3982 = vrot.lane.b32.xlu2 %v10496_v3, %s6710_s30 }
 0x5e2   : > { %v10816_v63 = vpop.permute.xlu2 %3750 }
 0x5e3   : > { %3878 = vrot.lane.b32.xlu1 %v10408_v6, %s6709_s14  ;;  %14298 = vst [vmem:[#allocation65_spill] sm:$0xff] %v10816_v63 }
 0x5e5   : > { %3876 = vrot.lane.b32.xlu0 %v10304_v16, %s6709_s14  ;;  %v10820_v49 = vpop.permute.xlu1 %3730 }
 0x5e7   : > { %v10822_v36 = vpop.permute.xlu0 %3728 }
 0x5e8   : > { %4366 = vrot.lane.b32.xlu2 %v10506_v53, %s6711_s8 }
 0x5ea   : > { %v10827_v3 = vpop.permute.xlu2 %3756 }
 0x5eb   : > { %4238 = vrot.lane.b32.xlu1 %v3279_v39, %s6712_s9  ;;  %14299 = vst [vmem:[#allocation115_spill] sm:$0xff] %v10827_v3 }
 0x5ed   : > { %4110 = vrot.lane.b32.xlu0 %v10629_v38, %s6713_s10  ;;  %v10831_v6 = vpop.permute.xlu1 %3736 }
 0x5ef   : > { %v10833_v16 = vpop.permute.xlu0 %3734 }
 0x5f0   : > { %4240 = vrot.lane.b32.xlu2 %v3280_v40, %s6712_s9 }
 0x5f2   : > { %v10838_v56 = vpop.permute.xlu2 %3762 }
 0x5f3   : > { %4112 = vrot.lane.b32.xlu1 %v10627_v58, %s6713_s10  ;;  %14300 = vst [vmem:[#allocation127_spill] sm:$0xff] %v10838_v56 }
 0x5f5   : > { %3984 = vrot.lane.b32.xlu0 %v10512_v60, %s6710_s30  ;;  %v10842_v39 = vpop.permute.xlu1 %3742 }
 0x5f7   : > { %v10844_v10 = vpop.permute.xlu0 %3740 }
 0x5f8   : > { %4114 = vrot.lane.b32.xlu2 %v10653_v20, %s6713_s10 }
 0x5fa   : > { %v10850_v21 = vpop.permute.xlu2 %3768 }
 0x5fb   : > { %3986 = vrot.lane.b32.xlu1 %v10506_v53, %s6710_s30  ;;  %14301 = vst [vmem:[#allocation153_spill] sm:$0xff] %v10850_v21 }
 0x5fd   : > { %4368 = vrot.lane.b32.xlu0 %v10504_v11, %s6711_s8  ;;  %v10854_v40 = vpop.permute.xlu1 %3748 }
 0x5fe   : > { %14302 = vst [vmem:[#allocation156_spill] sm:$0xff] %v10854_v40  ;;  %v3383_v40 = vld [vmem:[#allocation3 + $0x99] sm:$0xff] }
 0x5ff   : > { %v10856_v35 = vpop.permute.xlu0 %3746 }
 0x600   : > { %3988 = vrot.lane.b32.xlu2 %v10504_v11, %s6710_s30 }
 0x602   : > { %v10862_v60 = vpop.permute.xlu2 %3774 }
 0x603   : > { %4370 = vrot.lane.b32.xlu1 %v10526_v22, %s6711_s8  ;;  %14303 = vst [vmem:[#allocation169_spill] sm:$0xff] %v10862_v60  ;;  %v3378_v60 = vld [vmem:[#allocation3 + $0x61] sm:$0xff] }
 0x605   : > { %4242 = vrot.lane.b32.xlu0 %v3281_v4, %s6712_s9  ;;  %v10865_v53 = vpop.permute.xlu1 %3754 }
 0x606   : > { %14304 = vst [vmem:[#allocation192_spill] sm:$0xff] %v10865_v53 }
 0x607   : > { %v10867_v21 = vpop.permute.xlu0 %3752 }
 0x608   : > { %14305 = vst [vmem:[#allocation50_spill] sm:$0xff] %v10867_v21  ;;  %4372 = vrot.lane.b32.xlu2 %v10520_v5, %s6711_s8 }
 0x60a   : > { %v10872_v56 = vpop.permute.xlu2 %3780 }
 0x60b   : > { %4244 = vrot.lane.b32.xlu1 %v3282_v61, %s6712_s9  ;;  %14306 = vst [vmem:[#allocation116_spill] sm:$0xff] %v10872_v56 }
 0x60d   : > { %4116 = vrot.lane.b32.xlu0 %v10647_v24, %s6713_s10  ;;  %v10876_v11 = vpop.permute.xlu1 %3760 }
 0x60e   : > { %14307 = vst [vmem:[#allocation138_spill] sm:$0xff] %v10876_v11 }
 0x60f   : > { %v10878_v3 = vpop.permute.xlu0 %3758 }
 0x610   : > { %14308 = vst [vmem:[#allocation149_spill] sm:$0xff] %v10878_v3  ;;  %4246 = vrot.lane.b32.xlu2 %v3378_v60, %s6712_s9  ;;  %v3380_v3 = vld [vmem:[#allocation3 + $0x79] sm:$0xff] }
 0x612   : > { %v10883_v4 = vpop.permute.xlu2 %3786 }
 0x613   : > { %4118 = vrot.lane.b32.xlu1 %v10645_v17, %s6713_s10  ;;  %14309 = vst [vmem:[#allocation157_spill] sm:$0xff] %v10883_v4 }
 0x615   : > { %3990 = vrot.lane.b32.xlu0 %v10526_v22, %s6710_s30  ;;  %v10887_v61 = vpop.permute.xlu1 %3766  ;;  %v3379_v22 = vld [vmem:[#allocation3 + $0x69] sm:$0xff] }
 0x616   : > { %14310 = vst [vmem:[#allocation180_spill] sm:$0xff] %v10887_v61 }
 0x617   : > { %v10889_v56 = vpop.permute.xlu0 %3764 }
 0x618   : > { %14311 = vst [vmem:[#allocation191_spill] sm:$0xff] %v10889_v56  ;;  %4120 = vrot.lane.b32.xlu2 %v10671_v29, %s6713_s10 }
 0x61a   : > { %v10895_v11 = vpop.permute.xlu2 %3856 }
 0x61b   : > { %3992 = vrot.lane.b32.xlu1 %v10520_v5, %s6710_s30 }
 0x61d   : > { %4374 = vrot.lane.b32.xlu0 %v10518_v32, %s6711_s8  ;;  %v10899_v60 = vpop.permute.xlu1 %3772 }
 0x61e   : > { %14312 = vst [vmem:[#allocation158_spill] sm:$0xff] %v10899_v60 }
 0x61f   : > { %v10901_v4 = vpop.permute.xlu0 %3770 }
 0x620   : > { %14313 = vst [vmem:[#allocation123_spill] sm:$0xff] %v10901_v4  ;;  %3994 = vrot.lane.b32.xlu2 %v10518_v32, %s6710_s30 }
 0x622   : > { %v10907_v61 = vpop.permute.xlu2 %3862 }
 0x623   : > { %4376 = vrot.lane.b32.xlu1 %v10542_v12, %s6711_s8 }
 0x625   : > { %4248 = vrot.lane.b32.xlu0 %v3379_v22, %s6712_s9  ;;  %v10910_v5 = vpop.permute.xlu1 %3778  ;;  %v4730_v22 = vld [vmem:[%s13228_s3 + $0x40] sm:$0xff] }
 0x626   : > { %14314 = vst [vmem:[#allocation159_spill] sm:$0xff] %v10910_v5  ;;  %v4729_v5 = vld [vmem:[%s13228_s3 + $0x38] sm:$0xff]  ;;  %4839 = vmatpush.msra.mxu1 %v4730_v22  ;;  %6351 = vmatpush.msrb.mxu3 %v4730_v22 }
 0x627   : > { %v10912_v56 = vpop.permute.xlu0 %3776 }
 0x628   : > { %14315 = vst [vmem:[#allocation49_spill] sm:$0xff] %v10912_v56  ;;  %4378 = vrot.lane.b32.xlu2 %v10534_v47, %s6711_s8  ;;  %v3381_v56 = vld [vmem:[#allocation3 + $0x81] sm:$0xff]  ;;  %4840 = vmatpush.msra.mxu1 %v4729_v5 }
 0x629   : > { %6352 = vmatpush.msrb.mxu3 %v4729_v5  ;;  %v4726_v5 = vld [vmem:[%s13228_s3 + $0x20] sm:$0xff] }
 0x62a   : > { %v10917_v4 = vpop.permute.xlu2 %3868 }
 0x62b   : > { %4250 = vrot.lane.b32.xlu1 %v3380_v3, %s6712_s9 }
 0x62d   : > { %4122 = vrot.lane.b32.xlu0 %v10665_v45, %s6713_s10  ;;  %v10921_v32 = vpop.permute.xlu1 %3784 }
 0x62e   : > { %14316 = vst [vmem:[#allocation64_spill] sm:$0xff] %v10921_v32 }
 0x62f   : > { %v10923_v60 = vpop.permute.xlu0 %3782 }
 0x630   : > { %14317 = vst [vmem:[#allocation147_spill] sm:$0xff] %v10923_v60  ;;  %4252 = vrot.lane.b32.xlu2 %v3381_v56, %s6712_s9  ;;  %v4728_v60 = vld [vmem:[%s13228_s3 + $0x30] sm:$0xff]  ;;  %v4727_v56 = vld [vmem:[%s13228_s3 + $0x28] sm:$0xff] }
 0x631   : > { %4841 = vmatpush.msra.mxu1 %v4728_v60  ;;  %6353 = vmatpush.msrb.mxu3 %v4728_v60 }
 0x632   : > { %v10934_v3 = vpop.permute.xlu2 %3874 }
 0x633   : > { %4124 = vrot.lane.b32.xlu1 %v10663_v28, %s6713_s10  ;;  %14318 = vst [vmem:[#allocation55_spill] sm:$0xff] %v10934_v3  ;;  %4842 = vmatpush.msra.mxu1 %v4727_v56  ;;  %v3149_v3 = vld [vmem:[#allocation3] sm:$0xff] }
 0x634   : > { %6354 = vmatpush.msrb.mxu3 %v4727_v56  ;;  %v4724_v56 = vld [vmem:[%s13228_s3 + $0x10] sm:$0xff] }
 0x635   : > { %3996 = vrot.lane.b32.xlu0 %v10542_v12, %s6710_s30  ;;  %v3855_v32 = vpop.permute.xlu1 %3854  ;;  %v4725_v12 = vld [vmem:[%s13228_s3 + $0x18] sm:$0xff]  ;;  %4843 = vmatpush.msra.mxu1 %v4726_v5 }
 0x636   : > { %6355 = vmatpush.msrb.mxu3 %v4726_v5  ;;  %v4722_v5 = vld [vmem:[%s13228_s3] sm:$0xff] }
 0x637   : > { %v10941_v22 = vpop.permute.xlu0 %3788  ;;  %4844 = vmatpush.msra.mxu1 %v4725_v12 }
 0x638   : > { %14319 = vst [vmem:[#allocation89_spill] sm:$0xff] %v10941_v22  ;;  %4126 = vrot.lane.b32.xlu2 %v10689_v43, %s6713_s10  ;;  %6356 = vmatpush.msrb.mxu3 %v4725_v12  ;;  %v3382_v12 = vld [vmem:[#allocation3 + $0x91] sm:$0xff] }
 0x639   : > { %4845 = vmatpush.msra.mxu1 %v4724_v56 }
 0x63a   : > { %v3983_v60 = vpop.permute.xlu2 %3982  ;;  %6357 = vmatpush.msrb.mxu3 %v4724_v56 }
 0x63b   : > { %3998 = vrot.lane.b32.xlu1 %v10534_v47, %s6710_s30  ;;  %v4723_v47 = vld [vmem:[%s13228_s3 + $0x8] sm:$0xff] }
 0x63c   : > { %4846 = vmatpush.msra.mxu1 %v4723_v47  ;;  %6358 = vmatpush.msrb.mxu3 %v4723_v47 }
 0x63d   : > { %4380 = vrot.lane.b32.xlu0 %v10532_v54, %s6711_s8  ;;  %v10958_v22 = vpop.permute.xlu1 %3860 }
 0x63e   : > { %4847 = vmatpush.msra.mxu1 %v4722_v5  ;;  %6359 = vmatpush.msrb.mxu3 %v4722_v5  ;;  %v3384_v5 = vld [vmem:[#allocation3 + $0xa9] sm:$0xff] }
 0x63f   : > { %v10963_v53 = vpop.permute.xlu0 %3858 }
 0x640   : > { %4000 = vrot.lane.b32.xlu2 %v10532_v54, %s6710_s30 }
 0x642   : > { %v4367_v21 = vpop.permute.xlu2 %4366 }
 0x643   : > { %4382 = vrot.lane.b32.xlu1 %v10558_v8, %s6711_s8 }
 0x645   : > { %4254 = vrot.lane.b32.xlu0 %v3382_v12, %s6712_s9  ;;  %v10976_v63 = vpop.permute.xlu1 %3866 }
 0x647   : > { %v10978_v43 = vpop.permute.xlu0 %3864 }
 0x648   : > { %4384 = vrot.lane.b32.xlu2 %v10550_v18, %s6711_s8 }
 0x64a   : > { %v4241_v54 = vpop.permute.xlu2 %4240 }
 0x64b   : > { %4256 = vrot.lane.b32.xlu1 %v3383_v40, %s6712_s9 }
 0x64d   : > { %4128 = vrot.lane.b32.xlu0 %v10683_v25, %s6713_s10  ;;  %v10985_v56 = vpop.permute.xlu1 %3872  ;;  %v4462_v25 = vsel %vm14321_vm11, %v3149_v3, %v10530_v14  ;;  %v3150_v3 = vld [vmem:[#allocation3 + $0x8] sm:$0xff]  ;;  %vm14332_vm11 = vmmov %vm14328_vm7 }
 0x64f   : > { %v10987_v47 = vpop.permute.xlu0 %3870 }
 0x650   : > { %4258 = vrot.lane.b32.xlu2 %v3384_v5, %s6712_s9  ;;  %v4494_v5 = vsel %vm14322_vm5, %v4462_v25, %v10697_v9  ;;  %vm14333_vm5 = vmmov %vm14325_vm4 }
 0x652   : > { %v4115_v12 = vpop.permute.xlu2 %4114 }
 0x653   : > { %4130 = vrot.lane.b32.xlu1 %v10681_v23, %s6713_s10 }
 0x655   : > { %4002 = vrot.lane.b32.xlu0 %v10558_v8, %s6710_s30  ;;  %v10994_v28 = vpop.permute.xlu1 %3878  ;;  %v4526_v8 = vsel %vm14323_vm12, %v4494_v5, %v10773_v1  ;;  %v4463_v5 = vsel %vm14325_vm4, %v3150_v3, %v10493_v13  ;;  %vm14334_vm12 = vmmov %vm14326_vm0 }
 0x656   : > { %14320 = vst [vmem:[#allocation163_spill] sm:$0xff] %v10994_v28  ;;  %vm14336_vm4 = vmmov %vm14328_vm7 }
 0x657   : > { %v10996_v40 = vpop.permute.xlu0 %3876 }
 0x658   : > { %4132 = vrot.lane.b32.xlu2 %v10707_v30, %s6713_s10  ;;  %v4558_v30 = vsel %vm14324_vm10, %v4526_v8, %v3855_v32  ;;  %v3385_v32 = vld [vmem:[#allocation3 + $0xb1] sm:$0xff]  ;;  %vm14335_vm10 = vmmov %vm14331_vm9 }
 0x659   : > { %v4591_v14 = vsel %vm4590_vm3, %v4558_v30, %v3983_v60 }
 0x65a   : > { %v11006_v23 = vpop.permute.xlu2 %3988 }
 0x65b   : > { %4004 = vrot.lane.b32.xlu1 %v10550_v18, %s6710_s30 }
 0x65d   : > { %4386 = vrot.lane.b32.xlu0 %v10548_v34, %s6711_s8  ;;  %v4239_v28 = vpop.permute.xlu1 %4238 }
 0x65f   : > { %v4111_v18 = vpop.permute.xlu0 %4110 }
 0x660   : > { %v4624_v9 = vsel %vm4623_vm15, %v4591_v14, %v4111_v18  ;;  %4006 = vrot.lane.b32.xlu2 %v10548_v34, %s6710_s30  ;;  %v3386_v18 = vld [vmem:[#allocation3 + $0xc1] sm:$0xff] }
 0x661   : > { %v4657_v25 = vsel %vm4656_vm8, %v4624_v9, %v4239_v28  ;;  %v4495_v28 = vsel %vm14326_vm0, %v4463_v5, %v10695_v50  ;;  %vm14337_vm0 = vmmov %vm14333_vm5 }
 0x662   : > { %v4690_v1 = vsel %vm4689_vm2, %v4657_v25, %v4367_v21  ;;  %v4373_v60 = vpop.permute.xlu2 %4372  ;;  %v4527_v21 = vsel %vm14327_vm14, %v4495_v28, %v10822_v36  ;;  %vm14338_vm14 = vmmov %vm14330_vm6 }
 0x663   : > { %6245 = vmatmul.msk.f32.vlgmr.msra.gmra.mxu1 %vm4735_vm1, %v4690_v1  ;;  %4388 = vrot.lane.b32.xlu1 %v10571_v0, %s6711_s8  ;;  %v4559_v30 = vsel %vm14328_vm7, %v4527_v21, %v10895_v11  ;;  %v4464_v11 = vsel %vm14329_vm13, %v10615_v44, %v10556_v37  ;;  %vm14339_vm7 = vmmov %vm14331_vm9 }
 0x664   : > { %vm14340_vm13 = vmmov %vm14336_vm4 }
 0x665   : > { %4260 = vrot.lane.b32.xlu0 %v3385_v32, %s6712_s9  ;;  %v4113_v8 = vpop.permute.xlu1 %4112 }
 0x667   : > { %v3985_v34 = vpop.permute.xlu0 %3984 }
 0x668   : > { %v4592_v14 = vsel %vm4590_vm3, %v4559_v30, %v3985_v34  ;;  %4390 = vrot.lane.b32.xlu2 %v10566_v42, %s6711_s8  ;;  %v4496_v42 = vsel %vm14330_vm6, %v4464_v11, %v10637_v48  ;;  %vm14341_vm6 = vmmov %vm14337_vm0 }
 0x669   : > { %v4625_v13 = vsel %vm4623_vm15, %v4592_v14, %v4113_v8  ;;  %v4528_v1 = vsel %vm14331_vm9, %v4496_v42, %v10820_v49  ;;  %v3387_v8 = vld [vmem:[#allocation3 + $0xc9] sm:$0xff]  ;;  %v11080_v14 = vld [vmem:[#allocation3 + $0xd9] sm:$0xff]  ;;  %vm14342_vm9 = vmmov %vm14334_vm12 }
 0x66a   : > { %v4247_v9 = vpop.permute.xlu2 %4246  ;;  %v4658_v25 = vsel %vm4656_vm8, %v4625_v13, %v4241_v54 }
 0x66b   : > { %4262 = vrot.lane.b32.xlu1 %v3386_v18, %s6712_s9 }
 0x66d   : > { %4134 = vrot.lane.b32.xlu0 %v10701_v52, %s6713_s10  ;;  %v3987_v50 = vpop.permute.xlu1 %3986  ;;  %v4560_v52 = vsel %vm14332_vm11, %v4528_v1, %v10963_v53  ;;  %v3419_v53 = vld [vmem:[#allocation3 + $0xca] sm:$0xff]  ;;  %vm14343_vm11 = vmmov %vm14339_vm7 }
 0x66e   : > { %v4593_v37 = vsel %vm4590_vm3, %v4560_v52, %v3987_v50  ;;  %v11113_v52 = vld [vmem:[#allocation3 + $0x129] sm:$0xff] }
 0x66f   : > { %v4369_v36 = vpop.permute.xlu0 %4368  ;;  %v4626_v5 = vsel %vm4623_vm15, %v4593_v37, %v4115_v12 }
 0x670   : > { %v4691_v3 = vsel %vm4689_vm2, %v4658_v25, %v4369_v36  ;;  %4136 = vrot.lane.b32.xlu2 %v10699_v33, %s6713_s10 }
 0x671   : > { %6246 = vmatmul.msk.f32.gmra.mxu1 %vm4735_vm1, %v4691_v3 }
 0x672   : > { %v11055_v44 = vpop.permute.xlu2 %4120 }
 0x673   : > { %4008 = vrot.lane.b32.xlu1 %v10571_v0, %s6710_s30  ;;  %v4465_v0 = vsel %vm14333_vm5, %v10635_v46, %v10546_v31  ;;  %vm14344_vm5 = vmmov %vm14336_vm4 }
 0x675   : > { %3880 = vrot.lane.b32.xlu0 %v3385_v32, %s6709_s14  ;;  %v4371_v48 = vpop.permute.xlu1 %4370  ;;  %v4497_v32 = vsel %vm14334_vm12, %v4465_v0, %v10715_v27  ;;  %vm14345_vm12 = vmmov %vm14337_vm0  ;;  %v11145_v0 = vld [vmem:[#allocation3 + $0xe2] sm:$0xff] }
 0x676   : > { %v4529_v28 = vsel %vm14335_vm10, %v4497_v32, %v10782_v55  ;;  %v3323_v55 = vld [vmem:[#allocation3 + $0xc2] sm:$0xff]  ;;  %vm14346_vm10 = vmmov %vm14342_vm9 }
 0x677   : > { %v4243_v54 = vpop.permute.xlu0 %4242  ;;  %v4561_v34 = vsel %vm14336_vm4, %v4529_v28, %v10958_v22  ;;  %vm14347_vm4 = vmmov %vm14339_vm7 }
 0x678   : > { %v4659_v49 = vsel %vm4656_vm8, %v4626_v5, %v4243_v54  ;;  %3882 = vrot.lane.b32.xlu2 %v3386_v18, %s6709_s14  ;;  %v4594_v31 = vsel %vm4590_vm3, %v4561_v34, %v11006_v23  ;;  %v4466_v23 = vsel %vm14337_vm0, %v10629_v38, %v10502_v15  ;;  %v3420_v38 = vld [vmem:[#allocation3 + $0xda] sm:$0xff]  ;;  %vm14348_vm0 = vmmov %vm14344_vm5  ;;  %v11159_v34 = vld [vmem:[#allocation3 + $0x142] sm:$0xff] }
 0x679   : > { %v4692_v33 = vsel %vm4689_vm2, %v4659_v49, %v4371_v48  ;;  %v11117_v48 = vld [vmem:[#allocation3 + $0xe1] sm:$0xff] }
 0x67a   : > { %6247 = vmatmul.msk.f32.gmra.mxu1 %vm4735_vm1, %v4692_v33  ;;  %v11069_v12 = vpop.permute.xlu2 %3994 }
 0x67b   : > { %4392 = vrot.lane.b32.xlu1 %v3419_v53, %s6711_s8 }
 0x67d   : > { %4264 = vrot.lane.b32.xlu0 %v3387_v8, %s6712_s9  ;;  %v4245_v21 = vpop.permute.xlu1 %4244 }
 0x67f   : > { %v4117_v46 = vpop.permute.xlu0 %4116 }
 0x680   : > { %v4627_v30 = vsel %vm4623_vm15, %v4594_v31, %v4117_v46  ;;  %4266 = vrot.lane.b32.xlu2 %v11080_v14, %s6712_s9 }
 0x681   : > { %v4660_v27 = vsel %vm4656_vm8, %v4627_v30, %v4245_v21 }
 0x682   : > { %v4693_v18 = vsel %vm4689_vm2, %v4660_v27, %v4373_v60  ;;  %v4379_v22 = vpop.permute.xlu2 %4378  ;;  %v4498_v60 = vsel %vm14338_vm14, %v4466_v23, %v10713_v59  ;;  %vm14350_vm14 = vmmov %vm14341_vm6  ;;  %v14351_v27 = vld [vmem:[#allocation196_spill] sm:$0xff] }
 0x683   : > { %6248 = vmatmul.msk.f32.gmra.mxu1 %vm4735_vm1, %v4693_v18  ;;  %4138 = vrot.lane.b32.xlu1 %v10722_v51, %s6713_s10  ;;  %v4530_v50 = vsel %vm14339_vm7, %v4498_v60, %v10833_v16  ;;  %vm14352_vm7 = vmmov %vm14342_vm9 }
 0x684   : > { %v4562_v25 = vsel %vm14340_vm13, %v4530_v50, %v10907_v61  ;;  %v4467_v61 = vsel %vm14341_vm6, %v10627_v58, %v10577_v19  ;;  %vm14353_vm13 = vmmov %vm14347_vm4 }
 0x685   : > { %4010 = vrot.lane.b32.xlu0 %v3323_v55, %s6710_s30  ;;  %v4119_v13 = vpop.permute.xlu1 %4118  ;;  %v4499_v1 = vsel %vm14342_vm9, %v4467_v61, %v10655_v7  ;;  %v3357_v7 = vld [vmem:[#allocation3 + $0xe0] sm:$0xff]  ;;  %vm14354_vm6 = vmmov %vm14348_vm0  ;;  %v11204_v61 = vld [vmem:[#allocation3 + $0xf2] sm:$0xff] }
 0x686   : > { %v4531_v37 = vsel %vm14343_vm11, %v4499_v1, %v10831_v6  ;;  %vm14357_vm9 = vmmov %vm14345_vm12 }
 0x687   : > { %v3991_v36 = vpop.permute.xlu0 %3990  ;;  %v4563_v19 = vsel %vm14344_vm5, %v4531_v37, %v10978_v43  ;;  %v11134_v43 = vld [vmem:[#allocation3 + $0x12a] sm:$0xff]  ;;  %vm14359_vm11 = vmmov %vm14352_vm7 }
 0x688   : > { %v4595_v51 = vsel %vm4590_vm3, %v4562_v25, %v3991_v36  ;;  %4012 = vrot.lane.b32.xlu2 %v3419_v53, %s6710_s30  ;;  %v4468_v53 = vsel %vm14345_vm12, %v10653_v20, %v10564_v41  ;;  %v14356_v25 = vld [vmem:[#allocation113_spill] sm:$0xff]  ;;  %vm14360_vm5 = vmmov %vm14347_vm4 }
 0x689   : > { %v4628_v15 = vsel %vm4623_vm15, %v4595_v51, %v4119_v13  ;;  %v11181_v13 = vld [vmem:[#allocation3 + $0xf1] sm:$0xff]  ;;  %v4470_v51 = vsel %vm14357_vm9, %v10645_v17, %v14356_v25  ;;  %vm14361_vm12 = vmmov %vm14348_vm0  ;;  %v11285_v25 = vld [vmem:[#allocation3 + $0x159] sm:$0xff] }
 0x68a   : > { %v11102_v11 = vpop.permute.xlu2 %4252  ;;  %v4661_v16 = vsel %vm4656_vm8, %v4628_v15, %v4247_v9 }
 0x68b   : > { %3884 = vrot.lane.b32.xlu1 %v3387_v8, %s6709_s14 }
 0x68d   : > { %4394 = vrot.lane.b32.xlu0 %v3420_v38, %s6711_s8  ;;  %v3993_v59 = vpop.permute.xlu1 %3992 }
 0x68e   : > { %v4596_v58 = vsel %vm4590_vm3, %v4563_v19, %v3993_v59  ;;  %v14358_v59 = vld [vmem:[#allocation174_spill] sm:$0xff] }
 0x68f   : > { %v4375_v3 = vpop.permute.xlu0 %4374  ;;  %v4629_v6 = vsel %vm4623_vm15, %v4596_v58, %v11055_v44  ;;  %v4500_v44 = vsel %vm14346_vm10, %v4468_v53, %v10730_v2  ;;  %vm14363_vm10 = vmmov %vm14357_vm9 }
 0x690   : > { %v4694_v42 = vsel %vm4689_vm2, %v4661_v16, %v4375_v3  ;;  %3900 = vrot.lane.b32.xlu2 %v11113_v52, %s6709_s14  ;;  %v4532_v8 = vsel %vm14347_vm4, %v4500_v44, %v10793_v26  ;;  %v11167_v26 = vld [vmem:[#allocation3 + $0x141] sm:$0xff]  ;;  %v4502_v3 = vsel %vm14359_vm11, %v4470_v51, %v14358_v59  ;;  %vm14365_vm4 = vmmov %vm14352_vm7  ;;  %v14380_v51 = vld [vmem:[#allocation156_spill] sm:$0xff] }
 0x691   : > { %6249 = vmatmul.msk.f32.gmra.mxu1 %vm4735_vm1, %v4694_v42  ;;  %v4564_v41 = vsel %vm14348_vm0, %v4532_v8, %v10976_v63  ;;  %v11200_v16 = vld [vmem:[#allocation3 + $0x13a] sm:$0xff]  ;;  %vm14366_vm0 = vmmov %vm14360_vm5 }
 0x692   : > { %v11126_v9 = vpop.permute.xlu2 %4126  ;;  %v4597_v20 = vsel %vm4590_vm3, %v4564_v41, %v11069_v12  ;;  %v14349_v12 = vld [vmem:[#allocation194_spill] sm:$0xff]  ;;  %v3367_v59 = vld [vmem:[#allocation3 + $0x158] sm:$0xff] }
 0x693   : > { %4268 = vrot.lane.b32.xlu1 %v11117_v48, %s6712_s9  ;;  %v4469_v46 = vsel %vm14350_vm14, %v10647_v24, %v14349_v12  ;;  %v14355_v24 = vld [vmem:[#allocation86_spill] sm:$0xff]  ;;  %vm14367_vm14 = vmmov %vm14354_vm6 }
 0x694   : > { %v4501_v18 = vsel %vm14352_vm7, %v4469_v46, %v14351_v27  ;;  %v11213_v42 = vld [vmem:[#allocation3 + $0x139] sm:$0xff]  ;;  %vm14369_vm7 = vmmov %vm14357_vm9 }
 0x695   : > { %4140 = vrot.lane.b32.xlu0 %v3357_v7, %s6713_s10  ;;  %v4377_v54 = vpop.permute.xlu1 %4376  ;;  %v4533_v55 = vsel %vm14353_vm13, %v4501_v18, %v10844_v10  ;;  %v11224_v7 = vld [vmem:[#allocation3 + $0x151] sm:$0xff]  ;;  %vm14371_vm13 = vmmov %vm14365_vm4  ;;  %v11265_v18 = vld [vmem:[#allocation3 + $0xfa] sm:$0xff] }
 0x696   : > { %vm14374_vm9 = vmmov %vm14361_vm12 }
 0x697   : > { %v4249_v5 = vpop.permute.xlu0 %4248  ;;  %vm14377_vm11 = vmmov %vm14369_vm7 }
 0x698   : > { %v4662_v49 = vsel %vm4656_vm8, %v4629_v6, %v4249_v5  ;;  %4156 = vrot.lane.b32.xlu2 %v10752_v62, %s6713_s10 }
 0x699   : > { %v4695_v33 = vsel %vm4689_vm2, %v4662_v49, %v4377_v54  ;;  %v14362_v54 = vld [vmem:[#allocation75_spill] sm:$0xff]  ;;  %v3366_v49 = vld [vmem:[#allocation3 + $0x150] sm:$0xff] }
 0x69a   : > { %6250 = vmatmul.msk.f32.gmra.mxu1 %vm4735_vm1, %v4695_v33  ;;  %v11147_v32 = vpop.permute.xlu2 %4000  ;;  %v4471_v6 = vsel %vm14363_vm10, %v10671_v29, %v14362_v54  ;;  %vm14382_vm10 = vmmov %vm14374_vm9 }
 0x69b   : > { %4028 = vrot.lane.b32.xlu1 %v11134_v43, %s6710_s30 }
 0x69d   : > { %4396 = vrot.lane.b32.xlu0 %v11145_v0, %s6711_s8  ;;  %v4251_v62 = vpop.permute.xlu1 %4250 }
 0x69f   : > { %v4123_v28 = vpop.permute.xlu0 %4122 }
 0x6a0   : > { %v4630_v2 = vsel %vm4623_vm15, %v4597_v20, %v4123_v28  ;;  %4412 = vrot.lane.b32.xlu2 %v11159_v34, %s6711_s8  ;;  %v3359_v20 = vld [vmem:[#allocation3 + $0xf8] sm:$0xff] }
 0x6a1   : > { %v4663_v21 = vsel %vm4656_vm8, %v4630_v2, %v4251_v62  ;;  %v14368_v2 = vld [vmem:[#allocation183_spill] sm:$0xff] }
 0x6a2   : > { %v4696_v31 = vsel %vm4689_vm2, %v4663_v21, %v4379_v22  ;;  %v4385_v63 = vpop.permute.xlu2 %4384 }
 0x6a3   : > { %6251 = vmatmul.msk.f32.gmra.mxu1 %vm4735_vm1, %v4696_v31  ;;  %3886 = vrot.lane.b32.xlu1 %v11080_v14, %s6709_s14  ;;  %v4565_v14 = vsel %vm14354_vm6, %v4533_v55, %v10917_v4  ;;  %v14370_v31 = vld [vmem:[#allocation111_spill] sm:$0xff]  ;;  %vm14372_vm6 = vmmov %vm14366_vm0  ;;  %v11272_v55 = vld [vmem:[#allocation3 + $0xf9] sm:$0xff] }
 0x6a5   : > { %4284 = vrot.lane.b32.xlu0 %v11167_v26, %s6712_s9  ;;  %v4125_v30 = vpop.permute.xlu1 %4124 }
 0x6a7   : > { %v3997_v22 = vpop.permute.xlu0 %3996 }
 0x6a8   : > { %v4598_v23 = vsel %vm4590_vm3, %v4565_v14, %v3997_v22  ;;  %4270 = vrot.lane.b32.xlu2 %v11181_v13, %s6712_s9 }
 0x6a9   : > { %v4631_v60 = vsel %vm4623_vm15, %v4598_v23, %v4125_v30  ;;  %v14373_v30 = vld [vmem:[#allocation55_spill] sm:$0xff] }
 0x6aa   : > { %v11188_v50 = vpop.permute.xlu2 %4258  ;;  %v4664_v4 = vsel %vm4656_vm8, %v4631_v60, %v11102_v11  ;;  %v14376_v60 = vld [vmem:[#allocation77_spill] sm:$0xff] }
 0x6ab   : > { %4142 = vrot.lane.b32.xlu1 %v14355_v24, %s6713_s10  ;;  %v14375_v24 = vld [vmem:[#allocation103_spill] sm:$0xff] }
 0x6ad   : > { %4014 = vrot.lane.b32.xlu0 %v3420_v38, %s6710_s30  ;;  %v3999_v10 = vpop.permute.xlu1 %3998  ;;  %v4534_v38 = vsel %vm14360_vm5, %v4502_v3, %v10842_v39  ;;  %vm14379_vm5 = vmmov %vm14365_vm4 }
 0x6ae   : > { %v4566_v17 = vsel %vm14361_vm12, %v4534_v38, %v10987_v47  ;;  %vm14381_vm12 = vmmov %vm14366_vm0 }
 0x6af   : > { %v4381_v36 = vpop.permute.xlu0 %4380  ;;  %v4599_v11 = vsel %vm4590_vm3, %v4566_v17, %v3999_v10  ;;  %v4473_v10 = vsel %vm14377_vm11, %v14376_v60, %v14375_v24  ;;  %v11353_v60 = vld [vmem:[#allocation3 + $0x16a] sm:$0xff] }
 0x6b0   : > { %v4697_v15 = vsel %vm4689_vm2, %v4664_v4, %v4381_v36  ;;  %4030 = vrot.lane.b32.xlu2 %v11200_v16, %s6710_s30  ;;  %v4632_v37 = vsel %vm4623_vm15, %v4599_v11, %v11126_v9  ;;  %v14364_v9 = vld [vmem:[#allocation125_spill] sm:$0xff] }
 0x6b1   : > { %6252 = vmatmul.msk.f32.gmra.mxu1 %vm4735_vm1, %v4697_v15  ;;  %v4503_v5 = vsel %vm14365_vm4, %v4471_v6, %v14364_v9  ;;  %vm14385_vm4 = vmmov %vm14369_vm7  ;;  %v14388_v9 = vld [vmem:[#allocation65_spill] sm:$0xff] }
 0x6b2   : > { %v11215_v1 = vpop.permute.xlu2 %4132  ;;  %v4535_v53 = vsel %vm14366_vm0, %v4503_v5, %v10804_v57  ;;  %v11251_v57 = vld [vmem:[#allocation3 + $0x152] sm:$0xff]  ;;  %vm14387_vm0 = vmmov %vm14379_vm5 }
 0x6b3   : > { %4398 = vrot.lane.b32.xlu1 %v11204_v61, %s6711_s8 }
 0x6b5   : > { %3902 = vrot.lane.b32.xlu0 %v11213_v42, %s6709_s14  ;;  %v4383_v39 = vpop.permute.xlu1 %4382 }
 0x6b7   : > { %v4255_v19 = vpop.permute.xlu0 %4254 }
 0x6b8   : > { %v4665_v58 = vsel %vm4656_vm8, %v4632_v37, %v4255_v19  ;;  %3888 = vrot.lane.b32.xlu2 %v11117_v48, %s6709_s14  ;;  %v4567_v48 = vsel %vm14367_vm14, %v4535_v53, %v10985_v56  ;;  %vm14389_vm14 = vmmov %vm14372_vm6  ;;  %v14390_v53 = vld [vmem:[#allocation163_spill] sm:$0xff] }
 0x6b9   : > { %v4698_v47 = vsel %vm4689_vm2, %v4665_v58, %v4383_v39  ;;  %v4600_v29 = vsel %vm4590_vm3, %v4567_v48, %v11147_v32  ;;  %v4472_v32 = vsel %vm14369_vm7, %v10665_v45, %v14368_v2  ;;  %v14383_v58 = vld [vmem:[#allocation142_spill] sm:$0xff]  ;;  %vm14391_vm7 = vmmov %vm14374_vm9  ;;  %v14393_v2 = vld [vmem:[#allocation57_spill] sm:$0xff] }
 0x6ba   : > { %6253 = vmatmul.msk.f32.gmra.mxu1 %vm4735_vm1, %v4698_v47  ;;  %v11235_v33 = vpop.permute.xlu2 %4006  ;;  %v14384_v47 = vld [vmem:[#allocation95_spill] sm:$0xff]  ;;  %vm14399_vm11 = vmmov %vm14391_vm7 }
 0x6bb   : > { %4286 = vrot.lane.b32.xlu1 %v11224_v7, %s6712_s9 }
 0x6bd   : > { %4158 = vrot.lane.b32.xlu0 %v3366_v49, %s6713_s10  ;;  %v4257_v44 = vpop.permute.xlu1 %4256 }
 0x6bf   : > { %v4129_v8 = vpop.permute.xlu0 %4128 }
 0x6c0   : > { %v4633_v62 = vsel %vm4623_vm15, %v4600_v29, %v4129_v8  ;;  %4144 = vrot.lane.b32.xlu2 %v3359_v20, %s6713_s10 }
 0x6c1   : > { %v4666_v41 = vsel %vm4656_vm8, %v4633_v62, %v4257_v44 }
 0x6c2   : > { %v4699_v28 = vsel %vm4689_vm2, %v4666_v41, %v4385_v63  ;;  %v4391_v56 = vpop.permute.xlu2 %4390  ;;  %v4504_v63 = vsel %vm14371_vm13, %v4472_v32, %v14370_v31  ;;  %v11324_v41 = vld [vmem:[#allocation3 + $0x109] sm:$0xff]  ;;  %vm14394_vm13 = vmmov %vm14385_vm4 }
 0x6c3   : > { %6254 = vmatmul.msk.f32.gmra.mxu1 %vm4735_vm1, %v4699_v28  ;;  %4016 = vrot.lane.b32.xlu1 %v11145_v0, %s6710_s30  ;;  %v4536_v12 = vsel %vm14372_vm6, %v4504_v63, %v10856_v35  ;;  %v14392_v28 = vld [vmem:[#allocation56_spill] sm:$0xff]  ;;  %vm14396_vm6 = vmmov %vm14387_vm0  ;;  %v14397_v63 = vld [vmem:[#allocation50_spill] sm:$0xff] }
 0x6c4   : > { %v4568_v0 = vsel %vm14374_vm9, %v4536_v12, %v14373_v30  ;;  %v4475_v32 = vsel %vm14394_vm13, %v14393_v2, %v14392_v28  ;;  %vm14398_vm9 = vmmov %vm14381_vm12 }
 0x6c5   : > { %4414 = vrot.lane.b32.xlu0 %v11251_v57, %s6711_s8  ;;  %v4131_v21 = vpop.permute.xlu1 %4130 }
 0x6c7   : > { %v4003_v46 = vpop.permute.xlu0 %4002 }
 0x6c8   : > { %v4601_v27 = vsel %vm4590_vm3, %v4568_v0, %v4003_v46  ;;  %4400 = vrot.lane.b32.xlu2 %v11265_v18, %s6711_s8  ;;  %v3368_v46 = vld [vmem:[#allocation3 + $0x168] sm:$0xff] }
 0x6c9   : > { %v4634_v45 = vsel %vm4623_vm15, %v4601_v27, %v4131_v21  ;;  %v11344_v0 = vld [vmem:[#allocation3 + $0x10a] sm:$0xff] }
 0x6ca   : > { %v4137_v22 = vpop.permute.xlu2 %4136  ;;  %v4667_v23 = vsel %vm4656_vm8, %v4634_v45, %v11188_v50 }
 0x6cb   : > { %3904 = vrot.lane.b32.xlu1 %v11167_v26, %s6709_s14  ;;  %v14378_v26 = vld [vmem:[#allocation134_spill] sm:$0xff] }
 0x6cc   : > { %v4505_v4 = vsel %vm14379_vm5, %v4473_v10, %v14378_v26  ;;  %vm14402_vm5 = vmmov %vm14385_vm4 }
 0x6cd   : > { %4272 = vrot.lane.b32.xlu0 %v11272_v55, %s6712_s9  ;;  %v4005_v35 = vpop.permute.xlu1 %4004  ;;  %v4537_v15 = vsel %vm14381_vm12, %v4505_v4, %v14380_v51  ;;  %v14403_v51 = vld [vmem:[#allocation58_spill] sm:$0xff]  ;;  %vm14404_vm12 = vmmov %vm14387_vm0 }
 0x6ce   : > { %v4569_v50 = vsel %vm14382_vm10, %v4537_v15, %v10996_v40  ;;  %v11302_v40 = vld [vmem:[#allocation3 + $0x15a] sm:$0xff]  ;;  %vm14406_vm10 = vmmov %vm14398_vm9 }
 0x6cf   : > { %v4387_v14 = vpop.permute.xlu0 %4386  ;;  %v4602_v3 = vsel %vm4590_vm3, %v4569_v50, %v4005_v35 }
 0x6d0   : > { %v4700_v36 = vsel %vm4689_vm2, %v4667_v23, %v4387_v14  ;;  %4288 = vrot.lane.b32.xlu2 %v11285_v25, %s6712_s9  ;;  %v4635_v11 = vsel %vm4623_vm15, %v4602_v3, %v11215_v1  ;;  %v14386_v1 = vld [vmem:[#allocation166_spill] sm:$0xff] }
 0x6d1   : > { %6255 = vmatmul.msk.f32.gmra.mxu1 %vm4735_vm1, %v4700_v36  ;;  %v14400_v36 = vld [vmem:[#allocation154_spill] sm:$0xff] }
 0x6d2   : > { %v3883_v38 = vpop.permute.xlu2 %3882 }
 0x6d3   : > { %4160 = vrot.lane.b32.xlu1 %v3367_v59, %s6713_s10  ;;  %v14405_v59 = vld [vmem:[#allocation192_spill] sm:$0xff] }
 0x6d5   : > { %4032 = vrot.lane.b32.xlu0 %v11159_v34, %s6710_s30  ;;  %v4389_v17 = vpop.permute.xlu1 %4388  ;;  %v4474_v34 = vsel %vm14385_vm4, %v14384_v47, %v14383_v58  ;;  %vm14407_vm4 = vmmov %vm14391_vm7 }
 0x6d6   : > { %v4506_v54 = vsel %vm14387_vm0, %v4474_v34, %v14386_v1  ;;  %v11384_v1 = vld [vmem:[#allocation3 + $0x112] sm:$0xff]  ;;  %vm14409_vm0 = vmmov %vm14402_vm5 }
 0x6d7   : > { %v4261_v39 = vpop.permute.xlu0 %4260  ;;  %v4538_v5 = vsel %vm14389_vm14, %v4506_v54, %v14388_v9  ;;  %v6675_v9 = vld [vmem:[#allocation3 + $0xb0] sm:$0xff]  ;;  %vm14411_vm14 = vmmov %vm14396_vm6 }
 0x6d8   : > { %v4668_v37 = vsel %vm4656_vm8, %v4635_v11, %v4261_v39  ;;  %4018 = vrot.lane.b32.xlu2 %v11204_v61, %s6710_s30  ;;  %v4570_v61 = vsel %vm14391_vm7, %v4538_v5, %v14390_v53  ;;  %v11373_v11 = vld [vmem:[#allocation3 + $0x111] sm:$0xff]  ;;  %vm14413_vm7 = vmmov %vm14398_vm9 }
 0x6d9   : > { %v4701_v19 = vsel %vm4689_vm2, %v4668_v37, %v4389_v17  ;;  %v4603_v44 = vsel %vm4590_vm3, %v4570_v61, %v11235_v33  ;;  %v3361_v39 = vld [vmem:[#allocation3 + $0x110] sm:$0xff]  ;;  %v14412_v61 = vld [vmem:[#allocation115_spill] sm:$0xff]  ;;  %vm14414_vm13 = vmmov %vm14407_vm4 }
 0x6da   : > { %6256 = vmatmul.msk.f32.gmra.mxu1 %vm4735_vm1, %v4701_v19  ;;  %v4267_v6 = vpop.permute.xlu2 %4266 }
 0x6db   : > { %4416 = vrot.lane.b32.xlu1 %v11302_v40, %s6711_s8 }
 0x6dd   : > { %3890 = vrot.lane.b32.xlu0 %v11181_v13, %s6709_s14  ;;  %v4263_v49 = vpop.permute.xlu1 %4262  ;;  %v3360_v13 = vld [vmem:[#allocation3 + $0x108] sm:$0xff] }
 0x6df   : > { %v4135_v48 = vpop.permute.xlu0 %4134 }
 0x6e0   : > { %v4636_v29 = vsel %vm4623_vm15, %v4603_v44, %v4135_v48  ;;  %3906 = vrot.lane.b32.xlu2 %v11224_v7, %s6709_s14 }
 0x6e1   : > { %v4669_v8 = vsel %vm4656_vm8, %v4636_v29, %v4263_v49  ;;  %v14410_v49 = vld [vmem:[#allocation135_spill] sm:$0xff]  ;;  %v11401_v29 = vld [vmem:[#allocation3 + $0x171] sm:$0xff] }
 0x6e2   : > { %v4702_v62 = vsel %vm4689_vm2, %v4669_v8, %v4391_v56  ;;  %v4013_v20 = vpop.permute.xlu2 %4012  ;;  %v14395_v56 = vld [vmem:[#allocation112_spill] sm:$0xff] }
 0x6e3   : > { %6257 = vmatmul.msk.f32.gmra.mxu1 %vm4735_vm1, %v4702_v62  ;;  %4274 = vrot.lane.b32.xlu1 %v11324_v41, %s6712_s9  ;;  %v4507_v21 = vsel %vm14396_vm6, %v4475_v32, %v14395_v56  ;;  %v3369_v62 = vld [vmem:[#allocation3 + $0x170] sm:$0xff]  ;;  %v14415_v56 = vld [vmem:[#allocation145_spill] sm:$0xff]  ;;  %vm14416_vm6 = vmmov %vm14409_vm0 }
 0x6e4   : > { %v4539_v7 = vsel %vm14398_vm9, %v4507_v21, %v14397_v63  ;;  %v6676_v32 = vld [vmem:[#allocation3 + $0x110] sm:$0xff]  ;;  %v14417_v21 = vld [vmem:[#allocation151_spill] sm:$0xff]  ;;  %vm14418_vm9 = vmmov %vm14404_vm12 }
 0x6e5   : > { %4146 = vrot.lane.b32.xlu0 %v3360_v13, %s6713_s10  ;;  %v4009_v33 = vpop.permute.xlu1 %4008  ;;  %v3362_v63 = vld [vmem:[#allocation3 + $0x120] sm:$0xff] }
 0x6e7   : > { %v3881_v31 = vpop.permute.xlu0 %3880 }
 0x6e8   : > { %v4571_v12 = vsel %vm14399_vm11, %v4539_v7, %v3881_v31  ;;  %4162 = vrot.lane.b32.xlu2 %v3368_v46, %s6713_s10  ;;  %v14419_v7 = vld [vmem:[#allocation158_spill] sm:$0xff]  ;;  %vm14420_vm11 = vmmov %vm14413_vm7 }
 0x6e9   : > { %v4604_v30 = vsel %vm4590_vm3, %v4571_v12, %v4009_v33 }
 0x6ea   : > { %v11346_v27 = vpop.permute.xlu2 %3900  ;;  %v4637_v35 = vsel %vm4623_vm15, %v4604_v30, %v4137_v22  ;;  %v14401_v22 = vld [vmem:[#allocation178_spill] sm:$0xff] }
 0x6eb   : > { %4034 = vrot.lane.b32.xlu1 %v11251_v57, %s6710_s30  ;;  %v11360_v57 = vld [vmem:[#allocation3 + $0x169] sm:$0xff]  ;;  %v4476_v26 = vsel %vm14402_vm5, %v14401_v22, %v14400_v36  ;;  %vm14421_vm5 = vmmov %vm14407_vm4 }
 0x6ec   : > { %v4508_v15 = vsel %vm14404_vm12, %v4476_v26, %v14403_v51  ;;  %v11436_v22 = vld [vmem:[#allocation3 + $0x122] sm:$0xff]  ;;  %vm14423_vm12 = vmmov %vm14409_vm0 }
 0x6ed   : > { %4402 = vrot.lane.b32.xlu0 %v11344_v0, %s6711_s8  ;;  %v4393_v45 = vpop.permute.xlu1 %4392  ;;  %v4540_v50 = vsel %vm14406_vm10, %v4508_v15, %v14405_v59  ;;  %v14422_v26 = vld [vmem:[#allocation107_spill] sm:$0xff]  ;;  %v14424_v15 = vld [vmem:[#allocation114_spill] sm:$0xff]  ;;  %vm14425_vm10 = vmmov %vm14418_vm9 }
 0x6ef   : > { %v4265_v14 = vpop.permute.xlu0 %4264 }
 0x6f0   : > { %v4670_v23 = vsel %vm4656_vm8, %v4637_v35, %v4265_v14  ;;  %4418 = vrot.lane.b32.xlu2 %v11353_v60, %s6711_s8 }
 0x6f1   : > { %v4703_v24 = vsel %vm4689_vm2, %v4670_v23, %v4393_v45  ;;  %v11427_v45 = vld [vmem:[#allocation3 + $0x172] sm:$0xff] }
 0x6f2   : > { %6258 = vmatmul.msk.f32.gmra.mxu1 %vm4735_vm1, %v4703_v24  ;;  %v4157_v10 = vpop.permute.xlu2 %4156 }
 0x6f3   : > { %3892 = vrot.lane.b32.xlu1 %v11272_v55, %s6709_s14  ;;  %v4572_v55 = vsel %vm14407_vm4, %v4540_v50, %v3883_v38  ;;  %vm14427_vm4 = vmmov %vm14413_vm7 }
 0x6f5   : > { %4290 = vrot.lane.b32.xlu0 %v11360_v57, %s6712_s9  ;;  %v4139_v4 = vpop.permute.xlu1 %4138 }
 0x6f7   : > { %v4011_v3 = vpop.permute.xlu0 %4010 }
 0x6f8   : > { %v4605_v17 = vsel %vm4590_vm3, %v4572_v55, %v4011_v3  ;;  %4276 = vrot.lane.b32.xlu2 %v11373_v11, %s6712_s9  ;;  %v14426_v3 = vld [vmem:[#allocation149_spill] sm:$0xff] }
 0x6f9   : > { %v4638_v37 = vsel %vm4623_vm15, %v4605_v17, %v4139_v4 }
 0x6fa   : > { %v4413_v19 = vpop.permute.xlu2 %4412  ;;  %v4671_v38 = vsel %vm4656_vm8, %v4638_v37, %v4267_v6  ;;  %v11455_v37 = vld [vmem:[#allocation3 + $0x181] sm:$0xff] }
 0x6fb   : > { %4148 = vrot.lane.b32.xlu1 %v3361_v39, %s6713_s10 }
 0x6fd   : > { %4020 = vrot.lane.b32.xlu0 %v11265_v18, %s6710_s30  ;;  %v3885_v58 = vpop.permute.xlu1 %3884  ;;  %v14408_v18 = vld [vmem:[#allocation165_spill] sm:$0xff] }
 0x6fe   : > { %v4477_v5 = vsel %vm14409_vm0, %v6675_v9, %v14408_v18  ;;  %vm14428_vm0 = vmmov %vm14421_vm5 }
 0x6ff   : > { %v4395_v47 = vpop.permute.xlu0 %4394  ;;  %v4509_v53 = vsel %vm14411_vm14, %v4477_v5, %v14410_v49  ;;  %v11467_v5 = vld [vmem:[#allocation3 + $0x182] sm:$0xff]  ;;  %v14429_v49 = vld [vmem:[#allocation121_spill] sm:$0xff]  ;;  %vm14430_vm14 = vmmov %vm14416_vm6 }
 0x700   : > { %v4704_v34 = vsel %vm4689_vm2, %v4671_v38, %v4395_v47  ;;  %4036 = vrot.lane.b32.xlu2 %v11302_v40, %s6710_s30  ;;  %v4541_v44 = vsel %vm14413_vm7, %v4509_v53, %v14412_v61  ;;  %v14431_v61 = vld [vmem:[#allocation137_spill] sm:$0xff]  ;;  %vm14432_vm7 = vmmov %vm14418_vm9 }
 0x701   : > { %6259 = vmatmul.msk.f32.gmra.mxu1 %vm4735_vm1, %v4704_v34  ;;  %v4573_v48 = vsel %vm14414_vm13, %v4541_v44, %v3885_v58  ;;  %v3370_v58 = vld [vmem:[#allocation3 + $0x180] sm:$0xff]  ;;  %vm14434_vm13 = vmmov %vm14427_vm4 }
 0x702   : > { %v11390_v54 = vpop.permute.xlu2 %4270  ;;  %v4606_v8 = vsel %vm4590_vm3, %v4573_v48, %v4013_v20 }
 0x703   : > { %4404 = vrot.lane.b32.xlu1 %v11384_v1, %s6711_s8 }
 0x705   : > { %3908 = vrot.lane.b32.xlu0 %v11285_v25, %s6709_s14  ;;  %v4269_v6 = vpop.permute.xlu1 %4268 }
 0x707   : > { %v4141_v40 = vpop.permute.xlu0 %4140 }
 0x708   : > { %3894 = vrot.lane.b32.xlu2 %v11324_v41, %s6709_s14  ;;  %v4639_v25 = vsel %vm4623_vm15, %v4606_v8, %v4141_v40  ;;  %v4485_v41 = vsel %vm14416_vm6, %v6676_v32, %v14415_v56  ;;  %v14433_v40 = vld [vmem:[#allocation169_spill] sm:$0xff]  ;;  %vm14435_vm6 = vmmov %vm14428_vm0  ;;  %v6679_v56 = vld [vmem:[#allocation3 + $0xc8] sm:$0xff] }
 0x709   : > { %v4672_v2 = vsel %vm4656_vm8, %v4639_v25, %v4269_v6  ;;  %v4517_v31 = vsel %vm14418_vm9, %v4485_v41, %v14417_v21  ;;  %v14436_v41 = vld [vmem:[#allocation44_spill] sm:$0xff]  ;;  %vm14437_vm9 = vmmov %vm14423_vm12  ;;  %v3371_v21 = vld [vmem:[#allocation3 + $0x188] sm:$0xff] }
 0x70a   : > { %v11409_v13 = vpop.permute.xlu2 %4030  ;;  %v4549_v12 = vsel %vm14420_vm11, %v4517_v31, %v14419_v7  ;;  %vm14439_vm11 = vmmov %vm14432_vm7  ;;  %v14440_v31 = vld [vmem:[#allocation138_spill] sm:$0xff] }
 0x70b   : > { %4292 = vrot.lane.b32.xlu1 %v11401_v29, %s6712_s9  ;;  %v4581_v46 = vsel %vm14421_vm5, %v4549_v12, %v11346_v27  ;;  %vm14441_vm5 = vmmov %vm14427_vm4 }
 0x70d   : > { %4164 = vrot.lane.b32.xlu0 %v3369_v62, %s6713_s10  ;;  %v4029_v33 = vpop.permute.xlu1 %4028  ;;  %v3363_v62 = vld [vmem:[#allocation3 + $0x128] sm:$0xff] }
 0x70e   : > { %v4614_v30 = vsel %vm4590_vm3, %v4581_v46, %v4029_v33 }
 0x70f   : > { %v4397_v28 = vpop.permute.xlu0 %4396  ;;  %v4647_v23 = vsel %vm4623_vm15, %v4614_v30, %v4157_v10  ;;  %v11445_v10 = vld [vmem:[#allocation3 + $0x121] sm:$0xff] }
 0x710   : > { %v4705_v20 = vsel %vm4689_vm2, %v4672_v2, %v4397_v28  ;;  %4150 = vrot.lane.b32.xlu2 %v3362_v63, %s6713_s10 }
 0x711   : > { %6260 = vmatmul.msk.f32.gmra.mxu1 %vm4735_vm1, %v4705_v20  ;;  %v14438_v20 = vld [vmem:[#allocation176_spill] sm:$0xff] }
 0x712   : > { %v11429_v35 = vpop.permute.xlu2 %3888 }
 0x713   : > { %4022 = vrot.lane.b32.xlu1 %v11344_v0, %s6710_s30  ;;  %v6677_v0 = vld [vmem:[#allocation3 + $0xc0] sm:$0xff] }
 0x714   : > { %v4478_v4 = vsel %vm14423_vm12, %v6677_v0, %v14422_v26  ;;  %vm14442_vm12 = vmmov %vm14428_vm0  ;;  %v3403_v0 = vld [vmem:[#allocation3 + $0x189] sm:$0xff] }
 0x715   : > { %4420 = vrot.lane.b32.xlu0 %v11427_v45, %s6711_s8  ;;  %v3887_v14 = vpop.permute.xlu1 %3886  ;;  %v4510_v59 = vsel %vm14425_vm10, %v4478_v4, %v14424_v15  ;;  %vm14444_vm10 = vmmov %vm14437_vm9  ;;  %v14445_v26 = vld [vmem:[#allocation100_spill] sm:$0xff] }
 0x716   : > { %v4542_v55 = vsel %vm14427_vm4, %v4510_v59, %v14426_v3  ;;  %vm14446_vm4 = vmmov %vm14432_vm7  ;;  %v14447_v59 = vld [vmem:[#allocation49_spill] sm:$0xff] }
 0x717   : > { %v4285_v24 = vpop.permute.xlu0 %4284  ;;  %v4574_v17 = vsel %vm14428_vm0, %v4542_v55, %v3887_v14  ;;  %vm14448_vm0 = vmmov %vm14441_vm5 }
 0x718   : > { %v4680_v36 = vsel %vm4656_vm8, %v4647_v23, %v4285_v24  ;;  %4406 = vrot.lane.b32.xlu2 %v11436_v22, %s6711_s8 }
 0x719   : > { %v4713_v27 = vsel %vm4689_vm2, %v4680_v36, %v4413_v19 }
 0x71a   : > { %6268 = vmatmul.msk.f32.vlgmr.msrb.gmra.mxu3 %vm4735_vm1, %v4713_v27  ;;  %v4145_v51 = vpop.permute.xlu2 %4144  ;;  %v3435_v27 = vld [vmem:[#allocation3 + $0x18a] sm:$0xff] }
 0x71b   : > { %3910 = vrot.lane.b32.xlu1 %v11360_v57, %s6709_s14 }
 0x71d   : > { %4278 = vrot.lane.b32.xlu0 %v11445_v10, %s6712_s9  ;;  %v4143_v50 = vpop.permute.xlu1 %4142 }
 0x71f   : > { %v4015_v57 = vpop.permute.xlu0 %4014 }
 0x720   : > { %v4607_v39 = vsel %vm4590_vm3, %v4574_v17, %v4015_v57  ;;  %4294 = vrot.lane.b32.xlu2 %v11455_v37, %s6712_s9  ;;  %v3364_v57 = vld [vmem:[#allocation3 + $0x138] sm:$0xff] }
 0x721   : > { %v4640_v19 = vsel %vm4623_vm15, %v4607_v39, %v4143_v50  ;;  %v5835_v39 = vld [vmem:[%s13230_s5] sm:$0xf] }
 0x722   : > { %v4401_v47 = vpop.permute.xlu2 %4400  ;;  %v4673_v34 = vsel %vm4656_vm8, %v4640_v19, %v11390_v54  ;;  %v14451_v19 = vld [vmem:[#allocation5_spill] sm:$0xff] }
 0x723   : > { %4166 = vrot.lane.b32.xlu1 %v3370_v58, %s6713_s10 }
 0x725   : > { %4038 = vrot.lane.b32.xlu0 %v11353_v60, %s6710_s30  ;;  %v4399_v38 = vpop.permute.xlu1 %4398  ;;  %v6678_v60 = vld [vmem:[#allocation3 + $0x120] sm:$0xff] }
 0x726   : > { %v4706_v9 = vsel %vm4689_vm2, %v4673_v34, %v4399_v38  ;;  %v4486_v53 = vsel %vm14430_vm14, %v6678_v60, %v14429_v49  ;;  %vm14449_vm14 = vmmov %vm14435_vm6  ;;  %v14458_v49 = vld [vmem:[#allocation177_spill] sm:$0xff] }
 0x727   : > { %v3903_v18 = vpop.permute.xlu0 %3902  ;;  %6261 = vmatmul.msk.f32.gmra.mxu1 %vm4735_vm1, %v4706_v9  ;;  %v4518_v44 = vsel %vm14432_vm7, %v4486_v53, %v14431_v61  ;;  %vm14450_vm7 = vcmask 1043456   ;;  %v14454_v9 = vld [vmem:[#allocation7_spill] sm:$0xff] }
 0x728   : > { %4024 = vrot.lane.b32.xlu2 %v11384_v1, %s6710_s30  ;;  %v4550_v48 = vsel %vm14434_vm13, %v4518_v44, %v14433_v40  ;;  %6309 = vmatpush.msk.msra.mxu2 %vm14450_vm7, %v5835_v39  ;;  %vm14452_vm13 = vcmask 31744   ;;  %v3436_v44 = vld [vmem:[#allocation3 + $0x19a] sm:$0xff] }
 0x729   : > { %v4582_v8 = vsel %vm14435_vm6, %v4550_v48, %v3903_v18  ;;  %6310 = vmatmul.msk.f32.vlgmr.msra.gmra.mxu2 %vm14452_vm13, %v14451_v19  ;;  %vm14453_vm6 = vmmov %vm14450_vm7  ;;  %v14456_v18 = vld [vmem:[#allocation184_spill] sm:$0xff]  ;;  %v3404_v40 = vld [vmem:[#allocation3 + $0x199] sm:$0xff] }
 0x72a   : > { %v11473_v6 = vpop.permute.xlu2 %4288  ;;  %v4615_v25 = vsel %vm4590_vm3, %v4582_v8, %v11409_v13  ;;  %6360 = vmatpush.msk.msra.mxu3 %vm14453_vm6, %v5835_v39 }
 0x72b   : > { %4422 = vrot.lane.b32.xlu1 %v11467_v5, %s6711_s8 }
 0x72d   : > { %3896 = vrot.lane.b32.xlu0 %v11373_v11, %s6709_s14  ;;  %v4287_v54 = vpop.permute.xlu1 %4286 }
 0x72f   : > { %v4159_v1 = vpop.permute.xlu0 %4158 }
 0x730   : > { %3912 = vrot.lane.b32.xlu2 %v11401_v29, %s6709_s14  ;;  %v4648_v11 = vsel %vm4623_vm15, %v4615_v25, %v4159_v1  ;;  %v4479_v29 = vsel %vm14437_vm9, %v6679_v56, %v14436_v41  ;;  %vm14455_vm9 = vmmov %vm14452_vm13  ;;  %v3372_v1 = vld [vmem:[#allocation3 + $0x198] sm:$0xff]  ;;  %v14463_v25 = vld [vmem:[#allocation4_spill] sm:$0xff] }
 0x731   : > { %v4681_v32 = vsel %vm4656_vm8, %v4648_v11, %v4287_v54  ;;  %6311 = vmatmul.msk.f32.gmra.mxu2 %vm14455_vm9, %v14454_v9  ;;  %v14460_v54 = vld [vmem:[#allocation127_spill] sm:$0xff] }
 0x732   : > { %v11491_v33 = vpop.permute.xlu2 %4018 }
 0x733   : > { %4280 = vrot.lane.b32.xlu1 %v11113_v52, %s6712_s9  ;;  %v4511_v52 = vsel %vm14439_vm11, %v4479_v29, %v14438_v20  ;;  %vm14457_vm11 = vmmov %vm14444_vm10 }
 0x734   : > { %v4543_v63 = vsel %vm14441_vm5, %v4511_v52, %v14440_v31  ;;  %vm14459_vm5 = vmmov %vm14446_vm4 }
 0x735   : > { %4152 = vrot.lane.b32.xlu0 %v3363_v62, %s6713_s10  ;;  %v4017_v28 = vpop.permute.xlu1 %4016  ;;  %v4575_v7 = vsel %vm14442_vm12, %v4543_v63, %v11429_v35  ;;  %v14443_v35 = vld [vmem:[#allocation76_spill] sm:$0xff]  ;;  %vm14461_vm12 = vmmov %vm14448_vm0  ;;  %v3373_v63 = vld [vmem:[#allocation3 + $0x1a0] sm:$0xff] }
 0x736   : > { %v4608_v12 = vsel %vm4590_vm3, %v4575_v7, %v4017_v28  ;;  %vm14470_vm7 = vmmov %vm14461_vm12  ;;  %v14472_v7 = vld [vmem:[#allocation6_spill] sm:$0xff] }
 0x737   : > { %v4415_v2 = vpop.permute.xlu0 %4414  ;;  %v4641_v14 = vsel %vm4623_vm15, %v4608_v12, %v4145_v51 }
 0x738   : > { %v4714_v13 = vsel %vm4689_vm2, %v4681_v32, %v4415_v2  ;;  %4168 = vrot.lane.b32.xlu2 %v3371_v21, %s6713_s10  ;;  %v6682_v2 = vld [vmem:[#allocation3 + $0x138] sm:$0xff]  ;;  %v14465_v32 = vld [vmem:[#allocation108_spill] sm:$0xff] }
 0x739   : > { %6269 = vmatmul.msk.f32.gmra.mxu3 %vm4735_vm1, %v4714_v13  ;;  %v14469_v13 = vld [vmem:[#allocation159_spill] sm:$0xff] }
 0x73a   : > { %v11509_v46 = vpop.permute.xlu2 %3906 }
 0x73b   : > { %4040 = vrot.lane.b32.xlu1 %v11427_v45, %s6710_s30  ;;  %v6680_v45 = vld [vmem:[#allocation3 + $0x128] sm:$0xff] }
 0x73d   : > { %4408 = vrot.lane.b32.xlu0 %v11134_v43, %s6711_s8  ;;  %v3905_v30 = vpop.permute.xlu1 %3904  ;;  %v4487_v43 = vsel %vm14444_vm10, %v6680_v45, %v14443_v35  ;;  %vm14462_vm10 = vmmov %vm14449_vm14  ;;  %v14474_v45 = vld [vmem:[#allocation124_spill] sm:$0xff] }
 0x73e   : > { %v4519_v4 = vsel %vm14446_vm4, %v4487_v43, %v14445_v26  ;;  %vm14464_vm4 = vmmov %vm14455_vm9  ;;  %v14476_v43 = vld [vmem:[#allocation8_spill] sm:$0xff] }
 0x73f   : > { %v4273_v23 = vpop.permute.xlu0 %4272  ;;  %v4551_v50 = vsel %vm14448_vm0, %v4519_v4, %v14447_v59  ;;  %6312 = vmatmul.msk.f32.gmra.mxu2 %vm14464_vm4, %v14463_v25  ;;  %vm14466_vm0 = vmmov %vm14457_vm11  ;;  %v14493_v25 = vld [vmem:[#allocation132_spill] sm:$0xff] }
 0x740   : > { %v4674_v24 = vsel %vm4656_vm8, %v4641_v14, %v4273_v23  ;;  %4424 = vrot.lane.b32.xlu2 %v3435_v27, %s6711_s8  ;;  %v4583_v3 = vsel %vm14449_vm14, %v4551_v50, %v3905_v30  ;;  %v4488_v56 = vsel %vm14466_vm0, %v6682_v2, %v14465_v32  ;;  %vm14468_vm14 = vmmov %vm14459_vm5  ;;  %v14496_v32 = vld [vmem:[#allocation180_spill] sm:$0xff] }
 0x741   : > { %v4707_v36 = vsel %vm4689_vm2, %v4674_v24, %v4401_v47  ;;  %vm14471_vm13 = vmmov %vm14462_vm10 }
 0x742   : > { %6262 = vmatmul.msk.f32.gmra.mxu1 %vm4735_vm1, %v4707_v36  ;;  %v4163_v15 = vpop.permute.xlu2 %4162  ;;  %vm14473_vm6 = vmmov %vm14464_vm4  ;;  %v3405_v36 = vld [vmem:[#allocation3 + $0x1a1] sm:$0xff] }
 0x743   : > { %3898 = vrot.lane.b32.xlu1 %v11445_v10, %s6709_s14  ;;  %vm14475_vm9 = vmmov %vm14466_vm0 }
 0x744   : > { %vm14483_vm0 = vmmov %vm14464_vm4 }
 0x745   : > { %4296 = vrot.lane.b32.xlu0 %v3403_v0, %s6712_s9  ;;  %v4161_v51 = vpop.permute.xlu1 %4160 }
 0x747   : > { %v4033_v55 = vpop.permute.xlu0 %4032  ;;  %6313 = vmatmul.msk.f32.gmra.mxu2 %vm14473_vm6, %v14472_v7  ;;  %vm14490_vm6 = vmmov %vm14462_vm10 }
 0x748   : > { %v4616_v10 = vsel %vm4590_vm3, %v4583_v3, %v4033_v55  ;;  %4282 = vrot.lane.b32.xlu2 %v11213_v42, %s6712_s9 }
 0x749   : > { %v4649_v17 = vsel %vm4623_vm15, %v4616_v10, %v4161_v51 }
 0x74a   : > { %v4682_v42 = vsel %vm4656_vm8, %v4649_v17, %v11473_v6  ;;  %v4419_v38 = vpop.permute.xlu2 %4418  ;;  %v14481_v17 = vld [vmem:[#allocation10_spill] sm:$0xff] }
 0x74b   : > { %4154 = vrot.lane.b32.xlu1 %v3364_v57, %s6713_s10 }
 0x74d   : > { %4026 = vrot.lane.b32.xlu0 %v11436_v22, %s6710_s30  ;;  %v4417_v58 = vpop.permute.xlu1 %4416  ;;  %v6681_v22 = vld [vmem:[#allocation3 + $0xd8] sm:$0xff] }
 0x74e   : > { %v4715_v47 = vsel %vm4689_vm2, %v4682_v42, %v4417_v58  ;;  %v4480_v60 = vsel %vm14457_vm11, %v6681_v22, %v14456_v18  ;;  %vm14477_vm11 = vmmov %vm14464_vm4  ;;  %v14486_v18 = vld [vmem:[#allocation93_spill] sm:$0xff] }
 0x74f   : > { %v3891_v34 = vpop.permute.xlu0 %3890  ;;  %6270 = vmatmul.msk.f32.gmra.mxu3 %vm4735_vm1, %v4715_v47  ;;  %v4512_v53 = vsel %vm14459_vm5, %v4480_v60, %v14458_v49  ;;  %6314 = vmatmul.msk.f32.gmra.mxu2 %vm14477_vm11, %v14476_v43  ;;  %v14482_v47 = vld [vmem:[#allocation9_spill] sm:$0xff] }
 0x750   : > { %4042 = vrot.lane.b32.xlu2 %v11467_v5, %s6710_s30  ;;  %v4544_v5 = vsel %vm14461_vm12, %v4512_v53, %v14460_v54  ;;  %vm14480_vm12 = vmmov %vm14470_vm7 }
 0x752   : > { %v4277_v48 = vpop.permute.xlu2 %4276 }
 0x753   : > { %4410 = vrot.lane.b32.xlu1 %v11200_v16, %s6711_s8  ;;  %v4576_v16 = vsel %vm14462_vm10, %v4544_v5, %v3891_v34  ;;  %v14484_v34 = vld [vmem:[#allocation136_spill] sm:$0xff] }
 0x754   : > { %v4609_v8 = vsel %vm4590_vm3, %v4576_v16, %v11491_v33  ;;  %v14467_v33 = vld [vmem:[#allocation47_spill] sm:$0xff] }
 0x755   : > { %3914 = vrot.lane.b32.xlu0 %v11455_v37, %s6709_s14  ;;  %v4275_v6 = vpop.permute.xlu1 %4274  ;;  %v4520_v29 = vsel %vm14468_vm14, %v4488_v56, %v14467_v33  ;;  %vm14485_vm14 = vmmov %vm14475_vm9 }
 0x756   : > { %v4552_v20 = vsel %vm14470_vm7, %v4520_v29, %v14469_v13  ;;  %vm14487_vm7 = vmmov %vm14459_vm5 }
 0x757   : > { %v4147_v61 = vpop.permute.xlu0 %4146  ;;  %v4584_v52 = vsel %vm14471_vm13, %v4552_v20, %v11509_v46  ;;  %v3437_v46 = vld [vmem:[#allocation3 + $0x1a2] sm:$0xff]  ;;  %6315 = vmatmul.msk.f32.gmra.mxu2 %vm14464_vm4, %v14481_v17  ;;  %vm14489_vm13 = vmmov %vm14480_vm12  ;;  %v14498_v20 = vld [vmem:[#allocation13_spill] sm:$0xff] }
 0x758   : > { %4426 = vrot.lane.b32.xlu2 %v3436_v44, %s6711_s8  ;;  %v4642_v37 = vsel %vm4623_vm15, %v4609_v8, %v4147_v61  ;;  %v11617_v61 = vpop.f32.mrf.mxu1  ;;  %vm14494_vm11 = vmmov %vm14485_vm14 }
 0x759   : > { %v4675_v28 = vsel %vm4656_vm8, %v4642_v37, %v4275_v6  ;;  %v14488_v6 = vld [vmem:[#allocation116_spill] sm:$0xff]  ;;  %vm14499_vm4 = vmmov %vm14483_vm0 }
 0x75a   : > { %v4037_v21 = vpop.permute.xlu2 %4036  ;;  %v6685_v37 = vld [vmem:[#allocation3 + $0xf0] sm:$0xff] }
 0x75b   : > { %4298 = vrot.lane.b32.xlu1 %v3404_v40, %s6712_s9  ;;  %v14491_v40 = vld [vmem:[#allocation11_spill] sm:$0xff] }
 0x75d   : > { %4170 = vrot.lane.b32.xlu0 %v3372_v1, %s6713_s10  ;;  %v4035_v11 = vpop.permute.xlu1 %4034 }
 0x75e   : > { %v4617_v31 = vsel %vm4590_vm3, %v4584_v52, %v4035_v11  ;;  %v4482_v11 = vsel %vm14494_vm11, %v6685_v37, %v14493_v25  ;;  %v14523_v25 = vld [vmem:[#allocation146_spill] sm:$0xff] }
 0x75f   : > { %v4403_v62 = vpop.permute.xlu0 %4402  ;;  %v4650_v30 = vsel %vm4623_vm15, %v4617_v31, %v4163_v15  ;;  %v14479_v15 = vld [vmem:[#allocation191_spill] sm:$0xff]  ;;  %6316 = vmatmul.msk.f32.gmra.mxu2 %vm14483_vm0, %v14482_v47 }
 0x760   : > { %v4708_v41 = vsel %vm4689_vm2, %v4675_v28, %v4403_v62  ;;  %4172 = vrot.lane.b32.xlu2 %v3373_v63, %s6713_s10  ;;  %v14495_v28 = vld [vmem:[#allocation62_spill] sm:$0xff]  ;;  %v14514_v47 = vld [vmem:[#allocation63_spill] sm:$0xff] }
 0x761   : > { %6263 = vmatmul.msk.f32.gmra.mxu1 %vm4735_vm1, %v4708_v41  ;;  %v4514_v2 = vsel %vm14459_vm5, %v4482_v11, %v14495_v28  ;;  %v11632_v41 = vpop.f32.mrf.mxu1 }
 0x762   : > { %v3895_v4 = vpop.permute.xlu2 %3894  ;;  %v4546_v56 = vsel %vm14480_vm12, %v4514_v2, %v14496_v32 }
 0x763   : > { %4044 = vrot.lane.b32.xlu1 %v3435_v27, %s6710_s30  ;;  %v6683_v27 = vld [vmem:[#allocation3 + $0xe0] sm:$0xff] }
 0x764   : > { %v4481_v35 = vsel %vm14475_vm9, %v6683_v27, %v14474_v45  ;;  %vm14492_vm9 = vmmov %vm14483_vm0 }
 0x765   : > { %3916 = vrot.lane.b32.xlu0 %v3403_v0, %s6709_s14  ;;  %v3893_v12 = vpop.permute.xlu1 %3892  ;;  %v14478_v0 = vld [vmem:[#allocation155_spill] sm:$0xff]  ;;  %vm14501_vm0 = vmmov %vm14494_vm11 }
 0x766   : > { %v4513_v26 = vsel %vm14459_vm5, %v4481_v35, %v14478_v0  ;;  %v14506_v35 = vld [vmem:[#allocation147_spill] sm:$0xff]  ;;  %vm14511_vm11 = vmmov %vm14499_vm4 }
 0x767   : > { %v4291_v14 = vpop.permute.xlu0 %4290  ;;  %v4545_v59 = vsel %vm14480_vm12, %v4513_v26, %v14479_v15  ;;  %6317 = vmatmul.msk.f32.gmra.mxu2 %vm14492_vm9, %v14491_v40  ;;  %v14508_v15 = vld [vmem:[#allocation14_spill] sm:$0xff]  ;;  %vm14509_vm9 = vmmov %vm14499_vm4  ;;  %v6688_v40 = vld [vmem:[#allocation3 + $0x158] sm:$0xff] }
 0x768   : > { %v4683_v23 = vsel %vm4656_vm8, %v4650_v30, %v4291_v14  ;;  %v4577_v50 = vsel %vm14462_vm10, %v4545_v59, %v3893_v12  ;;  %vm14497_vm10 = vmmov %vm14490_vm6  ;;  %v6686_v12 = vld [vmem:[#allocation3 + $0x150] sm:$0xff]  ;;  %v14500_v30 = vld [vmem:[#allocation195_spill] sm:$0xff] }
 0x769   : > { %v4716_v24 = vsel %vm4689_vm2, %v4683_v23, %v4419_v38  ;;  %v6684_v38 = vld [vmem:[#allocation3 + $0x140] sm:$0xff]  ;;  %v4578_v33 = vsel %vm14497_vm10, %v4546_v56, %v3895_v4  ;;  %v4490_v14 = vsel %vm14501_vm0, %v6686_v12, %v14500_v30  ;;  %v11644_v23 = vpop.f32.mrf.mxu1  ;;  %v14531_v30 = vld [vmem:[#allocation19_spill] sm:$0xff] }
 0x76a   : > { %6271 = vmatmul.msk.f32.gmra.mxu3 %vm4735_vm1, %v4716_v24  ;;  %v4151_v58 = vpop.permute.xlu2 %4150  ;;  %v4489_v9 = vsel %vm14485_vm14, %v6684_v38, %v14484_v34  ;;  %vm14503_vm14 = vmmov %vm14499_vm4  ;;  %v14504_v24 = vld [vmem:[#allocation152_spill] sm:$0xff] }
 0x76b   : > { %4428 = vrot.lane.b32.xlu1 %v3437_v46, %s6711_s8  ;;  %v4521_v60 = vsel %vm14487_vm7, %v4489_v9, %v14486_v18  ;;  %v14502_v46 = vld [vmem:[#allocation12_spill] sm:$0xff]  ;;  %vm14505_vm7 = vmmov %vm14459_vm5  ;;  %v14516_v9 = vld [vmem:[#allocation153_spill] sm:$0xff] }
 0x76c   : > { %v4553_v49 = vsel %vm14489_vm13, %v4521_v60, %v14488_v6  ;;  %vm14507_vm13 = vmmov %vm14480_vm12 }
 0x76d   : > { %4300 = vrot.lane.b32.xlu0 %v3405_v36, %s6712_s9  ;;  %v4149_v51 = vpop.permute.xlu1 %4148  ;;  %v4522_v36 = vsel %vm14505_vm7, %v4490_v14, %v14504_v24  ;;  %vm14513_vm5 = vmmov %vm14501_vm0  ;;  %v14533_v14 = vld [vmem:[#allocation189_spill] sm:$0xff] }
 0x76e   : > { %v4554_v43 = vsel %vm14507_vm13, %v4522_v36, %v14506_v35  ;;  %vm14515_vm12 = vmmov %vm14505_vm7 }
 0x76f   : > { %v4021_v3 = vpop.permute.xlu0 %4020  ;;  %6318 = vmatmul.msk.f32.gmra.mxu2 %vm14499_vm4, %v14498_v20  ;;  %vm14517_vm10 = vmmov %vm14507_vm13 }
 0x770   : > { %v4610_v55 = vsel %vm4590_vm3, %v4577_v50, %v4021_v3  ;;  %vm14518_vm4 = vmmov %vm14490_vm6 }
 0x771   : > { %v4643_v10 = vsel %vm4623_vm15, %v4610_v55, %v4149_v51  ;;  %v11658_v3 = vpop.f32.mrf.mxu1  ;;  %vm14520_vm0 = vmmov %vm14509_vm9 }
 0x772   : > { %v4676_v39 = vsel %vm4656_vm8, %v4643_v10, %v4277_v48  ;;  %v4407_v5 = vpop.permute.xlu2 %4406  ;;  %vm14525_vm13 = vmmov %vm14517_vm10 }
 0x775   : > { %v4405_v57 = vpop.permute.xlu1 %4404 }
 0x776   : > { %v4709_v19 = vsel %vm4689_vm2, %v4676_v39, %v4405_v57  ;;  %v14510_v57 = vld [vmem:[#allocation16_spill] sm:$0xff]  ;;  %v6687_v39 = vld [vmem:[#allocation3 + $0xf8] sm:$0xff] }
 0x777   : > { %v3909_v42 = vpop.permute.xlu0 %3908  ;;  %6264 = vmatmul.msk.f32.gmra.mxu1 %vm4735_vm1, %v4709_v19  ;;  %6319 = vmatmul.msk.f32.gmra.mxu2 %vm14503_vm14, %v14502_v46  ;;  %v14512_v19 = vld [vmem:[#allocation79_spill] sm:$0xff]  ;;  %vm14522_vm14 = vmmov %vm14513_vm5 }
 0x778   : > { %v4585_v54 = vsel %vm14490_vm6, %v4553_v49, %v3909_v42 }
 0x779   : > { %v4618_v44 = vsel %vm4590_vm3, %v4585_v54, %v4037_v21  ;;  %v11668_v34 = vpop.f32.mrf.mxu1  ;;  %v14519_v54 = vld [vmem:[#allocation15_spill] sm:$0xff] }
 0x77a   : > { %v4295_v29 = vpop.permute.xlu2 %4294 }
 0x77d   : > { %v4293_v22 = vpop.permute.xlu1 %4292 }
 0x77f   : > { %v4165_v53 = vpop.permute.xlu0 %4164  ;;  %6320 = vmatmul.msk.f32.gmra.mxu2 %vm14509_vm9, %v14508_v15  ;;  %vm14528_vm9 = vmmov %vm14520_vm0 }
 0x780   : > { %v4651_v16 = vsel %vm4623_vm15, %v4618_v44, %v4165_v53 }
 0x781   : > { %v4684_v8 = vsel %vm4656_vm8, %v4651_v16, %v4293_v22 }
 0x782   : > { %v4025_v27 = vpop.permute.xlu2 %4024 }
 0x785   : > { %v4023_v48 = vpop.permute.xlu1 %4022 }
 0x786   : > { %v4611_v13 = vsel %vm4590_vm3, %v4578_v33, %v4023_v48  ;;  %v14521_v48 = vld [vmem:[#allocation187_spill] sm:$0xff]  ;;  %v14527_v33 = vld [vmem:[#allocation17_spill] sm:$0xff] }
 0x787   : > { %v4421_v1 = vpop.permute.xlu0 %4420  ;;  %v4644_v21 = vsel %vm4623_vm15, %v4611_v13, %v4151_v58  ;;  %6321 = vmatmul.msk.f32.gmra.mxu2 %vm14511_vm11, %v14510_v57  ;;  %v4483_v58 = vsel %vm14513_vm5, %v6687_v39, %v14512_v19  ;;  %vm14530_vm11 = vmmov %vm14513_vm5  ;;  %v14537_v57 = vld [vmem:[#allocation162_spill] sm:$0xff]  ;;  %v14539_v19 = vld [vmem:[#allocation37_spill] sm:$0xff] }
 0x788   : > { %v4717_v62 = vsel %vm4689_vm2, %v4684_v8, %v4421_v1  ;;  %v4515_v38 = vsel %vm14515_vm12, %v4483_v58, %v14514_v47  ;;  %v4491_v1 = vsel %vm14522_vm14, %v6688_v40, %v14521_v48  ;;  %v11680_v8 = vpop.f32.mrf.mxu1  ;;  %vm14532_vm5 = vmmov %vm14520_vm0  ;;  %v6691_v40 = vld [vmem:[#allocation3 + $0x170] sm:$0xff]  ;;  %v14547_v48 = vld [vmem:[#allocation110_spill] sm:$0xff] }
 0x789   : > { %6272 = vmatmul.msk.f32.gmra.mxu3 %vm4735_vm1, %v4717_v62  ;;  %v4547_v22 = vsel %vm14517_vm10, %v4515_v38, %v14516_v9  ;;  %v4523_v11 = vsel %vm14505_vm7, %v4491_v1, %v14523_v25  ;;  %v14524_v62 = vld [vmem:[#allocation64_spill] sm:$0xff]  ;;  %vm14534_vm12 = vmmov %vm14505_vm7  ;;  %v14549_v25 = vld [vmem:[#allocation179_spill] sm:$0xff] }
 0x78a   : > { %v3913_v10 = vpop.permute.xlu2 %3912  ;;  %v4555_v28 = vsel %vm14525_vm13, %v4523_v11, %v14524_v62  ;;  %vm14538_vm14 = vmmov %vm14530_vm11 }
 0x78b   : > { %vm14541_vm13 = vmmov %vm14517_vm10 }
 0x78d   : > { %v3911_v52 = vpop.permute.xlu1 %3910 }
 0x78e   : > { %v4586_v0 = vsel %vm14490_vm6, %v4554_v43, %v3911_v52  ;;  %vm14526_vm6 = vmmov %vm14518_vm4 }
 0x78f   : > { %v4279_v31 = vpop.permute.xlu0 %4278  ;;  %6322 = vmatmul.msk.f32.gmra.mxu2 %vm14520_vm0, %v14519_v54  ;;  %v4587_v2 = vsel %vm14526_vm6, %v4555_v28, %v3913_v10  ;;  %vm14542_vm6 = vmmov %vm14518_vm4  ;;  %v14551_v28 = vld [vmem:[#allocation89_spill] sm:$0xff] }
 0x790   : > { %v4677_v63 = vsel %vm4656_vm8, %v4644_v21, %v4279_v31  ;;  %v11695_v31 = vpop.f32.mrf.mxu1 }
 0x791   : > { %v4710_v7 = vsel %vm4689_vm2, %v4677_v63, %v4407_v5  ;;  %v6689_v63 = vld [vmem:[#allocation3 + $0x108] sm:$0xff] }
 0x792   : > { %6265 = vmatmul.msk.f32.gmra.mxu1 %vm4735_vm1, %v4710_v7  ;;  %v4169_v6 = vpop.permute.xlu2 %4168  ;;  %v14529_v7 = vld [vmem:[#allocation54_spill] sm:$0xff] }
 0x793   : > { %v4484_v12 = vsel %vm14530_vm11, %v6689_v63, %v14529_v7  ;;  %vm14546_vm11 = vmmov %vm14520_vm0 }
 0x794   : > { %v4516_v46 = vsel %vm14534_vm12, %v4484_v12, %v14533_v14  ;;  %vm14550_vm12 = vmmov %vm14505_vm7  ;;  %v14553_v12 = vld [vmem:[#allocation23_spill] sm:$0xff]  ;;  %v14555_v14 = vld [vmem:[#allocation29_spill] sm:$0xff] }
 0x795   : > { %v4167_v45 = vpop.permute.xlu1 %4166 }
 0x797   : > { %v4039_v26 = vpop.permute.xlu0 %4038  ;;  %6323 = vmatmul.msk.f32.gmra.mxu2 %vm14528_vm9, %v14527_v33  ;;  %vm14544_vm9 = vmmov %vm14520_vm0 }
 0x798   : > { %v4619_v4 = vsel %vm4590_vm3, %v4586_v0, %v4039_v26  ;;  %v11708_v26 = vpop.f32.mrf.mxu1 }
 0x799   : > { %v4652_v51 = vsel %vm4623_vm15, %v4619_v4, %v4167_v45 }
 0x79a   : > { %v4685_v50 = vsel %vm4656_vm8, %v4652_v51, %v4295_v29  ;;  %v4425_v32 = vpop.permute.xlu2 %4424  ;;  %v14536_v51 = vld [vmem:[#allocation18_spill] sm:$0xff] }
 0x79d   : > { %v4423_v59 = vpop.permute.xlu1 %4422 }
 0x79e   : > { %v4718_v55 = vsel %vm4689_vm2, %v4685_v50, %v4423_v59 }
 0x79f   : > { %v3897_v17 = vpop.permute.xlu0 %3896  ;;  %6273 = vmatmul.msk.f32.gmra.mxu3 %vm4735_vm1, %v4718_v55  ;;  %6324 = vmatmul.msk.f32.gmra.mxu2 %vm14532_vm5, %v14531_v30  ;;  %vm14548_vm5 = vmmov %vm14538_vm14 }
 0x7a0   : > { %v4579_v60 = vsel %vm14518_vm4, %v4547_v22, %v3897_v17  ;;  %v6690_v17 = vld [vmem:[#allocation3 + $0x168] sm:$0xff]  ;;  %v11722_v38 = vpop.f32.mrf.mxu1  ;;  %v14543_v22 = vld [vmem:[#allocation20_spill] sm:$0xff]  ;;  %v4493_v1 = vsel %vm14548_vm5, %v6691_v40, %v14547_v48  ;;  %vm14576_vm5 = vmmov %vm14520_vm0 }
 0x7a1   : > { %v4612_v49 = vsel %vm4590_vm3, %v4579_v60, %v4025_v27  ;;  %v14535_v27 = vld [vmem:[#allocation123_spill] sm:$0xff]  ;;  %v4492_v39 = vsel %vm14538_vm14, %v6690_v17, %v14537_v57  ;;  %v4525_v11 = vsel %vm14550_vm12, %v4493_v1, %v14549_v25  ;;  %vm14554_vm14 = vmmov %vm14520_vm0 }
 0x7a2   : > { %v4283_v24 = vpop.permute.xlu2 %4282  ;;  %v4548_v45 = vsel %vm14517_vm10, %v4516_v46, %v14535_v27  ;;  %v4524_v58 = vsel %vm14505_vm7, %v4492_v39, %v14539_v19  ;;  %v14557_v46 = vld [vmem:[#allocation25_spill] sm:$0xff]  ;;  %vm14558_vm7 = vmmov %vm14520_vm0  ;;  %v14561_v27 = vld [vmem:[#allocation24_spill] sm:$0xff] }
 0x7a3   : > { %v14575_v57 = vld [vmem:[#allocation87_spill] sm:$0xff]  ;;  %vm14578_vm12 = vmmov %vm14520_vm0 }
 0x7a5   : > { %v4281_v42 = vpop.permute.xlu1 %4280 }
 0x7a7   : > { %v4153_v18 = vpop.permute.xlu0 %4152  ;;  %6325 = vmatmul.msk.f32.gmra.mxu2 %vm14520_vm0, %v14536_v51  ;;  %v14569_v51 = vld [vmem:[#allocation28_spill] sm:$0xff] }
 0x7a8   : > { %v4645_v53 = vsel %vm4623_vm15, %v4612_v49, %v4153_v18 }
 0x7a9   : > { %v4678_v16 = vsel %vm4656_vm8, %v4645_v53, %v4281_v42  ;;  %v14540_v42 = vld [vmem:[#allocation157_spill] sm:$0xff] }
 0x7aa   : > { %v4043_v55 = vpop.permute.xlu2 %4042  ;;  %v4556_v47 = vsel %vm14541_vm13, %v4524_v58, %v14540_v42  ;;  %vm14568_vm13 = vmmov %vm14520_vm0 }
 0x7ad   : > { %v4041_v5 = vpop.permute.xlu1 %4040 }
 0x7ae   : > { %v4620_v56 = vsel %vm4590_vm3, %v4587_v2, %v4041_v5  ;;  %v4557_v2 = vsel %vm14517_vm10, %v4525_v11, %v14551_v28  ;;  %vm14579_vm10 = vcmask 64512  }
 0x7af   : > { %v4409_v44 = vpop.permute.xlu0 %4408  ;;  %v4653_v13 = vsel %vm4623_vm15, %v4620_v56, %v4169_v6  ;;  %6326 = vmatmul.msk.f32.gmra.mxu2 %vm14544_vm9, %v14543_v22  ;;  %vm14572_vm9 = vmmov %vm14520_vm0  ;;  %v14577_v22 = vld [vmem:[#allocation88_spill] sm:$0xff] }
 0x7b0   : > { %v4711_v37 = vsel %vm4689_vm2, %v4678_v16, %v4409_v44  ;;  %v14545_v44 = vld [vmem:[#allocation22_spill] sm:$0xff] }
 0x7b1   : > { %6266 = vmatmul.msk.f32.gmra.mxu1 %vm4735_vm1, %v4711_v37  ;;  %v11736_v37 = vpop.f32.mrf.mxu1 }
 0x7b2   : > { %v4427_v49 = vpop.permute.xlu2 %4426 }
 0x7b5   : > { %v3899_v29 = vpop.permute.xlu1 %3898 }
 0x7b6   : > { %v4580_v35 = vsel %vm14518_vm4, %v4548_v45, %v3899_v29  ;;  %v14552_v29 = vld [vmem:[#allocation21_spill] sm:$0xff] }
 0x7b7   : > { %v4297_v20 = vpop.permute.xlu0 %4296  ;;  %6327 = vmatmul.msk.f32.gmra.mxu2 %vm14546_vm11, %v14545_v44  ;;  %vm14574_vm11 = vmmov %vm14520_vm0 }
 0x7b8   : > { %v4686_v52 = vsel %vm4656_vm8, %v4653_v13, %v4297_v20 }
 0x7b9   : > { %v4719_v21 = vsel %vm4689_vm2, %v4686_v52, %v4425_v32  ;;  %v11746_v13 = vpop.f32.mrf.mxu1 }
 0x7ba   : > { %6274 = vmatmul.msk.f32.gmra.mxu3 %vm4735_vm1, %v4719_v21  ;;  %v4173_v56 = vpop.permute.xlu2 %4172 }
 0x7bd   : > { %v4155_v36 = vpop.permute.xlu1 %4154 }
 0x7bf   : > { %v4027_v43 = vpop.permute.xlu0 %4026  ;;  %6328 = vmatmul.msk.f32.gmra.mxu2 %vm14520_vm0, %v14552_v29 }
 0x7c0   : > { %v4613_v0 = vsel %vm4590_vm3, %v4580_v35, %v4027_v43  ;;  %v14563_v35 = vld [vmem:[#allocation30_spill] sm:$0xff] }
 0x7c1   : > { %v4646_v4 = vsel %vm4623_vm15, %v4613_v0, %v4155_v36  ;;  %v11754_v30 = vpop.f32.mrf.mxu1  ;;  %v14559_v36 = vld [vmem:[#allocation31_spill] sm:$0xff]  ;;  %v14565_v43 = vld [vmem:[#allocation26_spill] sm:$0xff] }
 0x7c2   : > { %v4679_v59 = vsel %vm4656_vm8, %v4646_v4, %v4283_v24  ;;  %v14567_v4 = vld [vmem:[#allocation32_spill] sm:$0xff] }
 0x7c5   : > { %v4411_v15 = vpop.permute.xlu1 %4410 }
 0x7c6   : > { %v4712_v50 = vsel %vm4689_vm2, %v4679_v59, %v4411_v15  ;;  %v14571_v59 = vld [vmem:[#allocation33_spill] sm:$0xff] }
 0x7c7   : > { %v3915_v10 = vpop.permute.xlu0 %3914  ;;  %6267 = vmatmul.msk.f32.gmra.mxu1 %vm4735_vm1, %v4712_v50  ;;  %6329 = vmatmul.msk.f32.gmra.mxu2 %vm14554_vm14, %v14553_v12  ;;  %v11782_v50 = vpop.f32.mrf.mxu2 }
 0x7c8   : > { %v4588_v9 = vsel %vm14542_vm6, %v4556_v47, %v3915_v10  ;;  %vm14570_vm6 = vmmov %vm14520_vm0  ;;  %v11789_v10 = vld [vmem:[%s13229_s4] ss:$0 sm:$0xff] }
 0x7c9   : > { %v4621_v60 = vsel %vm4590_vm3, %v4588_v9, %v4043_v55  ;;  %v11760_v24 = vpop.f32.mrf.mxu1  ;;  %v14573_v55 = vld [vmem:[#allocation27_spill] sm:$0xff]  ;;  %v11797_v39 = vadd.f32 %v11789_v10, %v11632_v41  ;;  %v11801_v19 = vadd.f32 %v11789_v10, %v11617_v61  ;;  %v11805_v58 = vadd.f32 %v11789_v10, %v11644_v23 }
 0x7ca   : > { %v11811_v47 = vadd.f32 %v11789_v10, %v11658_v3  ;;  %v11846_v40 = vadd.f32 %v11789_v10, %v11695_v31  ;;  %v11866_v29 = vadd.f32 %v11789_v10, %v11722_v38  ;;  %v11877_v12 = vadd.f32 %v11789_v10, %v11736_v37 }
 0x7cb   : > { %v5016_v42 = vmul.f32 %v11797_v39, %v11797_v39  ;;  %v5015_v9 = vmul.f32 %v11801_v19, %v11801_v19  ;;  %v4946_v61 = vsel %vm14579_vm10, %v11797_v39, 0.0  ;;  %v5017_v23 = vmul.f32 %v11805_v58, %v11805_v58 }
 0x7cd   : > { %v4299_v18 = vpop.permute.xlu1 %4298 }
 0x7cf   : > { %v4171_v6 = vpop.permute.xlu0 %4170  ;;  %6330 = vmatmul.msk.f32.gmra.mxu2 %vm14558_vm7, %v14557_v46 }
 0x7d0   : > { %v4654_v53 = vsel %vm4623_vm15, %v4621_v60, %v4171_v6 }
 0x7d1   : > { %v4687_v54 = vsel %vm4656_vm8, %v4654_v53, %v4299_v18  ;;  %v11766_v45 = vpop.f32.mrf.mxu1  ;;  %v11825_v18 = vadd.f32 %v11789_v10, %v11668_v34  ;;  %v11836_v53 = vadd.f32 %v11789_v10, %v11680_v8 }
 0x7d2   : > { %v4720_v5 = vsel %vm4689_vm2, %v4687_v54, %v4427_v49  ;;  %v5018_v49 = vmul.f32 %v11811_v47, %v11811_v47 }
 0x7d3   : > { %6275 = vmatmul.msk.f32.gmra.mxu3 %vm4735_vm1, %v4720_v5  ;;  %v5020_v11 = vmul.f32 %v11836_v53, %v11836_v53 }
 0x7d5   : > { %v4045_v16 = vpop.permute.xlu1 %4044 }
 0x7d7   : > { %v3917_v62 = vpop.permute.xlu0 %3916 }
 0x7d8   : > { %v4589_v32 = vsel %vm14518_vm4, %v4557_v2, %v3917_v62  ;;  %vm14580_vm4 = vmmov %vm14579_vm10  ;;  %v11855_v62 = vadd.f32 %v11789_v10, %v11708_v26 }
 0x7d9   : > { %v4622_v33 = vsel %vm4590_vm3, %v4589_v32, %v4045_v16  ;;  %vm14556_vm3 = vmmov %vm14520_vm0  ;;  %v11772_v0 = vpop.f32.mrf.mxu1  ;;  %v4945_v3 = vsel %vm14580_vm4, %v11801_v19, 0.0  ;;  %v5019_v16 = vmul.f32 %v11825_v18, %v11825_v18 }
 0x7da   : > { %v4655_v52 = vsel %vm4623_vm15, %v4622_v33, %v4173_v56  ;;  %vm14560_vm15 = vmmov %vm14520_vm0  ;;  %v4947_v5 = vadd.f32 %v4946_v61, %v4945_v3  ;;  %v5021_v33 = vmul.f32 %v11846_v40, %v11846_v40 }
 0x7dd   : > { %v4429_v20 = vpop.permute.xlu1 %4428 }
 0x7df   : > { %v4301_v21 = vpop.permute.xlu0 %4300 }
 0x7e0   : > { %v4688_v63 = vsel %vm4656_vm8, %v4655_v52, %v4301_v21  ;;  %vm14562_vm8 = vmmov %vm14520_vm0 }
 0x7e1   : > { %v4721_v7 = vsel %vm4689_vm2, %v4688_v63, %v4429_v20  ;;  %6331 = vmatmul.msk.f32.gmra.mxu2 %vm14562_vm8, %v14561_v27  ;;  %vm14564_vm2 = vmmov %vm14520_vm0  ;;  %v11778_v15 = vpop.f32.mrf.mxu1  ;;  %v11868_v20 = vpop.f32.mrf.mxu3  ;;  %v5023_v27 = vmul.f32 %v11866_v29, %v11866_v29 }
 0x7e2   : > { %6276 = vmatmul.msk.f32.gmra.mxu3 %vm4735_vm1, %v4721_v7  ;;  %vm14566_vm1 = vmmov %vm14520_vm0  ;;  %v5022_v7 = vmul.f32 %v11855_v62, %v11855_v62 }
 0x7e3   : > { %vm14581_vm0 = vmmov %vm14580_vm4 }
 0x7e4   : > { %v5048_v60 = vsel %vm14581_vm0, %v5016_v42, 0.0  ;;  %vm14582_vm14 = vmmov %vm14581_vm0 }
 0x7e5   : > { %v4948_v6 = vsel %vm14582_vm14, %v11805_v58, 0.0  ;;  %vm14584_vm7 = vmmov %vm14581_vm0 }
 0x7e6   : > { %v5050_v34 = vsel %vm14584_vm7, %v5017_v23, 0.0  ;;  %v4949_v1 = vadd.f32 %v4948_v6, %v4947_v5  ;;  %vm14586_vm8 = vmmov %vm14581_vm0  ;;  %v11904_v23 = vadd.f32 %v11789_v10, %v11760_v24  ;;  %v11915_v5 = vadd.f32 %v11789_v10, %v11766_v45  ;;  %v11917_v24 = vpop.f32.mrf.mxu2 }
 0x7e7   : > { %v5052_v8 = vsel %vm14586_vm8, %v5018_v49, 0.0  ;;  %vm14595_vm10 = vmmov %vm14581_vm0 }
 0x7e8   : > { %v4960_v37 = vsel %vm14595_vm10, %v11866_v29, 0.0  ;;  %vm14596_vm4 = vmmov %vm14581_vm0 }
 0x7e9   : > { %6332 = vmatmul.msk.f32.gmra.mxu2 %vm14566_vm1, %v14565_v43  ;;  %v11791_v17 = vpop.f32.mrf.mxu1  ;;  %vm14588_vm1 = vmmov %vm14581_vm0  ;;  %v11906_v3 = vpop.f32.mrf.mxu3 }
 0x7ea   : > { %6335 = vmatmul.msk.f32.vlgmr.msra.gmra.mxu3 %vm14556_vm3, %v14555_v14  ;;  %vm14583_vm3 = vmmov %vm14581_vm0  ;;  %v5054_v31 = vsel %vm14588_vm1, %v5019_v16, 0.0 }
 0x7eb   : > { %v5047_v54 = vsel %vm14583_vm3, %v5015_v9, 0.0  ;;  %vm14597_vm14 = vmmov %vm14581_vm0 }
 0x7ec   : > { %v5049_v48 = vadd.f32 %v5048_v60, %v5047_v54  ;;  %vm14598_vm3 = vmmov %vm14581_vm0 }
 0x7ed   : > { %vm14599_vm7 = vmmov %vm14581_vm0 }
 0x7ee   : > { %v5051_v28 = vadd.f32 %v5050_v34, %v5049_v48  ;;  %vm14601_vm8 = vmmov %vm14581_vm0 }
 0x7ef   : > { %vm14604_vm1 = vmmov %vm14581_vm0 }
 0x7f0   : > { %v5053_v26 = vadd.f32 %v5052_v8, %v5051_v28  ;;  %v11926_v8 = vadd.f32 %v11789_v10, %v11772_v0  ;;  %vm14614_vm10 = vmmov %vm14581_vm0 }
 0x7f1   : > { %6333 = vmatmul.msk.f32.gmra.mxu2 %vm14570_vm6, %v14569_v51  ;;  %v11815_v41 = vpop.f32.mrf.mxu1  ;;  %vm14590_vm6 = vmmov %vm14581_vm0 }
 0x7f2   : > { %6336 = vmatmul.msk.f32.gmra.mxu3 %vm14560_vm15, %v14559_v36  ;;  %vm14585_vm15 = vmmov %vm14581_vm0  ;;  %v5056_v21 = vsel %vm14590_vm6, %v5020_v11, 0.0  ;;  %v5055_v14 = vadd.f32 %v5054_v31, %v5053_v26  ;;  %v11935_v31 = vadd.f32 %v11789_v10, %v11778_v15 }
 0x7f3   : > { %v4950_v44 = vsel %vm14585_vm15, %v11811_v47, 0.0  ;;  %vm14600_vm15 = vmmov %vm14581_vm0 }
 0x7f4   : > { %v4951_v2 = vadd.f32 %v4950_v44, %v4949_v1  ;;  %v5057_v43 = vadd.f32 %v5056_v21, %v5055_v14  ;;  %v5027_v1 = vmul.f32 %v11904_v23, %v11904_v23  ;;  %14603 = vst [vmem:[#allocation139_spill] sm:$0xff] %v11935_v31  ;;  %v5029_v21 = vmul.f32 %v11926_v8, %v11926_v8  ;;  %vm14607_vm6 = vmmov %vm14581_vm0 }
 0x7f6   : > { %v5070_v0 = vsel %vm14604_vm1, %v5027_v1, 0.0  ;;  %vm14625_vm1 = vmmov %vm14581_vm0 }
 0x7f9   : > { %6334 = vmatmul.msk.f32.gmra.mxu2 %vm14574_vm11, %v14573_v55  ;;  %v11857_v32 = vpop.f32.mrf.mxu1  ;;  %vm14592_vm11 = vmmov %vm14581_vm0  ;;  %v11895_v55 = vadd.f32 %v11789_v10, %v11754_v30 }
 0x7fa   : > { %6337 = vmatmul.msk.f32.gmra.mxu3 %vm14564_vm2, %v14563_v35  ;;  %vm14587_vm2 = vmmov %vm14581_vm0  ;;  %v5058_v38 = vsel %vm14592_vm11, %v5021_v33, 0.0  ;;  %v11886_v35 = vadd.f32 %v11789_v10, %v11746_v13  ;;  %v5062_v13 = vsel %vm14596_vm4, %v5023_v27, 0.0  ;;  %v11955_v27 = vadd.f32 %v11789_v10, %v11815_v41 }
 0x7fb   : > { %v4952_v25 = vsel %vm14587_vm2, %v11825_v18, 0.0  ;;  %v5026_v54 = vmul.f32 %v11895_v55, %v11895_v55  ;;  %v4966_v48 = vsel %vm14600_vm15, %v11895_v55, 0.0  ;;  %vm14602_vm2 = vmmov %vm14581_vm0 }
 0x7fc   : > { %v4953_v52 = vadd.f32 %v4952_v25, %v4951_v2  ;;  %v5025_v61 = vmul.f32 %v11886_v35, %v11886_v35  ;;  %v4964_v49 = vsel %vm14598_vm3, %v11886_v35, 0.0  ;;  %v4968_v28 = vsel %vm14602_vm2, %v11904_v23, 0.0  ;;  %14609 = vst [vmem:[#allocation59_spill] sm:$0xff] %v11955_v27  ;;  %vm14610_vm11 = vmmov %vm14581_vm0 }
 0x7fd   : > { %v5068_v45 = vsel %vm14601_vm8, %v5026_v54, 0.0  ;;  %v5028_v2 = vmul.f32 %v11915_v5, %v11915_v5  ;;  %vm14616_vm4 = vmmov %vm14581_vm0  ;;  %v4978_v54 = vsel %vm14581_vm0, %v11955_v27, 0.0 }
 0x7fe   : > { %v5066_v16 = vsel %vm14599_vm7, %v5025_v61, 0.0  ;;  %v5032_v61 = vmul.f32 %v11955_v27, %v11955_v27  ;;  %vm14619_vm3 = vmmov %vm14581_vm0 }
 0x7ff   : > { %vm14621_vm7 = vmmov %vm14581_vm0 }
 0x800   : > { %vm14622_vm15 = vmmov %vm14581_vm0 }
 0x801   : > { %v4906_v9 = vpop.f32.mrf.mxu1  ;;  %vm14623_vm8 = vmmov %vm14581_vm0 }
 0x802   : > { %6338 = vmatmul.msk.f32.gmra.mxu3 %vm14568_vm13, %v14567_v4  ;;  %vm14589_vm13 = vmmov %vm14581_vm0 }
 0x803   : > { %v4954_v56 = vsel %vm14589_vm13, %v11836_v53, 0.0  ;;  %vm14605_vm13 = vmmov %vm14581_vm0 }
 0x804   : > { %v4955_v46 = vadd.f32 %v4954_v56, %v4953_v52  ;;  %v4970_v52 = vsel %vm14605_vm13, %v11915_v5, 0.0  ;;  %vm14624_vm2 = vmmov %vm14581_vm0 }
 0x805   : > { %vm14626_vm13 = vmmov %vm14581_vm0 }
 0x80a   : > { %6339 = vmatmul.msk.f32.gmra.mxu3 %vm14572_vm9, %v14571_v59  ;;  %vm14591_vm9 = vmmov %vm14581_vm0  ;;  %v5024_v59 = vmul.f32 %v11877_v12, %v11877_v12 }
 0x80b   : > { %v4956_v63 = vsel %vm14591_vm9, %v11846_v40, 0.0  ;;  %vm14608_vm9 = vmmov %vm14581_vm0 }
 0x80c   : > { %v4957_v4 = vadd.f32 %v4956_v63, %v4955_v46  ;;  %v5064_v6 = vsel %vm14597_vm14, %v5024_v59, 0.0  ;;  %v11944_v63 = vadd.f32 %v11789_v10, %v11791_v17  ;;  %v5072_v46 = vsel %vm14607_vm6, %v5028_v2, 0.0  ;;  %vm14618_vm14 = vmmov %vm14581_vm0 }
 0x80d   : > { %v5074_v17 = vsel %vm14610_vm11, %v5029_v21, 0.0  ;;  %v11964_v59 = vadd.f32 %v11789_v10, %v11857_v32  ;;  %vm14628_vm6 = vmmov %vm14581_vm0 }
 0x80e   : > { %14606 = vst [vmem:[#allocation190_spill] sm:$0xff] %v11944_v63  ;;  %vm14632_vm11 = vmmov %vm14581_vm0 }
 0x80f   : > { %v4909_v26 = vpop.f32.mrf.mxu1  ;;  %14612 = vst [vmem:[#allocation70_spill] sm:$0xff] %v11964_v59 }
 0x812   : > { %6340 = vmatmul.msk.f32.gmra.mxu3 %vm14576_vm5, %v14575_v57  ;;  %vm14593_vm5 = vmmov %vm14581_vm0  ;;  %v5059_v57 = vadd.f32 %v5058_v38, %v5057_v43  ;;  %v4972_v38 = vsel %vm14608_vm9, %v11926_v8, 0.0 }
 0x813   : > { %v4958_v36 = vsel %vm14593_vm5, %v11855_v62, 0.0  ;;  %vm14611_vm5 = vmmov %vm14581_vm0 }
 0x814   : > { %v4959_v42 = vadd.f32 %v4958_v36, %v4957_v4  ;;  %v5030_v36 = vmul.f32 %v11935_v31, %v11935_v31  ;;  %vm14630_vm9 = vmmov %vm14581_vm0 }
 0x816   : > { %v4961_v30 = vadd.f32 %v4960_v37, %v4959_v42  ;;  %v5031_v37 = vmul.f32 %v11944_v63, %v11944_v63 }
 0x818   : > { %v5078_v32 = vsel %vm14616_vm4, %v5031_v37, 0.0  ;;  %vm14637_vm4 = vmmov %vm14581_vm0 }
 0x81a   : > { %6341 = vmatmul.msk.f32.gmra.mxu3 %vm14578_vm12, %v14577_v22  ;;  %vm14594_vm12 = vmmov %vm14581_vm0  ;;  %v4962_v22 = vsel %vm14581_vm0, %v11877_v12, 0.0 }
 0x81b   : > { %v5060_v51 = vsel %vm14594_vm12, %v5022_v7, 0.0  ;;  %v4963_v44 = vadd.f32 %v4962_v22, %v4961_v30  ;;  %v11946_v7 = vpop.f32.mrf.mxu3  ;;  %vm14613_vm12 = vmmov %vm14581_vm0  ;;  %v4976_v22 = vsel %vm14614_vm10, %v11944_v63, 0.0 }
 0x81c   : > { %v5061_v60 = vadd.f32 %v5060_v51, %v5059_v57  ;;  %v4974_v51 = vsel %vm14611_vm5, %v11935_v31, 0.0  ;;  %v5076_v41 = vsel %vm14613_vm12, %v5030_v36, 0.0  ;;  %vm14633_vm5 = vmmov %vm14581_vm0 }
 0x81d   : > { %v4965_v11 = vadd.f32 %v4964_v49, %v4963_v44  ;;  %vm14634_vm12 = vmmov %vm14581_vm0 }
 0x81e   : > { %v5063_v34 = vadd.f32 %v5062_v13, %v5061_v60  ;;  %v11966_v13 = vpop.f32.mrf.mxu2  ;;  %v11974_v60 = vadd.f32 %v11789_v10, %v4906_v9  ;;  %v5080_v9 = vsel %vm14618_vm14, %v5032_v61, 0.0  ;;  %vm14636_vm10 = vmmov %vm14581_vm0 }
 0x81f   : > { %v4967_v33 = vadd.f32 %v4966_v48, %v4965_v11  ;;  %vm14639_vm14 = vmmov %vm14581_vm0 }
 0x820   : > { %v5065_v25 = vadd.f32 %v5064_v6, %v5063_v34  ;;  %14615 = vst [vmem:[#allocation38_spill] sm:$0xff] %v11974_v60  ;;  %v5033_v34 = vmul.f32 %v11964_v59, %v11964_v59  ;;  %v5034_v11 = vmul.f32 %v11974_v60, %v11974_v60 }
 0x821   : > { %v4969_v15 = vadd.f32 %v4968_v28, %v4967_v33  ;;  %v4982_v33 = vsel %vm14622_vm15, %v11974_v60, 0.0  ;;  %vm14644_vm15 = vmmov %vm14581_vm0 }
 0x822   : > { %v5067_v56 = vadd.f32 %v5066_v16, %v5065_v25  ;;  %v11982_v16 = vadd.f32 %v11789_v10, %v4909_v26  ;;  %v4980_v25 = vsel %vm14619_vm3, %v11964_v59, 0.0  ;;  %v5084_v21 = vsel %vm14623_vm8, %v5034_v11, 0.0  ;;  %vm14641_vm3 = vmmov %vm14581_vm0 }
 0x823   : > { %v4971_v4 = vadd.f32 %v4970_v52, %v4969_v15  ;;  %v4927_v44 = vpop.f32.mrf.mxu3  ;;  %vm14645_vm8 = vmmov %vm14581_vm0 }
 0x824   : > { %v5069_v14 = vadd.f32 %v5068_v45, %v5067_v56  ;;  %14617 = vst [vmem:[#allocation39_spill] sm:$0xff] %v11982_v16  ;;  %v5082_v56 = vsel %vm14621_vm7, %v5033_v34, 0.0  ;;  %v5035_v26 = vmul.f32 %v11982_v16, %v11982_v16  ;;  %vm14642_vm7 = vmmov %vm14581_vm0 }
 0x825   : > { %v4973_v42 = vadd.f32 %v4972_v38, %v4971_v4 }
 0x826   : > { %v5071_v43 = vadd.f32 %v5070_v0, %v5069_v14  ;;  %v4984_v14 = vsel %vm14624_vm2, %v11982_v16, 0.0  ;;  %v12002_v36 = vpop.f32.mrf.mxu2  ;;  %v5086_v4 = vsel %vm14625_vm1, %v5035_v26, 0.0  ;;  %vm14647_vm2 = vmmov %vm14581_vm0 }
 0x827   : > { %v4975_v6 = vadd.f32 %v4974_v51, %v4973_v42  ;;  %v12009_v51 = vadd.f32 %v11789_v10, %v11868_v20  ;;  %vm14649_vm1 = vmmov %vm14581_vm0 }
 0x828   : > { %v5073_v57 = vadd.f32 %v5072_v46, %v5071_v43 }
 0x829   : > { %v4977_v1 = vadd.f32 %v4976_v22, %v4975_v6  ;;  %14627 = vst [vmem:[#allocation170_spill] sm:$0xff] %v12009_v51  ;;  %v5038_v20 = vmul.f32 %v12009_v51, %v12009_v51 }
 0x82a   : > { %v5075_v30 = vadd.f32 %v5074_v17, %v5073_v57 }
 0x82b   : > { %v4979_v2 = vadd.f32 %v4978_v54, %v4977_v1  ;;  %v4930_v43 = vpop.f32.mrf.mxu3  ;;  %v4990_v1 = vsel %vm14633_vm5, %v12009_v51, 0.0  ;;  %vm14655_vm5 = vmmov %vm14581_vm0 }
 0x82c   : > { %v5077_v48 = vadd.f32 %v5076_v41, %v5075_v30 }
 0x82d   : > { %v4981_v52 = vadd.f32 %v4980_v25, %v4979_v2 }
 0x82e   : > { %v4912_v49 = vpop.f32.mrf.mxu1  ;;  %v5079_v28 = vadd.f32 %v5078_v32, %v5077_v48  ;;  %v12023_v32 = vadd.f32 %v11789_v10, %v11906_v3  ;;  %v12035_v3 = vpop.f32.mrf.mxu2 }
 0x82f   : > { %v11990_v45 = vadd.f32 %v11789_v10, %v4912_v49  ;;  %v4983_v38 = vadd.f32 %v4982_v33, %v4981_v52 }
 0x830   : > { %v5081_v0 = vadd.f32 %v5080_v9, %v5079_v28  ;;  %14631 = vst [vmem:[#allocation126_spill] sm:$0xff] %v12023_v32  ;;  %v5092_v28 = vsel %vm14634_vm12, %v5038_v20, 0.0  ;;  %v5039_v2 = vmul.f32 %v12023_v32, %v12023_v32  ;;  %v4992_v26 = vsel %vm14636_vm10, %v12023_v32, 0.0  ;;  %vm14656_vm12 = vmmov %vm14581_vm0 }
 0x831   : > { %14620 = vst [vmem:[#allocation101_spill] sm:$0xff] %v11990_v45  ;;  %v5036_v15 = vmul.f32 %v11990_v45, %v11990_v45  ;;  %v4986_v17 = vsel %vm14626_vm13, %v11990_v45, 0.0  ;;  %v4985_v57 = vadd.f32 %v4984_v14, %v4983_v38  ;;  %v12043_v14 = vadd.f32 %v11789_v10, %v4927_v44  ;;  %vm14650_vm13 = vmmov %vm14581_vm0 }
 0x832   : > { %v5083_v46 = vadd.f32 %v5082_v56, %v5081_v0  ;;  %v12033_v56 = vadd.f32 %v11789_v10, %v11946_v7  ;;  %v5094_v52 = vsel %vm14637_vm4, %v5039_v2, 0.0 }
 0x833   : > { %v5088_v41 = vsel %vm14628_vm6, %v5036_v15, 0.0  ;;  %v4987_v30 = vadd.f32 %v4986_v17, %v4985_v57  ;;  %v4933_v25 = vpop.f32.mrf.mxu3  ;;  %14638 = vst [vmem:[#allocation80_spill] sm:$0xff] %v12043_v14  ;;  %v5041_v17 = vmul.f32 %v12043_v14, %v12043_v14  ;;  %vm14651_vm6 = vmmov %vm14581_vm0 }
 0x834   : > { %v5085_v37 = vadd.f32 %v5084_v21, %v5083_v46  ;;  %14635 = vst [vmem:[#allocation51_spill] sm:$0xff] %v12033_v56  ;;  %v5040_v21 = vmul.f32 %v12033_v56, %v12033_v56  ;;  %v4994_v7 = vsel %vm14581_vm0, %v12033_v56, 0.0 }
 0x836   : > { %v5087_v61 = vadd.f32 %v5086_v4, %v5085_v37  ;;  %v5096_v4 = vsel %vm14639_vm14, %v5040_v21, 0.0  ;;  %v12051_v37 = vadd.f32 %v11789_v10, %v4930_v43  ;;  %v12055_v44 = vpop.f32.mrf.mxu2 }
 0x838   : > { %v5089_v54 = vadd.f32 %v5088_v41, %v5087_v61  ;;  %14640 = vst [vmem:[#allocation117_spill] sm:$0xff] %v12051_v37  ;;  %v5098_v61 = vsel %vm14642_vm7, %v5041_v17, 0.0  ;;  %v4998_v43 = vsel %vm14644_vm15, %v12051_v37, 0.0 }
 0x83d   : > { %v4936_v46 = vpop.f32.mrf.mxu3 }
 0x83e   : > { %v12076_v2 = vpop.f32.mrf.mxu2 }
 0x844   : > { %v4915_v42 = vpop.f32.mrf.mxu1 }
 0x845   : > { %v12013_v22 = vadd.f32 %v11789_v10, %v4915_v42  ;;  %v4996_v42 = vsel %vm14641_vm3, %v12043_v14, 0.0 }
 0x847   : > { %14629 = vst [vmem:[#allocation69_spill] sm:$0xff] %v12013_v22  ;;  %v4988_v6 = vsel %vm14630_vm9, %v12013_v22, 0.0  ;;  %v5037_v49 = vmul.f32 %v12013_v22, %v12013_v22  ;;  %vm14652_vm9 = vmmov %vm14581_vm0 }
 0x848   : > { %v4989_v34 = vadd.f32 %v4988_v6, %v4987_v30  ;;  %v5042_v30 = vmul.f32 %v12051_v37, %v12051_v37  ;;  %v12061_v6 = vadd.f32 %v11789_v10, %v4933_v25 }
 0x849   : > { %v5090_v48 = vsel %vm14632_vm11, %v5037_v49, 0.0  ;;  %vm14653_vm11 = vmmov %vm14581_vm0 }
 0x84a   : > { %v5091_v9 = vadd.f32 %v5090_v48, %v5089_v54  ;;  %v4991_v11 = vadd.f32 %v4990_v1, %v4989_v34  ;;  %14643 = vst [vmem:[#allocation143_spill] sm:$0xff] %v12061_v6  ;;  %v5100_v34 = vsel %vm14645_vm8, %v5042_v30, 0.0  ;;  %v5043_v48 = vmul.f32 %v12061_v6, %v12061_v6 }
 0x84b   : > { %v12069_v1 = vadd.f32 %v11789_v10, %v4936_v46 }
 0x84c   : > { %v5093_v33 = vadd.f32 %v5092_v28, %v5091_v9  ;;  %v4993_v0 = vadd.f32 %v4992_v26, %v4991_v11  ;;  %v5000_v11 = vsel %vm14647_vm2, %v12061_v6, 0.0 }
 0x84d   : > { %14646 = vst [vmem:[#allocation102_spill] sm:$0xff] %v12069_v1  ;;  %v5044_v26 = vmul.f32 %v12069_v1, %v12069_v1 }
 0x84e   : > { %v5095_v15 = vadd.f32 %v5094_v52, %v5093_v33  ;;  %v4995_v38 = vadd.f32 %v4994_v7, %v4993_v0  ;;  %v5102_v33 = vsel %vm14649_vm1, %v5043_v48, 0.0  ;;  %v5002_v52 = vsel %vm14650_vm13, %v12069_v1, 0.0 }
 0x84f   : > { %v5104_v7 = vsel %vm14651_vm6, %v5044_v26, 0.0 }
 0x850   : > { %v5097_v57 = vadd.f32 %v5096_v4, %v5095_v15  ;;  %v4997_v41 = vadd.f32 %v4996_v42, %v4995_v38 }
 0x852   : > { %v5099_v49 = vadd.f32 %v5098_v61, %v5097_v57  ;;  %v4999_v54 = vadd.f32 %v4998_v43, %v4997_v41  ;;  %v12096_v43 = vpop.f32.mrf.mxu2 }
 0x854   : > { %v5101_v9 = vadd.f32 %v5100_v34, %v5099_v49  ;;  %v5001_v28 = vadd.f32 %v5000_v11, %v4999_v54 }
 0x856   : > { %v4939_v20 = vpop.f32.mrf.mxu3  ;;  %v5103_v0 = vadd.f32 %v5102_v33, %v5101_v9  ;;  %v5003_v15 = vadd.f32 %v5002_v52, %v5001_v28 }
 0x857   : > { %v12074_v25 = vadd.f32 %v11789_v10, %v4939_v20 }
 0x858   : > { %v5105_v38 = vadd.f32 %v5104_v7, %v5103_v0 }
 0x859   : > { %14648 = vst [vmem:[#allocation130_spill] sm:$0xff] %v12074_v25  ;;  %v5045_v21 = vmul.f32 %v12074_v25, %v12074_v25  ;;  %v5004_v46 = vsel %vm14652_vm9, %v12074_v25, 0.0 }
 0x85a   : > { %v5005_v42 = vadd.f32 %v5004_v46, %v5003_v15  ;;  %v12099_v52 = vpop.f32.mrf.mxu2 }
 0x85b   : > { %v5106_v17 = vsel %vm14653_vm11, %v5045_v21, 0.0 }
 0x85c   : > { %v5107_v30 = vadd.f32 %v5106_v17, %v5105_v38 }
 0x865   : > { %v4942_v4 = vpop.f32.mrf.mxu3 }
 0x866   : > { %v12090_v57 = vadd.f32 %v11789_v10, %v4942_v4 }
 0x868   : > { %14654 = vst [vmem:[#allocation53_spill] sm:$0xff] %v12090_v57  ;;  %v5006_v41 = vsel %vm14655_vm5, %v12090_v57, 0.0  ;;  %v5046_v61 = vmul.f32 %v12090_v57, %v12090_v57 }
 0x869   : > { %v5007_v49 = vadd.f32 %v5006_v41, %v5005_v42  ;;  %v12105_v41 = vpop.f32.mrf.mxu2 }
 0x86a   : > { %v5108_v20 = vsel %vm14656_vm12, %v5046_v61, 0.0 }
 0x86b   : > { %v5008_v54 = vrot.slane %v5007_v49, 4  ;;  %v5109_v34 = vadd.f32 %v5108_v20, %v5107_v30 }
 0x86d   : > { %v5009_v48 = vadd.f32 %v5008_v54, %v5007_v49  ;;  %v5110_v9 = vrot.slane %v5109_v34, 4 }
 0x86f   : > { %v5010_v11 = vrot.slane %v5009_v48, 2  ;;  %v5111_v10 = vadd.f32 %v5110_v9, %v5109_v34 }
 0x871   : > { %v5011_v28 = vadd.f32 %v5010_v11, %v5009_v48  ;;  %v5112_v33 = vrot.slane %v5111_v10, 2  ;;  %v12107_v49 = vpop.f32.mrf.mxu2 }
 0x873   : > { %v5012_v26 = vrot.slane %v5011_v28, 1  ;;  %v5113_v0 = vadd.f32 %v5112_v33, %v5111_v10 }
 0x875   : > { %v5013_v21 = vadd.f32 %v5012_v26, %v5011_v28  ;;  %v5114_v15 = vrot.slane %v5113_v0, 1 }
 0x877   : > { %v12101_v7 = vmul.f32 0.00390625, %v5013_v21  ;;  %v5115_v46 = vadd.f32 %v5114_v15, %v5113_v0 }
 0x879   : > { %14657 = vst [vmem:[#allocation98_spill] sm:$0xff] %v12101_v7  ;;  %v5116_v38 = vmul.f32 0.00390625, %v5115_v46  ;;  %v5117_v4 = vmul.f32 %v12101_v7, %v12101_v7  ;;  %v5120_v11 = vsub.f32 %v11801_v19, %v12101_v7  ;;  %v5121_v10 = vsub.f32 %v11797_v39, %v12101_v7  ;;  %v12115_v33 = vpop.f32.mrf.mxu2 }
 0x87a   : > { %v5122_v28 = vsub.f32 %v11805_v58, %v12101_v7  ;;  %v5123_v26 = vsub.f32 %v11811_v47, %v12101_v7  ;;  %v5124_v21 = vsub.f32 %v11825_v18, %v12101_v7  ;;  %v5125_v58 = vsub.f32 %v11836_v53, %v12101_v7 }
 0x87b   : > { %v5118_v17 = vsub.f32 %v5116_v38, %v5117_v4  ;;  %v5126_v47 = vsub.f32 %v11846_v40, %v12101_v7  ;;  %v5127_v38 = vsub.f32 %v11855_v62, %v12101_v7  ;;  %v5128_v53 = vsub.f32 %v11866_v29, %v12101_v7 }
 0x87d   : > { %v5119_v42 = vmax.f32 %v5118_v17, 0.0 }
 0x87f   : > { %v5152_v61 = vadd.f32 1e-05, %v5119_v42 }
 0x881   : > { %6515 = vrsqrt.f32 %v5152_v61  ;;  %vm5159_vm4 = vweird.f32 %v5152_v61 }
 0x887   : > { %v6516_v30 = vpop.eup %6515 }
 0x888   : > { %v5154_v20 = vmul.f32 %v6516_v30, %v5152_v61  ;;  %vm5160_vm10 = vweird.f32 %v6516_v30 }
 0x889   : > { %vm5161_vm0 = vmor %vm5159_vm4, %vm5160_vm10 }
 0x88a   : > { %v5155_v54 = vmul.f32 %v6516_v30, %v5154_v20 }
 0x88c   : > { %v5156_v34 = vmul.f32 0.5, %v5155_v54  ;;  %v5130_v54 = vsub.f32 %v11886_v35, %v12101_v7 }
 0x88e   : > { %v5157_v48 = vsub.f32 1.5, %v5156_v34 }
 0x890   : > { %v5158_v9 = vmul.f32 %v6516_v30, %v5157_v48  ;;  %v5131_v48 = vsub.f32 %v11895_v55, %v12101_v7  ;;  %v5133_v55 = vsub.f32 %v11915_v5, %v12101_v7 }
 0x892   : > { %v12119_v0 = vsel %vm5161_vm0, %v6516_v30, %v5158_v9  ;;  %v5129_v30 = vsub.f32 %v11877_v12, %v12101_v7 }
 0x893   : > { %14658 = vst [vmem:[#allocation94_spill] sm:$0xff] %v12119_v0  ;;  %v12124_v15 = vmul.f32 %v12119_v0, %v5120_v11  ;;  %v12127_v19 = vmul.f32 %v12119_v0, %v5121_v10  ;;  %v12130_v39 = vmul.f32 %v12119_v0, %v5122_v28  ;;  %v12135_v46 = vmul.f32 %v12119_v0, %v5123_v26  ;;  %v12179_v28 = vpop.f32.mrf.mxu2 }
 0x894   : > { %v12140_v18 = vmul.f32 %v12119_v0, %v5124_v21  ;;  %v12145_v4 = vmul.f32 %v12119_v0, %v5125_v58  ;;  %v12151_v42 = vmul.f32 %v12119_v0, %v5126_v47  ;;  %v12158_v62 = vmul.f32 %v12119_v0, %v5127_v38 }
 0x895   : > { %v6277_v17 = vmul.f32 -1.442695, %v12124_v15  ;;  %v6278_v61 = vmul.f32 -1.442695, %v12127_v19  ;;  %v6279_v40 = vmul.f32 -1.442695, %v12130_v39  ;;  %v12164_v29 = vmul.f32 %v12119_v0, %v5128_v53 }
 0x896   : > { %v6280_v20 = vmul.f32 -1.442695, %v12135_v46  ;;  %v6281_v34 = vmul.f32 -1.442695, %v12140_v18  ;;  %v12170_v9 = vmul.f32 %v12119_v0, %v5129_v30  ;;  %v6282_v12 = vmul.f32 -1.442695, %v12145_v4 }
 0x897   : > { %6517 = vpow2.f32 %v6277_v17  ;;  %v5132_v11 = vsub.f32 %v11904_v23, %v12101_v7  ;;  %v12176_v35 = vmul.f32 %v12119_v0, %v5130_v54  ;;  %v6283_v10 = vmul.f32 -1.442695, %v12151_v42  ;;  %v12201_v54 = vld [vmem:[%s13231_s6] ss:$0 sm:$0xff] }
 0x898   : > { %6519 = vpow2.f32 %v6278_v61  ;;  %v12184_v26 = vmul.f32 %v12119_v0, %v5131_v48  ;;  %v6284_v21 = vmul.f32 -1.442695, %v12158_v62  ;;  %v6285_v23 = vmul.f32 -1.442695, %v12164_v29  ;;  %14662 = vst [vmem:[#allocation168_spill] sm:$0xff] %v12201_v54 }
 0x899   : > { %6521 = vpow2.f32 %v6279_v40  ;;  %v12188_v58 = vmul.f32 %v12119_v0, %v5132_v11  ;;  %v12192_v47 = vmul.f32 %v12119_v0, %v5133_v55  ;;  %v6286_v38 = vmul.f32 -1.442695, %v12170_v9 }
 0x89a   : > { %14659 = vst [vmem:[#allocation181_spill] sm:$0xff] %v12184_v26  ;;  %6523 = vpow2.f32 %v6280_v20  ;;  %v6287_v5 = vmul.f32 -1.442695, %v12176_v35  ;;  %v6288_v61 = vmul.f32 -1.442695, %v12184_v26  ;;  %v12217_v32 = vadd.f32 %v12201_v54, %v11782_v50 }
 0x89b   : > { %14660 = vst [vmem:[#allocation67_spill] sm:$0xff] %v12188_v58  ;;  %6525 = vpow2.f32 %v6281_v34  ;;  %v6289_v30 = vmul.f32 -1.442695, %v12188_v58  ;;  %v6290_v34 = vmul.f32 -1.442695, %v12192_v47  ;;  %v12265_v51 = vadd.f32 %v12201_v54, %v12099_v52 }
 0x89c   : > { %14661 = vst [vmem:[#allocation40_spill] sm:$0xff] %v12192_v47  ;;  %6527 = vpow2.f32 %v6282_v12  ;;  %v5134_v12 = vsub.f32 %v11926_v8, %v12101_v7  ;;  %v12219_v8 = vpop.f32.mrf.mxu2  ;;  %v12269_v1 = vadd.f32 %v12201_v54, %v12105_v41  ;;  %v12283_v52 = vadd.f32 %v12201_v54, %v12179_v28 }
 0x89d   : > { %v6518_v17 = vpop.eup %6517  ;;  %6529 = vpow2.f32 %v6283_v10  ;;  %14664 = vst [vmem:[#allocation185_spill] sm:$0xff] %v12219_v8 }
 0x89e   : > { %v6520_v53 = vpop.eup %6519  ;;  %6531 = vpow2.f32 %v6284_v21  ;;  %v12206_v11 = vadd.f32 1.0, %v6518_v17  ;;  %14667 = vst [vmem:[#allocation140_spill] sm:$0xff] %v12265_v51 }
 0x89f   : > { %v6522_v40 = vpop.eup %6521  ;;  %6533 = vpow2.f32 %v6285_v23  ;;  %v12208_v55 = vadd.f32 1.0, %v6520_v53  ;;  %v12211_v23 = vmul.f32 %v12119_v0, %v5134_v12  ;;  %v12225_v53 = vadd.f32 %v12201_v54, %v11917_v24  ;;  %14668 = vst [vmem:[#allocation52_spill] sm:$0xff] %v12269_v1 }
 0x8a0   : > { %v6524_v20 = vpop.eup %6523  ;;  %6535 = vpow2.f32 %v6286_v38  ;;  %v12213_v57 = vadd.f32 1.0, %v6522_v40  ;;  %v5334_v12 = vand.u32 2147483648, %v12206_v11  ;;  %14671 = vst [vmem:[#allocation164_spill] sm:$0xff] %v12283_v52  ;;  %v5332_v6 = vand.u32 2147483647, %v12206_v11 }
 0x8a1   : > { %v6526_v48 = vpop.eup %6525  ;;  %6537 = vpow2.f32 %v6287_v5  ;;  %14663 = vst [vmem:[#allocation104_spill] sm:$0xff] %v12211_v23  ;;  %v12221_v17 = vadd.f32 1.0, %v6524_v20  ;;  %v12240_v20 = vadd.f32 %v12201_v54, %v12035_v3  ;;  %v12254_v3 = vadd.f32 %v12201_v54, %v12076_v2 }
 0x8a2   : > { %v6528_v10 = vpop.eup %6527  ;;  %6539 = vpow2.f32 %v6288_v61  ;;  %v12229_v61 = vadd.f32 %v12201_v54, %v11966_v13  ;;  %v12231_v40 = vadd.f32 1.0, %v6526_v48  ;;  %v12247_v13 = vadd.f32 %v12201_v54, %v12055_v44 }
 0x8a3   : > { %v6530_v21 = vpop.eup %6529  ;;  %6541 = vpow2.f32 %v6289_v30  ;;  %v12236_v30 = vadd.f32 %v12201_v54, %v12002_v36  ;;  %v6291_v48 = vmul.f32 -1.442695, %v12211_v23  ;;  %14665 = vst [vmem:[#allocation109_spill] sm:$0xff] %v12254_v3  ;;  %v5349_v2 = vand.u32 2147483648, %v12208_v55 }
 0x8a4   : > { %v6532_v38 = vpop.eup %6531  ;;  %6543 = vpow2.f32 %v6290_v34  ;;  %v12242_v34 = vadd.f32 1.0, %v6528_v10  ;;  %v12258_v10 = vadd.f32 %v12201_v54, %v12096_v43  ;;  %v12260_v25 = vadd.f32 1.0, %v6530_v21  ;;  %v12310_v59 = vpop.f32.mrf.mxu2 }
 0x8a5   : > { %v6534_v5 = vpop.eup %6533  ;;  %6545 = vrcp.f32 %v12206_v11  ;;  %v12275_v43 = vadd.f32 %v12201_v54, %v12107_v49  ;;  %v12279_v21 = vadd.f32 %v12201_v54, %v12115_v33  ;;  %v12289_v45 = vor.u32 1.1754944e-38, %v5334_v12  ;;  %14672 = vst [vmem:[#allocation83_spill] sm:$0xff] %v12310_v59 }
 0x8a6   : > { %v6536_v50 = vpop.eup %6535  ;;  %6547 = vrcp.f32 %v12208_v55  ;;  %14666 = vst [vmem:[#allocation175_spill] sm:$0xff] %v12258_v10  ;;  %v5347_v49 = vand.u32 2147483647, %v12208_v55  ;;  %v12294_v16 = vadd.f32 1.0, %v6532_v38  ;;  %v5364_v28 = vand.u32 2147483648, %v12213_v57 }
 0x8a7   : > { %v6538_v24 = vpop.eup %6537  ;;  %6549 = vrcp.f32 %v12213_v57  ;;  %14669 = vst [vmem:[#allocation71_spill] sm:$0xff] %v12275_v43  ;;  %v12304_v12 = vor.u32 1.1754944e-38, %v5349_v2  ;;  %v5362_v60 = vand.u32 2147483647, %v12213_v57  ;;  %v5379_v56 = vand.u32 2147483648, %v12221_v17 }
 0x8a8   : > { %v6540_v36 = vpop.eup %6539  ;;  %6551 = vrcp.f32 %v12221_v17  ;;  %14670 = vst [vmem:[#allocation172_spill] sm:$0xff] %v12279_v21  ;;  %v12312_v52 = vadd.f32 1.0, %v6534_v5  ;;  %v12314_v27 = vadd.f32 1.0, %v6536_v50  ;;  %v12320_v2 = vadd.f32 1.0, %v6538_v24 }
 0x8a9   : > { %v6542_v44 = vpop.eup %6541  ;;  %6553 = vrcp.f32 %v12231_v40  ;;  %vm5328_vm14 = vweird.f32 %v12206_v11  ;;  %v5377_v59 = vand.u32 2147483647, %v12221_v17  ;;  %v12328_v50 = vadd.f32 1.0, %v6540_v36 }
 0x8aa   : > { %v6544_v22 = vpop.eup %6543  ;;  %6555 = vrcp.f32 %v12242_v34  ;;  %vm5343_vm3 = vweird.f32 %v12208_v55  ;;  %v12331_v1 = vor.u32 1.1754944e-38, %v5364_v28  ;;  %v12335_v63 = vadd.f32 1.0, %v6542_v44 }
 0x8ab   : > { %v12286_v41 = vpop.eup %6545  ;;  %6557 = vpow2.f32 %v6291_v48  ;;  %vm5358_vm7 = vweird.f32 %v12213_v57  ;;  %v12338_v0 = vor.u32 1.1754944e-38, %v5379_v56  ;;  %v12344_v58 = vadd.f32 1.0, %v6544_v22 }
 0x8ac   : > { %v12292_v37 = vpop.eup %6547  ;;  %v5324_v33 = vmul.f32 %v12286_v41, %v12206_v11  ;;  %6559 = vrcp.f32 %v12260_v25  ;;  %vm5373_vm15 = vweird.f32 %v12221_v17  ;;  %v5392_v44 = vand.u32 2147483647, %v12231_v40 }
 0x8ad   : > { %v12300_v14 = vpop.eup %6549  ;;  %v5339_v48 = vmul.f32 %v12292_v37, %v12208_v55  ;;  %vm5388_vm8 = vweird.f32 %v12231_v40  ;;  %v5394_v56 = vand.u32 2147483648, %v12231_v40  ;;  %vm12356_vm2 = vcmp.eq.f32.partialorder %v5332_v6, 8.507059e+37 }
 0x8ae   : > { %v12308_v38 = vpop.eup %6551  ;;  %v5325_v21 = vsub.f32 1.0, %v5324_v33  ;;  %v5354_v23 = vmul.f32 %v12300_v14, %v12213_v57  ;;  %vm5329_vm13 = vweird.f32 %v12286_v41  ;;  %vm12364_vm6 = vcmp.eq.f32.partialorder %v5347_v49, 8.507059e+37 }
 0x8af   : > { %v12318_v54 = vpop.eup %6553  ;;  %v5340_v8 = vsub.f32 1.0, %v5339_v48  ;;  %v5369_v43 = vmul.f32 %v12308_v38, %v12221_v17  ;;  %v5409_v6 = vand.u32 2147483648, %v12242_v34  ;;  %vm5344_vm9 = vweird.f32 %v12292_v37  ;;  %vm12393_vm0 = vmor %vm5328_vm14, %vm5329_vm13 }
 0x8b0   : > { %v12326_v5 = vpop.eup %6555  ;;  %v5355_v33 = vsub.f32 1.0, %v5354_v23  ;;  %v5384_v24 = vmul.f32 %v12318_v54, %v12231_v40  ;;  %v5326_v23 = vmul.f32 %v12286_v41, %v5325_v21  ;;  %vm12373_vm11 = vcmp.eq.f32.partialorder %v5362_v60, 8.507059e+37  ;;  %vm12407_vm1 = vmor %vm5343_vm3, %vm5344_vm9 }
 0x8b1   : > { %v6558_v47 = vpop.eup %6557  ;;  %v5370_v48 = vsub.f32 1.0, %v5369_v43  ;;  %v5399_v36 = vmul.f32 %v12326_v5, %v12242_v34  ;;  %v5341_v10 = vmul.f32 %v12292_v37, %v5340_v8  ;;  %vm12377_vm5 = vcmp.eq.f32.partialorder %v5377_v59, 8.507059e+37 }
 0x8b2   : > { %v12342_v51 = vpop.eup %6559  ;;  %v5385_v28 = vsub.f32 1.0, %v5384_v24  ;;  %v12354_v31 = vadd.f32 1.0, %v6558_v47  ;;  %v5356_v21 = vmul.f32 %v12300_v14, %v5355_v33  ;;  %v5407_v47 = vand.u32 2147483647, %v12242_v34 }
 0x8b3   : > { %v5400_v43 = vsub.f32 1.0, %v5399_v36  ;;  %v5414_v26 = vmul.f32 %v12342_v51, %v12260_v25  ;;  %v5371_v24 = vmul.f32 %v12308_v38, %v5370_v48  ;;  %v5327_v7 = vadd.f32 %v12286_v41, %v5326_v23 }
 0x8b4   : > { %v5386_v36 = vmul.f32 %v12318_v54, %v5385_v28  ;;  %v5342_v28 = vadd.f32 %v12292_v37, %v5341_v10  ;;  %vm5359_vm12 = vweird.f32 %v12300_v14  ;;  %vm5374_vm10 = vweird.f32 %v12308_v38 }
 0x8b5   : > { %v5401_v49 = vmul.f32 %v12326_v5, %v5400_v43  ;;  %v5415_v3 = vsub.f32 1.0, %v5414_v26  ;;  %vm12385_vm4 = vcmp.eq.f32.partialorder %v5392_v44, 8.507059e+37  ;;  %v5395_v60 = vor.u32 1.1754944e-38, %v5394_v56  ;;  %v12401_v44 = vpop.f32.mrf.mxu2  ;;  %vm12425_vm3 = vmor %vm5358_vm7, %vm5359_vm12 }
 0x8b6   : > { %v5357_v26 = vadd.f32 %v12300_v14, %v5356_v21  ;;  %v5372_v10 = vadd.f32 %v12308_v38, %v5371_v24  ;;  %6561 = vrcp.f32 %v12294_v16  ;;  %14685 = vst [vmem:[#allocation193_spill] sm:$0xff] %v12401_v44  ;;  %v5387_v56 = vadd.f32 %v12318_v54, %v5386_v36 }
 0x8b7   : > { %v5416_v43 = vmul.f32 %v12342_v51, %v5415_v3  ;;  %vm5389_vm14 = vweird.f32 %v12318_v54  ;;  %vm12413_vm13 = vcmp.eq.f32.partialorder %v5407_v47, 8.507059e+37  ;;  %v5422_v3 = vand.u32 2147483647, %v12260_v25 }
 0x8b8   : > { %v5331_v24 = vsel %vm12393_vm0, %v12286_v41, %v5327_v7  ;;  %v5402_v36 = vadd.f32 %v12326_v5, %v5401_v49  ;;  %vm5404_vm9 = vweird.f32 %v12326_v5  ;;  %v5410_v47 = vor.u32 1.1754944e-38, %v5409_v6  ;;  %vm12438_vm0 = vmor %vm5373_vm15, %vm5374_vm10 }
 0x8b9   : > { %v5346_v44 = vsel %vm12407_vm1, %v12292_v37, %v5342_v28  ;;  %vm5418_vm7 = vweird.f32 %v12260_v25  ;;  %vm5419_vm12 = vweird.f32 %v12342_v51  ;;  %6563 = vrcp.f32 %v12312_v52  ;;  %vm12455_vm15 = vmor %vm5388_vm8, %vm5389_vm14 }
 0x8ba   : > { %v5361_v57 = vsel %vm12425_vm3, %v12300_v14, %v5357_v26  ;;  %v5376_v37 = vsel %vm12438_vm0, %v12308_v38, %v5372_v10  ;;  %v5417_v41 = vadd.f32 %v12342_v51, %v5416_v43  ;;  %6565 = vrcp.f32 %v12314_v27 }
 0x8bb   : > { %v12464_v14 = vsel %vm12356_vm2, %v12289_v45, %v5331_v24  ;;  %v5391_v38 = vsel %vm12455_vm15, %v12318_v54, %v5387_v56  ;;  %vm14696_vm1 = vweird.f32 %v12242_v34  ;;  %vm12475_vm8 = vcmp.eq.f32.partialorder %v5422_v3, 8.507059e+37  ;;  %vm12506_vm2 = vmor %vm5418_vm7, %vm5419_vm12 }
 0x8bc   : > { %vm12471_vm10 = vmor %vm14696_vm1, %vm5404_vm9  ;;  %v5424_v49 = vand.u32 2147483648, %v12260_v25  ;;  %v12480_v28 = vpop.eup %6561  ;;  %v12485_v45 = vsel %vm12364_vm6, %v12304_v12, %v5346_v44  ;;  %v5439_v34 = vand.u32 2147483648, %v12294_v16  ;;  %6567 = vrcp.f32 %v12320_v2 }
 0x8bd   : > { %v5406_v54 = vsel %vm12471_vm10, %v12326_v5, %v5402_v36  ;;  %v12495_v22 = vsel %vm12373_vm11, %v12331_v1, %v5361_v57  ;;  %v12500_v59 = vsel %vm12377_vm5, %v12338_v0, %v5376_v37  ;;  %v5429_v5 = vmul.f32 %v12480_v28, %v12294_v16  ;;  %v12535_v44 = vpop.f32.mrf.mxu2 }
 0x8be   : > { %v5454_v8 = vand.u32 2147483648, %v12312_v52  ;;  %v12515_v1 = vsel %vm12385_vm4, %v5395_v60, %v5391_v38  ;;  %v5421_v0 = vsel %vm12506_vm2, %v12342_v51, %v5417_v41  ;;  %v5437_v33 = vand.u32 2147483647, %v12294_v16 }
 0x8bf   : > { %6569 = vrcp.f32 %v12328_v50  ;;  %v12522_v25 = vpop.eup %6563  ;;  %v12526_v48 = vsel %vm12413_vm13, %v5410_v47, %v5406_v54  ;;  %v5425_v26 = vor.u32 1.1754944e-38, %v5424_v49  ;;  %v5430_v10 = vsub.f32 1.0, %v5429_v5 }
 0x8c0   : > { %vm5433_vm6 = vweird.f32 %v12294_v16  ;;  %v12529_v23 = vpop.eup %6565  ;;  %v5440_v60 = vor.u32 1.1754944e-38, %v5439_v34  ;;  %v5444_v51 = vmul.f32 %v12522_v25, %v12312_v52  ;;  %v5452_v43 = vand.u32 2147483647, %v12312_v52 }
 0x8c1   : > { %6571 = vrcp.f32 %v12335_v63  ;;  %v12539_v11 = vsel %vm12475_vm8, %v5425_v26, %v5421_v0  ;;  %v5431_v56 = vmul.f32 %v12480_v28, %v5430_v10  ;;  %vm5448_vm11 = vweird.f32 %v12312_v52 }
 0x8c2   : > { %v12543_v21 = vor.u32 1.1754944e-38, %v5454_v8  ;;  %v5459_v3 = vmul.f32 %v12529_v23, %v12314_v27  ;;  %v12547_v24 = vpop.eup %6567  ;;  %vm12549_vm5 = vcmp.eq.f32.partialorder %v5437_v33, 8.507059e+37  ;;  %v5445_v36 = vsub.f32 1.0, %v5444_v51 }
 0x8c3   : > { %v5467_v47 = vand.u32 2147483647, %v12314_v27  ;;  %v5469_v7 = vand.u32 2147483648, %v12314_v27  ;;  %v5484_v57 = vand.u32 2147483648, %v12320_v2  ;;  %vm5463_vm4 = vweird.f32 %v12314_v27 }
 0x8c4   : > { %v5460_v37 = vsub.f32 1.0, %v5459_v3  ;;  %v5474_v17 = vmul.f32 %v12547_v24, %v12320_v2  ;;  %v5482_v41 = vand.u32 2147483647, %v12320_v2  ;;  %v5432_v40 = vadd.f32 %v12480_v28, %v5431_v56 }
 0x8c5   : > { %v12560_v38 = vpop.eup %6569  ;;  %vm5434_vm14 = vweird.f32 %v12480_v28  ;;  %v5446_v6 = vmul.f32 %v12522_v25, %v5445_v36  ;;  %6573 = vrcp.f32 %v12344_v58  ;;  %vm12566_vm13 = vcmp.eq.f32.partialorder %v5452_v43, 8.507059e+37 }
 0x8c6   : > { %v5461_v54 = vmul.f32 %v12529_v23, %v5460_v37  ;;  %v5475_v34 = vsub.f32 1.0, %v5474_v17  ;;  %vm5478_vm3 = vweird.f32 %v12320_v2  ;;  %v5489_v12 = vmul.f32 %v12560_v38, %v12328_v50  ;;  %vm12584_vm7 = vmor %vm5433_vm6, %vm5434_vm14  ;;  %v14742_v2 = vld [vmem:[#allocation94_spill] sm:$0xff] }
 0x8c7   : > { %v12574_v5 = vpop.eup %6571  ;;  %vm5449_vm9 = vweird.f32 %v12522_v25  ;;  %vm12577_vm0 = vcmp.eq.f32.partialorder %v5467_v47, 8.507059e+37  ;;  %v5470_v0 = vor.u32 1.1754944e-38, %v5469_v7  ;;  %v5485_v33 = vor.u32 1.1754944e-38, %v5484_v57 }
 0x8c8   : > { %v5499_v26 = vand.u32 2147483648, %v12328_v50  ;;  %v5447_v51 = vadd.f32 %v12522_v25, %v5446_v6  ;;  %v5476_v43 = vmul.f32 %v12547_v24, %v5475_v34  ;;  %vm12590_vm12 = vcmp.eq.f32.partialorder %v5482_v41, 8.507059e+37  ;;  %vm12613_vm8 = vmor %vm5448_vm11, %vm5449_vm9  ;;  %v12619_v34 = vpop.f32.mrf.mxu2 }
 0x8c9   : > { %v5490_v3 = vsub.f32 1.0, %v5489_v12  ;;  %v5504_v36 = vmul.f32 %v12574_v5, %v12335_v63  ;;  %v5436_v16 = vsel %vm12584_vm7, %v12480_v28, %v5432_v40  ;;  %v5462_v47 = vadd.f32 %v12529_v23, %v5461_v54 }
 0x8ca   : > { %vm5464_vm15 = vweird.f32 %v12529_v23  ;;  %vm5493_vm1 = vweird.f32 %v12328_v50  ;;  %v5497_v7 = vand.u32 2147483647, %v12328_v50  ;;  %v5477_v57 = vadd.f32 %v12547_v24, %v5476_v43 }
 0x8cb   : > { %vm5479_vm10 = vweird.f32 %v12547_v24  ;;  %v5512_v37 = vand.u32 2147483647, %v12335_v63  ;;  %v5514_v17 = vand.u32 2147483648, %v12335_v63  ;;  %v12607_v41 = vpop.eup %6573  ;;  %v5491_v40 = vmul.f32 %v12560_v38, %v5490_v3  ;;  %vm12630_vm6 = vmor %vm5463_vm4, %vm5464_vm15 }
 0x8cc   : > { %v5500_v6 = vor.u32 1.1754944e-38, %v5499_v26  ;;  %v5505_v54 = vsub.f32 1.0, %v5504_v36  ;;  %vm5508_vm2 = vweird.f32 %v12335_v63  ;;  %v5441_v12 = vsel %vm12549_vm5, %v5440_v60, %v5436_v16  ;;  %vm12644_vm11 = vmor %vm5478_vm3, %vm5479_vm10 }
 0x8cd   : > { %v5451_v10 = vsel %vm12613_vm8, %v12522_v25, %v5447_v51  ;;  %v5519_v26 = vmul.f32 %v12607_v41, %v12344_v58  ;;  %v5527_v43 = vand.u32 2147483647, %v12344_v58  ;;  %v5466_v60 = vsel %vm12630_vm6, %v12529_v23, %v5462_v47 }
 0x8ce   : > { %vm5494_vm5 = vweird.f32 %v12560_v38  ;;  %v5506_v27 = vmul.f32 %v12574_v5, %v5505_v54  ;;  %6575 = vrcp.f32 %v12354_v31  ;;  %v5481_v55 = vsel %vm12644_vm11, %v12547_v24, %v5477_v57 }
 0x8cf   : > { %vm12654_vm4 = vcmp.eq.f32.partialorder %v5497_v7, 8.507059e+37  ;;  %vm12658_vm14 = vcmp.eq.f32.partialorder %v5512_v37, 8.507059e+37  ;;  %v5515_v51 = vor.u32 1.1754944e-38, %v5514_v17  ;;  %v5520_v3 = vsub.f32 1.0, %v5519_v26 }
 0x8d0   : > { %v5529_v36 = vand.u32 2147483648, %v12344_v58  ;;  %v5456_v16 = vsel %vm12566_vm13, %v12543_v21, %v5451_v10  ;;  %v5492_v47 = vadd.f32 %v12560_v38, %v5491_v40  ;;  %vm5509_vm3 = vweird.f32 %v12574_v5  ;;  %v14735_v10 = vld [vmem:[#allocation139_spill] sm:$0xff] }
 0x8d1   : > { %vm5523_vm9 = vweird.f32 %v12344_v58  ;;  %v5471_v24 = vsel %vm12577_vm0, %v5470_v0, %v5466_v60  ;;  %v5507_v7 = vadd.f32 %v12574_v5, %v5506_v27  ;;  %v5521_v57 = vmul.f32 %v12607_v41, %v5520_v3  ;;  %vm12688_vm0 = vmor %vm5493_vm1, %vm5494_vm5  ;;  %v14738_v60 = vld [vmem:[#allocation175_spill] sm:$0xff]  ;;  %v14744_v3 = vld [vmem:[#allocation190_spill] sm:$0xff] }
 0x8d2   : > { %vm12673_vm7 = vcmp.eq.f32.partialorder %v5527_v43, 8.507059e+37  ;;  %v5486_v21 = vsel %vm12590_vm12, %v5485_v33, %v5481_v55  ;;  %vm5524_vm13 = vweird.f32 %v12607_v41  ;;  %v5803_v49 = vmul.f32 %v12464_v14, %v12124_v15  ;;  %vm12704_vm12 = vmor %vm5508_vm2, %vm5509_vm3  ;;  %v14737_v43 = vld [vmem:[#allocation181_spill] sm:$0xff]  ;;  %v14741_v55 = vld [vmem:[#allocation140_spill] sm:$0xff] }
 0x8d3   : > { %v5804_v8 = vmul.f32 %v12485_v45, %v12127_v19  ;;  %v5522_v56 = vadd.f32 %v12607_v41, %v5521_v57  ;;  %v5530_v33 = vor.u32 1.1754944e-38, %v5529_v36  ;;  %v5805_v17 = vmul.f32 %v12495_v22, %v12130_v39  ;;  %vm12730_vm1 = vmor %vm5523_vm9, %vm5524_vm13 }
 0x8d4   : > { %v5806_v15 = vmul.f32 %v12500_v59, %v12135_v46  ;;  %v6576_v14 = vpop.eup %6575  ;;  %v5496_v19 = vsel %vm12688_vm0, %v12560_v38, %v5492_v47  ;;  %vm5538_vm15 = vweird.f32 %v12354_v31  ;;  %v5542_v39 = vand.u32 2147483647, %v12354_v31 }
 0x8d5   : > { %v5807_v46 = vmul.f32 %v12515_v1, %v12140_v18  ;;  %v5511_v45 = vsel %vm12704_vm12, %v12574_v5, %v5507_v7  ;;  %v5534_v22 = vmul.f32 %v6576_v14, %v12354_v31  ;;  %v5544_v59 = vand.u32 2147483648, %v12354_v31  ;;  %v12739_v5 = vpop.f32.mrf.mxu2  ;;  %v14746_v7 = vld [vmem:[#allocation52_spill] sm:$0xff] }
 0x8d6   : > { %v5808_v63 = vmul.f32 %v12526_v48, %v12145_v4  ;;  %v5809_v1 = vmul.f32 %v12539_v11, %v12151_v42  ;;  %v5810_v4 = vmul.f32 %v5441_v12, %v12158_v62  ;;  %v6052_v48 = vadd.f32 %v12217_v32, %v5803_v49 }
 0x8d7   : > { %v6053_v38 = vadd.f32 %v12225_v53, %v5804_v8  ;;  %v5526_v58 = vsel %vm12730_vm1, %v12607_v41, %v5522_v56  ;;  %v5535_v28 = vsub.f32 1.0, %v5534_v22  ;;  %v6054_v40 = vadd.f32 %v12229_v61, %v5805_v17  ;;  %v14750_v56 = vld [vmem:[#allocation185_spill] sm:$0xff] }
 0x8d8   : > { %v6055_v54 = vadd.f32 %v12236_v30, %v5806_v15  ;;  %v5501_v42 = vsel %vm12654_vm4, %v5500_v6, %v5496_v19  ;;  %v5516_v32 = vsel %vm12658_vm14, %v5515_v51, %v5511_v45  ;;  %v5811_v62 = vmul.f32 %v5456_v16, %v12164_v29  ;;  %v14733_v29 = vld [vmem:[#allocation109_spill] sm:$0xff]  ;;  %v6031_v16 = vpop.f32.mrf.mxu3  ;;  %v14752_v15 = vld [vmem:[#allocation104_spill] sm:$0xff]  ;;  %v14756_v45 = vld [vmem:[#allocation83_spill] sm:$0xff] }
 0x8d9   : > { %v6056_v53 = vadd.f32 %v12240_v20, %v5807_v46  ;;  %vm14731_vm10 = vcmask 64512   ;;  %v5536_v11 = vmul.f32 %v6576_v14, %v5535_v28  ;;  %vm5539_vm8 = vweird.f32 %v6576_v14  ;;  %v14734_v20 = vld [vmem:[#allocation98_spill] sm:$0xff]  ;;  %v14753_v19 = vld [vmem:[#allocation172_spill] sm:$0xff] }
 0x8da   : > { %6084 = vst.msk [vmem:[%s12724_s18] sm:$0xff] %vm14731_vm10, %v6052_v48  ;;  %v5812_v61 = vmul.f32 %v5471_v24, %v12170_v9  ;;  %v6057_v41 = vadd.f32 %v12247_v13, %v5808_v63  ;;  %vm14732_vm2 = vmmov %vm14731_vm10  ;;  %v5531_v30 = vsel %vm12673_vm7, %v5530_v33, %v5526_v58  ;;  %v5813_v6 = vmul.f32 %v5486_v21, %v12176_v35  ;;  %v14740_v35 = vld [vmem:[#allocation67_spill] sm:$0xff]  ;;  %v14745_v24 = vld [vmem:[#allocation40_spill] sm:$0xff] }
 0x8db   : > { %6085 = vst.msk [vmem:[%s12724_s18 + $0x8] sm:$0xff] %vm14732_vm2, %v6053_v38  ;;  %v6058_v12 = vadd.f32 %v14733_v29, %v5809_v1  ;;  %v5135_v52 = vsub.f32 %v14735_v10, %v14734_v20  ;;  %vm14736_vm6 = vmmov %vm14732_vm2  ;;  %v5537_v26 = vadd.f32 %v6576_v14, %v5536_v11  ;;  %v5545_v9 = vor.u32 1.1754944e-38, %v5544_v59  ;;  %v14748_v21 = vld [vmem:[#allocation71_spill] sm:$0xff]  ;;  %v14751_v33 = vld [vmem:[#allocation168_spill] sm:$0xff] }
 0x8dc   : > { %6086 = vst.msk [vmem:[%s12724_s18 + $0x10] sm:$0xff] %vm14736_vm6, %v6054_v40  ;;  %v5814_v13 = vmul.f32 %v5501_v42, %v14737_v43  ;;  %v6059_v25 = vadd.f32 %v14738_v60, %v5810_v4  ;;  %vm14739_vm11 = vmmov %vm14732_vm2  ;;  %v5815_v27 = vmul.f32 %v5516_v32, %v14740_v35  ;;  %v6060_v23 = vadd.f32 %v14741_v55, %v5811_v62  ;;  %v14757_v59 = vld [vmem:[#allocation164_spill] sm:$0xff]  ;;  %v14761_v58 = vld [vmem:[#allocation70_spill] sm:$0xff] }
 0x8dd   : > { %6087 = vst.msk [vmem:[%s12724_s18 + $0x18] sm:$0xff] %vm14739_vm11, %v6055_v54  ;;  %vm5540_vm5 = vmor %vm5538_vm15, %vm5539_vm8  ;;  %v12775_v51 = vmul.f32 %v14742_v2, %v5135_v52  ;;  %v5136_v36 = vsub.f32 %v14744_v3, %v14734_v20  ;;  %vm5543_vm14 = vcmp.eq.f32.partialorder %v5542_v39, 8.507059e+37  ;;  %v5816_v31 = vmul.f32 %v5531_v30, %v14745_v24  ;;  %v14755_v39 = vld [vmem:[#allocation59_spill] sm:$0xff]  ;;  %v6013_v1 = vpop.f32.mrf.mxu2  ;;  %v14764_v32 = vld [vmem:[#allocation38_spill] sm:$0xff] }
 0x8de   : > { %vm14743_vm4 = vmmov %vm14732_vm2  ;;  %v5541_v47 = vsel %vm5540_vm5, %v6576_v14, %v5537_v26  ;;  %v6061_v57 = vadd.f32 %v14746_v7, %v5812_v61  ;;  %v6062_v49 = vadd.f32 %v14748_v21, %v5813_v6  ;;  %v5996_v17 = vadd.f32 %v14751_v33, %v14750_v56  ;;  %v14763_v54 = vld [vmem:[#allocation51_spill] sm:$0xff]  ;;  %v14774_v56 = vld [vmem:[#allocation69_spill] sm:$0xff] }
 0x8df   : > { %6088 = vst.msk [vmem:[%s12724_s18 + $0x20] sm:$0xff] %vm14743_vm4, %v6056_v53  ;;  %vm14747_vm3 = vmmov %vm14732_vm2  ;;  %v5546_v37 = vsel %vm5543_vm14, %v5545_v9, %v5541_v47  ;;  %v6292_v8 = vmul.f32 -1.442695, %v12775_v51  ;;  %v12790_v0 = vmul.f32 %v14742_v2, %v5136_v36  ;;  %v6063_v50 = vadd.f32 %v14753_v19, %v5814_v13  ;;  %v14765_v53 = vld [vmem:[#allocation193_spill] sm:$0xff] }
 0x8e0   : > { %6089 = vst.msk [vmem:[%s12724_s18 + $0x28] sm:$0xff] %vm14747_vm3, %v6057_v41  ;;  %vm14749_vm9 = vmmov %vm14732_vm2  ;;  %v5817_v14 = vmul.f32 %v5546_v37, %v14752_v15  ;;  %v5137_v46 = vsub.f32 %v14755_v39, %v14734_v20  ;;  %v5999_v22 = vadd.f32 %v14751_v33, %v14756_v45  ;;  %v6064_v63 = vadd.f32 %v14757_v59, %v5815_v27  ;;  %v6034_v9 = vpop.f32.mrf.mxu3  ;;  %v14772_v47 = vld [vmem:[#allocation101_spill] sm:$0xff]  ;;  %v14773_v37 = vld [vmem:[#allocation143_spill] sm:$0xff] }
 0x8e1   : > { %6090 = vst.msk [vmem:[%s12724_s18 + $0x30] sm:$0xff] %vm14749_vm9, %v6058_v12  ;;  %vm14754_vm7 = vmmov %vm14732_vm2  ;;  %6577 = vpow2.f32 %v6292_v8  ;;  %v6293_v18 = vmul.f32 -1.442695, %v12790_v0  ;;  %v6065_v4 = vadd.f32 %v5996_v17, %v5816_v31  ;;  %v5138_v28 = vsub.f32 %v14761_v58, %v14734_v20  ;;  %v14775_v15 = vld [vmem:[#allocation102_spill] sm:$0xff] }
 0x8e2   : > { %6091 = vst.msk [vmem:[%s12724_s18 + $0x38] sm:$0xff] %vm14754_vm7, %v6059_v25  ;;  %vm14758_vm13 = vmmov %vm14732_vm2  ;;  %v12809_v48 = vmul.f32 %v14742_v2, %v5137_v46  ;;  %v6066_v38 = vadd.f32 %v5999_v22, %v5817_v14  ;;  %v5145_v42 = vsub.f32 %v14763_v54, %v14734_v20  ;;  %v5139_v62 = vsub.f32 %v14764_v32, %v14734_v20  ;;  %v14770_v25 = vld [vmem:[#allocation39_spill] sm:$0xff]  ;;  %v14776_v39 = vld [vmem:[#allocation170_spill] sm:$0xff] }
 0x8e3   : > { %6092 = vst.msk [vmem:[%s12724_s18 + $0x40] sm:$0xff] %vm14758_vm13, %v6060_v23  ;;  %vm14759_vm0 = vmmov %vm14732_vm2  ;;  %6579 = vpow2.f32 %v6293_v18  ;;  %v12824_v11 = vadd.f32 %v14751_v33, %v14765_v53  ;;  %v12830_v61 = vadd.f32 %v14751_v33, %v12535_v44  ;;  %v12833_v41 = vmul.f32 %v14742_v2, %v5138_v28  ;;  %v14771_v23 = vld [vmem:[#allocation117_spill] sm:$0xff] }
 0x8e4   : > { %6093 = vst.msk [vmem:[%s12724_s18 + $0x48] sm:$0xff] %vm14759_vm0, %v6061_v57  ;;  %vm14760_vm12 = vmmov %vm14759_vm0  ;;  %v6294_v40 = vmul.f32 -1.442695, %v12809_v48  ;;  %v12839_v30 = vadd.f32 %v14751_v33, %v12619_v34  ;;  %v12842_v6 = vmul.f32 %v14742_v2, %v5145_v42  ;;  %v12845_v29 = vmul.f32 %v14742_v2, %v5139_v62  ;;  %v14769_v34 = vld [vmem:[#allocation80_spill] sm:$0xff] }
 0x8e5   : > { %6094 = vst.msk [vmem:[%s12724_s18 + $0x50] sm:$0xff] %vm14760_vm12, %v6062_v49  ;;  %vm14762_vm15 = vmmov %vm14759_vm0  ;;  %v6295_v44 = vmul.f32 -1.442695, %v12833_v41  ;;  %v12852_v10 = vadd.f32 %v14751_v33, %v12739_v5  ;;  %v12855_v52 = vadd.f32 %v14751_v33, %v6031_v16  ;;  %v5146_v26 = vsub.f32 %v14769_v34, %v14734_v20  ;;  %v6016_v7 = vpop.f32.mrf.mxu2 }
 0x8e6   : > { %6095 = vst.msk [vmem:[%s12724_s18 + $0x58] sm:$0xff] %vm14762_vm15, %v6063_v50  ;;  %vm14766_vm1 = vmmov %vm14759_vm0  ;;  %6581 = vpow2.f32 %v6294_v40  ;;  %v6302_v13 = vmul.f32 -1.442695, %v12842_v6  ;;  %v6296_v60 = vmul.f32 -1.442695, %v12845_v29  ;;  %v5140_v35 = vsub.f32 %v14770_v25, %v14734_v20 }
 0x8e7   : > { %6096 = vst.msk [vmem:[%s12724_s18 + $0x60] sm:$0xff] %vm14766_vm1, %v6064_v63  ;;  %vm14767_vm10 = vmmov %vm14759_vm0  ;;  %v6578_v12 = vpop.eup %6577  ;;  %6583 = vpow2.f32 %v6295_v44  ;;  %v12866_v5 = vadd.f32 %v14751_v33, %v6013_v1  ;;  %v12869_v55 = vmul.f32 %v14742_v2, %v5146_v26  ;;  %v5147_v3 = vsub.f32 %v14771_v23, %v14734_v20 }
 0x8e8   : > { %6097 = vst.msk [vmem:[%s12724_s18 + $0x68] sm:$0xff] %vm14767_vm10, %v6065_v4  ;;  %vm14768_vm8 = vmmov %vm14759_vm0  ;;  %v12859_v43 = vadd.f32 1.0, %v6578_v12  ;;  %v12875_v36 = vadd.f32 %v14751_v33, %v6034_v9  ;;  %v12878_v16 = vmul.f32 %v14742_v2, %v5140_v35  ;;  %v5141_v24 = vsub.f32 %v14772_v47, %v14734_v20 }
 0x8e9   : > { %6098 = vst.msk [vmem:[%s12724_s18 + $0x70] sm:$0xff] %vm14768_vm8, %v6066_v38  ;;  %v6580_v27 = vpop.eup %6579  ;;  %v12885_v57 = vmul.f32 %v14742_v2, %v5147_v3  ;;  %v5148_v21 = vsub.f32 %v14773_v37, %v14734_v20  ;;  %v5142_v17 = vsub.f32 %v14774_v56, %v14734_v20  ;;  %v5149_v14 = vsub.f32 %v14775_v15, %v14734_v20  ;;  %v14777_v38 = vld [vmem:[#allocation130_spill] sm:$0xff] }
 0x8ea   : > { %6585 = vrcp.f32 %v12859_v43  ;;  %v12882_v31 = vadd.f32 1.0, %v6580_v27  ;;  %v12890_v8 = vmul.f32 %v14742_v2, %v5141_v24  ;;  %v5557_v19 = vand.u32 2147483647, %v12859_v43 }
 0x8eb   : > { %6587 = vpow2.f32 %v6302_v13  ;;  %v6303_v50 = vmul.f32 -1.442695, %v12869_v55  ;;  %v5143_v46 = vsub.f32 %v14776_v39, %v14734_v20  ;;  %v5559_v45 = vand.u32 2147483648, %v12859_v43 }
 0x8ec   : > { %v6582_v49 = vpop.eup %6581  ;;  %6589 = vpow2.f32 %v6296_v60  ;;  %v6297_v59 = vmul.f32 -1.442695, %v12878_v16  ;;  %v12906_v63 = vadd.f32 %v14751_v33, %v6016_v7  ;;  %vm5553_vm2 = vweird.f32 %v12859_v43 }
 0x8ed   : > { %6591 = vrcp.f32 %v12882_v31  ;;  %v12902_v22 = vadd.f32 1.0, %v6582_v49  ;;  %v6584_v18 = vpop.eup %6583  ;;  %v6304_v1 = vmul.f32 -1.442695, %v12885_v57  ;;  %v12911_v4 = vmul.f32 %v14742_v2, %v5148_v21 }
 0x8ee   : > { %v5150_v58 = vsub.f32 %v14777_v38, %v14734_v20  ;;  %v5572_v40 = vand.u32 2147483647, %v12882_v31  ;;  %v5574_v54 = vand.u32 2147483648, %v12882_v31  ;;  %v6298_v33 = vmul.f32 -1.442695, %v12890_v8 }
 0x8ef   : > { %6593 = vrcp.f32 %v12902_v22  ;;  %vm12920_vm6 = vcmp.eq.f32.partialorder %v5557_v19, 8.507059e+37  ;;  %v12924_v53 = vadd.f32 1.0, %v6584_v18  ;;  %v5560_v44 = vor.u32 1.1754944e-38, %v5559_v45 }
 0x8f0   : > { %v6586_v28 = vpop.eup %6585  ;;  %6595 = vpow2.f32 %v6303_v50  ;;  %v5589_v34 = vand.u32 2147483648, %v12902_v22  ;;  %vm5568_vm11 = vweird.f32 %v12882_v31  ;;  %v5587_v60 = vand.u32 2147483647, %v12902_v22 }
 0x8f1   : > { %v6588_v42 = vpop.eup %6587  ;;  %v5549_v32 = vmul.f32 %v6586_v28, %v12859_v43  ;;  %6597 = vpow2.f32 %v6297_v59  ;;  %vm12933_vm5 = vcmp.eq.f32.partialorder %v5572_v40, 8.507059e+37  ;;  %v5575_v27 = vor.u32 1.1754944e-38, %v5574_v54 }
 0x8f2   : > { %v6590_v12 = vpop.eup %6589  ;;  %v12927_v26 = vadd.f32 1.0, %v6588_v42  ;;  %6599 = vrcp.f32 %v12924_v53  ;;  %vm5554_vm4 = vweird.f32 %v6586_v28  ;;  %vm5583_vm14 = vweird.f32 %v12902_v22 }
 0x8f3   : > { %v6592_v9 = vpop.eup %6591  ;;  %v5550_v13 = vsub.f32 1.0, %v5549_v32  ;;  %v5604_v3 = vand.u32 2147483648, %v12924_v53  ;;  %v5590_v7 = vor.u32 1.1754944e-38, %v5589_v34  ;;  %v5602_v37 = vand.u32 2147483647, %v12924_v53  ;;  %vm5555_vm9 = vmor %vm5553_vm2, %vm5554_vm4 }
 0x8f4   : > { %v5564_v25 = vmul.f32 %v6592_v9, %v12882_v31  ;;  %6601 = vrcp.f32 %v12927_v26  ;;  %v12941_v21 = vadd.f32 1.0, %v6590_v12  ;;  %vm12944_vm3 = vcmp.eq.f32.partialorder %v5587_v60, 8.507059e+37 }
 0x8f5   : > { %v5551_v23 = vmul.f32 %v6586_v28, %v5550_v13  ;;  %6603 = vpow2.f32 %v6304_v1  ;;  %v6594_v47 = vpop.eup %6593  ;;  %v5707_v59 = vand.u32 2147483647, %v12927_v26  ;;  %vm5569_vm7 = vweird.f32 %v6592_v9 }
 0x8f6   : > { %v5565_v24 = vsub.f32 1.0, %v5564_v25  ;;  %v6596_v49 = vpop.eup %6595  ;;  %v5579_v50 = vmul.f32 %v6594_v47, %v12902_v22  ;;  %6605 = vpow2.f32 %v6298_v33  ;;  %vm5598_vm13 = vweird.f32 %v12924_v53  ;;  %vm5570_vm1 = vmor %vm5568_vm11, %vm5569_vm7 }
 0x8f7   : > { %v5552_v19 = vadd.f32 %v6586_v28, %v5551_v23  ;;  %v6598_v18 = vpop.eup %6597  ;;  %v5709_v40 = vand.u32 2147483648, %v12927_v26  ;;  %6607 = vrcp.f32 %v12941_v21  ;;  %v5605_v12 = vor.u32 1.1754944e-38, %v5604_v3 }
 0x8f8   : > { %v5566_v1 = vmul.f32 %v6592_v9, %v5565_v24  ;;  %v6600_v54 = vpop.eup %6599  ;;  %v5580_v32 = vsub.f32 1.0, %v5579_v50  ;;  %vm5703_vm0 = vweird.f32 %v12927_v26  ;;  %vm5584_vm12 = vweird.f32 %v6594_v47 }
 0x8f9   : > { %v5556_v42 = vsel %vm5555_vm9, %v6586_v28, %v5552_v19  ;;  %v5594_v13 = vmul.f32 %v6600_v54, %v12924_v53  ;;  %vm12959_vm15 = vcmp.eq.f32.partialorder %v5602_v37, 8.507059e+37  ;;  %vm12968_vm10 = vcmp.eq.f32.partialorder %v5707_v59, 8.507059e+37  ;;  %vm5585_vm2 = vmor %vm5583_vm14, %vm5584_vm12 }
 0x8fa   : > { %v6602_v33 = vpop.eup %6601  ;;  %v5561_v34 = vsel %vm12920_vm6, %v5560_v44, %v5556_v42  ;;  %v5567_v43 = vadd.f32 %v6592_v9, %v5566_v1  ;;  %v5581_v28 = vmul.f32 %v6594_v47, %v5580_v32  ;;  %vm5599_vm8 = vweird.f32 %v6600_v54 }
 0x8fb   : > { %v6604_v25 = vpop.eup %6603  ;;  %v5818_v23 = vmul.f32 %v5561_v34, %v12775_v51  ;;  %v5699_v3 = vmul.f32 %v6602_v33, %v12927_v26  ;;  %v5595_v24 = vsub.f32 1.0, %v5594_v13  ;;  %v5710_v37 = vor.u32 1.1754944e-38, %v5709_v40 }
 0x8fc   : > { %v5571_v44 = vsel %vm5570_vm1, %v6592_v9, %v5567_v43  ;;  %v6606_v19 = vpop.eup %6605  ;;  %v5582_v31 = vadd.f32 %v6594_v47, %v5581_v28  ;;  %v12979_v9 = vadd.f32 1.0, %v6596_v49  ;;  %v12981_v40 = vadd.f32 1.0, %v6598_v18 }
 0x8fd   : > { %v6067_v50 = vadd.f32 %v12824_v11, %v5818_v23  ;;  %v5576_v51 = vsel %vm12933_vm5, %v5575_v27, %v5571_v44  ;;  %v5700_v1 = vsub.f32 1.0, %v5699_v3  ;;  %v6608_v42 = vpop.eup %6607  ;;  %v5596_v59 = vmul.f32 %v6600_v54, %v5595_v24  ;;  %vm5600_vm5 = vmor %vm5598_vm13, %vm5599_vm8 }
 0x8fe   : > { %v5819_v32 = vmul.f32 %v5576_v51, %v12790_v0  ;;  %vm14788_vm6 = vcmask 64512   ;;  %v5586_v11 = vsel %vm5585_vm2, %v6594_v47, %v5582_v31  ;;  %vm5704_vm11 = vweird.f32 %v6602_v33 }
 0x8ff   : > { %6099 = vst.msk [vmem:[%s12724_s18 + $0x78] sm:$0xff] %vm14788_vm6, %v6067_v50  ;;  %v5701_v35 = vmul.f32 %v6602_v33, %v5700_v1  ;;  %v5609_v27 = vmul.f32 %v6608_v42, %v12941_v21  ;;  %v5591_v0 = vsel %vm12944_vm3, %v5590_v7, %v5586_v11  ;;  %v5597_v22 = vadd.f32 %v6600_v54, %v5596_v59  ;;  %vm14789_vm4 = vmmov %vm14788_vm6 }
 0x900   : > { %v6068_v34 = vadd.f32 %v12830_v61, %v5819_v32  ;;  %6609 = vrcp.f32 %v12979_v9  ;;  %v5820_v49 = vmul.f32 %v5591_v0, %v12809_v48  ;;  %v5619_v43 = vand.u32 2147483648, %v12941_v21  ;;  %vm5705_vm14 = vmor %vm5703_vm0, %vm5704_vm11 }
 0x901   : > { %v5702_v18 = vadd.f32 %v6602_v33, %v5701_v35  ;;  %v5610_v47 = vsub.f32 1.0, %v5609_v27  ;;  %v5601_v61 = vsel %vm5600_vm5, %v6600_v54, %v5597_v22  ;;  %vm5614_vm3 = vweird.f32 %v6608_v42  ;;  %vm14790_vm9 = vmmov %vm14789_vm4 }
 0x902   : > { %6100 = vst.msk [vmem:[%s12724_s18 + $0x80] sm:$0xff] %vm14789_vm4, %v6068_v34  ;;  %v5617_v7 = vand.u32 2147483647, %v12941_v21  ;;  %6611 = vrcp.f32 %v12981_v40  ;;  %v6069_v48 = vadd.f32 %v12839_v30, %v5820_v49  ;;  %v5606_v53 = vsel %vm12959_vm15, %v5605_v12, %v5601_v61  ;;  %vm14791_vm12 = vmmov %vm14789_vm4 }
 0x903   : > { %v5706_v45 = vsel %vm5705_vm14, %v6602_v33, %v5702_v18  ;;  %v5611_v13 = vmul.f32 %v6608_v42, %v5610_v47  ;;  %v5821_v23 = vmul.f32 %v5606_v53, %v12833_v41  ;;  %v6305_v26 = vmul.f32 -1.442695, %v12911_v4  ;;  %vm14792_vm15 = vmmov %vm14789_vm4 }
 0x904   : > { %v5711_v54 = vsel %vm12968_vm10, %v5710_v37, %v5706_v45  ;;  %v13012_v28 = vmul.f32 %v14742_v2, %v5142_v17  ;;  %6101 = vst.msk [vmem:[%s12724_s18 + $0x88] sm:$0xff] %vm14790_vm9, %v6069_v48  ;;  %vm5613_vm7 = vweird.f32 %v12941_v21  ;;  %v5620_v41 = vor.u32 1.1754944e-38, %v5619_v43  ;;  %vm14797_vm5 = vmmov %vm14789_vm4 }
 0x905   : > { %v5828_v30 = vmul.f32 %v5711_v54, %v12842_v6  ;;  %v5612_v12 = vadd.f32 %v6608_v42, %v5611_v13  ;;  %v6070_v60 = vadd.f32 %v12852_v10, %v5821_v23  ;;  %vm5615_vm13 = vmor %vm5613_vm7, %vm5614_vm3  ;;  %v5722_v56 = vand.u32 2147483647, %v12979_v9  ;;  %v6019_v23 = vpop.f32.mrf.mxu2 }
 0x906   : > { %v6610_v33 = vpop.eup %6609  ;;  %v13021_v3 = vadd.f32 1.0, %v6604_v25  ;;  %v13023_v17 = vadd.f32 1.0, %v6606_v19  ;;  %vm5618_vm0 = vcmp.eq.f32.partialorder %v5617_v7, 8.507059e+37  ;;  %v5724_v10 = vand.u32 2147483648, %v12979_v9  ;;  %v13032_v25 = vpop.f32.mrf.mxu3  ;;  %vm14798_vm7 = vmmov %vm14797_vm5 }
 0x907   : > { %v6077_v62 = vadd.f32 %v12855_v52, %v5828_v30  ;;  %v5616_v44 = vsel %vm5615_vm13, %v6608_v42, %v5612_v12  ;;  %v5714_v6 = vmul.f32 %v6610_v33, %v12979_v9  ;;  %6102 = vst.msk [vmem:[%s12724_s18 + $0x90] sm:$0xff] %vm14791_vm12, %v6070_v60  ;;  %v5632_v37 = vand.u32 2147483647, %v12981_v40 }
 0x908   : > { %v6612_v21 = vpop.eup %6611  ;;  %v5621_v24 = vsel %vm5618_vm0, %v5620_v41, %v5616_v44  ;;  %6613 = vrcp.f32 %v13021_v3  ;;  %v13042_v51 = vmul.f32 %v14742_v2, %v5149_v14  ;;  %vm5718_vm1 = vweird.f32 %v12979_v9 }
 0x909   : > { %6109 = vst.msk [vmem:[%s12724_s18 + $0xc8] sm:$0xff] %vm14792_vm15, %v6077_v62  ;;  %v5822_v52 = vmul.f32 %v5621_v24, %v12845_v29  ;;  %v5715_v19 = vsub.f32 1.0, %v5714_v6  ;;  %v5624_v50 = vmul.f32 %v6612_v21, %v12981_v40  ;;  %vm13045_vm10 = vcmp.eq.f32.partialorder %v5722_v56, 8.507059e+37 }
 0x90a   : > { %v5634_v1 = vand.u32 2147483648, %v12981_v40  ;;  %6615 = vrcp.f32 %v13023_v17  ;;  %vm5719_vm8 = vweird.f32 %v6610_v33  ;;  %v5725_v59 = vor.u32 1.1754944e-38, %v5724_v10 }
 0x90b   : > { %v6071_v29 = vadd.f32 %v12866_v5, %v5822_v52  ;;  %v5716_v42 = vmul.f32 %v6610_v33, %v5715_v19  ;;  %v5625_v32 = vsub.f32 1.0, %v5624_v50  ;;  %vm5628_vm2 = vweird.f32 %v12981_v40  ;;  %vm5720_vm4 = vmor %vm5718_vm1, %vm5719_vm8 }
 0x90c   : > { %vm5629_vm6 = vweird.f32 %v6612_v21  ;;  %vm13053_vm11 = vcmp.eq.f32.partialorder %v5632_v37, 8.507059e+37  ;;  %6617 = vpow2.f32 %v6305_v26  ;;  %v6299_v35 = vmul.f32 -1.442695, %v13012_v28  ;;  %vm14799_vm1 = vmmov %vm14797_vm5  ;;  %v14800_v37 = vld [vmem:[#allocation126_spill] sm:$0xff] }
 0x90d   : > { %6103 = vst.msk [vmem:[%s12724_s18 + $0x98] sm:$0xff] %vm14797_vm5, %v6071_v29  ;;  %v5717_v14 = vadd.f32 %v6610_v33, %v5716_v42  ;;  %v5626_v11 = vmul.f32 %v6612_v21, %v5625_v32  ;;  %v5635_v5 = vor.u32 1.1754944e-38, %v5634_v1  ;;  %vm5733_vm14 = vweird.f32 %v13021_v3  ;;  %vm5630_vm3 = vmor %vm5628_vm2, %vm5629_vm6 }
 0x90e   : > { %v6614_v27 = vpop.eup %6613  ;;  %v5737_v34 = vand.u32 2147483647, %v13021_v3  ;;  %v6306_v0 = vmul.f32 -1.442695, %v13042_v51  ;;  %v5739_v47 = vand.u32 2147483648, %v13021_v3  ;;  %6619 = vpow2.f32 %v6299_v35  ;;  %v6040_v54 = vpop.f32.mrf.mxu3  ;;  %vm14802_vm2 = vmmov %vm14799_vm1 }
 0x90f   : > { %v5721_v22 = vsel %vm5720_vm4, %v6610_v33, %v5717_v14  ;;  %v5627_v49 = vadd.f32 %v6612_v21, %v5626_v11  ;;  %v5729_v18 = vmul.f32 %v6614_v27, %v13021_v3  ;;  %v5647_v9 = vand.u32 2147483647, %v13023_v17  ;;  %v13111_v3 = vld [vmem:[%s13231_s6] ss:$0 sm:$0xff]  ;;  %v6022_v35 = vpop.f32.mrf.mxu2  ;;  %vm14803_vm6 = vmmov %vm14799_vm1 }
 0x910   : > { %v6616_v43 = vpop.eup %6615  ;;  %v5726_v61 = vsel %vm13045_vm10, %v5725_v59, %v5721_v22  ;;  %v13077_v7 = vmul.f32 %v14742_v2, %v5143_v46  ;;  %vm5734_vm9 = vweird.f32 %v6614_v27  ;;  %6621 = vpow2.f32 %v6306_v0 }
 0x911   : > { %v5829_v48 = vmul.f32 %v5726_v61, %v12869_v55  ;;  %v5631_v53 = vsel %vm5630_vm3, %v6612_v21, %v5627_v49  ;;  %v5730_v45 = vsub.f32 1.0, %v5729_v18  ;;  %v5639_v13 = vmul.f32 %v6616_v43, %v13023_v17  ;;  %vm5735_vm0 = vmor %vm5733_vm14, %vm5734_vm9 }
 0x912   : > { %v5636_v40 = vsel %vm13053_vm11, %v5635_v5, %v5631_v53  ;;  %v6300_v26 = vmul.f32 -1.442695, %v13077_v7  ;;  %v6618_v39 = vpop.eup %6617  ;;  %v5649_v41 = vand.u32 2147483648, %v13023_v17  ;;  %v13093_v60 = vmul.f32 %v14742_v2, %v5150_v58  ;;  %v14801_v5 = vld [vmem:[#allocation53_spill] sm:$0xff] }
 0x913   : > { %v6078_v46 = vadd.f32 %v12875_v36, %v5829_v48  ;;  %v5823_v30 = vmul.f32 %v5636_v40, %v12878_v16  ;;  %v5731_v55 = vmul.f32 %v6614_v27, %v5730_v45  ;;  %v5640_v12 = vsub.f32 1.0, %v5639_v13 }
 0x914   : > { %v13087_v33 = vadd.f32 1.0, %v6618_v39  ;;  %6623 = vpow2.f32 %v6300_v26  ;;  %vm5644_vm13 = vweird.f32 %v6616_v43  ;;  %v6620_v62 = vpop.eup %6619  ;;  %vm5738_vm12 = vcmp.eq.f32.partialorder %v5737_v34, 8.507059e+37 }
 0x915   : > { %6110 = vst.msk [vmem:[%s12724_s18 + $0xd0] sm:$0xff] %vm14798_vm7, %v6078_v46  ;;  %v6072_v36 = vadd.f32 %v12906_v63, %v5823_v30  ;;  %v5732_v56 = vadd.f32 %v6614_v27, %v5731_v55  ;;  %v5641_v16 = vmul.f32 %v6616_v43, %v5640_v12  ;;  %v5740_v44 = vor.u32 1.1754944e-38, %v5739_v47 }
 0x916   : > { %vm5643_vm15 = vweird.f32 %v13023_v17  ;;  %6625 = vrcp.f32 %v13087_v33  ;;  %v13105_v6 = vadd.f32 1.0, %v6620_v62  ;;  %v6307_v63 = vmul.f32 -1.442695, %v13093_v60  ;;  %v6622_v21 = vpop.eup %6621 }
 0x917   : > { %6104 = vst.msk [vmem:[%s12724_s18 + $0xa0] sm:$0xff] %vm14799_vm1, %v6072_v36  ;;  %v5736_v38 = vsel %vm5735_vm0, %v6614_v27, %v5732_v56  ;;  %v5642_v58 = vadd.f32 %v6616_v43, %v5641_v16  ;;  %v6038_v17 = vadd.f32 %v13111_v3, %v13032_v25  ;;  %vm5645_vm10 = vmor %vm5643_vm15, %vm5644_vm13  ;;  %v5650_v10 = vor.u32 1.1754944e-38, %v5649_v41  ;;  %v6043_v27 = vpop.f32.mrf.mxu3 }
 0x918   : > { %v5741_v24 = vsel %vm5738_vm12, %v5740_v44, %v5736_v38  ;;  %v5144_v52 = vsub.f32 %v14800_v37, %v14734_v20  ;;  %vm5648_vm8 = vcmp.eq.f32.partialorder %v5647_v9, 8.507059e+37  ;;  %6627 = vrcp.f32 %v13105_v6 }
 0x919   : > { %v5830_v19 = vmul.f32 %v5741_v24, %v12885_v57  ;;  %v5646_v50 = vsel %vm5645_vm10, %v6616_v43, %v5642_v58  ;;  %v6020_v29 = vadd.f32 %v13111_v3, %v6019_v23  ;;  %v13121_v42 = vadd.f32 1.0, %v6622_v21 }
 0x91a   : > { %v6624_v31 = vpop.eup %6623  ;;  %v5651_v1 = vsel %vm5648_vm8, %v5650_v10, %v5646_v50  ;;  %v13124_v25 = vmul.f32 %v14742_v2, %v5144_v52  ;;  %6629 = vpow2.f32 %v6307_v63  ;;  %v5752_v14 = vand.u32 2147483647, %v13087_v33  ;;  %vm14808_vm8 = vmmov %vm14802_vm2 }
 0x91b   : > { %v6079_v32 = vadd.f32 %v6038_v17, %v5830_v19  ;;  %v5824_v59 = vmul.f32 %v5651_v1, %v12890_v8  ;;  %v13127_v15 = vadd.f32 1.0, %v6624_v31  ;;  %v5754_v11 = vand.u32 2147483648, %v13087_v33 }
 0x91c   : > { %v6626_v57 = vpop.eup %6625  ;;  %6631 = vrcp.f32 %v13121_v42  ;;  %v5151_v34 = vsub.f32 %v14801_v5, %v14734_v20  ;;  %v6041_v22 = vadd.f32 %v13111_v3, %v6040_v54  ;;  %v5662_v49 = vand.u32 2147483647, %v13105_v6 }
 0x91d   : > { %6111 = vst.msk [vmem:[%s12724_s18 + $0xd8] sm:$0xff] %vm14802_vm2, %v6079_v32  ;;  %v6073_v0 = vadd.f32 %v6020_v29, %v5824_v59  ;;  %v5744_v8 = vmul.f32 %v6626_v57, %v13087_v33  ;;  %v5664_v18 = vand.u32 2147483648, %v13105_v6  ;;  %6633 = vrcp.f32 %v13127_v15 }
 0x91e   : > { %v6628_v47 = vpop.eup %6627  ;;  %v6023_v61 = vadd.f32 %v13111_v3, %v6022_v35  ;;  %v13145_v20 = vadd.f32 %v13111_v3, %v6043_v27  ;;  %v6301_v9 = vmul.f32 -1.442695, %v13124_v25  ;;  %vm5748_vm11 = vweird.f32 %v13087_v33 }
 0x91f   : > { %6105 = vst.msk [vmem:[%s12724_s18 + $0xa8] sm:$0xff] %vm14803_vm6, %v6073_v0  ;;  %v5745_v43 = vsub.f32 1.0, %v5744_v8  ;;  %vm13149_vm5 = vcmp.eq.f32.partialorder %v5752_v14, 8.507059e+37  ;;  %v5755_v53 = vor.u32 1.1754944e-38, %v5754_v11  ;;  %v5654_v45 = vmul.f32 %v6628_v47, %v13105_v6  ;;  %v6025_v14 = vpop.f32.mrf.mxu2 }
 0x920   : > { %v6630_v13 = vpop.eup %6629  ;;  %vm5749_vm4 = vweird.f32 %v6626_v57  ;;  %vm5658_vm14 = vweird.f32 %v13105_v6  ;;  %6635 = vpow2.f32 %v6301_v9  ;;  %vm13155_vm3 = vcmp.eq.f32.partialorder %v5662_v49, 8.507059e+37  ;;  %v6046_v9 = vpop.f32.mrf.mxu3 }
 0x921   : > { %v5746_v40 = vmul.f32 %v6626_v57, %v5745_v43  ;;  %v5655_v54 = vsub.f32 1.0, %v5654_v45  ;;  %v5665_v39 = vor.u32 1.1754944e-38, %v5664_v18  ;;  %v13159_v46 = vadd.f32 1.0, %v6630_v13  ;;  %vm5750_vm7 = vmor %vm5748_vm11, %vm5749_vm4 }
 0x922   : > { %v6632_v23 = vpop.eup %6631  ;;  %vm5763_vm9 = vweird.f32 %v13121_v42  ;;  %v5767_v12 = vand.u32 2147483647, %v13121_v42  ;;  %vm5659_vm13 = vweird.f32 %v6628_v47  ;;  %v13168_v56 = vmul.f32 %v14742_v2, %v5151_v34 }
 0x923   : > { %v5747_v30 = vadd.f32 %v6626_v57, %v5746_v40  ;;  %v5759_v55 = vmul.f32 %v6632_v23, %v13121_v42  ;;  %v6634_v41 = vpop.eup %6633  ;;  %v5656_v36 = vmul.f32 %v6628_v47, %v5655_v54  ;;  %6637 = vrcp.f32 %v13159_v46  ;;  %vm5660_vm0 = vmor %vm5658_vm14, %vm5659_vm13 }
 0x924   : > { %v5769_v44 = vand.u32 2147483648, %v13121_v42  ;;  %v5669_v38 = vmul.f32 %v6634_v41, %v13127_v15  ;;  %v5677_v33 = vand.u32 2147483647, %v13127_v15  ;;  %v5679_v21 = vand.u32 2147483648, %v13127_v15 }
 0x925   : > { %v5751_v16 = vsel %vm5750_vm7, %v6626_v57, %v5747_v30  ;;  %v5760_v62 = vsub.f32 1.0, %v5759_v55  ;;  %v5657_v63 = vadd.f32 %v6628_v47, %v5656_v36  ;;  %vm5764_vm12 = vweird.f32 %v6632_v23 }
 0x926   : > { %v5756_v58 = vsel %vm13149_vm5, %v5755_v53, %v5751_v16  ;;  %v6636_v24 = vpop.eup %6635  ;;  %v5670_v10 = vsub.f32 1.0, %v5669_v38  ;;  %vm5674_vm15 = vweird.f32 %v6634_v41  ;;  %v6308_v19 = vmul.f32 -1.442695, %v13168_v56  ;;  %vm5765_vm1 = vmor %vm5763_vm9, %vm5764_vm12 }
 0x927   : > { %v5831_v17 = vmul.f32 %v5756_v58, %v12911_v4  ;;  %v5761_v2 = vmul.f32 %v6632_v23, %v5760_v62  ;;  %v5661_v37 = vsel %vm5660_vm0, %v6628_v47, %v5657_v63  ;;  %v13179_v52 = vadd.f32 1.0, %v6636_v24  ;;  %vm14809_vm5 = vmmov %vm14808_vm8  ;;  %v6028_v30 = vpop.f32.mrf.mxu2 }
 0x928   : > { %v5666_v31 = vsel %vm13155_vm3, %v5665_v39, %v5661_v37  ;;  %v5671_v29 = vmul.f32 %v6634_v41, %v5670_v10  ;;  %v5770_v32 = vor.u32 1.1754944e-38, %v5769_v44  ;;  %vm5673_vm10 = vweird.f32 %v13127_v15  ;;  %vm14810_vm14 = vmmov %vm14809_vm5 }
 0x929   : > { %v6080_v50 = vadd.f32 %v6041_v22, %v5831_v17  ;;  %v5762_v1 = vadd.f32 %v6632_v23, %v5761_v2  ;;  %v6638_v4 = vpop.eup %6637  ;;  %v5825_v6 = vmul.f32 %v5666_v31, %v13012_v28  ;;  %6639 = vrcp.f32 %v13179_v52  ;;  %vm5675_vm6 = vmor %vm5673_vm10, %vm5674_vm15  ;;  %v6049_v17 = vpop.f32.mrf.mxu3 }
 0x92a   : > { %vm5768_vm2 = vcmp.eq.f32.partialorder %v5767_v12, 8.507059e+37  ;;  %v5672_v57 = vadd.f32 %v6634_v41, %v5671_v29  ;;  %v5774_v11 = vmul.f32 %v6638_v4, %v13159_v46  ;;  %vm5678_vm11 = vcmp.eq.f32.partialorder %v5677_v33, 8.507059e+37  ;;  %vm14811_vm7 = vmmov %vm14809_vm5 }
 0x92b   : > { %6112 = vst.msk [vmem:[%s12724_s18 + $0xe0] sm:$0xff] %vm14808_vm8, %v6080_v50  ;;  %v5766_v59 = vsel %vm5765_vm1, %v6632_v23, %v5762_v1  ;;  %v6074_v35 = vadd.f32 %v6023_v61, %v5825_v6  ;;  %v5680_v28 = vor.u32 1.1754944e-38, %v5679_v21  ;;  %6641 = vpow2.f32 %v6308_v19  ;;  %vm14812_vm1 = vmmov %vm14809_vm5 }
 0x92c   : > { %v5771_v27 = vsel %vm5768_vm2, %v5770_v32, %v5766_v59  ;;  %v5676_v15 = vsel %vm5675_vm6, %v6634_v41, %v5672_v57  ;;  %v5775_v5 = vsub.f32 1.0, %v5774_v11  ;;  %v6026_v0 = vadd.f32 %v13111_v3, %v6025_v14  ;;  %vm14813_vm8 = vmmov %vm14812_vm1 }
 0x92d   : > { %v5832_v42 = vmul.f32 %v5771_v27, %v13042_v51  ;;  %6106 = vst.msk [vmem:[%s12724_s18 + $0xb0] sm:$0xff] %vm14809_vm5, %v6074_v35  ;;  %v5681_v34 = vsel %vm5678_vm11, %v5680_v28, %v5676_v15  ;;  %v5782_v8 = vand.u32 2147483647, %v13159_v46  ;;  %v5784_v22 = vand.u32 2147483648, %v13159_v46 }
 0x92e   : > { %v5826_v18 = vmul.f32 %v5681_v34, %v13077_v7  ;;  %v5776_v47 = vmul.f32 %v6638_v4, %v5775_v5  ;;  %vm5779_vm4 = vweird.f32 %v6638_v4  ;;  %vm5778_vm3 = vweird.f32 %v13159_v46 }
 0x92f   : > { %v6081_v49 = vadd.f32 %v13145_v20, %v5832_v42  ;;  %v6640_v51 = vpop.eup %6639  ;;  %vm5780_vm9 = vmor %vm5778_vm3, %vm5779_vm4  ;;  %v5785_v53 = vor.u32 1.1754944e-38, %v5784_v22  ;;  %vm5783_vm13 = vcmp.eq.f32.partialorder %v5782_v8, 8.507059e+37  ;;  %v6047_v40 = vadd.f32 %v13111_v3, %v6046_v9 }
 0x930   : > { %v6075_v43 = vadd.f32 %v6026_v0, %v5826_v18  ;;  %v5777_v61 = vadd.f32 %v6638_v4, %v5776_v47  ;;  %v5684_v48 = vmul.f32 %v6640_v51, %v13179_v52  ;;  %v5694_v23 = vand.u32 2147483648, %v13179_v52  ;;  %vm14814_vm4 = vmmov %vm14812_vm1 }
 0x931   : > { %6113 = vst.msk [vmem:[%s12724_s18 + $0xe8] sm:$0xff] %vm14810_vm14, %v6081_v49  ;;  %v6642_v45 = vpop.eup %6641  ;;  %vm5689_vm0 = vweird.f32 %v6640_v51  ;;  %v5692_v46 = vand.u32 2147483647, %v13179_v52  ;;  %vm5688_vm12 = vweird.f32 %v13179_v52  ;;  %v6029_v16 = vadd.f32 %v13111_v3, %v6028_v30 }
 0x932   : > { %6107 = vst.msk [vmem:[%s12724_s18 + $0xb8] sm:$0xff] %vm14811_vm7, %v6075_v43  ;;  %v5781_v20 = vsel %vm5780_vm9, %v6638_v4, %v5777_v61  ;;  %v5685_v7 = vsub.f32 1.0, %v5684_v48  ;;  %v5322_v54 = vadd.f32 1.0, %v6642_v45  ;;  %vm5690_vm15 = vmor %vm5688_vm12, %vm5689_vm0  ;;  %v5695_v41 = vor.u32 1.1754944e-38, %v5694_v23 }
 0x933   : > { %v5786_v13 = vsel %vm5783_vm13, %v5785_v53, %v5781_v20  ;;  %vm5693_vm10 = vcmp.eq.f32.partialorder %v5692_v46, 8.507059e+37 }
 0x934   : > { %v5833_v26 = vmul.f32 %v5786_v13, %v13093_v60  ;;  %v5686_v39 = vmul.f32 %v6640_v51, %v5685_v7  ;;  %6643 = vrcp.f32 %v5322_v54  ;;  %v5799_v33 = vand.u32 2147483648, %v5322_v54 }
 0x935   : > { %v5797_v24 = vand.u32 2147483647, %v5322_v54  ;;  %vm5793_vm6 = vweird.f32 %v5322_v54 }
 0x936   : > { %v6082_v55 = vadd.f32 %v6047_v40, %v5833_v26  ;;  %v5687_v12 = vadd.f32 %v6640_v51, %v5686_v39  ;;  %v5800_v10 = vor.u32 1.1754944e-38, %v5799_v33 }
 0x937   : > { %vm5798_vm5 = vcmp.eq.f32.partialorder %v5797_v24, 8.507059e+37 }
 0x938   : > { %6114 = vst.msk [vmem:[%s12724_s18 + $0xf0] sm:$0xff] %vm14812_vm1, %v6082_v55  ;;  %v5691_v36 = vsel %vm5690_vm15, %v6640_v51, %v5687_v12 }
 0x939   : > { %v5696_v60 = vsel %vm5693_vm10, %v5695_v41, %v5691_v36 }
 0x93a   : > { %v5827_v62 = vmul.f32 %v5696_v60, %v13124_v25  ;;  %v6644_v44 = vpop.eup %6643  ;;  %v6050_v25 = vadd.f32 %v13111_v3, %v6049_v17 }
 0x93b   : > { %v5789_v58 = vmul.f32 %v6644_v44, %v5322_v54  ;;  %vm5794_vm2 = vweird.f32 %v6644_v44 }
 0x93c   : > { %v6076_v38 = vadd.f32 %v6029_v16, %v5827_v62  ;;  %vm5795_vm11 = vmor %vm5793_vm6, %vm5794_vm2 }
 0x93d   : > { %v5790_v63 = vsub.f32 1.0, %v5789_v58 }
 0x93e   : > { %6108 = vst.msk [vmem:[%s12724_s18 + $0xc0] sm:$0xff] %vm14813_vm8, %v6076_v38 }
 0x93f   : > { %v5791_v21 = vmul.f32 %v6644_v44, %v5790_v63 }
 0x941   : > { %v5792_v2 = vadd.f32 %v6644_v44, %v5791_v21 }
 0x943   : > { %v5796_v37 = vsel %vm5795_vm11, %v6644_v44, %v5792_v2 }
 0x944   : > { %v5801_v52 = vsel %vm5798_vm5, %v5800_v10, %v5796_v37 }
 0x945   : > { %v5834_v19 = vmul.f32 %v5801_v52, %v13168_v56 }
 0x947   : > { %v6083_v50 = vadd.f32 %v6050_v25, %v5834_v19 }
 0x949   : > { %6115 = vst.msk [vmem:[%s12724_s18 + $0xf8] sm:$0xff] %vm14814_vm4, %v6083_v50 }
 0x94a PF: > { %s17_s24 = sadd.s32 1, %s6699_s24  }
 0x94b   : > { %p14_p4 = scmp.ge.s32.totalorder %s17_s24, 4  }
 0x94d   :  { %16 = sbr.rel (!%p14_p4) target bundleno = 1 (0x1), region = 84 }

</bundles_post_ra>
